<compile_context>
chip_gen: v6e
topology: v6e:2x2x1
jax: 0.10.0
libtpu: 0.0.40
codegen_flags: <defaults>
</compile_context>

<pallas_src>
import functools

import jax
import jax.numpy as jnp
from jax import lax
from jax.experimental import pallas as pl
from jax.experimental.pallas import tpu as pltpu


def _round_up(x, m):
    return ((x + m - 1) // m) * m


# ----------------------------------------------------------------------------
# Fused Pallas kernel: the full QE conv stack for one image per grid step.
# ----------------------------------------------------------------------------
def _qe_fused_kernel(x_ref, wh_ref, bh_ref, wo_ref, bo_ref, o_ref,
                     buf_ref, pat_ref, *, H, W, Wp, Cpad, n_hidden, cout_pad):
    # x_ref  : (1, H+2, Wp, Cpad) f32   pre-padded image (zero halo + chan pad)
    # wh_ref : (n_hidden, 9*Cpad, Cpad) bf16   im2col-packed hidden weights
    # bh_ref : (n_hidden, 1, Cpad) f32         hidden biases
    # wo_ref : (cout_pad, 9*Cpad) bf16         final conv weights, transposed
    # bo_ref : (cout_pad, 1) f32               final conv bias
    # o_ref  : (1, cout_pad, H*W) f32          output, channel-major (NCHW-flat)
    # buf_ref: (H+2, Wp, Cpad) f32             running activation with zero halo
    # pat_ref: (H*W, 9*Cpad) bf16              im2col patch matrix scratch
    HW = H * W

    # One aligned full-tile store initialises the activation buffer; the zero
    # halo rows/cols arrive with the input DMA, so no in-kernel zero fills.
    buf_ref[...] = x_ref[0]

    def pack_taps():
        # im2col: pack the 9 shifted 3x3 taps into pat at 128-lane-aligned
        # column offsets.  Row shifts (dy) are free leading-dim offsets; the
        # +/-1 column shifts (dx) ride the XLU as a sublane rotate whose
        # wrapped elements come from always-zero halo columns.
        for dy in range(3):
            rows = buf_ref[dy:dy + H, :, :]              # (H, Wp, C), aligned
            flat = rows.reshape(H * Wp, Cpad)            # layout no-op
            for dx in range(3):
                tap = dy * 3 + dx
                if dx == 1:
                    col = rows[:, :W, :]                 # aligned slice
                else:
                    shift = (1 - dx) % (H * Wp)          # +1 or (H*Wp - 1)
                    col = pltpu.roll(flat, shift, axis=0)
                    col = col.reshape(H, Wp, Cpad)[:, :W, :]
                pat_ref[:, tap * Cpad:(tap + 1) * Cpad] = (
                    col.reshape(HW, Cpad).astype(jnp.bfloat16))

    def hidden_layer(layer, carry):
        pack_taps()
        # One deep-K MXU matmul per layer: bf16 x bf16 -> f32 accumulation.
        acc = jnp.dot(pat_ref[...], wh_ref[layer],
                      preferred_element_type=jnp.float32)     # (HW, Cpad) f32
        acc = jnp.maximum(acc + bh_ref[layer], 0.0)           # bias + ReLU, f32
        buf_ref[1:H + 1, 0:W, :] = acc.reshape(H, W, Cpad)    # aligned writeback
        return carry

    # fori_loop over the 7 ReLU layers bounds code size and vreg live ranges;
    # weights/biases are resident and dynamically indexed.
    lax.fori_loop(0, n_hidden, hidden_layer, 0)

    # Final conv (no ReLU), computed transposed so the stored slab is the slim,
    # lane-dense (cout_pad, H*W) block: W_out^T (cout_pad, K) . pat^T (K, HW).
    pack_taps()
    out_t = lax.dot_general(
        wo_ref[...], pat_ref[...],
        dimension_numbers=(((1,), (1,)), ((), ())),
        preferred_element_type=jnp.float32)                   # (cout_pad, HW)
    o_ref[0] = out_t + bo_ref[...]


# ----------------------------------------------------------------------------
# Parameter packing + forward wrapper
# ----------------------------------------------------------------------------
def _pack_qe_params(params, cpad, cout_pad):
    """Hidden layers: zero-pad to a uniform 128-lane channel width and pack the
    weights into im2col (9*Cpad, Cpad) bf16 slabs; biases -> (L-1, 1, Cpad) f32.
    Final layer: pack transposed as (cout_pad, 9*Cpad) bf16 + (cout_pad, 1) bias."""
    *hidden, (w_out, b_out) = params
    wh_list, bh_list = [], []
    for (w, b) in hidden:
        kh, kw, cin, cout = w.shape
        assert kh == 3 and kw == 3, "QE uses 3x3 convs"
        wk = jnp.zeros((kh * kw, cpad, cpad), jnp.float32)
        wk = wk.at[:, :cin, :cout].set(w.reshape(kh * kw, cin, cout))
        wh_list.append(wk.reshape(kh * kw * cpad, cpad))
        bh_list.append(jnp.zeros((cpad,), jnp.float32).at[:cout].set(b))
    wh = jnp.stack(wh_list).astype(jnp.bfloat16)         # (L-1, 9*Cpad, Cpad)
    bh = jnp.stack(bh_list)[:, None, :]                  # (L-1, 1, Cpad) f32

    kh, kw, cin, cout = w_out.shape
    assert kh == 3 and kw == 3
    wo = jnp.zeros((kh * kw, cpad, cout_pad), jnp.float32)
    wo = wo.at[:, :cin, :cout].set(w_out.reshape(kh * kw, cin, cout))
    wo_t = wo.reshape(kh * kw * cpad, cout_pad).T.astype(jnp.bfloat16)
    bo = jnp.zeros((cout_pad, 1), jnp.float32).at[:cout, 0].set(b_out)
    return wh, bh, wo_t, bo


def qe_forward(params, x_nchw):
    """Matches QE.forward: NCHW input/output like PyTorch.
    Matmuls run in bf16 with f32 accumulation; bias/ReLU epilogue in f32."""
    N, in_nc, H, W = x_nchw.shape
    assert len(params) >= 2
    assert W % 8 == 0, "this kernel assumes the image width is a multiple of 8"
    n_layers = len(params)
    n_hidden = n_layers - 1
    out_nc = params[-1][0].shape[3]

    max_c = max(max(w.shape[2] for (w, _) in params),
                max(w.shape[3] for (w, _) in params[:-1]))
    cpad = _round_up(max_c, 128)          # lane-dense channels (Cpad == Kstride)
    cout_pad = _round_up(out_nc, 8)       # slim transposed output sublane width
    wp = _round_up(W + 2, 8)              # sublane-aligned padded row width
    hw = H * W

    wh, bh, wo_t, bo = _pack_qe_params(params, cpad, cout_pad)

    # NCHW -> NHWC, then pre-pad to the kernel's halo'd layout:
    # rows get a 1-px zero halo top/bottom; cols W..wp-1 and chans >= in_nc are
    # zero.  The image interior lives at [1:H+1, 0:W, :in_nc].
    x = jnp.transpose(x_nchw, (0, 2, 3, 1))
    x = jnp.pad(x, ((0, 0), (1, 1), (0, wp - W), (0, cpad - in_nc)))

    kernel = functools.partial(_qe_fused_kernel, H=H, W=W, Wp=wp, Cpad=cpad,
                               n_hidden=n_hidden, cout_pad=cout_pad)
    out = pl.pallas_call(
        kernel,
        out_shape=jax.ShapeDtypeStruct((N, cout_pad, hw), jnp.float32),
        grid=(N,),
        in_specs=[
            pl.BlockSpec((1, H + 2, wp, cpad), lambda n: (n, 0, 0, 0)),
            pl.BlockSpec((n_hidden, 9 * cpad, cpad), lambda n: (0, 0, 0)),
            pl.BlockSpec((n_hidden, 1, cpad), lambda n: (0, 0, 0)),
            pl.BlockSpec((cout_pad, 9 * cpad), lambda n: (0, 0)),
            pl.BlockSpec((cout_pad, 1), lambda n: (0, 0)),
        ],
        out_specs=pl.BlockSpec((1, cout_pad, hw), lambda n: (n, 0, 0)),
        scratch_shapes=[
            pltpu.VMEM((H + 2, wp, cpad), jnp.float32),      # halo'd activation
            pltpu.VMEM((hw, 9 * cpad), jnp.bfloat16),        # im2col patches
        ],
        compiler_params=pltpu.CompilerParams(
            dimension_semantics=("parallel",),
            vmem_limit_bytes=32 * 1024 * 1024),
    )(x, wh, bh, wo_t, bo)

    # (N, cout_pad, H*W) is already channel-major: slice + reshape to NCHW.
    return out[:, :out_nc, :].reshape(N, out_nc, H, W)


# ----------------------------------------------------------------------------
# Parameter init + pure-JAX reference (mirrors the kernel's mixed precision:
# bf16 conv operands, f32 accumulation, f32 bias/ReLU, f32 carried activation)
# ----------------------------------------------------------------------------
def init_qe_params(key, in_nc=64, nf=48, nb=8, out_nc=3, base_ks=3):
    """Deterministic He-style init.  Weights HWIO f32, biases (Cout,) f32."""
    layers = []
    chans = [(in_nc, nf)] + [(nf, nf)] * (nb - 2) + [(nf, out_nc)]
    for (cin, cout) in chans:
        key, kw, kb = jax.random.split(key, 3)
        std = (2.0 / (base_ks * base_ks * cin)) ** 0.5
        w = jax.random.normal(kw, (base_ks, base_ks, cin, cout),
                              jnp.float32) * std
        b = jax.random.normal(kb, (cout,), jnp.float32) * 0.01
        layers.append((w, b))
    return layers


def qe_forward_ref(params, x_nchw):
    x = jnp.transpose(x_nchw, (0, 2, 3, 1))
    n_layers = len(params)
    for i, (w, b) in enumerate(params):
        y = jax.lax.conv_general_dilated(
            x.astype(jnp.bfloat16), w.astype(jnp.bfloat16),
            window_strides=(1, 1), padding="SAME",
            dimension_numbers=("NHWC", "HWIO", "NHWC"),
            preferred_element_type=jnp.float32)
        y = y + b[None, None, None, :]
        if i < n_layers - 1:
            y = jnp.maximum(y, 0.0)
        x = y
    return jnp.transpose(x, (0, 3, 1, 2))


if __name__ == "__main__":
    # Module defaults: in_nc=64, nf=48, nb=8, out_nc=3; batch=2, spatial 16x16.
    IN_NC, NF, NB, OUT_NC = 64, 48, 8, 3
    N, H, W = 2, 16, 16

    key = jax.random.PRNGKey(0)
    key, kx = jax.random.split(key)
    x = jax.random.normal(kx, (N, IN_NC, H, W), jnp.float32)     # NCHW

    params = init_qe_params(key, in_nc=IN_NC, nf=NF, nb=NB, out_nc=OUT_NC)

    out = jax.block_until_ready(jax.jit(qe_forward)(params, x))
    assert out.shape == (N, OUT_NC, H, W), out.shape

    ref = jax.block_until_ready(qe_forward_ref(params, x))
    assert jnp.allclose(out, ref, atol=1e-2, rtol=1e-2), float(
        jnp.max(jnp.abs(out - ref)))

    print("KERNEL_OK")
</pallas_src>

<mosaic_0001>
module attributes {stable_mosaic.version = 11 : i64} {
  func.func @_qe_fused_kernel(%arg0: i32, %arg1: memref<1x18x24x128xf32, #tpu.memory_space<vmem>>, %arg2: memref<7x1152x128xbf16, #tpu.memory_space<vmem>>, %arg3: memref<7x1x128xf32, #tpu.memory_space<vmem>>, %arg4: memref<8x1152xbf16, #tpu.memory_space<vmem>>, %arg5: memref<8x1xf32, #tpu.memory_space<vmem>>, %arg6: memref<1x8x256xf32, #tpu.memory_space<vmem>>, %arg7: memref<18x24x128xf32, #tpu.memory_space<vmem>>, %arg8: memref<256x1152xbf16, #tpu.memory_space<vmem>>) attributes {dimension_semantics = [#tpu.dimension_semantics<parallel>], iteration_bounds = array<i64: 2>, scalar_prefetch = 0 : i64, scratch_operands = 2 : i64, tpu.core_type = #tpu.core_type<tc>, window_params = [{transform_indices = @transform_0, window_bounds = array<i64: 1, 18, 24, 128>}, {pipeline_mode = #tpu.pipeline_mode<synchronous>, transform_indices = @transform_1, window_bounds = array<i64: 7, 1152, 128>}, {pipeline_mode = #tpu.pipeline_mode<synchronous>, transform_indices = @transform_2, window_bounds = array<i64: 7, 1, 128>}, {pipeline_mode = #tpu.pipeline_mode<synchronous>, transform_indices = @transform_3, window_bounds = array<i64: 8, 1152>}, {pipeline_mode = #tpu.pipeline_mode<synchronous>, transform_indices = @transform_4, window_bounds = array<i64: 8, 1>}, {transform_indices = @transform_5, window_bounds = array<i64: 1, 8, 256>}]} {
    %c0 = arith.constant 0 : index
    %c0_0 = arith.constant 0 : index
    %c0_1 = arith.constant 0 : index
    %c0_2 = arith.constant 0 : index
    %0 = vector.load %arg1[%c0, %c0_0, %c0_1, %c0_2] : memref<1x18x24x128xf32, #tpu.memory_space<vmem>>, vector<1x18x24x128xf32>
    %1 = vector.shape_cast %0 : vector<1x18x24x128xf32> to vector<18x24x128xf32>
    %c0_3 = arith.constant 0 : index
    %c0_4 = arith.constant 0 : index
    %c0_5 = arith.constant 0 : index
    %2 = vector.load %arg7[%c0_3, %c0_4, %c0_5] : memref<18x24x128xf32, #tpu.memory_space<vmem>>, vector<18x24x128xf32>
    tpu.vector_store %arg7[%c0_3, %c0_4, %c0_5], %1 {strides = array<i32>} : memref<18x24x128xf32, #tpu.memory_space<vmem>>, vector<18x24x128xf32>,
    %c0_i32 = arith.constant 0 : i32
    %c7_i32 = arith.constant 7 : i32
    %3 = arith.addi %c0_i32, %c7_i32 : i32
    %c1_i32 = arith.constant 1 : i32
    scf.for %arg9 = %c0_i32 to %3 step %c1_i32  : i32 {
      %c0_38 = arith.constant 0 : index
      %c0_39 = arith.constant 0 : index
      %c0_40 = arith.constant 0 : index
      %67 = vector.load %arg7[%c0_38, %c0_39, %c0_40] : memref<18x24x128xf32, #tpu.memory_space<vmem>>, vector<16x24x128xf32>
      %68 = vector.shape_cast %67 : vector<16x24x128xf32> to vector<384x128xf32>
      %c1_i32_41 = arith.constant 1 : i32
      %69 = tpu.dynamic_rotate %68 by %c1_i32_41 dim 0 : vector<384x128xf32>, i32 -> vector<384x128xf32>
      %70 = vector.shape_cast %69 : vector<384x128xf32> to vector<16x24x128xf32>
      %71 = vector.extract_strided_slice %70 {offsets = [0, 0, 0], sizes = [16, 16, 128], strides = [1, 1, 1]} : vector<16x24x128xf32> to vector<16x16x128xf32>
      %72 = vector.shape_cast %71 : vector<16x16x128xf32> to vector<256x128xf32>
      %73 = arith.truncf %72 : vector<256x128xf32> to vector<256x128xbf16>
      %c0_42 = arith.constant 0 : index
      %c0_43 = arith.constant 0 : index
      %74 = vector.load %arg8[%c0_42, %c0_43] : memref<256x1152xbf16, #tpu.memory_space<vmem>>, vector<256x128xbf16>
      tpu.vector_store %arg8[%c0_42, %c0_43], %73 {strides = array<i32>} : memref<256x1152xbf16, #tpu.memory_space<vmem>>, vector<256x128xbf16>,
      %75 = vector.extract_strided_slice %67 {offsets = [0, 0, 0], sizes = [16, 16, 128], strides = [1, 1, 1]} : vector<16x24x128xf32> to vector<16x16x128xf32>
      %76 = vector.shape_cast %75 : vector<16x16x128xf32> to vector<256x128xf32>
      %77 = arith.truncf %76 : vector<256x128xf32> to vector<256x128xbf16>
      %c0_44 = arith.constant 0 : index
      %c128_45 = arith.constant 128 : index
      %78 = vector.load %arg8[%c0_44, %c128_45] : memref<256x1152xbf16, #tpu.memory_space<vmem>>, vector<256x128xbf16>
      tpu.vector_store %arg8[%c0_44, %c128_45], %77 {strides = array<i32>} : memref<256x1152xbf16, #tpu.memory_space<vmem>>, vector<256x128xbf16>,
      %c383_i32_46 = arith.constant 383 : i32
      %79 = tpu.dynamic_rotate %68 by %c383_i32_46 dim 0 : vector<384x128xf32>, i32 -> vector<384x128xf32>
      %80 = vector.shape_cast %79 : vector<384x128xf32> to vector<16x24x128xf32>
      %81 = vector.extract_strided_slice %80 {offsets = [0, 0, 0], sizes = [16, 16, 128], strides = [1, 1, 1]} : vector<16x24x128xf32> to vector<16x16x128xf32>
      %82 = vector.shape_cast %81 : vector<16x16x128xf32> to vector<256x128xf32>
      %83 = arith.truncf %82 : vector<256x128xf32> to vector<256x128xbf16>
      %c0_47 = arith.constant 0 : index
      %c256_48 = arith.constant 256 : index
      %84 = vector.load %arg8[%c0_47, %c256_48] : memref<256x1152xbf16, #tpu.memory_space<vmem>>, vector<256x128xbf16>
      tpu.vector_store %arg8[%c0_47, %c256_48], %83 {strides = array<i32>} : memref<256x1152xbf16, #tpu.memory_space<vmem>>, vector<256x128xbf16>,
      %c1_49 = arith.constant 1 : index
      %c0_50 = arith.constant 0 : index
      %c0_51 = arith.constant 0 : index
      %85 = vector.load %arg7[%c1_49, %c0_50, %c0_51] : memref<18x24x128xf32, #tpu.memory_space<vmem>>, vector<16x24x128xf32>
      %86 = vector.shape_cast %85 : vector<16x24x128xf32> to vector<384x128xf32>
      %c1_i32_52 = arith.constant 1 : i32
      %87 = tpu.dynamic_rotate %86 by %c1_i32_52 dim 0 : vector<384x128xf32>, i32 -> vector<384x128xf32>
      %88 = vector.shape_cast %87 : vector<384x128xf32> to vector<16x24x128xf32>
      %89 = vector.extract_strided_slice %88 {offsets = [0, 0, 0], sizes = [16, 16, 128], strides = [1, 1, 1]} : vector<16x24x128xf32> to vector<16x16x128xf32>
      %90 = vector.shape_cast %89 : vector<16x16x128xf32> to vector<256x128xf32>
      %91 = arith.truncf %90 : vector<256x128xf32> to vector<256x128xbf16>
      %c0_53 = arith.constant 0 : index
      %c384_54 = arith.constant 384 : index
      %92 = vector.load %arg8[%c0_53, %c384_54] : memref<256x1152xbf16, #tpu.memory_space<vmem>>, vector<256x128xbf16>
      tpu.vector_store %arg8[%c0_53, %c384_54], %91 {strides = array<i32>} : memref<256x1152xbf16, #tpu.memory_space<vmem>>, vector<256x128xbf16>,
      %93 = vector.extract_strided_slice %85 {offsets = [0, 0, 0], sizes = [16, 16, 128], strides = [1, 1, 1]} : vector<16x24x128xf32> to vector<16x16x128xf32>
      %94 = vector.shape_cast %93 : vector<16x16x128xf32> to vector<256x128xf32>
      %95 = arith.truncf %94 : vector<256x128xf32> to vector<256x128xbf16>
      %c0_55 = arith.constant 0 : index
      %c512_56 = arith.constant 512 : index
      %96 = vector.load %arg8[%c0_55, %c512_56] : memref<256x1152xbf16, #tpu.memory_space<vmem>>, vector<256x128xbf16>
      tpu.vector_store %arg8[%c0_55, %c512_56], %95 {strides = array<i32>} : memref<256x1152xbf16, #tpu.memory_space<vmem>>, vector<256x128xbf16>,
      %c383_i32_57 = arith.constant 383 : i32
      %97 = tpu.dynamic_rotate %86 by %c383_i32_57 dim 0 : vector<384x128xf32>, i32 -> vector<384x128xf32>
      %98 = vector.shape_cast %97 : vector<384x128xf32> to vector<16x24x128xf32>
      %99 = vector.extract_strided_slice %98 {offsets = [0, 0, 0], sizes = [16, 16, 128], strides = [1, 1, 1]} : vector<16x24x128xf32> to vector<16x16x128xf32>
      %100 = vector.shape_cast %99 : vector<16x16x128xf32> to vector<256x128xf32>
      %101 = arith.truncf %100 : vector<256x128xf32> to vector<256x128xbf16>
      %c0_58 = arith.constant 0 : index
      %c640_59 = arith.constant 640 : index
      %102 = vector.load %arg8[%c0_58, %c640_59] : memref<256x1152xbf16, #tpu.memory_space<vmem>>, vector<256x128xbf16>
      tpu.vector_store %arg8[%c0_58, %c640_59], %101 {strides = array<i32>} : memref<256x1152xbf16, #tpu.memory_space<vmem>>, vector<256x128xbf16>,
      %c2_60 = arith.constant 2 : index
      %c0_61 = arith.constant 0 : index
      %c0_62 = arith.constant 0 : index
      %103 = vector.load %arg7[%c2_60, %c0_61, %c0_62] : memref<18x24x128xf32, #tpu.memory_space<vmem>>, vector<16x24x128xf32>
      %104 = vector.shape_cast %103 : vector<16x24x128xf32> to vector<384x128xf32>
      %c1_i32_63 = arith.constant 1 : i32
      %105 = tpu.dynamic_rotate %104 by %c1_i32_63 dim 0 : vector<384x128xf32>, i32 -> vector<384x128xf32>
      %106 = vector.shape_cast %105 : vector<384x128xf32> to vector<16x24x128xf32>
      %107 = vector.extract_strided_slice %106 {offsets = [0, 0, 0], sizes = [16, 16, 128], strides = [1, 1, 1]} : vector<16x24x128xf32> to vector<16x16x128xf32>
      %108 = vector.shape_cast %107 : vector<16x16x128xf32> to vector<256x128xf32>
      %109 = arith.truncf %108 : vector<256x128xf32> to vector<256x128xbf16>
      %c0_64 = arith.constant 0 : index
      %c768_65 = arith.constant 768 : index
      %110 = vector.load %arg8[%c0_64, %c768_65] : memref<256x1152xbf16, #tpu.memory_space<vmem>>, vector<256x128xbf16>
      tpu.vector_store %arg8[%c0_64, %c768_65], %109 {strides = array<i32>} : memref<256x1152xbf16, #tpu.memory_space<vmem>>, vector<256x128xbf16>,
      %111 = vector.extract_strided_slice %103 {offsets = [0, 0, 0], sizes = [16, 16, 128], strides = [1, 1, 1]} : vector<16x24x128xf32> to vector<16x16x128xf32>
      %112 = vector.shape_cast %111 : vector<16x16x128xf32> to vector<256x128xf32>
      %113 = arith.truncf %112 : vector<256x128xf32> to vector<256x128xbf16>
      %c0_66 = arith.constant 0 : index
      %c896_67 = arith.constant 896 : index
      %114 = vector.load %arg8[%c0_66, %c896_67] : memref<256x1152xbf16, #tpu.memory_space<vmem>>, vector<256x128xbf16>
      tpu.vector_store %arg8[%c0_66, %c896_67], %113 {strides = array<i32>} : memref<256x1152xbf16, #tpu.memory_space<vmem>>, vector<256x128xbf16>,
      %c383_i32_68 = arith.constant 383 : i32
      %115 = tpu.dynamic_rotate %104 by %c383_i32_68 dim 0 : vector<384x128xf32>, i32 -> vector<384x128xf32>
      %116 = vector.shape_cast %115 : vector<384x128xf32> to vector<16x24x128xf32>
      %117 = vector.extract_strided_slice %116 {offsets = [0, 0, 0], sizes = [16, 16, 128], strides = [1, 1, 1]} : vector<16x24x128xf32> to vector<16x16x128xf32>
      %118 = vector.shape_cast %117 : vector<16x16x128xf32> to vector<256x128xf32>
      %119 = arith.truncf %118 : vector<256x128xf32> to vector<256x128xbf16>
      %c0_69 = arith.constant 0 : index
      %c1024_70 = arith.constant 1024 : index
      %120 = vector.load %arg8[%c0_69, %c1024_70] : memref<256x1152xbf16, #tpu.memory_space<vmem>>, vector<256x128xbf16>
      tpu.vector_store %arg8[%c0_69, %c1024_70], %119 {strides = array<i32>} : memref<256x1152xbf16, #tpu.memory_space<vmem>>, vector<256x128xbf16>,
      %c0_71 = arith.constant 0 : index
      %c0_72 = arith.constant 0 : index
      %121 = vector.load %arg8[%c0_71, %c0_72] : memref<256x1152xbf16, #tpu.memory_space<vmem>>, vector<256x1152xbf16>
      %122 = arith.index_cast %arg9 : i32 to index
      %c0_73 = arith.constant 0 : index
      %c0_74 = arith.constant 0 : index
      %123 = vector.load %arg2[%122, %c0_73, %c0_74] : memref<7x1152x128xbf16, #tpu.memory_space<vmem>>, vector<1x1152x128xbf16>
      %124 = vector.shape_cast %123 : vector<1x1152x128xbf16> to vector<1152x128xbf16>
      %cst_75 = arith.constant dense<0.000000e+00> : vector<256x128xf32>
      %125 = tpu.matmul %121, %124, %cst_75 {dimension_numbers = #tpu.dot_dimension_numbers<[1], [0], [0], [1], [0, 0, 1, 1], [], []>} : vector<256x1152xbf16>, vector<1152x128xbf16>, vector<256x128xf32> -> vector<256x128xf32>
      %126 = arith.index_cast %arg9 : i32 to index
      %c0_76 = arith.constant 0 : index
      %c0_77 = arith.constant 0 : index
      %127 = vector.load %arg3[%126, %c0_76, %c0_77] : memref<7x1x128xf32, #tpu.memory_space<vmem>>, vector<1x1x128xf32>
      %128 = vector.shape_cast %127 : vector<1x1x128xf32> to vector<1x128xf32>
      %129 = vector.broadcast %128 : vector<1x128xf32> to vector<256x128xf32>
      %130 = arith.addf %125, %129 : vector<256x128xf32>
      %cst_78 = arith.constant 0.000000e+00 : f32
      %131 = vector.broadcast %cst_78 : f32 to vector<256x128xf32>
      %132 = arith.maximumf %130, %131 : vector<256x128xf32>
      %133 = vector.shape_cast %132 : vector<256x128xf32> to vector<16x16x128xf32>
      %c1_79 = arith.constant 1 : index
      %c0_80 = arith.constant 0 : index
      %c0_81 = arith.constant 0 : index
      %134 = vector.load %arg7[%c1_79, %c0_80, %c0_81] : memref<18x24x128xf32, #tpu.memory_space<vmem>>, vector<16x16x128xf32>
      tpu.vector_store %arg7[%c1_79, %c0_80, %c0_81], %133 {strides = array<i32>} : memref<18x24x128xf32, #tpu.memory_space<vmem>>, vector<16x16x128xf32>,
    }
    %c7_i32_6 = arith.constant 7 : i32
    %c0_7 = arith.constant 0 : index
    %c0_8 = arith.constant 0 : index
    %c0_9 = arith.constant 0 : index
    %4 = vector.load %arg7[%c0_7, %c0_8, %c0_9] : memref<18x24x128xf32, #tpu.memory_space<vmem>>, vector<16x24x128xf32>
    %5 = vector.shape_cast %4 : vector<16x24x128xf32> to vector<384x128xf32>
    %c1_i32_10 = arith.constant 1 : i32
    %6 = tpu.dynamic_rotate %5 by %c1_i32_10 dim 0 : vector<384x128xf32>, i32 -> vector<384x128xf32>
    %7 = vector.shape_cast %6 : vector<384x128xf32> to vector<16x24x128xf32>
    %8 = vector.extract_strided_slice %7 {offsets = [0, 0, 0], sizes = [16, 16, 128], strides = [1, 1, 1]} : vector<16x24x128xf32> to vector<16x16x128xf32>
    %9 = vector.shape_cast %8 : vector<16x16x128xf32> to vector<256x128xf32>
    %10 = arith.truncf %9 : vector<256x128xf32> to vector<256x128xbf16>
    %c0_11 = arith.constant 0 : index
    %c0_12 = arith.constant 0 : index
    %11 = vector.load %arg8[%c0_11, %c0_12] : memref<256x1152xbf16, #tpu.memory_space<vmem>>, vector<256x128xbf16>
    tpu.vector_store %arg8[%c0_11, %c0_12], %10 {strides = array<i32>} : memref<256x1152xbf16, #tpu.memory_space<vmem>>, vector<256x128xbf16>,
    %12 = vector.extract_strided_slice %4 {offsets = [0, 0, 0], sizes = [16, 16, 128], strides = [1, 1, 1]} : vector<16x24x128xf32> to vector<16x16x128xf32>
    %13 = vector.shape_cast %12 : vector<16x16x128xf32> to vector<256x128xf32>
    %14 = arith.truncf %13 : vector<256x128xf32> to vector<256x128xbf16>
    %c0_13 = arith.constant 0 : index
    %c128 = arith.constant 128 : index
    %15 = vector.load %arg8[%c0_13, %c128] : memref<256x1152xbf16, #tpu.memory_space<vmem>>, vector<256x128xbf16>
    tpu.vector_store %arg8[%c0_13, %c128], %14 {strides = array<i32>} : memref<256x1152xbf16, #tpu.memory_space<vmem>>, vector<256x128xbf16>,
    %c383_i32 = arith.constant 383 : i32
    %16 = tpu.dynamic_rotate %5 by %c383_i32 dim 0 : vector<384x128xf32>, i32 -> vector<384x128xf32>
    %17 = vector.shape_cast %16 : vector<384x128xf32> to vector<16x24x128xf32>
    %18 = vector.extract_strided_slice %17 {offsets = [0, 0, 0], sizes = [16, 16, 128], strides = [1, 1, 1]} : vector<16x24x128xf32> to vector<16x16x128xf32>
    %19 = vector.shape_cast %18 : vector<16x16x128xf32> to vector<256x128xf32>
    %20 = arith.truncf %19 : vector<256x128xf32> to vector<256x128xbf16>
    %c0_14 = arith.constant 0 : index
    %c256 = arith.constant 256 : index
    %21 = vector.load %arg8[%c0_14, %c256] : memref<256x1152xbf16, #tpu.memory_space<vmem>>, vector<256x128xbf16>
    tpu.vector_store %arg8[%c0_14, %c256], %20 {strides = array<i32>} : memref<256x1152xbf16, #tpu.memory_space<vmem>>, vector<256x128xbf16>,
    %c1 = arith.constant 1 : index
    %c0_15 = arith.constant 0 : index
    %c0_16 = arith.constant 0 : index
    %22 = vector.load %arg7[%c1, %c0_15, %c0_16] : memref<18x24x128xf32, #tpu.memory_space<vmem>>, vector<16x24x128xf32>
    %23 = vector.shape_cast %22 : vector<16x24x128xf32> to vector<384x128xf32>
    %c1_i32_17 = arith.constant 1 : i32
    %24 = tpu.dynamic_rotate %23 by %c1_i32_17 dim 0 : vector<384x128xf32>, i32 -> vector<384x128xf32>
    %25 = vector.shape_cast %24 : vector<384x128xf32> to vector<16x24x128xf32>
    %26 = vector.extract_strided_slice %25 {offsets = [0, 0, 0], sizes = [16, 16, 128], strides = [1, 1, 1]} : vector<16x24x128xf32> to vector<16x16x128xf32>
    %27 = vector.shape_cast %26 : vector<16x16x128xf32> to vector<256x128xf32>
    %28 = arith.truncf %27 : vector<256x128xf32> to vector<256x128xbf16>
    %c0_18 = arith.constant 0 : index
    %c384 = arith.constant 384 : index
    %29 = vector.load %arg8[%c0_18, %c384] : memref<256x1152xbf16, #tpu.memory_space<vmem>>, vector<256x128xbf16>
    tpu.vector_store %arg8[%c0_18, %c384], %28 {strides = array<i32>} : memref<256x1152xbf16, #tpu.memory_space<vmem>>, vector<256x128xbf16>,
    %30 = vector.extract_strided_slice %22 {offsets = [0, 0, 0], sizes = [16, 16, 128], strides = [1, 1, 1]} : vector<16x24x128xf32> to vector<16x16x128xf32>
    %31 = vector.shape_cast %30 : vector<16x16x128xf32> to vector<256x128xf32>
    %32 = arith.truncf %31 : vector<256x128xf32> to vector<256x128xbf16>
    %c0_19 = arith.constant 0 : index
    %c512 = arith.constant 512 : index
    %33 = vector.load %arg8[%c0_19, %c512] : memref<256x1152xbf16, #tpu.memory_space<vmem>>, vector<256x128xbf16>
    tpu.vector_store %arg8[%c0_19, %c512], %32 {strides = array<i32>} : memref<256x1152xbf16, #tpu.memory_space<vmem>>, vector<256x128xbf16>,
    %c383_i32_20 = arith.constant 383 : i32
    %34 = tpu.dynamic_rotate %23 by %c383_i32_20 dim 0 : vector<384x128xf32>, i32 -> vector<384x128xf32>
    %35 = vector.shape_cast %34 : vector<384x128xf32> to vector<16x24x128xf32>
    %36 = vector.extract_strided_slice %35 {offsets = [0, 0, 0], sizes = [16, 16, 128], strides = [1, 1, 1]} : vector<16x24x128xf32> to vector<16x16x128xf32>
    %37 = vector.shape_cast %36 : vector<16x16x128xf32> to vector<256x128xf32>
    %38 = arith.truncf %37 : vector<256x128xf32> to vector<256x128xbf16>
    %c0_21 = arith.constant 0 : index
    %c640 = arith.constant 640 : index
    %39 = vector.load %arg8[%c0_21, %c640] : memref<256x1152xbf16, #tpu.memory_space<vmem>>, vector<256x128xbf16>
    tpu.vector_store %arg8[%c0_21, %c640], %38 {strides = array<i32>} : memref<256x1152xbf16, #tpu.memory_space<vmem>>, vector<256x128xbf16>,
    %c2 = arith.constant 2 : index
    %c0_22 = arith.constant 0 : index
    %c0_23 = arith.constant 0 : index
    %40 = vector.load %arg7[%c2, %c0_22, %c0_23] : memref<18x24x128xf32, #tpu.memory_space<vmem>>, vector<16x24x128xf32>
    %41 = vector.shape_cast %40 : vector<16x24x128xf32> to vector<384x128xf32>
    %c1_i32_24 = arith.constant 1 : i32
    %42 = tpu.dynamic_rotate %41 by %c1_i32_24 dim 0 : vector<384x128xf32>, i32 -> vector<384x128xf32>
    %43 = vector.shape_cast %42 : vector<384x128xf32> to vector<16x24x128xf32>
    %44 = vector.extract_strided_slice %43 {offsets = [0, 0, 0], sizes = [16, 16, 128], strides = [1, 1, 1]} : vector<16x24x128xf32> to vector<16x16x128xf32>
    %45 = vector.shape_cast %44 : vector<16x16x128xf32> to vector<256x128xf32>
    %46 = arith.truncf %45 : vector<256x128xf32> to vector<256x128xbf16>
    %c0_25 = arith.constant 0 : index
    %c768 = arith.constant 768 : index
    %47 = vector.load %arg8[%c0_25, %c768] : memref<256x1152xbf16, #tpu.memory_space<vmem>>, vector<256x128xbf16>
    tpu.vector_store %arg8[%c0_25, %c768], %46 {strides = array<i32>} : memref<256x1152xbf16, #tpu.memory_space<vmem>>, vector<256x128xbf16>,
    %48 = vector.extract_strided_slice %40 {offsets = [0, 0, 0], sizes = [16, 16, 128], strides = [1, 1, 1]} : vector<16x24x128xf32> to vector<16x16x128xf32>
    %49 = vector.shape_cast %48 : vector<16x16x128xf32> to vector<256x128xf32>
    %50 = arith.truncf %49 : vector<256x128xf32> to vector<256x128xbf16>
    %c0_26 = arith.constant 0 : index
    %c896 = arith.constant 896 : index
    %51 = vector.load %arg8[%c0_26, %c896] : memref<256x1152xbf16, #tpu.memory_space<vmem>>, vector<256x128xbf16>
    tpu.vector_store %arg8[%c0_26, %c896], %50 {strides = array<i32>} : memref<256x1152xbf16, #tpu.memory_space<vmem>>, vector<256x128xbf16>,
    %c383_i32_27 = arith.constant 383 : i32
    %52 = tpu.dynamic_rotate %41 by %c383_i32_27 dim 0 : vector<384x128xf32>, i32 -> vector<384x128xf32>
    %53 = vector.shape_cast %52 : vector<384x128xf32> to vector<16x24x128xf32>
    %54 = vector.extract_strided_slice %53 {offsets = [0, 0, 0], sizes = [16, 16, 128], strides = [1, 1, 1]} : vector<16x24x128xf32> to vector<16x16x128xf32>
    %55 = vector.shape_cast %54 : vector<16x16x128xf32> to vector<256x128xf32>
    %56 = arith.truncf %55 : vector<256x128xf32> to vector<256x128xbf16>
    %c0_28 = arith.constant 0 : index
    %c1024 = arith.constant 1024 : index
    %57 = vector.load %arg8[%c0_28, %c1024] : memref<256x1152xbf16, #tpu.memory_space<vmem>>, vector<256x128xbf16>
    tpu.vector_store %arg8[%c0_28, %c1024], %56 {strides = array<i32>} : memref<256x1152xbf16, #tpu.memory_space<vmem>>, vector<256x128xbf16>,
    %c0_29 = arith.constant 0 : index
    %c0_30 = arith.constant 0 : index
    %58 = vector.load %arg4[%c0_29, %c0_30] : memref<8x1152xbf16, #tpu.memory_space<vmem>>, vector<8x1152xbf16>
    %c0_31 = arith.constant 0 : index
    %c0_32 = arith.constant 0 : index
    %59 = vector.load %arg8[%c0_31, %c0_32] : memref<256x1152xbf16, #tpu.memory_space<vmem>>, vector<256x1152xbf16>
    %cst = arith.constant dense<0.000000e+00> : vector<8x256xf32>
    %60 = tpu.matmul %58, %59, %cst {dimension_numbers = #tpu.dot_dimension_numbers<[1], [1], [0], [0], [0, 0, 1, 0], [], []>} : vector<8x1152xbf16>, vector<256x1152xbf16>, vector<8x256xf32> -> vector<8x256xf32>
    %c0_33 = arith.constant 0 : index
    %c0_34 = arith.constant 0 : index
    %61 = vector.load %arg5[%c0_33, %c0_34] : memref<8x1xf32, #tpu.memory_space<vmem>>, vector<8x1xf32>
    %62 = vector.broadcast %61 : vector<8x1xf32> to vector<8x256xf32>
    %63 = arith.addf %60, %62 : vector<8x256xf32>
    %c0_35 = arith.constant 0 : index
    %c0_36 = arith.constant 0 : index
    %c0_37 = arith.constant 0 : index
    %64 = vector.load %arg6[%c0_35, %c0_36, %c0_37] : memref<1x8x256xf32, #tpu.memory_space<vmem>>, vector<1x8x256xf32>
    %65 = vector.shape_cast %64 : vector<1x8x256xf32> to vector<8x256xf32>
    %66 = vector.shape_cast %63 : vector<8x256xf32> to vector<1x8x256xf32>
    tpu.vector_store %arg6[%c0_35, %c0_36, %c0_37], %66 {strides = array<i32>} : memref<1x8x256xf32, #tpu.memory_space<vmem>>, vector<1x8x256xf32>,
    return
  }
  func.func @transform_0(%arg0: i32) -> (i32, i32, i32, i32) {
    %c0_i32 = arith.constant 0 : i32
    %c0_i32_0 = arith.constant 0 : i32
    %c0_i32_1 = arith.constant 0 : i32
    %c0_i32_2 = arith.constant 0 : i32
    return %arg0, %c0_i32, %c0_i32_0, %c0_i32_1 : i32, i32, i32, i32
  }
  func.func @transform_1(%arg0: i32) -> (i32, i32, i32) {
    %c0_i32 = arith.constant 0 : i32
    %c0_i32_0 = arith.constant 0 : i32
    %c0_i32_1 = arith.constant 0 : i32
    %c0_i32_2 = arith.constant 0 : i32
    return %c0_i32, %c0_i32_0, %c0_i32_1 : i32, i32, i32
  }
  func.func @transform_2(%arg0: i32) -> (i32, i32, i32) {
    %c0_i32 = arith.constant 0 : i32
    %c0_i32_0 = arith.constant 0 : i32
    %c0_i32_1 = arith.constant 0 : i32
    %c0_i32_2 = arith.constant 0 : i32
    return %c0_i32, %c0_i32_0, %c0_i32_1 : i32, i32, i32
  }
  func.func @transform_3(%arg0: i32) -> (i32, i32) {
    %c0_i32 = arith.constant 0 : i32
    %c0_i32_0 = arith.constant 0 : i32
    %c0_i32_1 = arith.constant 0 : i32
    return %c0_i32, %c0_i32_0 : i32, i32
  }
  func.func @transform_4(%arg0: i32) -> (i32, i32) {
    %c0_i32 = arith.constant 0 : i32
    %c0_i32_0 = arith.constant 0 : i32
    %c0_i32_1 = arith.constant 0 : i32
    return %c0_i32, %c0_i32_0 : i32, i32
  }
  func.func @transform_5(%arg0: i32) -> (i32, i32, i32) {
    %c0_i32 = arith.constant 0 : i32
    %c0_i32_0 = arith.constant 0 : i32
    %c0_i32_1 = arith.constant 0 : i32
    return %arg0, %c0_i32, %c0_i32_0 : i32, i32, i32
  }
}

</mosaic_0001>

<bundles_post_ra>
// kernel: qe_forward.1
= control target key start
LH: loop header
LB: loop body
LE: loop exit
PB: predicated region body
PF: predicated region fallthrough
CT: control target
= control target key end

     0   :  { %s10758_s18 = smov 0   ;;  %s12618_s0 = inlined_call_operand.vmem [shape: f32[2,18,24,128], index: 0, kind: input, shape index: {}]   ;;  %s12619_s1 = inlined_call_operand.vmem [shape: bf16[7,1152,128], index: 1, kind: input, shape index: {}]   ;;  %s12620_s2 = inlined_call_operand.vmem [shape: f32[7,1,128], index: 2, kind: input, shape index: {}]   ;;  %s12621_s3 = inlined_call_operand.vmem [shape: bf16[8,1152], index: 3, kind: input, shape index: {}]   ;;  %s12622_s4 = inlined_call_operand.vmem [shape: f32[8,1], index: 4, kind: input, shape index: {}]   ;;  %s12623_s5 = inlined_call_operand.vmem [shape: f32[2,8,256], index: 5, kind: output, shape index: {}]  }
   0x1 LB: > { %s8041_s19 = sadd.s32 4294967295, %s10721_s18   ;;  %p8045_p0 = scmp.ge.s32.totalorder %s10721_s18, 1  ;;  %s10721_s18 = sphi %s10758_s18, %s15_s18  }
   0x2   : > { %p187_p1 = scmp.lt.s32.totalorder %s10721_s18, 3 }
   0x4   : > { %p188_p2 = pnand %p8045_p0, %p187_p1 }
   0x6   : > { %191 = sbr.rel (%p188_p2) target bundleno = 1109 (0x455), region = 40 }
   0xb   : > { %p215_p3 = scmp.lt.s32.totalorder %s8041_s19, 1  ;;  %s10830_s28 = smov 0  }
   0xd   : > { %s12649_s19 = smov (!%p215_p3, %s8041_s19), 1 }
   0xe   : > { %s10130_s20 = smul.u32 432, %s12649_s19  ;;  %s8998_s21 = sshll.u32 %s12649_s19, 4 }
   0xf   : > { %s10769_s24 = scalar_lea.vmem %s12623_s5, %s8998_s21 }
  0x10   : > { %s10774_s27 = scalar_lea.vmem %s12618_s0, %s10130_s20 }
  0x11   : > { %v226_v0 = vld [vmem:[%s10774_s27] sm:$0xff]  ;;  %v227_v1 = vld [vmem:[%s10774_s27 + $0x8] sm:$0xff]  ;;  %v228_v2 = vld [vmem:[%s10774_s27 + $0x10] sm:$0xff] }
  0x12   : > { %280 = vst [vmem:[#allocation2 + $0xb0] sm:$0xff] %v226_v0  ;;  %281 = vst [vmem:[#allocation2 + $0xd0] sm:$0xff] %v227_v1  ;;  %v229_v3 = vld [vmem:[%s10774_s27 + $0x18] sm:$0xff]  ;;  %v230_v4 = vld [vmem:[%s10774_s27 + $0x20] sm:$0xff] }
  0x13   : > { %282 = vst [vmem:[#allocation2 + $0x10] sm:$0xff] %v228_v2  ;;  %v231_v5 = vld [vmem:[%s10774_s27 + $0x28] sm:$0xff]  ;;  %283 = vst [vmem:[#allocation2 + $0x48] sm:$0xff] %v229_v3  ;;  %v232_v6 = vld [vmem:[%s10774_s27 + $0x30] sm:$0xff] }
  0x14   : > { %284 = vst [vmem:[#allocation2 + $0x160] sm:$0xff] %v230_v4  ;;  %285 = vst [vmem:[#allocation2 + $0x128] sm:$0xff] %v231_v5  ;;  %v233_v7 = vld [vmem:[%s10774_s27 + $0x38] sm:$0xff]  ;;  %v234_v8 = vld [vmem:[%s10774_s27 + $0x40] sm:$0xff] }
  0x15   : > { %286 = vst [vmem:[#allocation2 + $0x40] sm:$0xff] %v232_v6  ;;  %287 = vst [vmem:[#allocation2 + $0x178] sm:$0xff] %v233_v7  ;;  %v235_v9 = vld [vmem:[%s10774_s27 + $0x48] sm:$0xff]  ;;  %v236_v10 = vld [vmem:[%s10774_s27 + $0x50] sm:$0xff] }
  0x16   : > { %288 = vst [vmem:[#allocation2 + $0x108] sm:$0xff] %v234_v8  ;;  %v237_v11 = vld [vmem:[%s10774_s27 + $0x58] sm:$0xff]  ;;  %289 = vst [vmem:[#allocation2 + $0x110] sm:$0xff] %v235_v9  ;;  %v238_v12 = vld [vmem:[%s10774_s27 + $0x60] sm:$0xff] }
  0x17   : > { %290 = vst [vmem:[#allocation2 + $0x90] sm:$0xff] %v236_v10  ;;  %291 = vst [vmem:[#allocation2 + $0x118] sm:$0xff] %v237_v11  ;;  %v239_v13 = vld [vmem:[%s10774_s27 + $0x68] sm:$0xff]  ;;  %v240_v14 = vld [vmem:[%s10774_s27 + $0x70] sm:$0xff] }
  0x18   : > { %292 = vst [vmem:[#allocation2 + $0x148] sm:$0xff] %v238_v12  ;;  %293 = vst [vmem:[#allocation2 + $0x100] sm:$0xff] %v239_v13  ;;  %v241_v15 = vld [vmem:[%s10774_s27 + $0x78] sm:$0xff]  ;;  %v242_v16 = vld [vmem:[%s10774_s27 + $0x80] sm:$0xff] }
  0x19   : > { %294 = vst [vmem:[#allocation2 + $0x58] sm:$0xff] %v240_v14  ;;  %v243_v17 = vld [vmem:[%s10774_s27 + $0x88] sm:$0xff]  ;;  %295 = vst [vmem:[#allocation2 + $0xd8] sm:$0xff] %v241_v15  ;;  %v244_v18 = vld [vmem:[%s10774_s27 + $0x90] sm:$0xff] }
  0x1a   : > { %296 = vst [vmem:[#allocation2 + $0x180] sm:$0xff] %v242_v16  ;;  %297 = vst [vmem:[#allocation2 + $0x130] sm:$0xff] %v243_v17  ;;  %v245_v19 = vld [vmem:[%s10774_s27 + $0x98] sm:$0xff]  ;;  %v246_v20 = vld [vmem:[%s10774_s27 + $0xa0] sm:$0xff] }
  0x1b   : > { %298 = vst [vmem:[#allocation2 + $0x138] sm:$0xff] %v244_v18  ;;  %299 = vst [vmem:[#allocation2 + $0x78] sm:$0xff] %v245_v19  ;;  %v247_v21 = vld [vmem:[%s10774_s27 + $0xa8] sm:$0xff]  ;;  %v248_v22 = vld [vmem:[%s10774_s27 + $0xb0] sm:$0xff] }
  0x1c   : > { %300 = vst [vmem:[#allocation2 + $0x1a0] sm:$0xff] %v246_v20  ;;  %v249_v23 = vld [vmem:[%s10774_s27 + $0xb8] sm:$0xff]  ;;  %301 = vst [vmem:[#allocation2 + $0x158] sm:$0xff] %v247_v21  ;;  %v250_v24 = vld [vmem:[%s10774_s27 + $0xc0] sm:$0xff] }
  0x1d   : > { %302 = vst [vmem:[#allocation2 + $0x98] sm:$0xff] %v248_v22  ;;  %303 = vst [vmem:[#allocation2 + $0xe8] sm:$0xff] %v249_v23  ;;  %v251_v25 = vld [vmem:[%s10774_s27 + $0xc8] sm:$0xff]  ;;  %v252_v26 = vld [vmem:[%s10774_s27 + $0xd0] sm:$0xff] }
  0x1e   : > { %304 = vst [vmem:[#allocation2 + $0x80] sm:$0xff] %v250_v24  ;;  %305 = vst [vmem:[#allocation2 + $0xa8] sm:$0xff] %v251_v25  ;;  %v253_v27 = vld [vmem:[%s10774_s27 + $0xd8] sm:$0xff]  ;;  %v254_v28 = vld [vmem:[%s10774_s27 + $0xe0] sm:$0xff] }
  0x1f   : > { %306 = vst [vmem:[#allocation2 + $0x28] sm:$0xff] %v252_v26  ;;  %v255_v29 = vld [vmem:[%s10774_s27 + $0xe8] sm:$0xff]  ;;  %307 = vst [vmem:[#allocation2] sm:$0xff] %v253_v27  ;;  %v256_v30 = vld [vmem:[%s10774_s27 + $0xf0] sm:$0xff] }
  0x20   : > { %308 = vst [vmem:[#allocation2 + $0x168] sm:$0xff] %v254_v28  ;;  %309 = vst [vmem:[#allocation2 + $0xb8] sm:$0xff] %v255_v29  ;;  %v257_v31 = vld [vmem:[%s10774_s27 + $0xf8] sm:$0xff]  ;;  %v258_v32 = vld [vmem:[%s10774_s27 + $0x100] sm:$0xff] }
  0x21   : > { %310 = vst [vmem:[#allocation2 + $0x1a8] sm:$0xff] %v256_v30  ;;  %311 = vst [vmem:[#allocation2 + $0x140] sm:$0xff] %v257_v31  ;;  %v259_v33 = vld [vmem:[%s10774_s27 + $0x108] sm:$0xff]  ;;  %v260_v34 = vld [vmem:[%s10774_s27 + $0x110] sm:$0xff] }
  0x22   : > { %312 = vst [vmem:[#allocation2 + $0x50] sm:$0xff] %v258_v32  ;;  %v261_v35 = vld [vmem:[%s10774_s27 + $0x118] sm:$0xff]  ;;  %313 = vst [vmem:[#allocation2 + $0xa0] sm:$0xff] %v259_v33  ;;  %v262_v36 = vld [vmem:[%s10774_s27 + $0x120] sm:$0xff] }
  0x23   : > { %314 = vst [vmem:[#allocation2 + $0x170] sm:$0xff] %v260_v34  ;;  %315 = vst [vmem:[#allocation2 + $0x198] sm:$0xff] %v261_v35  ;;  %v263_v37 = vld [vmem:[%s10774_s27 + $0x128] sm:$0xff]  ;;  %v264_v38 = vld [vmem:[%s10774_s27 + $0x130] sm:$0xff] }
  0x24   : > { %316 = vst [vmem:[#allocation2 + $0xc0] sm:$0xff] %v262_v36  ;;  %317 = vst [vmem:[#allocation2 + $0x190] sm:$0xff] %v263_v37  ;;  %v265_v39 = vld [vmem:[%s10774_s27 + $0x138] sm:$0xff]  ;;  %v266_v40 = vld [vmem:[%s10774_s27 + $0x140] sm:$0xff] }
  0x25   : > { %318 = vst [vmem:[#allocation2 + $0xc8] sm:$0xff] %v264_v38  ;;  %v267_v41 = vld [vmem:[%s10774_s27 + $0x148] sm:$0xff]  ;;  %319 = vst [vmem:[#allocation2 + $0xf0] sm:$0xff] %v265_v39  ;;  %v268_v42 = vld [vmem:[%s10774_s27 + $0x150] sm:$0xff] }
  0x26   : > { %320 = vst [vmem:[#allocation2 + $0x150] sm:$0xff] %v266_v40  ;;  %321 = vst [vmem:[#allocation2 + $0x30] sm:$0xff] %v267_v41  ;;  %v269_v43 = vld [vmem:[%s10774_s27 + $0x158] sm:$0xff]  ;;  %v270_v44 = vld [vmem:[%s10774_s27 + $0x160] sm:$0xff] }
  0x27   : > { %322 = vst [vmem:[#allocation2 + $0xf8] sm:$0xff] %v268_v42  ;;  %323 = vst [vmem:[#allocation2 + $0x18] sm:$0xff] %v269_v43  ;;  %v271_v45 = vld [vmem:[%s10774_s27 + $0x168] sm:$0xff]  ;;  %v272_v46 = vld [vmem:[%s10774_s27 + $0x170] sm:$0xff] }
  0x28   : > { %324 = vst [vmem:[#allocation2 + $0x8] sm:$0xff] %v270_v44  ;;  %v273_v47 = vld [vmem:[%s10774_s27 + $0x178] sm:$0xff]  ;;  %325 = vst [vmem:[#allocation2 + $0x60] sm:$0xff] %v271_v45  ;;  %v274_v48 = vld [vmem:[%s10774_s27 + $0x180] sm:$0xff] }
  0x29   : > { %326 = vst [vmem:[#allocation2 + $0x70] sm:$0xff] %v272_v46  ;;  %327 = vst [vmem:[#allocation2 + $0x68] sm:$0xff] %v273_v47  ;;  %v275_v49 = vld [vmem:[%s10774_s27 + $0x188] sm:$0xff]  ;;  %v276_v50 = vld [vmem:[%s10774_s27 + $0x190] sm:$0xff] }
  0x2a   : > { %328 = vst [vmem:[#allocation2 + $0x38] sm:$0xff] %v274_v48  ;;  %329 = vst [vmem:[#allocation2 + $0x20] sm:$0xff] %v275_v49  ;;  %v277_v51 = vld [vmem:[%s10774_s27 + $0x198] sm:$0xff]  ;;  %v278_v52 = vld [vmem:[%s10774_s27 + $0x1a0] sm:$0xff] }
  0x2b   : > { %330 = vst [vmem:[#allocation2 + $0x88] sm:$0xff] %v276_v50  ;;  %v279_v53 = vld [vmem:[%s10774_s27 + $0x1a8] sm:$0xff]  ;;  %331 = vst [vmem:[#allocation2 + $0xe0] sm:$0xff] %v277_v51 }
  0x2c   : > { %332 = vst [vmem:[#allocation2 + $0x120] sm:$0xff] %v278_v52  ;;  %333 = vst [vmem:[#allocation2 + $0x188] sm:$0xff] %v279_v53 }
  0x2d LB: >> { %v10835_v54 = vld [vmem:[#allocation2 + $0xb0] sm:$0xff]  ;;  %v436_v57 = vlaneseq  ;;  %v375_v62 = vld [vmem:[#allocation2 + $0x198] sm:$0xff]  ;;  %v10846_v63 = vld [vmem:[#allocation2 + $0xc0] sm:$0xff]  ;;  %s9287_s29 = smul.u32 576, %s10725_s28  ;;  %s2717_s10 = scalar_lea.vmem %s12620_s2, %s10725_s28  ;;  %s10725_s28 = sphi %s10830_s28, %s339_s28  }
  0x2e   : >> { %v10837_v55 = vld [vmem:[#allocation2 + $0xd0] sm:$0xff]  ;;  %v388_v58 = vrot.slane %v10835_v54, 7  ;;  %v9031_v61 = vpack.c.bf16 %v10835_v54, %v10835_v54  ;;  %v423_v3 = vrot.slane %v375_v62, 7  ;;  %v424_v4 = vrot.slane %v10846_v63, 7  ;;  %v10869_v9 = vld [vmem:[#allocation2 + $0x48] sm:$0xff]  ;;  %v10871_v10 = vld [vmem:[#allocation2 + $0x160] sm:$0xff] }
  0x2f   : >> { %v389_v59 = vrot.slane %v10837_v55, 7  ;;  %v10848_v0 = vld [vmem:[#allocation2 + $0x190] sm:$0xff]  ;;  %v10851_v1 = vshrl.u32 %v436_v57, 7  ;;  %v9032_v2 = vpack.c.bf16 %v10837_v55, %v10837_v55  ;;  %s10860_s7 = scalar_lea.vmem %s12619_s1, %s9287_s29  ;;  %v9055_v6 = vpack.c.bf16 %v10846_v63, %v10846_v63  ;;  %v10892_v26 = vld [vmem:[#allocation2 + $0xc8] sm:$0xff]  ;;  %s339_s28 = sadd.s32 1, %s10725_s28  }
  0x30   : >> { %v10839_v56 = vld [vmem:[#allocation2 + $0x68] sm:$0xff]  ;;  %759 = vst [vmem:[#allocation3 + $0x4] sm:$0xf] %v9031_v61  ;;  %v425_v5 = vrot.slane %v10848_v0, 7  ;;  %v9056_v7 = vpack.c.bf16 %v10848_v0, %v10848_v0  ;;  %v10867_v8 = vld [vmem:[#allocation2 + $0x10] sm:$0xff]  ;;  %v10148_v12 = vld [vmem:[%s10860_s7 + $0x78] sm:$0xff]   ;;  %v9033_v24 = vpack.c.bf16 %v10869_v9, %v10869_v9  ;;  %v9034_v25 = vpack.c.bf16 %v10871_v10, %v10871_v10 }
  0x31   : >> { %v435_v60 = vrot.slane %v10839_v56, 7  ;;  %12626 = vst [vmem:[#allocation4_spill] sm:$0xff] %v10851_v1  ;;  %vm438_vm0 = vcmp.lt.s32.totalorder %v10851_v1, 1  ;;  %760 = vst [vmem:[#allocation3 + $0x28] sm:$0xf] %v9032_v2  ;;  %v10873_v11 = vld [vmem:[#allocation2 + $0xf0] sm:$0xff]  ;;  %9576 = vmatprep.subr.bf16.mxu0 %v10148_v12  ;;  %10114 = vmatprep.subr.bf16.mxu1 %v10148_v12 }
  0x32   : >> { %v469_v13 = vsel %vm438_vm0, %v388_v58, %v389_v59  ;;  %v445_v15 = vsel %vm438_vm0, %v424_v4, %v425_v5  ;;  %v446_v16 = vsel %vm438_vm0, %v423_v3, %v424_v4  ;;  %v10884_v17 = vld [vmem:[#allocation2 + $0x150] sm:$0xff]  ;;  %v10149_v18 = vld [vmem:[%s10860_s7 + $0x38] sm:$0xff]   ;;  %783 = vst [vmem:[#allocation3 + $0x364] sm:$0xf] %v9055_v6  ;;  %784 = vst [vmem:[#allocation3 + $0x388] sm:$0xf] %v9056_v7 }
  0x33   : >> { %v470_v14 = vsel %vm438_vm0, %v435_v60, %v388_v58  ;;  %v9000_v20 = vpack.c.bf16 %v469_v13, %v469_v13  ;;  %v9023_v21 = vpack.c.bf16 %v446_v16, %v446_v16  ;;  %v9024_v22 = vpack.c.bf16 %v445_v15, %v445_v15  ;;  %v10150_v23 = vld [vmem:[%s10860_s7 + $0x70] sm:$0xff]   ;;  %9577 = vmatpush3.bf16.msra.mxu0 %v10149_v18  ;;  %v10152_v30 = vld [vmem:[%s10860_s7 + $0x68] sm:$0xff]   ;;  %v10154_v38 = vld [vmem:[%s10860_s7 + $0x60] sm:$0xff]   ;;  %p336_p4 = scmp.ge.s32.totalorder %s339_s28, 7  }
  0x34   : >> { %v8999_v19 = vpack.c.bf16 %v470_v14, %v470_v14  ;;  %v9057_v27 = vpack.c.bf16 %v10873_v11, %v10873_v11  ;;  %10122 = vmatpush3.bf16.msra.mxu1 %v10149_v18  ;;  %v10151_v28 = vld [vmem:[%s10860_s7 + $0x30] sm:$0xff]   ;;  %v9058_v29 = vpack.c.bf16 %v10884_v17, %v10884_v17  ;;  %9578 = vmatprep.subr.bf16.mxu0 %v10150_v23  ;;  %v390_v31 = vrot.slane %v10867_v8, 7  ;;  %v10153_v35 = vld [vmem:[%s10860_s7 + $0x28] sm:$0xff]   ;;  %v10155_v46 = vld [vmem:[%s10860_s7 + $0x20] sm:$0xff]  }
  0x35   : >> { %600 = vst [vmem:[#allocation3 + $0x24] sm:$0xf] %v9000_v20  ;;  %623 = vst [vmem:[#allocation3 + $0x360] sm:$0xf] %v9023_v21  ;;  %10115 = vmatprep.subr.bf16.mxu1 %v10150_v23  ;;  %v10902_v32 = vrot.slane %v10869_v9, 7  ;;  %v791_v33 = vrot.slane %v10835_v54, 1 }
  0x36   : >> { %599 = vst [vmem:[#allocation3] sm:$0xf] %v8999_v19  ;;  %624 = vst [vmem:[#allocation3 + $0x384] sm:$0xf] %v9024_v22  ;;  %v392_v34 = vrot.slane %v10871_v10, 7  ;;  %v426_v37 = vrot.slane %v10892_v26, 7 }
  0x37   : >> { %761 = vst [vmem:[#allocation3 + $0x4c] sm:$0xf] %v9033_v24  ;;  %762 = vst [vmem:[#allocation3 + $0x70] sm:$0xf] %v9034_v25  ;;  %9579 = vmatpush3.bf16.msra.mxu0 %v10151_v28  ;;  %v468_v36 = vsel %vm438_vm0, %v390_v31, %v10902_v32  ;;  %v427_v41 = vrot.slane %v10873_v11, 7  ;;  %v792_v42 = vrot.slane %v10837_v55, 1 }
  0x38   : >> { %785 = vst [vmem:[#allocation3 + $0x3ac] sm:$0xf] %v9057_v27  ;;  %786 = vst [vmem:[#allocation3 + $0x3d0] sm:$0xf] %v9058_v29  ;;  %10123 = vmatpush3.bf16.msra.mxu1 %v10151_v28  ;;  %9580 = vmatprep.subr.bf16.mxu0 %v10152_v30  ;;  %v467_v39 = vsel %vm438_vm0, %v10902_v32, %v392_v34  ;;  %v9001_v40 = vpack.c.bf16 %v468_v36, %v468_v36  ;;  %v428_v44 = vrot.slane %v10884_v17, 7  ;;  %v10156_v50 = vld [vmem:[%s10860_s7 + $0x58] sm:$0xff]  }
  0x39   : >> { %1449 = vst [vmem:[#allocation3 + $0x10] sm:$0xf] %v9033_v24  ;;  %1450 = vst [vmem:[#allocation3 + $0x34] sm:$0xf] %v9034_v25  ;;  %10116 = vmatprep.subr.bf16.mxu1 %v10152_v30  ;;  %v9002_v43 = vpack.c.bf16 %v467_v39, %v467_v39  ;;  %v444_v45 = vsel %vm438_vm0, %v426_v37, %v427_v41  ;;  %v793_v49 = vrot.slane %v10867_v8, 1  ;;  %vm839_vm1 = vcmp.lt.s32.totalorder %v10851_v1, 7 }
  0x3a   : >> { %601 = vst [vmem:[#allocation3 + $0x48] sm:$0xf] %v9001_v40  ;;  %v443_v47 = vsel %vm438_vm0, %v427_v41, %v428_v44  ;;  %v9025_v48 = vpack.c.bf16 %v444_v45, %v444_v45  ;;  %v871_v53 = vsel %vm839_vm1, %v791_v33, %v792_v42  ;;  %v794_v54 = vrot.slane %v10869_v9, 1  ;;  %v10931_v55 = vld [vmem:[#allocation2 + $0x128] sm:$0xff]  ;;  %v10157_v60 = vld [vmem:[%s10860_s7 + $0x18] sm:$0xff]   ;;  %v10158_v62 = vld [vmem:[%s10860_s7 + $0x50] sm:$0xff]  }
  0x3b   : >> { %9581 = vmatpush3.bf16.msra.mxu0 %v10153_v35  ;;  %602 = vst [vmem:[#allocation3 + $0x6c] sm:$0xf] %v9002_v43  ;;  %1290 = vst [vmem:[#allocation3 + $0x30] sm:$0xf] %v9002_v43  ;;  %v9026_v51 = vpack.c.bf16 %v443_v47, %v443_v47  ;;  %v870_v52 = vsel %vm839_vm1, %v792_v42, %v793_v49  ;;  %v9063_v57 = vpack.c.bf16 %v871_v53, %v871_v53  ;;  %v10166_v3 = vld [vmem:[#allocation3 + $0x4] ss:$36 sps:$4 sm:$0xff]  }
  0x3c   : >> { %10124 = vmatpush3.bf16.msra.mxu1 %v10153_v35  ;;  %9582 = vmatprep.subr.bf16.mxu0 %v10154_v38  ;;  %625 = vst [vmem:[#allocation3 + $0x3a8] sm:$0xf] %v9025_v48  ;;  %v9064_v58 = vpack.c.bf16 %v870_v52, %v870_v52  ;;  %v795_v59 = vrot.slane %v10871_v10, 1  ;;  %v796_v61 = vrot.slane %v10931_v55, 1  ;;  %v827_v6 = vrot.slane %v10846_v63, 1  ;;  %v10159_v9 = vld [vmem:[%s10860_s7 + $0x10] sm:$0xff]  }
  0x3d   : >> { %10117 = vmatprep.subr.bf16.mxu1 %v10154_v38  ;;  %626 = vst [vmem:[#allocation3 + $0x3cc] sm:$0xf] %v9026_v51  ;;  %1000 = vst [vmem:[#allocation3 + $0x8] sm:$0xf] %v9063_v57  ;;  %v10169_v7 = vld [vmem:[#allocation3 + $0x364] ss:$36 sps:$4 sm:$0xff]   ;;  %3925 = vmatprep.mubr.bf16.mxu0 %v10166_v3 }
  0x3e   : >> { %1001 = vst [vmem:[#allocation3 + $0x2c] sm:$0xf] %v9064_v58  ;;  %v869_v2 = vsel %vm839_vm1, %v794_v54, %v795_v59  ;;  %v868_v4 = vsel %vm839_vm1, %v795_v59, %v796_v61  ;;  %v828_v10 = vrot.slane %v10848_v0, 1  ;;  %v10160_v12 = vld [vmem:[%s10860_s7 + $0x48] sm:$0xff]   ;;  %4021 = vmatprep.mubr.bf16.mxu1 %v10169_v7  ;;  %v829_v63 = vrot.slane %v10892_v26, 1  ;;  %v10162_v15 = vld [vmem:[%s10860_s7 + $0x40] sm:$0xff]  }
  0x3f   : >> { %9583 = vmatpush3.bf16.msra.mxu0 %v10155_v46  ;;  %v9065_v5 = vpack.c.bf16 %v869_v2, %v869_v2  ;;  %v9066_v8 = vpack.c.bf16 %v868_v4, %v868_v4  ;;  %v10161_v13 = vld [vmem:[%s10860_s7 + $0x8] sm:$0xff]   ;;  %v10163_v19 = vld [vmem:[%s10860_s7] sm:$0xff]   ;;  %v10170_v20 = vld [vmem:[%s10860_s7 + $0xf8] sm:$0xff]   ;;  %v393_v26 = vrot.slane %v10931_v55, 7  ;;  %v830_v33 = vrot.slane %v10873_v11, 1 }
  0x40   : >> { %10125 = vmatpush3.bf16.msra.mxu1 %v10155_v46  ;;  %9584 = vmatprep.subr.bf16.mxu0 %v10156_v50  ;;  %v846_v0 = vsel %vm839_vm1, %v828_v10, %v829_v63  ;;  %v847_v14 = vsel %vm839_vm1, %v827_v6, %v828_v10  ;;  %v10164_v21 = vld [vmem:[#allocation3] ss:$36 sps:$4 sm:$0xff]   ;;  %v10173_v23 = vld [vmem:[%s10860_s7 + $0x178] sm:$0xff]   ;;  %v346_v30 = vld [vmem:[#allocation2 + $0x40] sm:$0xff]  ;;  %v831_v34 = vrot.slane %v10884_v17, 1 }
  0x41   : >> { %10118 = vmatprep.subr.bf16.mxu1 %v10156_v50  ;;  %1002 = vst [vmem:[#allocation3 + $0x50] sm:$0xf] %v9065_v5  ;;  %1689 = vst [vmem:[#allocation3 + $0x14] sm:$0xf] %v9065_v5  ;;  %v9087_v16 = vpack.c.bf16 %v847_v14, %v847_v14  ;;  %v9088_v18 = vpack.c.bf16 %v846_v0, %v846_v0  ;;  %v10167_v22 = vld [vmem:[#allocation3 + $0x360] ss:$36 sps:$4 sm:$0xff]   ;;  %v9035_v37 = vpack.c.bf16 %v346_v30, %v346_v30 }
  0x42   : >> { %1003 = vst [vmem:[#allocation3 + $0x74] sm:$0xf] %v9066_v8  ;;  %1690 = vst [vmem:[#allocation3 + $0x38] sm:$0xf] %v9066_v8  ;;  %v10171_v24 = vld [vmem:[%s10860_s7 + $0xb8] sm:$0xff]   ;;  %v10172_v27 = vld [vmem:[%s10860_s7 + $0xf0] sm:$0xff]   ;;  %v845_v3 = vsel %vm839_vm1, %v830_v33, %v831_v34 }
  0x43   : >> { %9585 = vmatpush3.bf16.msra.mxu0 %v10157_v60  ;;  %1024 = vst [vmem:[#allocation3 + $0x368] sm:$0xf] %v9087_v16  ;;  %1025 = vst [vmem:[#allocation3 + $0x38c] sm:$0xf] %v9088_v18  ;;  %v10175_v25 = vld [vmem:[%s10860_s7 + $0x138] sm:$0xff]   ;;  %v394_v35 = vrot.slane %v346_v30, 7  ;;  %v9089_v6 = vpack.c.bf16 %v845_v3, %v845_v3 }
  0x44   : >> { %10126 = vmatpush3.bf16.msra.mxu1 %v10157_v60  ;;  %9586 = vmatprep.subr.bf16.mxu0 %v10158_v62  ;;  %v10176_v28 = vld [vmem:[#allocation3 + $0x4c] ss:$36 sps:$4 sm:$0xff]   ;;  %v381_v39 = vld [vmem:[#allocation2 + $0x30] sm:$0xff]  ;;  %763 = vst [vmem:[#allocation3 + $0x94] sm:$0xf] %v9035_v37  ;;  %v797_v53 = vrot.slane %v346_v30, 1 }
  0x45   : >> { %10119 = vmatprep.subr.bf16.mxu1 %v10158_v62  ;;  %v10178_v29 = vld [vmem:[#allocation3 + $0x3ac] ss:$36 sps:$4 sm:$0xff]   ;;  %v10174_v42 = vld [vmem:[%s10860_s7 + $0xb0] sm:$0xff]   ;;  %v429_v43 = vrot.slane %v381_v39, 7  ;;  %v466_v47 = vsel %vm438_vm0, %v393_v26, %v394_v35  ;;  %v10182_v57 = vld [vmem:[%s10860_s7 + $0xe8] sm:$0xff]   ;;  %v832_v2 = vrot.slane %v381_v39, 1 }
  0x46   : >> { %v10959_v31 = vld [vmem:[#allocation2 + $0x178] sm:$0xff]  ;;  %v9003_v49 = vpack.c.bf16 %v466_v47, %v466_v47  ;;  %v10193_v52 = vld [vmem:[%s10860_s7 + $0x170] sm:$0xff]   ;;  %v10183_v4 = vld [vmem:[%s10860_s7 + $0xa8] sm:$0xff]   ;;  %1451 = vst [vmem:[#allocation3 + $0x58] sm:$0xf] %v9035_v37 }
  0x47   : >> { %9587 = vmatpush3.bf16.msra.mxu0 %v10159_v9  ;;  %v395_v36 = vrot.slane %v10959_v31, 7  ;;  %v9036_v38 = vpack.c.bf16 %v10959_v31, %v10959_v31  ;;  %v10966_v40 = vld [vmem:[#allocation2 + $0xf8] sm:$0xff]  ;;  %v798_v60 = vrot.slane %v10959_v31, 1  ;;  %v10195_v62 = vld [vmem:[%s10860_s7 + $0x130] sm:$0xff]   ;;  %v10184_v7 = vld [vmem:[%s10860_s7 + $0xe0] sm:$0xff]  }
  0x48   : >> { %10127 = vmatpush3.bf16.msra.mxu1 %v10159_v9  ;;  %9588 = vmatprep.subr.bf16.mxu0 %v10160_v12  ;;  %v10968_v41 = vld [vmem:[#allocation2 + $0x18] sm:$0xff]  ;;  %v430_v11 = vrot.slane %v10966_v40, 7  ;;  %v9059_v45 = vpack.c.bf16 %v10966_v40, %v10966_v40  ;;  %603 = vst [vmem:[#allocation3 + $0x90] sm:$0xf] %v9003_v49  ;;  %1291 = vst [vmem:[#allocation3 + $0x54] sm:$0xf] %v9003_v49 }
  0x49   : >> { %10120 = vmatprep.subr.bf16.mxu1 %v10160_v12  ;;  %v431_v44 = vrot.slane %v10968_v41, 7  ;;  %v465_v46 = vsel %vm438_vm0, %v394_v35, %v395_v36  ;;  %764 = vst [vmem:[#allocation3 + $0xb8] sm:$0xf] %v9036_v38  ;;  %v9060_v48 = vpack.c.bf16 %v10968_v41, %v10968_v41  ;;  %v10180_v54 = vld [vmem:[#allocation3 + $0x48] ss:$36 sps:$4 sm:$0xff]   ;;  %v867_v5 = vsel %vm839_vm1, %v797_v53, %v798_v60  ;;  %v348_v8 = vld [vmem:[#allocation2 + $0x108] sm:$0xff] }
  0x4a   : >> { %v9004_v50 = vpack.c.bf16 %v465_v46, %v465_v46  ;;  %787 = vst [vmem:[#allocation3 + $0x3f4] sm:$0xf] %v9059_v45  ;;  %v10181_v55 = vld [vmem:[#allocation3 + $0x3a8] ss:$36 sps:$4 sm:$0xff]   ;;  %v442_v58 = vsel %vm438_vm0, %v429_v43, %v430_v11  ;;  %v10997_v9 = vld [vmem:[#allocation2 + $0x110] sm:$0xff]  ;;  %v9067_v10 = vpack.c.bf16 %v867_v5, %v867_v5  ;;  %v11003_v12 = vsel %vm839_vm1, %v831_v34, %v832_v2  ;;  %v11012_v18 = vld [vmem:[#allocation2 + $0x8] sm:$0xff] }
  0x4b   : >> { %9589 = vmatpush3.bf16.msra.mxu0 %v10161_v13  ;;  %v441_v51 = vsel %vm438_vm0, %v430_v11, %v431_v44  ;;  %788 = vst [vmem:[#allocation3 + $0x418] sm:$0xf] %v9060_v48  ;;  %v9027_v61 = vpack.c.bf16 %v442_v58, %v442_v58  ;;  %1452 = vst [vmem:[#allocation3 + $0x7c] sm:$0xf] %v9036_v38  ;;  %v833_v63 = vrot.slane %v10966_v40, 1  ;;  %v11007_v0 = vld [vmem:[#allocation2 + $0x90] sm:$0xff] }
  0x4c   : >> { %10128 = vmatpush3.bf16.msra.mxu1 %v10161_v13  ;;  %9590 = vmatprep.subr.bf16.mxu0 %v10162_v15  ;;  %v9028_v59 = vpack.c.bf16 %v441_v51, %v441_v51  ;;  %604 = vst [vmem:[#allocation3 + $0xb4] sm:$0xf] %v9004_v50  ;;  %1292 = vst [vmem:[#allocation3 + $0x78] sm:$0xf] %v9004_v50  ;;  %v834_v13 = vrot.slane %v10968_v41, 1  ;;  %v396_v14 = vrot.slane %v348_v8, 7 }
  0x4d   : >> { %10121 = vmatprep.subr.bf16.mxu1 %v10162_v15  ;;  %627 = vst [vmem:[#allocation3 + $0x3f0] sm:$0xf] %v9027_v61  ;;  %v397_v15 = vrot.slane %v10997_v9, 7  ;;  %v9037_v16 = vpack.c.bf16 %v10997_v9, %v10997_v9  ;;  %v11014_v17 = vld [vmem:[#allocation2 + $0x60] sm:$0xff]  ;;  %1026 = vst [vmem:[#allocation3 + $0x3b0] sm:$0xf] %v9089_v6  ;;  %v9090_v48 = vpack.c.bf16 %v11003_v12, %v11003_v12 }
  0x4e   : >> { %628 = vst [vmem:[#allocation3 + $0x414] sm:$0xf] %v9028_v59  ;;  %1004 = vst [vmem:[#allocation3 + $0x98] sm:$0xf] %v9067_v10  ;;  %v10192_v30 = vld [vmem:[%s10860_s7 + $0xd8] sm:$0xff]   ;;  %v800_v44 = vrot.slane %v10997_v9, 1  ;;  %v843_v49 = vsel %vm839_vm1, %v833_v63, %v834_v13 }
  0x4f   : >> { %9591 = vmatpush3.bf16.msra.mxu0 %v10163_v19  ;;  %1691 = vst [vmem:[#allocation3 + $0x5c] sm:$0xf] %v9067_v10  ;;  %v464_v26 = vsel %vm438_vm0, %v396_v14, %v397_v15  ;;  %765 = vst [vmem:[#allocation3 + $0xdc] sm:$0xf] %v9037_v16  ;;  %v10194_v43 = vld [vmem:[%s10860_s7 + $0x98] sm:$0xff]   ;;  %v801_v47 = vrot.slane %v11007_v0, 1 }
  0x50   : >> { %10129 = vmatpush3.bf16.msra.mxu1 %v10163_v19  ;;  %9800 = vmatprep.subr.bf16.mxu0 %v10173_v23  ;;  %v799_v19 = vrot.slane %v348_v8, 1  ;;  %v432_v23 = vrot.slane %v11012_v18, 7  ;;  %v9005_v33 = vpack.c.bf16 %v464_v26, %v464_v26  ;;  %v10186_v36 = vld [vmem:[#allocation3 + $0x94] ss:$36 sps:$4 sm:$0xff]   ;;  %v10196_v50 = vld [vmem:[%s10860_s7 + $0xd0] sm:$0xff]   ;;  %v835_v51 = vrot.slane %v11012_v18, 1 }
  0x51   : >> { %9688 = vmatprep.subr.bf16.mxu1 %v10170_v20  ;;  %v398_v20 = vrot.slane %v11007_v0, 7  ;;  %1453 = vst [vmem:[#allocation3 + $0xa0] sm:$0xf] %v9037_v16  ;;  %v10207_v53 = vld [vmem:[%s10860_s7 + $0x168] sm:$0xff]   ;;  %1027 = vst [vmem:[#allocation3 + $0x3d4] sm:$0xf] %v9090_v48 }
  0x52   : >> { %3926 = vmatmul.mubr.bf16.vlgmr.msra.gmra.mxu0 %v10164_v21  ;;  %v9038_v21 = vpack.c.bf16 %v11007_v0, %v11007_v0  ;;  %v866_v35 = vsel %vm839_vm1, %v798_v60, %v799_v19  ;;  %605 = vst [vmem:[#allocation3 + $0xd8] sm:$0xf] %v9005_v33  ;;  %1293 = vst [vmem:[#allocation3 + $0x9c] sm:$0xf] %v9005_v33  ;;  %v10188_v45 = vld [vmem:[#allocation3 + $0x3f4] ss:$36 sps:$4 sm:$0xff]   ;;  %v842_v58 = vsel %vm839_vm1, %v834_v13, %v835_v51 }
  0x53   : >> { %4022 = vmatmul.mubr.bf16.vlgmr.msra.gmra.mxu1 %v10167_v22  ;;  %9801 = vmatpush3.bf16.msra.mxu0 %v10175_v25  ;;  %v11019_v22 = vld [vmem:[#allocation2 + $0x70] sm:$0xff]  ;;  %v10185_v25 = vld [vmem:[%s10860_s7 + $0xa0] sm:$0xff]   ;;  %v463_v31 = vsel %vm438_vm0, %v397_v15, %v398_v20  ;;  %v9068_v40 = vpack.c.bf16 %v866_v35, %v866_v35  ;;  %v838_v59 = vrot.slane %v10839_v56, 1  ;;  %v10209_v60 = vld [vmem:[%s10860_s7 + $0x128] sm:$0xff]   ;;  %v9092_v2 = vpack.c.bf16 %v842_v58, %v842_v58 }
  0x54   : >> { %9689 = vmatpush3.bf16.msra.mxu1 %v10171_v24  ;;  %3933 = vmatprep.mubr.bf16.mxu0 %v10176_v28  ;;  %v433_v24 = vrot.slane %v11014_v17, 7  ;;  %v9061_v28 = vpack.c.bf16 %v11014_v17, %v11014_v17  ;;  %766 = vst [vmem:[#allocation3 + $0x100] sm:$0xf] %v9038_v21  ;;  %v9006_v37 = vpack.c.bf16 %v463_v31, %v463_v31  ;;  %1454 = vst [vmem:[#allocation3 + $0xc4] sm:$0xf] %v9038_v21  ;;  %v351_v61 = vld [vmem:[#allocation2 + $0x118] sm:$0xff] }
  0x55   : >> { %9690 = vmatprep.subr.bf16.mxu1 %v10172_v27  ;;  %4029 = vmatprep.mubr.bf16.mxu1 %v10178_v29  ;;  %v434_v27 = vrot.slane %v11019_v22, 7  ;;  %v9062_v29 = vpack.c.bf16 %v11019_v22, %v11019_v22  ;;  %v10191_v46 = vld [vmem:[#allocation3 + $0x3f0] ss:$36 sps:$4 sm:$0xff]   ;;  %1005 = vst [vmem:[#allocation3 + $0xbc] sm:$0xf] %v9068_v40  ;;  %v836_v3 = vrot.slane %v11014_v17, 1 }
  0x56   : >> { %9802 = vmatprep.subr.bf16.mxu0 %v10193_v52  ;;  %v440_v34 = vsel %vm438_vm0, %v432_v23, %v433_v24  ;;  %789 = vst [vmem:[#allocation3 + $0x43c] sm:$0xf] %v9061_v28  ;;  %606 = vst [vmem:[#allocation3 + $0xfc] sm:$0xf] %v9006_v37  ;;  %v9091_v52 = vpack.c.bf16 %v843_v49, %v843_v49  ;;  %v11063_v41 = vld [vmem:[#allocation2 + $0x100] sm:$0xff]  ;;  %v399_v5 = vrot.slane %v351_v61, 7 }
  0x57   : >> { %9803 = vmatpush3.bf16.msra.mxu0 %v10195_v62  ;;  %v439_v38 = vsel %vm438_vm0, %v433_v24, %v434_v27  ;;  %v9029_v39 = vpack.c.bf16 %v440_v34, %v440_v34  ;;  %790 = vst [vmem:[#allocation3 + $0x460] sm:$0xf] %v9062_v29  ;;  %1294 = vst [vmem:[#allocation3 + $0xc0] sm:$0xf] %v9006_v37  ;;  %v352_v62 = vld [vmem:[#allocation2 + $0x148] sm:$0xff]  ;;  %v802_v8 = vrot.slane %v351_v61, 1 }
  0x58   : >> { %9691 = vmatpush3.bf16.msra.mxu1 %v10174_v42  ;;  %v10190_v42 = vld [vmem:[#allocation3 + $0x90] ss:$36 sps:$4 sm:$0xff]   ;;  %v9030_v11 = vpack.c.bf16 %v439_v38, %v439_v38  ;;  %1692 = vst [vmem:[#allocation3 + $0x80] sm:$0xf] %v9068_v40  ;;  %1028 = vst [vmem:[#allocation3 + $0x3f8] sm:$0xf] %v9091_v52  ;;  %9804 = vmatprep.subr.bf16.mxu0 %v10207_v53  ;;  %v9040_v12 = vpack.c.bf16 %v11063_v41, %v11063_v41 }
  0x59   : >> { %9692 = vmatprep.subr.bf16.mxu1 %v10182_v57  ;;  %629 = vst [vmem:[#allocation3 + $0x438] sm:$0xf] %v9029_v39  ;;  %v400_v6 = vrot.slane %v352_v62, 7  ;;  %v1080_v56 = vld [vmem:[#allocation2 + $0x88] sm:$0xff]  ;;  %v401_v10 = vrot.slane %v11063_v41, 7  ;;  %v864_v15 = vsel %vm839_vm1, %v801_v47, %v802_v8  ;;  %v803_v16 = vrot.slane %v352_v62, 1 }
  0x5a   : >> { %3934 = vmatmul.mubr.bf16.gmra.mxu0 %v10180_v54  ;;  %630 = vst [vmem:[#allocation3 + $0x45c] sm:$0xf] %v9030_v11  ;;  %v865_v54 = vsel %vm839_vm1, %v800_v44, %v801_v47  ;;  %v10204_v9 = vld [vmem:[%s10860_s7 + $0xc8] sm:$0xff]   ;;  %v1128_v63 = vrot.slane %v1080_v56, 7  ;;  %1029 = vst [vmem:[#allocation3 + $0x41c] sm:$0xf] %v9092_v2  ;;  %v9070_v23 = vpack.c.bf16 %v864_v15, %v864_v15 }
  0x5b   : >> { %4030 = vmatmul.mubr.bf16.gmra.mxu1 %v10181_v55  ;;  %3941 = vmatprep.mubr.bf16.mxu0 %v10186_v36  ;;  %v10197_v55 = vld [vmem:[%s10860_s7 + $0x90] sm:$0xff]   ;;  %v9069_v57 = vpack.c.bf16 %v865_v54, %v865_v54  ;;  %v10205_v0 = vld [vmem:[%s10860_s7 + $0x88] sm:$0xff]   ;;  %v462_v14 = vsel %vm438_vm0, %v399_v5, %v400_v6  ;;  %v804_v18 = vrot.slane %v11063_v41, 1  ;;  %v461_v20 = vsel %vm438_vm0, %v400_v6, %v401_v10  ;;  %v10206_v28 = vld [vmem:[%s10860_s7 + $0xc0] sm:$0xff]  }
  0x5c   : >> { %9693 = vmatpush3.bf16.msra.mxu1 %v10183_v4  ;;  %4037 = vmatprep.mubr.bf16.mxu1 %v10188_v45  ;;  %v837_v4 = vrot.slane %v11019_v22, 1  ;;  %v10198_v13 = vld [vmem:[#allocation3 + $0xdc] ss:$36 sps:$4 sm:$0xff]   ;;  %v9007_v21 = vpack.c.bf16 %v462_v14, %v462_v14  ;;  %768 = vst [vmem:[#allocation3 + $0x148] sm:$0xf] %v9040_v12  ;;  %v1160_v22 = vsel %vm438_vm0, %v1128_v63, %v10902_v32  ;;  %v354_v29 = vld [vmem:[#allocation2 + $0x58] sm:$0xff] }
  0x5d   : >> { %9694 = vmatprep.subr.bf16.mxu1 %v10184_v7  ;;  %v9039_v7 = vpack.c.bf16 %v352_v62, %v352_v62  ;;  %1006 = vst [vmem:[#allocation3 + $0xe0] sm:$0xf] %v9069_v57  ;;  %1693 = vst [vmem:[#allocation3 + $0xa4] sm:$0xf] %v9069_v57  ;;  %9805 = vmatpush3.bf16.msra.mxu0 %v10209_v60  ;;  %v10202_v19 = vld [vmem:[#allocation3 + $0xd8] ss:$36 sps:$4 sm:$0xff]   ;;  %v9095_v26 = vpack.c.bf16 %v1160_v22, %v1160_v22 }
  0x5e   : >> { %v10200_v17 = vld [vmem:[#allocation3 + $0x43c] ss:$36 sps:$4 sm:$0xff]   ;;  %v863_v27 = vsel %vm839_vm1, %v803_v16, %v804_v18  ;;  %607 = vst [vmem:[#allocation3 + $0x120] sm:$0xf] %v9007_v21  ;;  %1007 = vst [vmem:[#allocation3 + $0x104] sm:$0xf] %v9070_v23  ;;  %v840_v32 = vsel %vm839_vm1, %v837_v4, %v838_v59  ;;  %v841_v36 = vsel %vm839_vm1, %v836_v3, %v837_v4 }
  0x5f   : >> { %767 = vst [vmem:[#allocation3 + $0x124] sm:$0xf] %v9039_v7  ;;  %1455 = vst [vmem:[#allocation3 + $0xe8] sm:$0xf] %v9039_v7  ;;  %v355_v31 = vld [vmem:[#allocation2 + $0xd8] sm:$0xff]  ;;  %v11085_v33 = vld [vmem:[#allocation2 + $0x180] sm:$0xff]  ;;  %v9094_v37 = vpack.c.bf16 %v840_v32, %v840_v32 }
  0x60   : >> { %9695 = vmatpush3.bf16.msra.mxu1 %v10185_v25  ;;  %v9008_v25 = vpack.c.bf16 %v461_v20, %v461_v20  ;;  %1295 = vst [vmem:[#allocation3 + $0xe4] sm:$0xf] %v9007_v21  ;;  %1694 = vst [vmem:[#allocation3 + $0xc8] sm:$0xf] %v9070_v23  ;;  %v402_v34 = vrot.slane %v354_v29, 7  ;;  %v805_v35 = vrot.slane %v354_v29, 1 }
  0x61   : >> { %9696 = vmatprep.subr.bf16.mxu1 %v10192_v30  ;;  %v10203_v24 = vld [vmem:[#allocation3 + $0x438] ss:$36 sps:$4 sm:$0xff]   ;;  %v9071_v30 = vpack.c.bf16 %v863_v27, %v863_v27  ;;  %1289 = vst [vmem:[#allocation3 + $0xc] sm:$0xf] %v9095_v26  ;;  %v10208_v38 = vld [vmem:[%s10860_s7 + $0x80] sm:$0xff]   ;;  %v403_v39 = vrot.slane %v355_v31, 7 }
  0x62   : >> { %3942 = vmatmul.mubr.bf16.gmra.mxu0 %v10190_v42  ;;  %608 = vst [vmem:[#allocation3 + $0x144] sm:$0xf] %v9008_v25  ;;  %1296 = vst [vmem:[#allocation3 + $0x108] sm:$0xf] %v9008_v25  ;;  %v404_v40 = vrot.slane %v11085_v33, 7  ;;  %v9041_v42 = vpack.c.bf16 %v355_v31, %v355_v31  ;;  %v10224_v11 = vld [vmem:[%s10860_s7 + $0x160] sm:$0xff]   ;;  %v862_v45 = vsel %vm839_vm1, %v804_v18, %v805_v35 }
  0x63   : >> { %4038 = vmatmul.mubr.bf16.gmra.mxu1 %v10191_v46  ;;  %3949 = vmatprep.mubr.bf16.mxu0 %v10198_v13  ;;  %1008 = vst [vmem:[#allocation3 + $0x128] sm:$0xf] %v9071_v30  ;;  %1456 = vst [vmem:[#allocation3 + $0x10c] sm:$0xf] %v9040_v12  ;;  %v10216_v44 = vld [vmem:[%s10860_s7 + $0x1f8] sm:$0xff]   ;;  %v9093_v46 = vpack.c.bf16 %v841_v36, %v841_v36  ;;  %v460_v48 = vsel %vm438_vm0, %v402_v34, %v403_v39  ;;  %v10225_v49 = vld [vmem:[%s10860_s7 + $0x120] sm:$0xff]  }
  0x64   : >> { %9697 = vmatpush3.bf16.msra.mxu1 %v10194_v43  ;;  %4045 = vmatprep.mubr.bf16.mxu1 %v10200_v17  ;;  %v9042_v43 = vpack.c.bf16 %v11085_v33, %v11085_v33  ;;  %1695 = vst [vmem:[#allocation3 + $0xec] sm:$0xf] %v9071_v30  ;;  %1031 = vst [vmem:[#allocation3 + $0x464] sm:$0xf] %v9094_v37  ;;  %v459_v47 = vsel %vm438_vm0, %v403_v39, %v404_v40  ;;  %v806_v51 = vrot.slane %v355_v31, 1  ;;  %v357_v54 = vld [vmem:[#allocation2 + $0x130] sm:$0xff] }
  0x65   : >> { %9698 = vmatprep.subr.bf16.mxu1 %v10196_v50  ;;  %769 = vst [vmem:[#allocation3 + $0x16c] sm:$0xf] %v9041_v42  ;;  %9806 = vmatprep.subr.bf16.mxu0 %v10224_v11  ;;  %v9072_v50 = vpack.c.bf16 %v862_v45, %v862_v45  ;;  %v9009_v52 = vpack.c.bf16 %v460_v48, %v460_v48  ;;  %v11102_v57 = vld [vmem:[#allocation2 + $0x78] sm:$0xff]  ;;  %v807_v58 = vrot.slane %v11085_v33, 1  ;;  %1457 = vst [vmem:[#allocation3 + $0x130] sm:$0xf] %v9041_v42 }
  0x66   : >> { %770 = vst [vmem:[#allocation3 + $0x190] sm:$0xf] %v9042_v43  ;;  %v9010_v53 = vpack.c.bf16 %v459_v47, %v459_v47  ;;  %1458 = vst [vmem:[#allocation3 + $0x154] sm:$0xf] %v9042_v43  ;;  %9807 = vmatpush3.bf16.msra.mxu0 %v10225_v49  ;;  %v405_v59 = vrot.slane %v357_v54, 7  ;;  %v407_v61 = vrot.slane %v11102_v57, 7  ;;  %v9044_v4 = vpack.c.bf16 %v11102_v57, %v11102_v57 }
  0x67   : >> { %1030 = vst [vmem:[#allocation3 + $0x440] sm:$0xf] %v9093_v46  ;;  %1009 = vst [vmem:[#allocation3 + $0x14c] sm:$0xf] %v9072_v50  ;;  %v10217_v2 = vld [vmem:[%s10860_s7 + $0x1b8] sm:$0xff]   ;;  %v808_v41 = vrot.slane %v357_v54, 1  ;;  %v861_v5 = vsel %vm839_vm1, %v806_v51, %v807_v58 }
  0x68   : >> { %9699 = vmatpush3.bf16.msra.mxu1 %v10197_v55  ;;  %v358_v55 = vld [vmem:[#allocation2 + $0x138] sm:$0xff]  ;;  %1696 = vst [vmem:[#allocation3 + $0x110] sm:$0xf] %v9072_v50  ;;  %609 = vst [vmem:[#allocation3 + $0x168] sm:$0xf] %v9009_v52  ;;  %v10232_v8 = vld [vmem:[%s10860_s7 + $0x1f0] sm:$0xff]  }
  0x69   : >> { %9700 = vmatprep.subr.bf16.mxu1 %v10204_v9  ;;  %v406_v60 = vrot.slane %v358_v55, 7  ;;  %v9043_v62 = vpack.c.bf16 %v358_v55, %v358_v55  ;;  %610 = vst [vmem:[#allocation3 + $0x18c] sm:$0xf] %v9010_v53  ;;  %v10220_v3 = vld [vmem:[#allocation3 + $0x54] ss:$36 sps:$4 sm:$0xff]   ;;  %v9073_v9 = vpack.c.bf16 %v861_v5, %v861_v5  ;;  %v809_v10 = vrot.slane %v358_v55, 1 }
  0x6a   : >> { %3950 = vmatmul.mubr.bf16.gmra.mxu0 %v10202_v19  ;;  %1297 = vst [vmem:[#allocation3 + $0x12c] sm:$0xf] %v9009_v52  ;;  %1298 = vst [vmem:[#allocation3 + $0x150] sm:$0xf] %v9010_v53  ;;  %v10210_v6 = vld [vmem:[#allocation3 + $0x124] ss:$36 sps:$4 sm:$0xff]   ;;  %v860_v15 = vsel %vm839_vm1, %v807_v58, %v808_v41 }
  0x6b   : >> { %4046 = vmatmul.mubr.bf16.gmra.mxu1 %v10203_v24  ;;  %v457_v7 = vsel %vm438_vm0, %v406_v60, %v407_v61  ;;  %v458_v56 = vsel %vm438_vm0, %v405_v59, %v406_v60  ;;  %771 = vst [vmem:[#allocation3 + $0x1b4] sm:$0xf] %v9043_v62  ;;  %v10212_v12 = vld [vmem:[#allocation3 + $0x8] ss:$36 sps:$4 sm:$0xff]   ;;  %v10215_v13 = vld [vmem:[#allocation3 + $0x120] ss:$36 sps:$4 sm:$0xff]   ;;  %3957 = vmatprep.mubr.bf16.mxu0 %v10210_v6 }
  0x6c   : >> { %9701 = vmatpush3.bf16.msra.mxu1 %v10205_v0  ;;  %v10214_v63 = vld [vmem:[#allocation3 + $0xc] ss:$36 sps:$4 sm:$0xff]   ;;  %v9011_v0 = vpack.c.bf16 %v458_v56, %v458_v56  ;;  %v9012_v14 = vpack.c.bf16 %v457_v7, %v457_v7  ;;  %772 = vst [vmem:[#allocation3 + $0x1d8] sm:$0xf] %v9044_v4  ;;  %1459 = vst [vmem:[#allocation3 + $0x178] sm:$0xf] %v9043_v62  ;;  %v9074_v16 = vpack.c.bf16 %v860_v15, %v860_v15 }
  0x6d   : >> { %9702 = vmatprep.subr.bf16.mxu1 %v10206_v28  ;;  %1010 = vst [vmem:[#allocation3 + $0x170] sm:$0xf] %v9073_v9  ;;  %1697 = vst [vmem:[#allocation3 + $0x134] sm:$0xf] %v9073_v9  ;;  %4086 = vmatprep.mubr.bf16.mxu1 %v10214_v63  ;;  %v10233_v18 = vld [vmem:[%s10860_s7 + $0x1b0] sm:$0xff]   ;;  %v810_v17 = vrot.slane %v11102_v57, 1 }
  0x6e   : >> { %611 = vst [vmem:[#allocation3 + $0x1b0] sm:$0xf] %v9011_v0  ;;  %612 = vst [vmem:[#allocation3 + $0x1d4] sm:$0xf] %v9012_v14  ;;  %v10234_v19 = vld [vmem:[%s10860_s7 + $0x158] sm:$0xff]   ;;  %v360_v21 = vld [vmem:[#allocation2 + $0x1a0] sm:$0xff] }
  0x6f   : >> { %1299 = vst [vmem:[#allocation3 + $0x174] sm:$0xf] %v9011_v0  ;;  %1300 = vst [vmem:[#allocation3 + $0x198] sm:$0xf] %v9012_v14  ;;  %v10235_v20 = vld [vmem:[%s10860_s7 + $0x118] sm:$0xff]   ;;  %v859_v22 = vsel %vm839_vm1, %v809_v10, %v810_v17  ;;  %9808 = vmatprep.subr.bf16.mxu0 %v10234_v19  ;;  %v408_v24 = vrot.slane %v360_v21, 7 }
  0x70   : >> { %9703 = vmatpush3.bf16.msra.mxu1 %v10208_v38  ;;  %1460 = vst [vmem:[#allocation3 + $0x19c] sm:$0xf] %v9044_v4  ;;  %1011 = vst [vmem:[#allocation3 + $0x194] sm:$0xf] %v9074_v16  ;;  %v10218_v23 = vld [vmem:[#allocation3 + $0x16c] ss:$36 sps:$4 sm:$0xff]   ;;  %v9075_v26 = vpack.c.bf16 %v859_v22, %v859_v22  ;;  %9809 = vmatpush3.bf16.msra.mxu0 %v10235_v20 }
  0x71   : >> { %9912 = vmatprep.subr.bf16.mxu1 %v10216_v44  ;;  %1698 = vst [vmem:[#allocation3 + $0x158] sm:$0xf] %v9074_v16  ;;  %v811_v25 = vrot.slane %v360_v21, 1  ;;  %v10222_v27 = vld [vmem:[#allocation3 + $0x168] ss:$36 sps:$4 sm:$0xff]   ;;  %v363_v36 = vld [vmem:[#allocation2 + $0xe8] sm:$0xff] }
  0x72   : >> { %3958 = vmatmul.mubr.bf16.gmra.mxu0 %v10215_v13  ;;  %v361_v28 = vld [vmem:[#allocation2 + $0x158] sm:$0xff]  ;;  %v10223_v30 = vld [vmem:[#allocation3 + $0x50] ss:$36 sps:$4 sm:$0xff]   ;;  %1012 = vst [vmem:[#allocation3 + $0x1b8] sm:$0xf] %v9075_v26  ;;  %v411_v44 = vrot.slane %v363_v36, 7 }
  0x73   : >> { %4087 = vmatmul.mubr.bf16.vlgmr.msra.gmra.mxu1 %v10212_v12  ;;  %v362_v29 = vld [vmem:[#allocation2 + $0x98] sm:$0xff]  ;;  %3965 = vmatprep.mubr.bf16.mxu0 %v10218_v23  ;;  %v409_v32 = vrot.slane %v361_v28, 7  ;;  %v9045_v33 = vpack.c.bf16 %v361_v28, %v361_v28  ;;  %1699 = vst [vmem:[#allocation3 + $0x17c] sm:$0xf] %v9075_v26  ;;  %v10228_v35 = vld [vmem:[#allocation3 + $0x9c] ss:$36 sps:$4 sm:$0xff]   ;;  %v858_v38 = vsel %vm839_vm1, %v810_v17, %v811_v25 }
  0x74   : >> { %9913 = vmatpush3.bf16.msra.mxu1 %v10217_v2  ;;  %4094 = vmatprep.mubr.bf16.mxu1 %v10220_v3  ;;  %v410_v31 = vrot.slane %v362_v29, 7  ;;  %v9046_v34 = vpack.c.bf16 %v362_v29, %v362_v29  ;;  %v11124_v37 = vld [vmem:[#allocation2 + $0x80] sm:$0xff]  ;;  %v812_v39 = vrot.slane %v361_v28, 1  ;;  %v813_v40 = vrot.slane %v362_v29, 1  ;;  %v11133_v48 = vld [vmem:[#allocation2 + $0xa8] sm:$0xff]  ;;  %v10248_v58 = vld [vmem:[%s10860_s7 + $0x150] sm:$0xff]  }
  0x75   : >> { %9914 = vmatprep.subr.bf16.mxu1 %v10232_v8  ;;  %v10226_v42 = vld [vmem:[#allocation3 + $0x1b4] ss:$36 sps:$4 sm:$0xff]   ;;  %v456_v11 = vsel %vm438_vm0, %v408_v24, %v409_v32  ;;  %773 = vst [vmem:[#allocation3 + $0x1fc] sm:$0xf] %v9045_v33  ;;  %v412_v45 = vrot.slane %v11124_v37, 7  ;;  %v9047_v49 = vpack.c.bf16 %v11124_v37, %v11124_v37  ;;  %v9076_v50 = vpack.c.bf16 %v858_v38, %v858_v38  ;;  %v10250_v5 = vld [vmem:[%s10860_s7 + $0x110] sm:$0xff]  }
  0x76   : >> { %v455_v43 = vsel %vm438_vm0, %v409_v32, %v410_v31  ;;  %774 = vst [vmem:[#allocation3 + $0x220] sm:$0xf] %v9046_v34  ;;  %v9013_v46 = vpack.c.bf16 %v456_v11, %v456_v11  ;;  %1461 = vst [vmem:[#allocation3 + $0x1c0] sm:$0xf] %v9045_v33  ;;  %v413_v51 = vrot.slane %v11133_v48, 7  ;;  %v9048_v53 = vpack.c.bf16 %v11133_v48, %v11133_v48  ;;  %v10249_v2 = vld [vmem:[%s10860_s7 + $0x1e8] sm:$0xff]  }
  0x77   : >> { %v9014_v47 = vpack.c.bf16 %v455_v43, %v455_v43  ;;  %v454_v52 = vsel %vm438_vm0, %v411_v44, %v412_v45  ;;  %v857_v54 = vsel %vm839_vm1, %v812_v39, %v813_v40  ;;  %v10230_v55 = vld [vmem:[#allocation3 + $0x1b0] ss:$36 sps:$4 sm:$0xff]   ;;  %775 = vst [vmem:[#allocation3 + $0x244] sm:$0xf] %v9047_v49  ;;  %1013 = vst [vmem:[#allocation3 + $0x1dc] sm:$0xf] %v9076_v50  ;;  %9810 = vmatprep.subr.bf16.mxu0 %v10248_v58 }
  0x78   : >> { %9915 = vmatpush3.bf16.msra.mxu1 %v10233_v18  ;;  %613 = vst [vmem:[#allocation3 + $0x1f8] sm:$0xf] %v9013_v46  ;;  %v9015_v57 = vpack.c.bf16 %v454_v52, %v454_v52  ;;  %1301 = vst [vmem:[#allocation3 + $0x1bc] sm:$0xf] %v9013_v46  ;;  %v814_v59 = vrot.slane %v363_v36, 1  ;;  %v9077_v60 = vpack.c.bf16 %v857_v54, %v857_v54  ;;  %v815_v3 = vrot.slane %v11124_v37, 1 }
  0x79   : >> { %614 = vst [vmem:[#allocation3 + $0x21c] sm:$0xf] %v9014_v47  ;;  %1302 = vst [vmem:[#allocation3 + $0x1e0] sm:$0xf] %v9014_v47  ;;  %v10231_v61 = vld [vmem:[#allocation3 + $0x98] ss:$36 sps:$4 sm:$0xff]   ;;  %v453_v62 = vsel %vm438_vm0, %v412_v45, %v413_v51  ;;  %9916 = vmatprep.subr.bf16.mxu1 %v10249_v2  ;;  %9811 = vmatpush3.bf16.msra.mxu0 %v10250_v5 }
  0x7a   : >> { %3966 = vmatmul.mubr.bf16.gmra.mxu0 %v10222_v27  ;;  %1700 = vst [vmem:[#allocation3 + $0x1a0] sm:$0xf] %v9076_v50  ;;  %776 = vst [vmem:[#allocation3 + $0x268] sm:$0xf] %v9048_v53  ;;  %v10238_v4 = vld [vmem:[#allocation3 + $0xe4] ss:$36 sps:$4 sm:$0xff]   ;;  %v9016_v41 = vpack.c.bf16 %v453_v62, %v453_v62  ;;  %v856_v6 = vsel %vm839_vm1, %v813_v40, %v814_v59 }
  0x7b   : >> { %4095 = vmatmul.mubr.bf16.gmra.mxu1 %v10223_v30  ;;  %3973 = vmatprep.mubr.bf16.mxu0 %v10226_v42  ;;  %615 = vst [vmem:[#allocation3 + $0x240] sm:$0xf] %v9015_v57  ;;  %1014 = vst [vmem:[#allocation3 + $0x200] sm:$0xf] %v9077_v60  ;;  %v816_v7 = vrot.slane %v11133_v48, 1  ;;  %v10251_v56 = vld [vmem:[%s10860_s7 + $0x1a8] sm:$0xff]   ;;  %v9078_v8 = vpack.c.bf16 %v856_v6, %v856_v6 }
  0x7c   : >> { %4102 = vmatprep.mubr.bf16.mxu1 %v10228_v35  ;;  %1303 = vst [vmem:[#allocation3 + $0x204] sm:$0xf] %v9015_v57  ;;  %1462 = vst [vmem:[#allocation3 + $0x1e4] sm:$0xf] %v9046_v34  ;;  %v366_v9 = vld [vmem:[#allocation2 + $0x28] sm:$0xff]  ;;  %v367_v10 = vld [vmem:[#allocation2] sm:$0xff]  ;;  %9917 = vmatpush3.bf16.msra.mxu1 %v10251_v56 }
  0x7d   : >> { %1701 = vst [vmem:[#allocation3 + $0x1c4] sm:$0xf] %v9077_v60  ;;  %1463 = vst [vmem:[#allocation3 + $0x208] sm:$0xf] %v9047_v49  ;;  %v11154_v12 = vld [vmem:[#allocation2 + $0x168] sm:$0xff]  ;;  %v855_v63 = vsel %vm839_vm1, %v815_v3, %v816_v7  ;;  %v414_v13 = vrot.slane %v366_v9, 7  ;;  %v9049_v15 = vpack.c.bf16 %v367_v10, %v367_v10 }
  0x7e   : >> { %1464 = vst [vmem:[#allocation3 + $0x22c] sm:$0xf] %v9048_v53  ;;  %616 = vst [vmem:[#allocation3 + $0x264] sm:$0xf] %v9016_v41  ;;  %v415_v0 = vrot.slane %v367_v10, 7  ;;  %v416_v14 = vrot.slane %v11154_v12, 7  ;;  %v9050_v18 = vpack.c.bf16 %v11154_v12, %v11154_v12  ;;  %v9079_v17 = vpack.c.bf16 %v855_v63, %v855_v63 }
  0x7f   : >> { %1304 = vst [vmem:[#allocation3 + $0x228] sm:$0xf] %v9016_v41  ;;  %v10258_v16 = vld [vmem:[%s10860_s7 + $0x148] sm:$0xff]   ;;  %1015 = vst [vmem:[#allocation3 + $0x224] sm:$0xf] %v9078_v8  ;;  %v817_v22 = vrot.slane %v366_v9, 1 }
  0x80   : >> { %1702 = vst [vmem:[#allocation3 + $0x1e8] sm:$0xf] %v9078_v8  ;;  %v10236_v19 = vld [vmem:[#allocation3 + $0x1fc] ss:$36 sps:$4 sm:$0xff]   ;;  %v451_v20 = vsel %vm438_vm0, %v415_v0, %v416_v14  ;;  %v452_v21 = vsel %vm438_vm0, %v414_v13, %v415_v0  ;;  %777 = vst [vmem:[#allocation3 + $0x28c] sm:$0xf] %v9049_v15  ;;  %9812 = vmatprep.subr.bf16.mxu0 %v10258_v16 }
  0x81   : >> { %v818_v23 = vrot.slane %v367_v10, 1  ;;  %v10240_v24 = vld [vmem:[#allocation3 + $0x1f8] ss:$36 sps:$4 sm:$0xff]   ;;  %v9017_v25 = vpack.c.bf16 %v452_v21, %v452_v21  ;;  %v9018_v26 = vpack.c.bf16 %v451_v20, %v451_v20  ;;  %778 = vst [vmem:[#allocation3 + $0x2b0] sm:$0xf] %v9050_v18  ;;  %v854_v28 = vsel %vm839_vm1, %v816_v7, %v817_v22  ;;  %v369_v30 = vld [vmem:[#allocation2 + $0xb8] sm:$0xff] }
  0x82   : >> { %3974 = vmatmul.mubr.bf16.gmra.mxu0 %v10230_v55  ;;  %1016 = vst [vmem:[#allocation3 + $0x248] sm:$0xf] %v9079_v17  ;;  %1703 = vst [vmem:[#allocation3 + $0x20c] sm:$0xf] %v9079_v17  ;;  %v10259_v27 = vld [vmem:[%s10860_s7 + $0x108] sm:$0xff]   ;;  %v819_v29 = vrot.slane %v11154_v12, 1  ;;  %v9080_v33 = vpack.c.bf16 %v854_v28, %v854_v28 }
  0x83   : >> { %4103 = vmatmul.mubr.bf16.gmra.mxu1 %v10231_v61  ;;  %1465 = vst [vmem:[#allocation3 + $0x250] sm:$0xf] %v9049_v15  ;;  %1466 = vst [vmem:[#allocation3 + $0x274] sm:$0xf] %v9050_v18  ;;  %3981 = vmatprep.mubr.bf16.mxu0 %v10236_v19  ;;  %v11170_v32 = vld [vmem:[#allocation2 + $0x1a8] sm:$0xff]  ;;  %v11172_v31 = vld [vmem:[#allocation2 + $0x140] sm:$0xff] }
  0x84   : >> { %4110 = vmatprep.mubr.bf16.mxu1 %v10238_v4  ;;  %617 = vst [vmem:[#allocation3 + $0x288] sm:$0xf] %v9017_v25  ;;  %618 = vst [vmem:[#allocation3 + $0x2ac] sm:$0xf] %v9018_v26  ;;  %v10241_v34 = vld [vmem:[#allocation3 + $0xe0] ss:$36 sps:$4 sm:$0xff]   ;;  %9813 = vmatpush3.bf16.msra.mxu0 %v10259_v27  ;;  %v9051_v37 = vpack.c.bf16 %v11170_v32, %v11170_v32  ;;  %v9052_v38 = vpack.c.bf16 %v11172_v31, %v11172_v31 }
  0x85   : >> { %1305 = vst [vmem:[#allocation3 + $0x24c] sm:$0xf] %v9017_v25  ;;  %1306 = vst [vmem:[#allocation3 + $0x270] sm:$0xf] %v9018_v26  ;;  %v10242_v35 = vld [vmem:[#allocation3 + $0x244] ss:$36 sps:$4 sm:$0xff]   ;;  %v853_v39 = vsel %vm839_vm1, %v818_v23, %v819_v29 }
  0x86   : >> { %v417_v36 = vrot.slane %v369_v30, 7  ;;  %v10244_v40 = vld [vmem:[#allocation3 + $0x12c] ss:$36 sps:$4 sm:$0xff]   ;;  %v418_v42 = vrot.slane %v11170_v32, 7  ;;  %v419_v43 = vrot.slane %v11172_v31, 7  ;;  %v9081_v11 = vpack.c.bf16 %v853_v39, %v853_v39  ;;  %v372_v53 = vld [vmem:[#allocation2 + $0x50] sm:$0xff] }
  0x87   : >> { %1017 = vst [vmem:[#allocation3 + $0x26c] sm:$0xf] %v9080_v33  ;;  %1704 = vst [vmem:[#allocation3 + $0x230] sm:$0xf] %v9080_v33  ;;  %v11182_v44 = vld [vmem:[#allocation2 + $0x198] sm:$0xff]  ;;  %v10266_v48 = vld [vmem:[%s10860_s7 + $0x1e0] sm:$0xff]  }
  0x88   : >> { %v826_v45 = vrot.slane %v11182_v44, 1  ;;  %779 = vst [vmem:[#allocation3 + $0x2d4] sm:$0xf] %v9051_v37  ;;  %780 = vst [vmem:[#allocation3 + $0x2f8] sm:$0xf] %v9052_v38  ;;  %v449_v46 = vsel %vm438_vm0, %v418_v42, %v419_v43  ;;  %v450_v47 = vsel %vm438_vm0, %v417_v36, %v418_v42  ;;  %v820_v49 = vrot.slane %v369_v30, 1  ;;  %9918 = vmatprep.subr.bf16.mxu1 %v10266_v48 }
  0x89   : >> { %1018 = vst [vmem:[#allocation3 + $0x290] sm:$0xf] %v9081_v11  ;;  %1705 = vst [vmem:[#allocation3 + $0x254] sm:$0xf] %v9081_v11  ;;  %v9019_v50 = vpack.c.bf16 %v450_v47, %v450_v47  ;;  %v9020_v51 = vpack.c.bf16 %v449_v46, %v449_v46  ;;  %v10267_v52 = vld [vmem:[%s10860_s7 + $0x1a0] sm:$0xff]   ;;  %v821_v55 = vrot.slane %v11170_v32, 1 }
  0x8a   : >> { %3982 = vmatmul.mubr.bf16.gmra.mxu0 %v10240_v24  ;;  %1467 = vst [vmem:[#allocation3 + $0x298] sm:$0xf] %v9051_v37  ;;  %v373_v54 = vld [vmem:[#allocation2 + $0xa0] sm:$0xff]  ;;  %v822_v57 = vrot.slane %v11172_v31, 1  ;;  %1468 = vst [vmem:[#allocation3 + $0x2bc] sm:$0xf] %v9052_v38  ;;  %v852_v62 = vsel %vm839_vm1, %v819_v29, %v820_v49  ;;  %9919 = vmatpush3.bf16.msra.mxu1 %v10267_v52 }
  0x8b   : >> { %4111 = vmatmul.mubr.bf16.gmra.mxu1 %v10241_v34  ;;  %3989 = vmatprep.mubr.bf16.mxu0 %v10242_v35  ;;  %v374_v58 = vld [vmem:[#allocation2 + $0x170] sm:$0xff]  ;;  %v420_v59 = vrot.slane %v372_v53, 7  ;;  %v421_v60 = vrot.slane %v373_v54, 7  ;;  %v9053_v61 = vpack.c.bf16 %v373_v54, %v373_v54  ;;  %v10247_v2 = vld [vmem:[#allocation3 + $0x128] ss:$36 sps:$4 sm:$0xff]   ;;  %v9082_v41 = vpack.c.bf16 %v852_v62, %v852_v62  ;;  %v10274_v63 = vld [vmem:[%s10860_s7 + $0x140] sm:$0xff]  }
  0x8c   : >> { %4118 = vmatprep.mubr.bf16.mxu1 %v10244_v40  ;;  %619 = vst [vmem:[#allocation3 + $0x2d0] sm:$0xf] %v9019_v50  ;;  %620 = vst [vmem:[#allocation3 + $0x2f4] sm:$0xf] %v9020_v51  ;;  %v422_v3 = vrot.slane %v374_v58, 7  ;;  %v9054_v4 = vpack.c.bf16 %v374_v58, %v374_v58  ;;  %v823_v5 = vrot.slane %v372_v53, 1  ;;  %v851_v9 = vsel %vm839_vm1, %v821_v55, %v822_v57 }
  0x8d   : >> { %1307 = vst [vmem:[#allocation3 + $0x294] sm:$0xf] %v9019_v50  ;;  %1308 = vst [vmem:[#allocation3 + $0x2b8] sm:$0xf] %v9020_v51  ;;  %v10246_v6 = vld [vmem:[#allocation3 + $0x240] ss:$36 sps:$4 sm:$0xff]   ;;  %v448_v8 = vsel %vm438_vm0, %v420_v59, %v421_v60  ;;  %v9083_v0 = vpack.c.bf16 %v851_v9, %v851_v9  ;;  %9814 = vmatprep.subr.bf16.mxu0 %v10274_v63 }
  0x8e   : >> { %v10252_v7 = vld [vmem:[#allocation3 + $0x28c] ss:$36 sps:$4 sm:$0xff]   ;;  %v10254_v56 = vld [vmem:[#allocation3 + $0x174] ss:$36 sps:$4 sm:$0xff]   ;;  %781 = vst [vmem:[#allocation3 + $0x31c] sm:$0xf] %v9053_v61  ;;  %v447_v10 = vsel %vm438_vm0, %v421_v60, %v422_v3  ;;  %v9021_v12 = vpack.c.bf16 %v448_v8, %v448_v8  ;;  %v850_v13 = vsel %vm839_vm1, %v822_v57, %v823_v5 }
  0x8f   : >> { %782 = vst [vmem:[#allocation3 + $0x340] sm:$0xf] %v9054_v4  ;;  %1019 = vst [vmem:[#allocation3 + $0x2b4] sm:$0xf] %v9082_v41  ;;  %v9022_v14 = vpack.c.bf16 %v447_v10, %v447_v10  ;;  %v10275_v15 = vld [vmem:[%s10860_s7 + $0x100] sm:$0xff]   ;;  %v9084_v16 = vpack.c.bf16 %v850_v13, %v850_v13  ;;  %v824_v18 = vrot.slane %v373_v54, 1 }
  0x90   : >> { %1706 = vst [vmem:[#allocation3 + $0x278] sm:$0xf] %v9082_v41  ;;  %1469 = vst [vmem:[#allocation3 + $0x2e0] sm:$0xf] %v9053_v61  ;;  %v825_v17 = vrot.slane %v374_v58, 1  ;;  %9815 = vmatpush3.bf16.msra.mxu0 %v10275_v15  ;;  %v10282_v26 = vld [vmem:[%s10860_s7 + $0x1d8] sm:$0xff]  }
  0x91   : >> { %1470 = vst [vmem:[#allocation3 + $0x304] sm:$0xf] %v9054_v4  ;;  %621 = vst [vmem:[#allocation3 + $0x318] sm:$0xf] %v9021_v12  ;;  %v10256_v21 = vld [vmem:[#allocation3 + $0x288] ss:$36 sps:$4 sm:$0xff]   ;;  %9920 = vmatprep.subr.bf16.mxu1 %v10282_v26 }
  0x92   : >> { %1020 = vst [vmem:[#allocation3 + $0x2d8] sm:$0xf] %v9083_v0  ;;  %1309 = vst [vmem:[#allocation3 + $0x2dc] sm:$0xf] %v9021_v12  ;;  %3990 = vmatmul.mubr.bf16.gmra.mxu0 %v10246_v6  ;;  %v848_v19 = vsel %vm839_vm1, %v825_v17, %v826_v45  ;;  %v849_v20 = vsel %vm839_vm1, %v824_v18, %v825_v17  ;;  %v10257_v24 = vld [vmem:[#allocation3 + $0x170] ss:$36 sps:$4 sm:$0xff]  }
  0x93   : >> { %1707 = vst [vmem:[#allocation3 + $0x29c] sm:$0xf] %v9083_v0  ;;  %622 = vst [vmem:[#allocation3 + $0x33c] sm:$0xf] %v9022_v14  ;;  %4119 = vmatmul.mubr.bf16.gmra.mxu1 %v10247_v2  ;;  %3997 = vmatprep.mubr.bf16.mxu0 %v10252_v7  ;;  %v9085_v22 = vpack.c.bf16 %v849_v20, %v849_v20  ;;  %v9086_v23 = vpack.c.bf16 %v848_v19, %v848_v19  ;;  %v10260_v25 = vld [vmem:[#allocation3 + $0x2d4] ss:$36 sps:$4 sm:$0xff]  }
  0x94   : >> { %1021 = vst [vmem:[#allocation3 + $0x2fc] sm:$0xf] %v9084_v16  ;;  %1310 = vst [vmem:[#allocation3 + $0x300] sm:$0xf] %v9022_v14  ;;  %4126 = vmatprep.mubr.bf16.mxu1 %v10254_v56  ;;  %v10262_v27 = vld [vmem:[#allocation3 + $0x1bc] ss:$36 sps:$4 sm:$0xff]  }
  0x95   : >> { %1708 = vst [vmem:[#allocation3 + $0x2c0] sm:$0xf] %v9084_v16  ;;  %v10283_v28 = vld [vmem:[%s10860_s7 + $0x198] sm:$0xff]   ;;  %1022 = vst [vmem:[#allocation3 + $0x320] sm:$0xf] %v9085_v22  ;;  %v10297_v34 = vld [vmem:[%s10860_s7 + $0x1d0] sm:$0xff]  }
  0x96   : >> { %1023 = vst [vmem:[#allocation3 + $0x344] sm:$0xf] %v9086_v23  ;;  %1709 = vst [vmem:[#allocation3 + $0x2e4] sm:$0xf] %v9085_v22  ;;  %v11214_v29 = vld [vmem:[%s10860_s7 + $0x238] sm:$0xff]   ;;  %9921 = vmatpush3.bf16.msra.mxu1 %v10283_v28  ;;  %v10298_v35 = vld [vmem:[%s10860_s7 + $0x190] sm:$0xff]  }
  0x97   : >> { %10066 = vmatprep.subr.bf16.mxu0 %v11214_v29  ;;  %v10265_v30 = vld [vmem:[#allocation3 + $0x1b8] ss:$36 sps:$4 sm:$0xff]   ;;  %v10264_v32 = vld [vmem:[#allocation3 + $0x2d0] ss:$36 sps:$4 sm:$0xff]   ;;  %v10270_v33 = vld [vmem:[#allocation3 + $0x204] ss:$36 sps:$4 sm:$0xff]   ;;  %9922 = vmatprep.subr.bf16.mxu1 %v10297_v34 }
  0x98   : >> { %v10268_v31 = vld [vmem:[#allocation3 + $0x31c] ss:$36 sps:$4 sm:$0xff]   ;;  %v1065_v36 = vld [vmem:[#allocation2 + $0x198] sm:$0xff]  ;;  %v1066_v37 = vld [vmem:[#allocation2 + $0xc0] sm:$0xff] }
  0x99   : >> { %v1067_v38 = vld [vmem:[#allocation2 + $0x190] sm:$0xff]  ;;  %v1113_v39 = vrot.slane %v1065_v36, 7  ;;  %v1513_v40 = vrot.slane %v1065_v36, 1  ;;  %v1114_v42 = vrot.slane %v1066_v37, 7  ;;  %v1068_v11 = vld [vmem:[#allocation2 + $0xc8] sm:$0xff]  ;;  %v9149_v44 = vpack.c.bf16 %v1066_v37, %v1066_v37  ;;  %v11236_v12 = vld [vmem:[#allocation2 + $0xf8] sm:$0xff] }
  0x9a   : >> { %3998 = vmatmul.mubr.bf16.gmra.mxu0 %v10256_v21  ;;  %9923 = vmatpush3.bf16.msra.mxu1 %v10298_v35  ;;  %v1115_v43 = vrot.slane %v1067_v38, 7  ;;  %v9150_v45 = vpack.c.bf16 %v1067_v38, %v1067_v38  ;;  %v1069_v46 = vld [vmem:[#allocation2 + $0xf0] sm:$0xff]  ;;  %v1116_v48 = vrot.slane %v1068_v11, 7  ;;  %v1514_v50 = vrot.slane %v1066_v37, 1  ;;  %v10280_v52 = vld [vmem:[#allocation3 + $0x14] ss:$36 sps:$4 sm:$0xff]  }
  0x9b   : >> { %4127 = vmatmul.mubr.bf16.gmra.mxu1 %v10257_v24  ;;  %4005 = vmatprep.mubr.bf16.mxu0 %v10260_v25  ;;  %v11219_v47 = vld [vmem:[#allocation2 + $0x150] sm:$0xff]  ;;  %v1539_v49 = vsel %vm839_vm1, %v825_v17, %v1513_v40  ;;  %v1138_v54 = vsel %vm438_vm0, %v1113_v39, %v1114_v42  ;;  %v1117_v55 = vrot.slane %v1069_v46, 7  ;;  %1471 = vst [vmem:[#allocation3 + $0x328] sm:$0xf] %v9149_v44  ;;  %v10272_v58 = vld [vmem:[#allocation3 + $0x318] ss:$36 sps:$4 sm:$0xff]  }
  0x9c   : >> { %4134 = vmatprep.mubr.bf16.mxu1 %v10262_v27  ;;  %v10273_v51 = vld [vmem:[#allocation3 + $0x200] ss:$36 sps:$4 sm:$0xff]   ;;  %v1137_v53 = vsel %vm438_vm0, %v1114_v42, %v1115_v43  ;;  %v1118_v57 = vrot.slane %v11219_v47, 7  ;;  %1472 = vst [vmem:[#allocation3 + $0x34c] sm:$0xf] %v9150_v45  ;;  %v9117_v60 = vpack.c.bf16 %v1138_v54, %v1138_v54  ;;  %v9180_v62 = vpack.c.bf16 %v1539_v49, %v1539_v49  ;;  %v10312_v41 = vld [vmem:[%s10860_s7 + $0x1c8] sm:$0xff]  }
  0x9d   : >> { %v10276_v59 = vld [vmem:[#allocation3 + $0x24c] ss:$36 sps:$4 sm:$0xff]   ;;  %v9118_v61 = vpack.c.bf16 %v1137_v53, %v1137_v53  ;;  %v9151_v2 = vpack.c.bf16 %v1069_v46, %v1069_v46  ;;  %v1136_v4 = vsel %vm438_vm0, %v1116_v48, %v1117_v55  ;;  %v1515_v5 = vrot.slane %v1067_v38, 1  ;;  %v10313_v8 = vld [vmem:[%s10860_s7 + $0x188] sm:$0xff]   ;;  %9924 = vmatprep.subr.bf16.mxu1 %v10312_v41  ;;  %v1071_v10 = vld [vmem:[#allocation2 + $0x30] sm:$0xff] }
  0x9e   : >> { %v1135_v3 = vsel %vm438_vm0, %v1117_v55, %v1118_v57  ;;  %v9152_v6 = vpack.c.bf16 %v11219_v47, %v11219_v47  ;;  %1311 = vst [vmem:[#allocation3 + $0x324] sm:$0xf] %v9117_v60  ;;  %v9119_v7 = vpack.c.bf16 %v1136_v4, %v1136_v4  ;;  %1710 = vst [vmem:[#allocation3 + $0x308] sm:$0xf] %v9180_v62  ;;  %v1516_v9 = vrot.slane %v1068_v11, 1  ;;  %v11241_v14 = vld [vmem:[#allocation2 + $0x18] sm:$0xff] }
  0x9f   : >> { %1312 = vst [vmem:[#allocation3 + $0x348] sm:$0xf] %v9118_v61  ;;  %v9120_v56 = vpack.c.bf16 %v1135_v3, %v1135_v3  ;;  %1473 = vst [vmem:[#allocation3 + $0x370] sm:$0xf] %v9151_v2  ;;  %v1538_v63 = vsel %vm839_vm1, %v1514_v50, %v1515_v5  ;;  %v1517_v13 = vrot.slane %v1069_v46, 1  ;;  %v1518_v0 = vrot.slane %v11219_v47, 1  ;;  %9925 = vmatpush3.bf16.msra.mxu1 %v10313_v8 }
  0xa0   : >> { %1474 = vst [vmem:[#allocation3 + $0x394] sm:$0xf] %v9152_v6  ;;  %1313 = vst [vmem:[#allocation3 + $0x36c] sm:$0xf] %v9119_v7  ;;  %v1119_v15 = vrot.slane %v1071_v10, 7  ;;  %v1120_v16 = vrot.slane %v11236_v12, 7  ;;  %v1537_v18 = vsel %vm839_vm1, %v1515_v5, %v1516_v9  ;;  %v9181_v17 = vpack.c.bf16 %v1538_v63, %v1538_v63 }
  0xa1   : >> { %1314 = vst [vmem:[#allocation3 + $0x390] sm:$0xf] %v9120_v56  ;;  %v1121_v19 = vrot.slane %v11241_v14, 7  ;;  %v1074_v20 = vld [vmem:[#allocation2 + $0x8] sm:$0xff]  ;;  %v9182_v21 = vpack.c.bf16 %v1537_v18, %v1537_v18  ;;  %v1536_v22 = vsel %vm839_vm1, %v1517_v13, %v1518_v0  ;;  %v9153_v23 = vpack.c.bf16 %v11236_v12, %v11236_v12  ;;  %v11253_v25 = vld [vmem:[#allocation2 + $0x60] sm:$0xff]  ;;  %v11255_v26 = vld [vmem:[#allocation2 + $0x70] sm:$0xff] }
  0xa2   : >> { %4006 = vmatmul.mubr.bf16.gmra.mxu0 %v10264_v32  ;;  %v1134_v24 = vsel %vm438_vm0, %v1119_v15, %v1120_v16  ;;  %v1122_v27 = vrot.slane %v1074_v20, 7  ;;  %1711 = vst [vmem:[#allocation3 + $0x32c] sm:$0xf] %v9181_v17  ;;  %v1519_v28 = vrot.slane %v1071_v10, 1  ;;  %v10278_v32 = vld [vmem:[#allocation3 + $0x10] ss:$36 sps:$4 sm:$0xff]   ;;  %v9154_v40 = vpack.c.bf16 %v11241_v14, %v11241_v14 }
  0xa3   : >> { %4135 = vmatmul.mubr.bf16.gmra.mxu1 %v10265_v30  ;;  %4013 = vmatprep.mubr.bf16.mxu0 %v10268_v31  ;;  %v9183_v30 = vpack.c.bf16 %v1536_v22, %v1536_v22  ;;  %v1133_v31 = vsel %vm438_vm0, %v1120_v16, %v1121_v19  ;;  %v1123_v34 = vrot.slane %v11253_v25, 7  ;;  %v1124_v35 = vrot.slane %v11255_v26, 7  ;;  %v10327_v36 = vld [vmem:[%s10860_s7 + $0x1c0] sm:$0xff]   ;;  %1712 = vst [vmem:[#allocation3 + $0x350] sm:$0xf] %v9182_v21  ;;  %v11281_v57 = vld [vmem:[%s10860_s7 + $0x228] sm:$0xff]  }
  0xa4   : >> { %4142 = vmatprep.mubr.bf16.mxu1 %v10270_v33  ;;  %v9121_v33 = vpack.c.bf16 %v1134_v24, %v1134_v24  ;;  %1475 = vst [vmem:[#allocation3 + $0x3b8] sm:$0xf] %v9153_v23  ;;  %v10281_v37 = vld [vmem:[#allocation3 + $0x248] ss:$36 sps:$4 sm:$0xff]   ;;  %v9122_v38 = vpack.c.bf16 %v1133_v31, %v1133_v31  ;;  %v1535_v39 = vsel %vm839_vm1, %v1518_v0, %v1519_v28  ;;  %v10285_v43 = vld [vmem:[#allocation3 + $0x294] ss:$36 sps:$4 sm:$0xff]  }
  0xa5   : >> { %1713 = vst [vmem:[#allocation3 + $0x374] sm:$0xf] %v9183_v30  ;;  %v9155_v42 = vpack.c.bf16 %v11253_v25, %v11253_v25  ;;  %v1131_v11 = vsel %vm438_vm0, %v1123_v34, %v1124_v35  ;;  %v1132_v44 = vsel %vm438_vm0, %v1122_v27, %v1123_v34  ;;  %9926 = vmatprep.subr.bf16.mxu1 %v10327_v36  ;;  %v1520_v46 = vrot.slane %v11236_v12, 1  ;;  %v10287_v47 = vld [vmem:[#allocation3 + $0x5c] ss:$36 sps:$4 sm:$0xff]   ;;  %v10328_v54 = vld [vmem:[%s10860_s7 + $0x180] sm:$0xff]  }
  0xa6   : >> { %1315 = vst [vmem:[#allocation3 + $0x3b4] sm:$0xf] %v9121_v33  ;;  %v9184_v45 = vpack.c.bf16 %v1535_v39, %v1535_v39  ;;  %1316 = vst [vmem:[#allocation3 + $0x3d8] sm:$0xf] %v9122_v38  ;;  %v9123_v48 = vpack.c.bf16 %v1132_v44, %v1132_v44  ;;  %v9124_v49 = vpack.c.bf16 %v1131_v11, %v1131_v11  ;;  %v1522_v53 = vrot.slane %v1074_v20, 1  ;;  %v10429_v62 = vld [vmem:[#allocation2 + $0x88] sm:$0xff] }
  0xa7   : >> { %1476 = vst [vmem:[#allocation3 + $0x3dc] sm:$0xf] %v9154_v40  ;;  %v9156_v50 = vpack.c.bf16 %v11255_v26, %v11255_v26  ;;  %1477 = vst [vmem:[#allocation3 + $0x400] sm:$0xf] %v9155_v42  ;;  %v1523_v55 = vrot.slane %v11253_v25, 1  ;;  %v1524_v61 = vrot.slane %v11255_v26, 1  ;;  %9927 = vmatpush3.bf16.msra.mxu1 %v10328_v54 }
  0xa8   : >> { %1714 = vst [vmem:[#allocation3 + $0x398] sm:$0xf] %v9184_v45  ;;  %1317 = vst [vmem:[#allocation3 + $0x3fc] sm:$0xf] %v9123_v48  ;;  %v1528_v2 = vrot.slane %v10429_v62, 1  ;;  %v1078_v3 = vld [vmem:[#allocation2 + $0x38] sm:$0xff] }
  0xa9   : >> { %1318 = vst [vmem:[#allocation3 + $0x420] sm:$0xf] %v9124_v49  ;;  %1478 = vst [vmem:[#allocation3 + $0x424] sm:$0xf] %v9156_v50  ;;  %v1079_v4 = vld [vmem:[#allocation2 + $0x20] sm:$0xff]  ;;  %v1126_v7 = vrot.slane %v1078_v3, 7  ;;  %v1532_v8 = vsel %vm839_vm1, %v1523_v55, %v1524_v61  ;;  %v9157_v9 = vpack.c.bf16 %v1078_v3, %v1078_v3 }
  0xaa   : >> { %4014 = vmatmul.mubr.bf16.gmra.mxu0 %v10272_v58  ;;  %v1077_v58 = vld [vmem:[#allocation2 + $0x68] sm:$0xff]  ;;  %v1127_v56 = vrot.slane %v1079_v4, 7  ;;  %v9187_v63 = vpack.c.bf16 %v1532_v8, %v1532_v8  ;;  %v9158_v13 = vpack.c.bf16 %v1079_v4, %v1079_v4  ;;  %v1526_v0 = vrot.slane %v1078_v3, 1  ;;  %v10293_v15 = vld [vmem:[#allocation3 + $0xa4] ss:$36 sps:$4 sm:$0xff]   ;;  %v1722_v23 = vld [vmem:[#allocation2 + $0x40] sm:$0xff] }
  0xab   : >> { %4143 = vmatmul.mubr.bf16.gmra.mxu1 %v10273_v51  ;;  %4247 = vmatprep.mubr.bf16.mxu0 %v10280_v52  ;;  %v10299_v51 = vld [vmem:[%s10860_s7 + $0x230] sm:$0xff]   ;;  %v1521_v52 = vrot.slane %v11241_v14, 1  ;;  %v1125_v41 = vrot.slane %v1077_v58, 7  ;;  %v1525_v6 = vrot.slane %v1077_v58, 1  ;;  %v10290_v10 = vld [vmem:[#allocation3 + $0x58] ss:$36 sps:$4 sm:$0xff]   ;;  %v9223_v28 = vpack.c.bf16 %v1722_v23, %v1722_v23 }
  0xac   : >> { %4150 = vmatprep.mubr.bf16.mxu1 %v10276_v59  ;;  %v10289_v14 = vld [vmem:[#allocation3 + $0x290] ss:$36 sps:$4 sm:$0xff]   ;;  %v1129_v16 = vsel %vm438_vm0, %v1126_v7, %v1127_v56  ;;  %1479 = vst [vmem:[#allocation3 + $0x448] sm:$0xf] %v9157_v9  ;;  %v1527_v19 = vrot.slane %v1079_v4, 1  ;;  %v11297_v24 = vld [vmem:[#allocation2 + $0x178] sm:$0xff] }
  0xad   : >> { %v1533_v59 = vsel %vm839_vm1, %v1521_v52, %v1522_v53  ;;  %v1534_v60 = vsel %vm839_vm1, %v1520_v46, %v1521_v52  ;;  %v1531_v12 = vsel %vm839_vm1, %v1524_v61, %v1525_v6  ;;  %v1130_v18 = vsel %vm438_vm0, %v1125_v41, %v1126_v7  ;;  %v10291_v20 = vld [vmem:[#allocation3 + $0x2dc] ss:$36 sps:$4 sm:$0xff]   ;;  %1717 = vst [vmem:[#allocation3 + $0x404] sm:$0xf] %v9187_v63  ;;  %v10329_v25 = vld [vmem:[%s10860_s7 + $0x220] sm:$0xff]   ;;  %v10342_v44 = vld [vmem:[%s10860_s7 + $0x218] sm:$0xff]  }
  0xae   : >> { %v9185_v5 = vpack.c.bf16 %v1534_v60, %v1534_v60  ;;  %v9188_v17 = vpack.c.bf16 %v1531_v12, %v1531_v12  ;;  %v9125_v21 = vpack.c.bf16 %v1130_v18, %v1130_v18  ;;  %v9126_v22 = vpack.c.bf16 %v1129_v16, %v1129_v16  ;;  %1480 = vst [vmem:[#allocation3 + $0x46c] sm:$0xf] %v9158_v13  ;;  %v1724_v45 = vld [vmem:[#allocation2 + $0x108] sm:$0xff]  ;;  %v1725_v46 = vld [vmem:[#allocation2 + $0x110] sm:$0xff]  ;;  %v1727_v60 = vld [vmem:[#allocation2 + $0x118] sm:$0xff] }
  0xaf   : >> { %v1770_v26 = vrot.slane %v1722_v23, 7  ;;  %v1771_v27 = vrot.slane %v11297_v24, 7  ;;  %v9224_v30 = vpack.c.bf16 %v11297_v24, %v11297_v24  ;;  %v1529_v31 = vsel %vm839_vm1, %v1527_v19, %v1528_v2  ;;  %2138 = vst [vmem:[#allocation3 + $0x1c] sm:$0xf] %v9223_v28  ;;  %v1726_v49 = vld [vmem:[#allocation2 + $0x90] sm:$0xff]  ;;  %v11319_v61 = vld [vmem:[#allocation2 + $0x148] sm:$0xff] }
  0xb0   : >> { %1715 = vst [vmem:[#allocation3 + $0x3bc] sm:$0xf] %v9185_v5  ;;  %1718 = vst [vmem:[#allocation3 + $0x428] sm:$0xf] %v9188_v17  ;;  %v1530_v33 = vsel %vm839_vm1, %v1526_v0, %v1527_v19  ;;  %v9190_v39 = vpack.c.bf16 %v1529_v31, %v1529_v31  ;;  %v2170_v40 = vrot.slane %v1722_v23, 1  ;;  %v2171_v42 = vrot.slane %v11297_v24, 1 }
  0xb1   : >> { %1319 = vst [vmem:[#allocation3 + $0x444] sm:$0xf] %v9125_v21  ;;  %1320 = vst [vmem:[#allocation3 + $0x468] sm:$0xf] %v9126_v22  ;;  %v1848_v35 = vsel %vm438_vm0, %v1770_v26, %v1771_v27  ;;  %v9189_v36 = vpack.c.bf16 %v1530_v33, %v1530_v33  ;;  %v1772_v50 = vrot.slane %v1724_v45, 7  ;;  %v9225_v52 = vpack.c.bf16 %v1725_v46, %v1725_v46  ;;  %v11321_v62 = vld [vmem:[#allocation2 + $0x100] sm:$0xff] }
  0xb2   : >> { %4248 = vmatmul.mubr.bf16.vlgmr.msra.gmra.mxu0 %v10278_v32  ;;  %v11303_v32 = vld [vmem:[#allocation2 + $0x188] sm:$0xff]  ;;  %2139 = vst [vmem:[#allocation3 + $0x40] sm:$0xf] %v9224_v30  ;;  %v9192_v38 = vpack.c.bf16 %v1848_v35, %v1848_v35  ;;  %1720 = vst [vmem:[#allocation3 + $0x470] sm:$0xf] %v9190_v39  ;;  %v1774_v54 = vrot.slane %v1726_v49, 7  ;;  %v9226_v55 = vpack.c.bf16 %v1726_v49, %v1726_v49 }
  0xb3   : >> { %4151 = vmatmul.mubr.bf16.gmra.mxu1 %v10281_v37  ;;  %10067 = vmatpush3.bf16.msra.mxu0 %v11214_v29  ;;  %v9186_v29 = vpack.c.bf16 %v1533_v59, %v1533_v59  ;;  %v1817_v34 = vrot.slane %v11303_v32, 7  ;;  %v10296_v37 = vld [vmem:[#allocation3 + $0xa0] ss:$36 sps:$4 sm:$0xff]   ;;  %1719 = vst [vmem:[#allocation3 + $0x44c] sm:$0xf] %v9189_v36  ;;  %v2174_v58 = vrot.slane %v1726_v49, 1  ;;  %v2249_v3 = vsel %vm839_vm1, %v2170_v40, %v2171_v42 }
  0xb4   : >> { %4158 = vmatprep.mubr.bf16.mxu1 %v10285_v43  ;;  %4255 = vmatprep.mubr.bf16.mxu0 %v10287_v47  ;;  %v10295_v43 = vld [vmem:[#allocation3 + $0x2d8] ss:$36 sps:$4 sm:$0xff]   ;;  %v10302_v47 = vld [vmem:[#allocation3 + $0xec] ss:$36 sps:$4 sm:$0xff]   ;;  %1979 = vst [vmem:[#allocation3 + $0x3c] sm:$0xf] %v9192_v38  ;;  %v9227_v9 = vpack.c.bf16 %v11319_v61, %v11319_v61  ;;  %v9255_v16 = vpack.c.bf16 %v2249_v3, %v2249_v3 }
  0xb5   : >> { %10068 = vmatprep.subr.bf16.mxu0 %v10299_v51  ;;  %1716 = vst [vmem:[#allocation3 + $0x3e0] sm:$0xf] %v9186_v29  ;;  %v1849_v11 = vsel %vm438_vm0, %v1817_v34, %v1770_v26  ;;  %v10300_v53 = vld [vmem:[#allocation3 + $0x324] ss:$36 sps:$4 sm:$0xff]   ;;  %2140 = vst [vmem:[#allocation3 + $0x64] sm:$0xf] %v9225_v52 }
  0xb6   : >> { %v9191_v48 = vpack.c.bf16 %v1849_v11, %v1849_v11  ;;  %v2172_v2 = vrot.slane %v1724_v45, 1  ;;  %2141 = vst [vmem:[#allocation3 + $0x88] sm:$0xf] %v9226_v55  ;;  %v1775_v29 = vrot.slane %v1727_v60, 7  ;;  %v1776_v56 = vrot.slane %v11319_v61, 7  ;;  %v10355_v63 = vld [vmem:[%s10860_s7 + $0x210] sm:$0xff]  }
  0xb7   : >> { %10069 = vmatpush3.bf16.msra.mxu0 %v10299_v51  ;;  %v1773_v51 = vrot.slane %v1725_v46, 7  ;;  %v1777_v8 = vrot.slane %v11321_v62, 7  ;;  %v2175_v12 = vrot.slane %v1727_v60, 1  ;;  %v10305_v0 = vld [vmem:[#allocation3 + $0xe8] ss:$36 sps:$4 sm:$0xff]   ;;  %v1733_v38 = vld [vmem:[#allocation2 + $0x130] sm:$0xff] }
  0xb8   : >> { %10070 = vmatprep.subr.bf16.mxu0 %v11281_v57  ;;  %1978 = vst [vmem:[#allocation3 + $0x18] sm:$0xf] %v9191_v48  ;;  %v2248_v13 = vsel %vm839_vm1, %v2171_v42, %v2172_v2  ;;  %2142 = vst [vmem:[#allocation3 + $0xac] sm:$0xf] %v9227_v9  ;;  %v1731_v21 = vld [vmem:[#allocation2 + $0xd8] sm:$0xff]  ;;  %v2176_v39 = vrot.slane %v11319_v61, 1 }
  0xb9   : >> { %v1847_v59 = vsel %vm438_vm0, %v1772_v50, %v1773_v51  ;;  %v1846_v4 = vsel %vm438_vm0, %v1773_v51, %v1774_v54  ;;  %v2246_v19 = vsel %vm839_vm1, %v2174_v58, %v2175_v12  ;;  %v9256_v22 = vpack.c.bf16 %v2248_v13, %v2248_v13  ;;  %v10308_v23 = vld [vmem:[#allocation3 + $0x134] ss:$36 sps:$4 sm:$0xff]   ;;  %2378 = vst [vmem:[#allocation3 + $0x20] sm:$0xf] %v9255_v16  ;;  %v10304_v30 = vld [vmem:[#allocation3 + $0x320] ss:$36 sps:$4 sm:$0xff]  }
  0xba   : >> { %4256 = vmatmul.mubr.bf16.gmra.mxu0 %v10290_v10  ;;  %v9193_v41 = vpack.c.bf16 %v1847_v59, %v1847_v59  ;;  %v9194_v6 = vpack.c.bf16 %v1846_v4, %v1846_v4  ;;  %v9228_v10 = vpack.c.bf16 %v11321_v62, %v11321_v62  ;;  %v9258_v24 = vpack.c.bf16 %v2246_v19, %v2246_v19  ;;  %v10306_v31 = vld [vmem:[#allocation3 + $0x36c] ss:$36 sps:$4 sm:$0xff]   ;;  %v10368_v50 = vld [vmem:[%s10860_s7 + $0x208] sm:$0xff]  }
  0xbb   : >> { %4159 = vmatmul.mubr.bf16.gmra.mxu1 %v10289_v14  ;;  %4263 = vmatprep.mubr.bf16.mxu0 %v10293_v15  ;;  %v1844_v14 = vsel %vm438_vm0, %v1776_v56, %v1777_v8  ;;  %v1845_v15 = vsel %vm438_vm0, %v1775_v29, %v1776_v56  ;;  %v1779_v27 = vrot.slane %v1731_v21, 7  ;;  %v9229_v28 = vpack.c.bf16 %v1731_v21, %v1731_v21  ;;  %v1735_v11 = vld [vmem:[#allocation2 + $0x78] sm:$0xff]  ;;  %v10311_v60 = vld [vmem:[#allocation3 + $0x130] ss:$36 sps:$4 sm:$0xff]   ;;  %v1739_v19 = vld [vmem:[#allocation2 + $0xe8] sm:$0xff] }
  0xbc   : >> { %4166 = vmatprep.mubr.bf16.mxu1 %v10291_v20  ;;  %10071 = vmatpush3.bf16.msra.mxu0 %v11281_v57  ;;  %v2173_v57 = vrot.slane %v1725_v46, 1  ;;  %1980 = vst [vmem:[#allocation3 + $0x60] sm:$0xf] %v9193_v41  ;;  %1981 = vst [vmem:[#allocation3 + $0x84] sm:$0xf] %v9194_v6  ;;  %v9195_v18 = vpack.c.bf16 %v1845_v15, %v1845_v15  ;;  %v9196_v17 = vpack.c.bf16 %v1844_v14, %v1844_v14  ;;  %v11344_v20 = vld [vmem:[#allocation2 + $0x58] sm:$0xff] }
  0xbd   : >> { %10072 = vmatprep.subr.bf16.mxu0 %v10329_v25  ;;  %2143 = vst [vmem:[#allocation3 + $0xd0] sm:$0xf] %v9228_v10  ;;  %v1778_v26 = vrot.slane %v11344_v20, 7  ;;  %2379 = vst [vmem:[#allocation3 + $0x44] sm:$0xf] %v9256_v22  ;;  %v2179_v36 = vrot.slane %v1731_v21, 1  ;;  %v9232_v51 = vpack.c.bf16 %v1735_v11, %v1735_v11 }
  0xbe   : >> { %v2247_v5 = vsel %vm839_vm1, %v2173_v57, %v2174_v58  ;;  %1982 = vst [vmem:[#allocation3 + $0xa8] sm:$0xf] %v9195_v18  ;;  %1983 = vst [vmem:[#allocation3 + $0xcc] sm:$0xf] %v9196_v17  ;;  %v2181_v45 = vrot.slane %v1733_v38, 1  ;;  %v1783_v48 = vrot.slane %v1735_v11, 7 }
  0xbf   : >> { %v9257_v7 = vpack.c.bf16 %v2247_v5, %v2247_v5  ;;  %2381 = vst [vmem:[#allocation3 + $0x8c] sm:$0xf] %v9258_v24  ;;  %v1843_v35 = vsel %vm438_vm0, %v1778_v26, %v1779_v27  ;;  %2144 = vst [vmem:[#allocation3 + $0xf4] sm:$0xf] %v9229_v28  ;;  %v2177_v52 = vrot.slane %v11321_v62, 1  ;;  %v2178_v58 = vrot.slane %v11344_v20, 1 }
  0xc0   : >> { %10073 = vmatpush3.bf16.msra.mxu0 %v10329_v25  ;;  %v1732_v25 = vld [vmem:[#allocation2 + $0x180] sm:$0xff]  ;;  %v9197_v42 = vpack.c.bf16 %v1843_v35, %v1843_v35  ;;  %2147 = vst [vmem:[#allocation3 + $0x160] sm:$0xf] %v9232_v51  ;;  %v10317_v41 = vld [vmem:[#allocation3 + $0x17c] ss:$36 sps:$4 sm:$0xff]   ;;  %v1737_v8 = vld [vmem:[#allocation2 + $0x158] sm:$0xff] }
  0xc1   : >> { %10074 = vmatprep.subr.bf16.mxu0 %v10342_v44  ;;  %2380 = vst [vmem:[#allocation3 + $0x68] sm:$0xf] %v9257_v7  ;;  %v1780_v33 = vrot.slane %v1732_v25, 7  ;;  %v9230_v34 = vpack.c.bf16 %v1732_v25, %v1732_v25  ;;  %v1736_v2 = vld [vmem:[#allocation2 + $0x1a0] sm:$0xff]  ;;  %v2245_v3 = vsel %vm839_vm1, %v2176_v39, %v2177_v52  ;;  %v2244_v29 = vsel %vm839_vm1, %v2177_v52, %v2178_v58  ;;  %v10310_v56 = vld [vmem:[#allocation3 + $0x368] ss:$36 sps:$4 sm:$0xff]  }
  0xc2   : >> { %4264 = vmatmul.mubr.bf16.gmra.mxu0 %v10296_v37  ;;  %v2180_v37 = vrot.slane %v1732_v25, 1  ;;  %1984 = vst [vmem:[#allocation3 + $0xf0] sm:$0xf] %v9197_v42  ;;  %v1784_v5 = vrot.slane %v1736_v2, 7  ;;  %v9259_v6 = vpack.c.bf16 %v2245_v3, %v2245_v3  ;;  %v1738_v9 = vld [vmem:[#allocation2 + $0x98] sm:$0xff]  ;;  %v9260_v10 = vpack.c.bf16 %v2244_v29, %v2244_v29  ;;  %v11367_v20 = vld [vmem:[#allocation2 + $0x80] sm:$0xff] }
  0xc3   : >> { %4167 = vmatmul.mubr.bf16.gmra.mxu1 %v10295_v43  ;;  %4271 = vmatprep.mubr.bf16.mxu0 %v10302_v47  ;;  %v1842_v40 = vsel %vm438_vm0, %v1779_v27, %v1780_v33  ;;  %2145 = vst [vmem:[#allocation3 + $0x118] sm:$0xf] %v9230_v34  ;;  %v1734_v43 = vld [vmem:[#allocation2 + $0x138] sm:$0xff]  ;;  %v2183_v12 = vrot.slane %v1735_v11, 1  ;;  %v10315_v13 = vld [vmem:[#allocation3 + $0x3b4] ss:$36 sps:$4 sm:$0xff]   ;;  %v9233_v15 = vpack.c.bf16 %v1737_v8, %v1737_v8 }
  0xc4   : >> { %4174 = vmatprep.mubr.bf16.mxu1 %v10300_v53  ;;  %10075 = vmatpush3.bf16.msra.mxu0 %v10342_v44  ;;  %v1781_v44 = vrot.slane %v1733_v38, 7  ;;  %v9198_v46 = vpack.c.bf16 %v1842_v40, %v1842_v40  ;;  %v1782_v47 = vrot.slane %v1734_v43, 7  ;;  %v9231_v49 = vpack.c.bf16 %v1734_v43, %v1734_v43  ;;  %2382 = vst [vmem:[#allocation3 + $0xb0] sm:$0xf] %v9259_v6  ;;  %v11377_v25 = vld [vmem:[#allocation2 + $0xa8] sm:$0xff]  ;;  %v1745_v3 = vld [vmem:[#allocation2 + $0xb8] sm:$0xff] }
  0xc5   : >> { %10076 = vmatprep.subr.bf16.mxu0 %v10355_v63  ;;  %v2242_v53 = vsel %vm839_vm1, %v2180_v37, %v2181_v45  ;;  %v2243_v54 = vsel %vm839_vm1, %v2179_v36, %v2180_v37  ;;  %v2182_v7 = vrot.slane %v1734_v43, 1  ;;  %v1786_v14 = vrot.slane %v1738_v9, 7  ;;  %2383 = vst [vmem:[#allocation3 + $0xd4] sm:$0xf] %v9260_v10  ;;  %2148 = vst [vmem:[#allocation3 + $0x184] sm:$0xf] %v9233_v15 }
  0xc6   : >> { %1985 = vst [vmem:[#allocation3 + $0x114] sm:$0xf] %v9198_v46  ;;  %v1840_v55 = vsel %vm438_vm0, %v1782_v47, %v1783_v48  ;;  %v1841_v57 = vsel %vm438_vm0, %v1781_v44, %v1782_v47  ;;  %2146 = vst [vmem:[#allocation3 + $0x13c] sm:$0xf] %v9231_v49  ;;  %v9261_v59 = vpack.c.bf16 %v2243_v54, %v2243_v54  ;;  %v2185_v18 = vrot.slane %v1737_v8, 1  ;;  %v10381_v37 = vld [vmem:[%s10860_s7 + $0x200] sm:$0xff]  }
  0xc7   : >> { %v9199_v61 = vpack.c.bf16 %v1841_v57, %v1841_v57  ;;  %v9200_v62 = vpack.c.bf16 %v1840_v55, %v1840_v55  ;;  %v9262_v4 = vpack.c.bf16 %v2242_v53, %v2242_v53  ;;  %v9234_v16 = vpack.c.bf16 %v1738_v9, %v1738_v9  ;;  %v10320_v39 = vld [vmem:[#allocation3 + $0x178] ss:$36 sps:$4 sm:$0xff]   ;;  %v10323_v44 = vld [vmem:[#allocation3 + $0x1c4] ss:$36 sps:$4 sm:$0xff]   ;;  %v10319_v48 = vld [vmem:[#allocation3 + $0x3b0] ss:$36 sps:$4 sm:$0xff]  }
  0xc8   : >> { %10077 = vmatpush3.bf16.msra.mxu0 %v10355_v63  ;;  %2384 = vst [vmem:[#allocation3 + $0xf8] sm:$0xf] %v9261_v59  ;;  %v2184_v63 = vrot.slane %v1736_v2, 1  ;;  %v2186_v17 = vrot.slane %v1738_v9, 1  ;;  %v2241_v22 = vsel %vm839_vm1, %v2182_v7, %v2183_v12  ;;  %v1787_v26 = vrot.slane %v1739_v19, 7  ;;  %v1742_v49 = vld [vmem:[#allocation2 + $0x28] sm:$0xff] }
  0xc9   : >> { %10078 = vmatprep.subr.bf16.mxu0 %v10368_v50  ;;  %1986 = vst [vmem:[#allocation3 + $0x138] sm:$0xf] %v9199_v61  ;;  %1987 = vst [vmem:[#allocation3 + $0x15c] sm:$0xf] %v9200_v62  ;;  %v1788_v27 = vrot.slane %v11367_v20, 7  ;;  %v9235_v33 = vpack.c.bf16 %v11367_v20, %v11367_v20  ;;  %v9236_v35 = vpack.c.bf16 %v11377_v25, %v11377_v25  ;;  %v2187_v36 = vrot.slane %v1739_v19, 1 }
  0xca   : >> { %4272 = vmatmul.mubr.bf16.gmra.mxu0 %v10305_v0  ;;  %2385 = vst [vmem:[#allocation3 + $0x11c] sm:$0xf] %v9262_v4  ;;  %v1785_v0 = vrot.slane %v1737_v8, 7  ;;  %v2240_v21 = vsel %vm839_vm1, %v2183_v12, %v2184_v63  ;;  %2149 = vst [vmem:[#allocation3 + $0x1a8] sm:$0xf] %v9234_v16  ;;  %v9263_v38 = vpack.c.bf16 %v2241_v22, %v2241_v22  ;;  %v2188_v52 = vrot.slane %v11367_v20, 1 }
  0xcb   : >> { %4175 = vmatmul.mubr.bf16.gmra.mxu1 %v10304_v30  ;;  %4279 = vmatprep.mubr.bf16.mxu0 %v10308_v23  ;;  %v1837_v34 = vsel %vm438_vm0, %v1787_v26, %v1788_v27  ;;  %2150 = vst [vmem:[#allocation3 + $0x1cc] sm:$0xf] %v9235_v33  ;;  %v9264_v43 = vpack.c.bf16 %v2240_v21, %v2240_v21  ;;  %2151 = vst [vmem:[#allocation3 + $0x1f0] sm:$0xf] %v9236_v35  ;;  %v2189_v53 = vrot.slane %v11377_v25, 1  ;;  %v11398_v55 = vld [vmem:[#allocation2 + $0x168] sm:$0xff] }
  0xcc   : >> { %4182 = vmatprep.mubr.bf16.mxu1 %v10306_v31  ;;  %10079 = vmatpush3.bf16.msra.mxu0 %v10368_v50  ;;  %v1838_v23 = vsel %vm438_vm0, %v1785_v0, %v1786_v14  ;;  %v1839_v24 = vsel %vm438_vm0, %v1784_v5, %v1785_v0  ;;  %v1789_v31 = vrot.slane %v11377_v25, 7  ;;  %v9203_v42 = vpack.c.bf16 %v1837_v34, %v1837_v34  ;;  %v11394_v50 = vld [vmem:[#allocation2] sm:$0xff]  ;;  %v10321_v54 = vld [vmem:[#allocation3 + $0x3fc] ss:$36 sps:$4 sm:$0xff]  }
  0xcd   : >> { %v9201_v28 = vpack.c.bf16 %v1839_v24, %v1839_v24  ;;  %v9202_v30 = vpack.c.bf16 %v1838_v23, %v1838_v23  ;;  %v2239_v11 = vsel %vm839_vm1, %v2185_v18, %v2186_v17  ;;  %10080 = vmatprep.subr.bf16.mxu0 %v10381_v37  ;;  %2386 = vst [vmem:[#allocation3 + $0x140] sm:$0xf] %v9263_v38  ;;  %2387 = vst [vmem:[#allocation3 + $0x164] sm:$0xf] %v9264_v43  ;;  %v11408_v4 = vld [vmem:[#allocation2 + $0x1a8] sm:$0xff]  ;;  %v11420_v63 = vld [vmem:[#allocation2 + $0x50] sm:$0xff] }
  0xce   : >> { %v1836_v40 = vsel %vm438_vm0, %v1788_v27, %v1789_v31  ;;  %v2238_v46 = vsel %vm839_vm1, %v2186_v17, %v2187_v36  ;;  %v9265_v47 = vpack.c.bf16 %v2239_v11, %v2239_v11  ;;  %1990 = vst [vmem:[#allocation3 + $0x1c8] sm:$0xf] %v9203_v42  ;;  %v1790_v57 = vrot.slane %v1742_v49, 7  ;;  %v10326_v18 = vld [vmem:[#allocation3 + $0x1c0] ss:$36 sps:$4 sm:$0xff]  }
  0xcf   : >> { %1988 = vst [vmem:[#allocation3 + $0x180] sm:$0xf] %v9201_v28  ;;  %1989 = vst [vmem:[#allocation3 + $0x1a4] sm:$0xf] %v9202_v30  ;;  %v9204_v45 = vpack.c.bf16 %v1836_v40, %v1836_v40  ;;  %v9266_v51 = vpack.c.bf16 %v2238_v46, %v2238_v46  ;;  %v1791_v58 = vrot.slane %v11394_v50, 7  ;;  %v9237_v59 = vpack.c.bf16 %v11394_v50, %v11394_v50  ;;  %v1750_v23 = vld [vmem:[#allocation2 + $0x170] sm:$0xff] }
  0xd0   : >> { %10081 = vmatpush3.bf16.msra.mxu0 %v10381_v37  ;;  %2388 = vst [vmem:[#allocation3 + $0x188] sm:$0xf] %v9265_v47  ;;  %v1792_v61 = vrot.slane %v11398_v55, 7  ;;  %v9238_v62 = vpack.c.bf16 %v11398_v55, %v11398_v55  ;;  %v2192_v2 = vrot.slane %v11398_v55, 1  ;;  %v2190_v5 = vrot.slane %v1742_v49, 1  ;;  %v1752_v46 = vld [vmem:[#allocation2 + $0xc0] sm:$0xff] }
  0xd1   : >> { %1991 = vst [vmem:[#allocation3 + $0x1ec] sm:$0xf] %v9204_v45  ;;  %2389 = vst [vmem:[#allocation3 + $0x1ac] sm:$0xf] %v9266_v51  ;;  %v1835_v29 = vsel %vm438_vm0, %v1790_v57, %v1791_v58  ;;  %v1793_v6 = vrot.slane %v1745_v3, 7  ;;  %v1794_v7 = vrot.slane %v11408_v4, 7  ;;  %v9239_v10 = vpack.c.bf16 %v11408_v4, %v11408_v4 }
  0xd2   : >> { %4280 = vmatmul.mubr.bf16.gmra.mxu0 %v10311_v60  ;;  %v2191_v60 = vrot.slane %v11394_v50, 1  ;;  %2152 = vst [vmem:[#allocation3 + $0x214] sm:$0xf] %v9237_v59  ;;  %v1834_v8 = vsel %vm438_vm0, %v1791_v58, %v1792_v61  ;;  %v9205_v9 = vpack.c.bf16 %v1835_v29, %v1835_v29  ;;  %2153 = vst [vmem:[#allocation3 + $0x238] sm:$0xf] %v9238_v62  ;;  %v2193_v12 = vrot.slane %v1745_v3, 1 }
  0xd3   : >> { %4183 = vmatmul.mubr.bf16.gmra.mxu1 %v10310_v56  ;;  %4287 = vmatprep.mubr.bf16.mxu0 %v10317_v41  ;;  %v11410_v41 = vld [vmem:[#allocation2 + $0x140] sm:$0xff]  ;;  %v9206_v0 = vpack.c.bf16 %v1834_v8, %v1834_v8  ;;  %v1833_v15 = vsel %vm438_vm0, %v1793_v6, %v1794_v7  ;;  %2154 = vst [vmem:[#allocation3 + $0x25c] sm:$0xf] %v9239_v10  ;;  %v1796_v24 = vrot.slane %v11420_v63, 7  ;;  %v10325_v28 = vld [vmem:[#allocation3 + $0x3f8] ss:$36 sps:$4 sm:$0xff]  }
  0xd4   : >> { %4190 = vmatprep.mubr.bf16.mxu1 %v10315_v13  ;;  %v1795_v56 = vrot.slane %v11410_v41, 7  ;;  %v1749_v13 = vld [vmem:[#allocation2 + $0xa0] sm:$0xff]  ;;  %v9240_v16 = vpack.c.bf16 %v11410_v41, %v11410_v41  ;;  %1992 = vst [vmem:[#allocation3 + $0x210] sm:$0xf] %v9205_v9  ;;  %v9207_v17 = vpack.c.bf16 %v1833_v15, %v1833_v15  ;;  %v2236_v21 = vsel %vm839_vm1, %v2189_v53, %v2190_v5  ;;  %v10330_v30 = vld [vmem:[#allocation3 + $0x444] ss:$36 sps:$4 sm:$0xff]  }
  0xd5   : >> { %v9241_v20 = vpack.c.bf16 %v1749_v13, %v1749_v13  ;;  %v10332_v22 = vld [vmem:[#allocation3 + $0x20c] ss:$36 sps:$4 sm:$0xff]   ;;  %1993 = vst [vmem:[#allocation3 + $0x234] sm:$0xf] %v9206_v0  ;;  %v1797_v25 = vrot.slane %v1749_v13, 7  ;;  %v2237_v26 = vsel %vm839_vm1, %v2188_v52, %v2189_v53  ;;  %v9268_v27 = vpack.c.bf16 %v2236_v21, %v2236_v21  ;;  %v11445_v50 = vld [vmem:[#allocation2 + $0x190] sm:$0xff] }
  0xd6   : >> { %v1832_v14 = vsel %vm438_vm0, %v1794_v7, %v1795_v56  ;;  %2155 = vst [vmem:[#allocation3 + $0x280] sm:$0xf] %v9240_v16  ;;  %1994 = vst [vmem:[#allocation3 + $0x258] sm:$0xf] %v9207_v17  ;;  %v1798_v31 = vrot.slane %v1750_v23, 7  ;;  %v9242_v33 = vpack.c.bf16 %v1750_v23, %v1750_v23  ;;  %v9267_v34 = vpack.c.bf16 %v2237_v26, %v2237_v26  ;;  %v1751_v45 = vld [vmem:[#allocation2 + $0x198] sm:$0xff] }
  0xd7   : >> { %v9208_v19 = vpack.c.bf16 %v1832_v14, %v1832_v14  ;;  %2156 = vst [vmem:[#allocation3 + $0x2a4] sm:$0xf] %v9241_v20  ;;  %v2234_v35 = vsel %vm839_vm1, %v2192_v2, %v2193_v12  ;;  %v1831_v36 = vsel %vm438_vm0, %v1796_v24, %v1797_v25  ;;  %v2197_v37 = vrot.slane %v1749_v13, 1  ;;  %2391 = vst [vmem:[#allocation3 + $0x1f4] sm:$0xf] %v9268_v27  ;;  %v1754_v10 = vld [vmem:[#allocation2 + $0xc8] sm:$0xff] }
  0xd8   : >> { %v2198_v38 = vrot.slane %v1750_v23, 1  ;;  %v1830_v40 = vsel %vm438_vm0, %v1797_v25, %v1798_v31  ;;  %v9209_v42 = vpack.c.bf16 %v1831_v36, %v1831_v36  ;;  %2157 = vst [vmem:[#allocation3 + $0x2c8] sm:$0xf] %v9242_v33  ;;  %2390 = vst [vmem:[#allocation3 + $0x1d0] sm:$0xf] %v9267_v34  ;;  %v9270_v11 = vpack.c.bf16 %v2234_v35, %v2234_v35  ;;  %v1755_v12 = vld [vmem:[#allocation2 + $0xf0] sm:$0xff] }
  0xd9   : >> { %1995 = vst [vmem:[#allocation3 + $0x27c] sm:$0xf] %v9208_v19  ;;  %v2194_v47 = vrot.slane %v11408_v4, 1  ;;  %v1799_v51 = vrot.slane %v1751_v45, 7  ;;  %v1800_v52 = vrot.slane %v1752_v46, 7  ;;  %v9243_v53 = vpack.c.bf16 %v1752_v46, %v1752_v46  ;;  %v1756_v0 = vld [vmem:[#allocation2 + $0x150] sm:$0xff] }
  0xda   : >> { %4288 = vmatmul.mubr.bf16.gmra.mxu0 %v10320_v39  ;;  %v2235_v39 = vsel %vm839_vm1, %v2191_v60, %v2192_v2  ;;  %v2231_v49 = vsel %vm839_vm1, %v2197_v37, %v2198_v38  ;;  %1996 = vst [vmem:[#allocation3 + $0x2a0] sm:$0xf] %v9209_v42  ;;  %2393 = vst [vmem:[#allocation3 + $0x23c] sm:$0xf] %v9270_v11  ;;  %v1801_v55 = vrot.slane %v11445_v50, 7  ;;  %v2196_v62 = vrot.slane %v11420_v63, 1 }
  0xdb   : >> { %4191 = vmatmul.mubr.bf16.gmra.mxu1 %v10319_v48  ;;  %4295 = vmatprep.mubr.bf16.mxu0 %v10323_v44  ;;  %v9269_v43 = vpack.c.bf16 %v2235_v39, %v2235_v39  ;;  %v9210_v44 = vpack.c.bf16 %v1830_v40, %v1830_v40  ;;  %v2195_v48 = vrot.slane %v11410_v41, 1  ;;  %v9244_v57 = vpack.c.bf16 %v11445_v50, %v11445_v50  ;;  %v10335_v60 = vld [vmem:[#allocation3 + $0x208] ss:$36 sps:$4 sm:$0xff]   ;;  %v10336_v4 = vld [vmem:[#allocation3 + $0x254] ss:$36 sps:$4 sm:$0xff]   ;;  %v1757_v21 = vld [vmem:[#allocation2 + $0x30] sm:$0xff] }
  0xdc   : >> { %4198 = vmatprep.mubr.bf16.mxu1 %v10321_v54  ;;  %v2199_v54 = vrot.slane %v1751_v45, 1  ;;  %v9273_v59 = vpack.c.bf16 %v2231_v49, %v2231_v49  ;;  %v1829_v61 = vsel %vm438_vm0, %v1799_v51, %v1800_v52  ;;  %2158 = vst [vmem:[#allocation3 + $0x2ec] sm:$0xf] %v9243_v53  ;;  %v1828_v41 = vsel %vm438_vm0, %v1800_v52, %v1801_v55  ;;  %v10334_v7 = vld [vmem:[#allocation3 + $0x440] ss:$36 sps:$4 sm:$0xff]   ;;  %v11470_v34 = vld [vmem:[#allocation2 + $0xf8] sm:$0xff] }
  0xdd   : >> { %2392 = vst [vmem:[#allocation3 + $0x218] sm:$0xf] %v9269_v43  ;;  %1997 = vst [vmem:[#allocation3 + $0x2c4] sm:$0xf] %v9210_v44  ;;  %v2233_v58 = vsel %vm839_vm1, %v2194_v47, %v2195_v48  ;;  %v9211_v5 = vpack.c.bf16 %v1829_v61, %v1829_v61  ;;  %v2200_v6 = vrot.slane %v1752_v46, 1  ;;  %v9212_v56 = vpack.c.bf16 %v1828_v41, %v1828_v41  ;;  %v11472_v35 = vld [vmem:[#allocation2 + $0x18] sm:$0xff] }
  0xde   : >> { %v9271_v2 = vpack.c.bf16 %v2233_v58, %v2233_v58  ;;  %v2230_v3 = vsel %vm839_vm1, %v2198_v38, %v2199_v54  ;;  %2159 = vst [vmem:[#allocation3 + $0x310] sm:$0xf] %v9244_v57  ;;  %2396 = vst [vmem:[#allocation3 + $0x2a8] sm:$0xf] %v9273_v59  ;;  %v2232_v8 = vsel %vm839_vm1, %v2195_v48, %v2196_v62  ;;  %v10340_v9 = vld [vmem:[#allocation3 + $0x1c] ss:$36 sps:$4 sm:$0xff]  }
  0xdf   : >> { %v9274_v29 = vpack.c.bf16 %v2230_v3, %v2230_v3  ;;  %1998 = vst [vmem:[#allocation3 + $0x2e8] sm:$0xf] %v9211_v5  ;;  %v9272_v63 = vpack.c.bf16 %v2232_v8, %v2232_v8  ;;  %v2201_v13 = vrot.slane %v11445_v50, 1  ;;  %1999 = vst [vmem:[#allocation3 + $0x30c] sm:$0xf] %v9212_v56  ;;  %v1802_v14 = vrot.slane %v1754_v10, 7 }
  0xe0   : >> { %2394 = vst [vmem:[#allocation3 + $0x260] sm:$0xf] %v9271_v2  ;;  %v1803_v15 = vrot.slane %v1755_v12, 7  ;;  %v9245_v16 = vpack.c.bf16 %v1755_v12, %v1755_v12  ;;  %v1804_v17 = vrot.slane %v1756_v0, 7  ;;  %v9246_v19 = vpack.c.bf16 %v1756_v0, %v1756_v0  ;;  %v10341_v25 = vld [vmem:[#allocation3 + $0x250] ss:$36 sps:$4 sm:$0xff]  }
  0xe1   : >> { %2397 = vst [vmem:[#allocation3 + $0x2cc] sm:$0xf] %v9274_v29  ;;  %v2204_v20 = vrot.slane %v1756_v0, 1  ;;  %2395 = vst [vmem:[#allocation3 + $0x284] sm:$0xf] %v9272_v63  ;;  %v2205_v36 = vrot.slane %v1757_v21, 1  ;;  %v9247_v42 = vpack.c.bf16 %v11470_v34, %v11470_v34  ;;  %v9248_v43 = vpack.c.bf16 %v11472_v35, %v11472_v35 }
  0xe2   : >> { %4296 = vmatmul.mubr.bf16.gmra.mxu0 %v10326_v18  ;;  %v2203_v18 = vrot.slane %v1755_v12, 1  ;;  %v1827_v23 = vsel %vm438_vm0, %v1802_v14, %v1803_v15  ;;  %2160 = vst [vmem:[#allocation3 + $0x334] sm:$0xf] %v9245_v16  ;;  %v1826_v26 = vsel %vm438_vm0, %v1803_v15, %v1804_v17  ;;  %2161 = vst [vmem:[#allocation3 + $0x358] sm:$0xf] %v9246_v19  ;;  %v2202_v37 = vrot.slane %v1754_v10, 1 }
  0xe3   : >> { %4199 = vmatmul.mubr.bf16.gmra.mxu1 %v10325_v28  ;;  %4303 = vmatprep.mubr.bf16.mxu0 %v10332_v22  ;;  %v2229_v22 = vsel %vm839_vm1, %v2200_v6, %v2201_v13  ;;  %v9213_v27 = vpack.c.bf16 %v1827_v23, %v1827_v23  ;;  %v1805_v28 = vrot.slane %v1757_v21, 7  ;;  %v10343_v31 = vld [vmem:[#allocation3 + $0x29c] ss:$36 sps:$4 sm:$0xff]   ;;  %v9214_v33 = vpack.c.bf16 %v1826_v26, %v1826_v26  ;;  %v10345_v46 = vld [vmem:[#allocation3 + $0x64] ss:$36 sps:$4 sm:$0xff]   ;;  %v1761_v57 = vld [vmem:[#allocation2 + $0x60] sm:$0xff] }
  0xe4   : >> { %4206 = vmatprep.mubr.bf16.mxu1 %v10330_v30  ;;  %v9275_v24 = vpack.c.bf16 %v2229_v22, %v2229_v22  ;;  %v2227_v30 = vsel %vm839_vm1, %v2203_v18, %v2204_v20  ;;  %v1806_v39 = vrot.slane %v11470_v34, 7  ;;  %v1807_v40 = vrot.slane %v11472_v35, 7  ;;  %v10338_v11 = vld [vmem:[#allocation3 + $0x18] ss:$36 sps:$4 sm:$0xff]   ;;  %2162 = vst [vmem:[#allocation3 + $0x37c] sm:$0xf] %v9247_v42 }
  0xe5   : >> { %v9277_v38 = vpack.c.bf16 %v2227_v30, %v2227_v30  ;;  %2000 = vst [vmem:[#allocation3 + $0x330] sm:$0xf] %v9213_v27  ;;  %2001 = vst [vmem:[#allocation3 + $0x354] sm:$0xf] %v9214_v33  ;;  %v2228_v44 = vsel %vm839_vm1, %v2201_v13, %v2202_v37  ;;  %v2226_v45 = vsel %vm839_vm1, %v2204_v20, %v2205_v36  ;;  %v2217_v51 = vrot.slane %v11303_v32, 1  ;;  %v1760_v54 = vld [vmem:[#allocation2 + $0x8] sm:$0xff] }
  0xe6   : >> { %2398 = vst [vmem:[#allocation3 + $0x2f0] sm:$0xf] %v9275_v24  ;;  %v1824_v47 = vsel %vm438_vm0, %v1806_v39, %v1807_v40  ;;  %v1825_v48 = vsel %vm438_vm0, %v1805_v28, %v1806_v39  ;;  %2163 = vst [vmem:[#allocation3 + $0x3a0] sm:$0xf] %v9248_v43  ;;  %v9276_v49 = vpack.c.bf16 %v2228_v44, %v2228_v44  ;;  %v2206_v55 = vrot.slane %v11470_v34, 1  ;;  %v1762_v58 = vld [vmem:[#allocation2 + $0x70] sm:$0xff] }
  0xe7   : >> { %2400 = vst [vmem:[#allocation3 + $0x338] sm:$0xf] %v9277_v38  ;;  %v9278_v50 = vpack.c.bf16 %v2226_v45, %v2226_v45  ;;  %v9215_v52 = vpack.c.bf16 %v1825_v48, %v1825_v48  ;;  %v9216_v53 = vpack.c.bf16 %v1824_v47, %v1824_v47  ;;  %v1808_v59 = vrot.slane %v1760_v54, 7  ;;  %v11491_v5 = vld [vmem:[#allocation2 + $0x38] sm:$0xff]  ;;  %v11493_v29 = vld [vmem:[#allocation2 + $0x20] sm:$0xff]  ;;  %v1766_v23 = vld [vmem:[#allocation2 + $0x88] sm:$0xff] }
  0xe8   : >> { %2399 = vst [vmem:[#allocation3 + $0x314] sm:$0xf] %v9276_v49  ;;  %v2207_v61 = vrot.slane %v11472_v35, 1  ;;  %v2208_v62 = vrot.slane %v1760_v54, 1  ;;  %v1809_v2 = vrot.slane %v1761_v57, 7  ;;  %v1810_v3 = vrot.slane %v1762_v58, 7 }
  0xe9   : >> { %2401 = vst [vmem:[#allocation3 + $0x35c] sm:$0xf] %v9278_v50  ;;  %2002 = vst [vmem:[#allocation3 + $0x378] sm:$0xf] %v9215_v52  ;;  %v9250_v41 = vpack.c.bf16 %v1762_v58, %v1762_v58  ;;  %v2209_v6 = vrot.slane %v1761_v57, 1  ;;  %v1812_v8 = vrot.slane %v11491_v5, 7  ;;  %v9251_v13 = vpack.c.bf16 %v11491_v5, %v11491_v5 }
  0xea   : >> { %4304 = vmatmul.mubr.bf16.gmra.mxu0 %v10335_v60  ;;  %v1763_v60 = vld [vmem:[#allocation2 + $0x68] sm:$0xff]  ;;  %2003 = vst [vmem:[#allocation3 + $0x39c] sm:$0xf] %v9216_v53  ;;  %v1822_v10 = vsel %vm438_vm0, %v1809_v2, %v1810_v3  ;;  %v1823_v12 = vsel %vm438_vm0, %v1808_v59, %v1809_v2  ;;  %v1813_v63 = vrot.slane %v11493_v29, 7  ;;  %v10348_v0 = vld [vmem:[#allocation3 + $0x60] ss:$36 sps:$4 sm:$0xff]   ;;  %v9252_v17 = vpack.c.bf16 %v11493_v29, %v11493_v29 }
  0xeb   : >> { %4207 = vmatmul.mubr.bf16.gmra.mxu1 %v10334_v7  ;;  %4311 = vmatprep.mubr.bf16.mxu0 %v10336_v4  ;;  %v9249_v4 = vpack.c.bf16 %v1761_v57, %v1761_v57  ;;  %v2210_v7 = vrot.slane %v1762_v58, 1  ;;  %v1811_v56 = vrot.slane %v1763_v60, 7  ;;  %2165 = vst [vmem:[#allocation3 + $0x3e8] sm:$0xf] %v9250_v41  ;;  %v10349_v14 = vld [vmem:[#allocation3 + $0x2e4] ss:$36 sps:$4 sm:$0xff]   ;;  %v9217_v15 = vpack.c.bf16 %v1823_v12, %v1823_v12 }
  0xec   : >> { %4408 = vmatprep.mubr.bf16.mxu1 %v10340_v9  ;;  %v10347_v9 = vld [vmem:[#allocation3 + $0x298] ss:$36 sps:$4 sm:$0xff]   ;;  %v9218_v16 = vpack.c.bf16 %v1822_v10, %v1822_v10  ;;  %v1820_v19 = vsel %vm438_vm0, %v1812_v8, %v1813_v63  ;;  %2166 = vst [vmem:[#allocation3 + $0x40c] sm:$0xf] %v9251_v13  ;;  %v2211_v21 = vrot.slane %v1763_v60, 1  ;;  %v2224_v22 = vsel %vm839_vm1, %v2207_v61, %v2208_v62  ;;  %v1767_v24 = vld [vmem:[#allocation2 + $0xe0] sm:$0xff] }
  0xed   : >> { %2164 = vst [vmem:[#allocation3 + $0x3c4] sm:$0xf] %v9249_v4  ;;  %v1821_v18 = vsel %vm438_vm0, %v1811_v56, %v1812_v8  ;;  %2004 = vst [vmem:[#allocation3 + $0x3c0] sm:$0xf] %v9217_v15  ;;  %v9220_v26 = vpack.c.bf16 %v1820_v19, %v1820_v19  ;;  %v2225_v27 = vsel %vm839_vm1, %v2206_v55, %v2207_v61  ;;  %v1814_v38 = vrot.slane %v1766_v23, 7 }
  0xee   : >> { %v9219_v20 = vpack.c.bf16 %v1821_v18, %v1821_v18  ;;  %2005 = vst [vmem:[#allocation3 + $0x3e4] sm:$0xf] %v9218_v16  ;;  %2167 = vst [vmem:[#allocation3 + $0x430] sm:$0xf] %v9252_v17  ;;  %v9280_v28 = vpack.c.bf16 %v2224_v22, %v2224_v22  ;;  %v2223_v30 = vsel %vm839_vm1, %v2209_v6, %v2210_v7  ;;  %v1815_v39 = vrot.slane %v1767_v24, 7 }
  0xef   : >> { %v9279_v33 = vpack.c.bf16 %v2225_v27, %v2225_v27  ;;  %v2222_v34 = vsel %vm839_vm1, %v2210_v7, %v2211_v21  ;;  %v9281_v35 = vpack.c.bf16 %v2223_v30, %v2223_v30  ;;  %v9253_v36 = vpack.c.bf16 %v1767_v24, %v1767_v24  ;;  %2007 = vst [vmem:[#allocation3 + $0x42c] sm:$0xf] %v9220_v26  ;;  %v10353_v50 = vld [vmem:[#allocation3 + $0x2e0] ss:$36 sps:$4 sm:$0xff]   ;;  %v10356_v52 = vld [vmem:[#allocation3 + $0x32c] ss:$36 sps:$4 sm:$0xff]  }
  0xf0   : >> { %2006 = vst [vmem:[#allocation3 + $0x408] sm:$0xf] %v9219_v20  ;;  %2403 = vst [vmem:[#allocation3 + $0x3a4] sm:$0xf] %v9280_v28  ;;  %v9282_v37 = vpack.c.bf16 %v2222_v34, %v2222_v34  ;;  %v2215_v43 = vrot.slane %v1767_v24, 1  ;;  %v2212_v45 = vrot.slane %v11491_v5, 1 }
  0xf1   : >> { %2402 = vst [vmem:[#allocation3 + $0x380] sm:$0xf] %v9279_v33  ;;  %2404 = vst [vmem:[#allocation3 + $0x3c8] sm:$0xf] %v9281_v35  ;;  %v2214_v49 = vrot.slane %v1766_v23, 1 }
  0xf2   : >> { %4312 = vmatmul.mubr.bf16.gmra.mxu0 %v10341_v25  ;;  %v10351_v25 = vld [vmem:[#allocation3 + $0xac] ss:$36 sps:$4 sm:$0xff]   ;;  %2168 = vst [vmem:[#allocation3 + $0x454] sm:$0xf] %v9253_v36  ;;  %2405 = vst [vmem:[#allocation3 + $0x3ec] sm:$0xf] %v9282_v37 }
  0xf3   : >> { %4409 = vmatmul.mubr.bf16.vlgmr.msra.gmra.mxu1 %v10338_v11  ;;  %4319 = vmatprep.mubr.bf16.mxu0 %v10343_v31  ;;  %v1768_v31 = vld [vmem:[#allocation2 + $0x120] sm:$0xff]  ;;  %v1819_v11 = vsel %vm438_vm0, %v1814_v38, %v1815_v39  ;;  %v10354_v58 = vld [vmem:[#allocation3 + $0xa8] ss:$36 sps:$4 sm:$0xff]   ;;  %v10364_v41 = vld [vmem:[#allocation3 + $0x13c] ss:$36 sps:$4 sm:$0xff]  }
  0xf4   : >> { %4416 = vmatprep.mubr.bf16.mxu1 %v10345_v46  ;;  %v9254_v40 = vpack.c.bf16 %v1768_v31, %v1768_v31  ;;  %v1816_v42 = vrot.slane %v1768_v31, 7  ;;  %v2216_v44 = vrot.slane %v1768_v31, 1  ;;  %v2213_v46 = vrot.slane %v11493_v29, 1  ;;  %v10358_v2 = vld [vmem:[#allocation3 + $0xf4] ss:$36 sps:$4 sm:$0xff]  }
  0xf5   : >> { %v9221_v48 = vpack.c.bf16 %v1819_v11, %v1819_v11  ;;  %v10360_v32 = vld [vmem:[#allocation3 + $0x328] ss:$36 sps:$4 sm:$0xff]   ;;  %v10361_v4 = vld [vmem:[#allocation3 + $0xf0] ss:$36 sps:$4 sm:$0xff]   ;;  %v10367_v29 = vld [vmem:[#allocation3 + $0x138] ss:$36 sps:$4 sm:$0xff]  }
  0xf6   : >> { %2169 = vst [vmem:[#allocation3 + $0x478] sm:$0xf] %v9254_v40  ;;  %v1818_v47 = vsel %vm438_vm0, %v1815_v39, %v1816_v42  ;;  %v2221_v54 = vsel %vm839_vm1, %v2212_v45, %v2213_v46  ;;  %v2218_v55 = vsel %vm839_vm1, %v2216_v44, %v2217_v51  ;;  %v2219_v57 = vsel %vm839_vm1, %v2215_v43, %v2216_v44  ;;  %v10362_v51 = vld [vmem:[#allocation3 + $0x374] ss:$36 sps:$4 sm:$0xff]   ;;  %v10369_v6 = vld [vmem:[#allocation3 + $0x3bc] ss:$36 sps:$4 sm:$0xff]  }
  0xf7   : >> { %v9222_v53 = vpack.c.bf16 %v1818_v47, %v1818_v47  ;;  %2008 = vst [vmem:[#allocation3 + $0x450] sm:$0xf] %v9221_v48  ;;  %v2220_v59 = vsel %vm839_vm1, %v2213_v46, %v2214_v49  ;;  %v9283_v60 = vpack.c.bf16 %v2221_v54, %v2221_v54  ;;  %v9285_v61 = vpack.c.bf16 %v2219_v57, %v2219_v57  ;;  %v10366_v5 = vld [vmem:[#allocation3 + $0x370] ss:$36 sps:$4 sm:$0xff]   ;;  %v10371_v7 = vld [vmem:[#allocation3 + $0x184] ss:$36 sps:$4 sm:$0xff]  }
  0xf8   : >> { %v9286_v62 = vpack.c.bf16 %v2218_v55, %v2218_v55  ;;  %v9284_v3 = vpack.c.bf16 %v2220_v59, %v2220_v59  ;;  %v10374_v18 = vld [vmem:[#allocation3 + $0x180] ss:$36 sps:$4 sm:$0xff]   ;;  %v10377_v21 = vld [vmem:[#allocation3 + $0x1cc] ss:$36 sps:$4 sm:$0xff]   ;;  %v10384_v39 = vld [vmem:[#allocation3 + $0x214] ss:$36 sps:$4 sm:$0xff]  }
  0xf9   : >> { %2009 = vst [vmem:[#allocation3 + $0x474] sm:$0xf] %v9222_v53  ;;  %2406 = vst [vmem:[#allocation3 + $0x410] sm:$0xf] %v9283_v60  ;;  %v10375_v17 = vld [vmem:[#allocation3 + $0x404] ss:$36 sps:$4 sm:$0xff]  }
  0xfa   : >> { %4320 = vmatmul.mubr.bf16.gmra.mxu0 %v10347_v9  ;;  %2408 = vst [vmem:[#allocation3 + $0x458] sm:$0xf] %v9285_v61  ;;  %2409 = vst [vmem:[#allocation3 + $0x47c] sm:$0xf] %v9286_v62  ;;  %v10379_v31 = vld [vmem:[#allocation3 + $0x400] ss:$36 sps:$4 sm:$0xff]  }
  0xfb   : >> { %4417 = vmatmul.mubr.bf16.gmra.mxu1 %v10348_v0  ;;  %4327 = vmatprep.mubr.bf16.mxu0 %v10349_v14  ;;  %2407 = vst [vmem:[#allocation3 + $0x434] sm:$0xf] %v9284_v3  ;;  %v10373_v14 = vld [vmem:[#allocation3 + $0x3b8] ss:$36 sps:$4 sm:$0xff]   ;;  %v10380_v35 = vld [vmem:[#allocation3 + $0x1c8] ss:$36 sps:$4 sm:$0xff]  }
  0xfc   : >> { %4424 = vmatprep.mubr.bf16.mxu1 %v10351_v25  ;;  %v10382_v36 = vld [vmem:[#allocation3 + $0x44c] ss:$36 sps:$4 sm:$0xff]   ;;  %v10391_v53 = vld [vmem:[#allocation3 + $0x20] ss:$36 sps:$4 sm:$0xff]  }
  0xfd   : >> { %v10386_v48 = vld [vmem:[#allocation3 + $0x448] ss:$36 sps:$4 sm:$0xff]   ;;  %v10390_v57 = vld [vmem:[#allocation3 + $0x25c] ss:$36 sps:$4 sm:$0xff]  }
 0x102   : >> { %4328 = vmatmul.mubr.bf16.gmra.mxu0 %v10353_v50 }
 0x103   : >> { %4425 = vmatmul.mubr.bf16.gmra.mxu1 %v10354_v58  ;;  %4335 = vmatprep.mubr.bf16.mxu0 %v10356_v52  ;;  %v10387_v52 = vld [vmem:[#allocation3 + $0x210] ss:$36 sps:$4 sm:$0xff]  }
 0x104   : >> { %4432 = vmatprep.mubr.bf16.mxu1 %v10358_v2 }
 0x10a   : >> { %4336 = vmatmul.mubr.bf16.gmra.mxu0 %v10360_v32 }
 0x10b   : >> { %4433 = vmatmul.mubr.bf16.gmra.mxu1 %v10361_v4  ;;  %4343 = vmatprep.mubr.bf16.mxu0 %v10362_v51  ;;  %v10392_v51 = vld [vmem:[#allocation3 + $0x68] ss:$36 sps:$4 sm:$0xff]  }
 0x10c   : >> { %4440 = vmatprep.mubr.bf16.mxu1 %v10364_v41 }
 0x112   : >> { %v9592_v56 = vpop.f32.mrf.mxu0  ;;  %4344 = vmatmul.mubr.bf16.gmra.mxu0 %v10366_v5  ;;  %v10388_v5 = vld [vmem:[#allocation3 + $0x258] ss:$36 sps:$4 sm:$0xff]  }
 0x113   : >> { %v9664_v8 = vpop.f32.mrf.mxu1  ;;  %4441 = vmatmul.mubr.bf16.gmra.mxu1 %v10367_v29  ;;  %4351 = vmatprep.mubr.bf16.mxu0 %v10369_v6  ;;  %v10396_v29 = vld [vmem:[#allocation3 + $0xb0] ss:$36 sps:$4 sm:$0xff]  }
 0x114   : >> { %v9593_v9 = vpop.f32.mrf.mxu0  ;;  %4448 = vmatprep.mubr.bf16.mxu1 %v10371_v7 }
 0x115   : >> { %v9665_v10 = vpop.f32.mrf.mxu1  ;;  %v11533_v12 = vadd.f32 %v9593_v9, %v9592_v56  ;;  %v10395_v56 = vld [vmem:[#allocation3 + $0x2a4] ss:$36 sps:$4 sm:$0xff]  }
 0x116   : >> { %v11535_v63 = vadd.f32 %v9665_v10, %v9664_v8  ;;  %v9595_v13 = vpop.f32.mrf.mxu0 }
 0x117   : >> { %v9667_v0 = vpop.f32.mrf.mxu1 }
 0x118   : >> { %v9596_v15 = vpop.f32.mrf.mxu0 }
 0x119   : >> { %v9668_v16 = vpop.f32.mrf.mxu1  ;;  %v11537_v19 = vadd.f32 %v9596_v15, %v9595_v13  ;;  %v11569_v13 = vld [vmem:[%s2717_s10] ss:$0 sm:$0xff] }
 0x11a   : >> { %v11539_v20 = vadd.f32 %v9668_v16, %v9667_v0  ;;  %v9598_v22 = vpop.f32.mrf.mxu0  ;;  %4352 = vmatmul.mubr.bf16.gmra.mxu0 %v10373_v14  ;;  %v3928_v15 = vadd.f32 %v11533_v12, %v11569_v13 }
 0x11b   : >> { %v9670_v23 = vpop.f32.mrf.mxu1  ;;  %4449 = vmatmul.mubr.bf16.gmra.mxu1 %v10374_v18  ;;  %4359 = vmatprep.mubr.bf16.mxu0 %v10375_v17  ;;  %v10397_v17 = vld [vmem:[#allocation3 + $0xf8] ss:$36 sps:$4 sm:$0xff]  }
 0x11c   : >> { %v9599_v24 = vpop.f32.mrf.mxu0  ;;  %4456 = vmatprep.mubr.bf16.mxu1 %v10377_v21 }
 0x11d   : >> { %v9671_v25 = vpop.f32.mrf.mxu1  ;;  %v11541_v26 = vadd.f32 %v9599_v24, %v9598_v22  ;;  %v10393_v22 = vld [vmem:[#allocation3 + $0x2a0] ss:$36 sps:$4 sm:$0xff]  }
 0x11e   : >> { %v11543_v27 = vadd.f32 %v9671_v25, %v9670_v23  ;;  %v9601_v28 = vpop.f32.mrf.mxu0  ;;  %v10401_v23 = vld [vmem:[#allocation3 + $0x140] ss:$36 sps:$4 sm:$0xff]  }
 0x11f   : >> { %v9673_v30 = vpop.f32.mrf.mxu1 }
 0x120   : >> { %v9602_v33 = vpop.f32.mrf.mxu0 }
 0x121   : >> { %v9674_v34 = vpop.f32.mrf.mxu1  ;;  %v11545_v37 = vadd.f32 %v9602_v33, %v9601_v28  ;;  %v10400_v28 = vld [vmem:[#allocation3 + $0x2ec] ss:$36 sps:$4 sm:$0xff]   ;;  %v3931_v33 = vadd.f32 %v11537_v19, %v11569_v13 }
 0x122   : >> { %v11547_v38 = vadd.f32 %v9674_v34, %v9673_v30  ;;  %v9604_v40 = vpop.f32.mrf.mxu0  ;;  %4360 = vmatmul.mubr.bf16.gmra.mxu0 %v10379_v31 }
 0x123   : >> { %v9676_v42 = vpop.f32.mrf.mxu1  ;;  %4457 = vmatmul.mubr.bf16.gmra.mxu1 %v10380_v35  ;;  %4367 = vmatprep.mubr.bf16.mxu0 %v10382_v36 }
 0x124   : >> { %v9605_v43 = vpop.f32.mrf.mxu0  ;;  %4464 = vmatprep.mubr.bf16.mxu1 %v10384_v39 }
 0x125   : >> { %v9677_v11 = vpop.f32.mrf.mxu1  ;;  %v11549_v44 = vadd.f32 %v9605_v43, %v9604_v40  ;;  %v3936_v43 = vadd.f32 %v11541_v26, %v11569_v13 }
 0x126   : >> { %v11551_v45 = vadd.f32 %v9677_v11, %v9676_v42  ;;  %v9607_v46 = vpop.f32.mrf.mxu0 }
 0x127   : >> { %v9679_v47 = vpop.f32.mrf.mxu1 }
 0x128   : >> { %v9608_v49 = vpop.f32.mrf.mxu0 }
 0x129   : >> { %v9680_v50 = vpop.f32.mrf.mxu1  ;;  %v11553_v54 = vadd.f32 %v9608_v49, %v9607_v46  ;;  %v10406_v49 = vld [vmem:[#allocation3 + $0x1d0] ss:$36 sps:$4 sm:$0xff]  }
 0x12a   : >> { %v11555_v55 = vadd.f32 %v9680_v50, %v9679_v47  ;;  %v9610_v58 = vpop.f32.mrf.mxu0  ;;  %4368 = vmatmul.mubr.bf16.gmra.mxu0 %v10386_v48  ;;  %v10402_v47 = vld [vmem:[#allocation3 + $0x188] ss:$36 sps:$4 sm:$0xff]  }
 0x12b   : >> { %v9682_v59 = vpop.f32.mrf.mxu1  ;;  %4465 = vmatmul.mubr.bf16.gmra.mxu1 %v10387_v52  ;;  %10082 = vmatprep.mubr.bf16.mxu0 %v10391_v53  ;;  %v10398_v48 = vld [vmem:[#allocation3 + $0x2e8] ss:$36 sps:$4 sm:$0xff]   ;;  %v10405_v53 = vld [vmem:[#allocation3 + $0x334] ss:$36 sps:$4 sm:$0xff]  }
 0x12c   : >> { %v9611_v60 = vpop.f32.mrf.mxu0  ;;  %4472 = vmatprep.mubr.bf16.mxu1 %v10390_v57 }
 0x12d   : >> { %v9683_v61 = vpop.f32.mrf.mxu1  ;;  %v11557_v62 = vadd.f32 %v9611_v60, %v9610_v58 }
 0x12e   : >> { %v11559_v2 = vadd.f32 %v9683_v61, %v9682_v59  ;;  %v9613_v3 = vpop.f32.mrf.mxu0  ;;  %v3939_v59 = vadd.f32 %v11545_v37, %v11569_v13 }
 0x12f   : >> { %v9685_v32 = vpop.f32.mrf.mxu1 }
 0x130   : >> { %v9614_v4 = vpop.f32.mrf.mxu0 }
 0x131   : >> { %v9686_v41 = vpop.f32.mrf.mxu1  ;;  %v11561_v6 = vadd.f32 %v9614_v4, %v9613_v3 }
 0x132   : >> { %v11563_v7 = vadd.f32 %v9686_v41, %v9685_v32  ;;  %v9616_v8 = vpop.f32.mrf.mxu0  ;;  %10083 = vmatmul.mubr.bf16.vlgmr.msra.gmra.mxu0 %v10392_v51  ;;  %v3944_v41 = vadd.f32 %v11549_v44, %v11569_v13 }
 0x133   : >> { %v9704_v9 = vpop.f32.mrf.mxu1  ;;  %4473 = vmatmul.mubr.bf16.gmra.mxu1 %v10388_v5  ;;  %10086 = vmatprep.mubr.bf16.mxu0 %v10396_v29 }
 0x134   : >> { %v9617_v10 = vpop.f32.mrf.mxu0  ;;  %4480 = vmatprep.mubr.bf16.mxu1 %v10395_v56  ;;  %v10407_v56 = vld [vmem:[#allocation3 + $0x218] ss:$36 sps:$4 sm:$0xff]  }
 0x135   : >> { %v11571_v0 = vadd.f32 %v9617_v10, %v9616_v8  ;;  %v9705_v14 = vpop.f32.mrf.mxu1  ;;  %v10403_v8 = vld [vmem:[#allocation3 + $0x330] ss:$36 sps:$4 sm:$0xff]  }
 0x136   : >> { %v9706_v16 = vadd.f32 %v9705_v14, %v9704_v9  ;;  %v9619_v18 = vpop.f32.mrf.mxu0  ;;  %v10411_v9 = vld [vmem:[#allocation3 + $0x260] ss:$36 sps:$4 sm:$0xff]  }
 0x137   : >> { %v9707_v21 = vpop.f32.mrf.mxu1 }
 0x138   : >> { %v11575_v24 = vadd.f32 %v9706_v16, %v3928_v15  ;;  %v9620_v25 = vpop.f32.mrf.mxu0  ;;  %v10410_v15 = vld [vmem:[#allocation3 + $0x37c] ss:$36 sps:$4 sm:$0xff]  }
 0x139   : >> { %v11577_v30 = vadd.f32 %v9620_v25, %v9619_v18  ;;  %v9708_v31 = vpop.f32.mrf.mxu1 }
 0x13a   : >> { %v9709_v34 = vadd.f32 %v9708_v31, %v9707_v21  ;;  %v9622_v35 = vpop.f32.mrf.mxu0  ;;  %10087 = vmatmul.mubr.bf16.gmra.mxu0 %v10397_v17  ;;  %v3947_v17 = vadd.f32 %v11553_v54, %v11569_v13 }
 0x13b   : >> { %v9710_v12 = vpop.f32.mrf.mxu1  ;;  %4481 = vmatmul.mubr.bf16.gmra.mxu1 %v10393_v22  ;;  %10090 = vmatprep.mubr.bf16.mxu0 %v10401_v23 }
 0x13c   : >> { %v11581_v36 = vadd.f32 %v9709_v34, %v3931_v33  ;;  %v9623_v39 = vpop.f32.mrf.mxu0  ;;  %4488 = vmatprep.mubr.bf16.mxu1 %v10400_v28  ;;  %v3952_v33 = vadd.f32 %v11557_v62, %v11569_v13 }
 0x13d   : >> { %v11583_v40 = vadd.f32 %v9623_v39, %v9622_v35  ;;  %v9711_v42 = vpop.f32.mrf.mxu1  ;;  %v10408_v39 = vld [vmem:[#allocation3 + $0x378] ss:$36 sps:$4 sm:$0xff]  }
 0x13e   : >> { %v9712_v11 = vadd.f32 %v9711_v42, %v9710_v12  ;;  %v9625_v46 = vpop.f32.mrf.mxu0  ;;  %v10412_v12 = vld [vmem:[#allocation3 + $0x2a8] ss:$36 sps:$4 sm:$0xff]   ;;  %v10416_v42 = vld [vmem:[#allocation3 + $0x2f0] ss:$36 sps:$4 sm:$0xff]  }
 0x13f   : >> { %v9713_v19 = vpop.f32.mrf.mxu1 }
 0x140   : >> { %v11587_v50 = vadd.f32 %v9712_v11, %v3936_v43  ;;  %v9626_v52 = vpop.f32.mrf.mxu0 }
 0x141   : >> { %v11589_v57 = vadd.f32 %v9626_v52, %v9625_v46  ;;  %v9714_v58 = vpop.f32.mrf.mxu1  ;;  %v10415_v46 = vld [vmem:[#allocation3 + $0x3c4] ss:$36 sps:$4 sm:$0xff]  }
 0x142   : >> { %v9715_v60 = vadd.f32 %v9714_v58, %v9713_v19  ;;  %v9628_v61 = vpop.f32.mrf.mxu0  ;;  %10091 = vmatmul.mubr.bf16.gmra.mxu0 %v10402_v47 }
 0x143   : >> { %v9716_v26 = vpop.f32.mrf.mxu1  ;;  %4489 = vmatmul.mubr.bf16.gmra.mxu1 %v10398_v48  ;;  %10094 = vmatprep.mubr.bf16.mxu0 %v10406_v49  ;;  %v3955_v48 = vadd.f32 %v11561_v6, %v11569_v13 }
 0x144   : >> { %v11593_v3 = vadd.f32 %v9715_v60, %v3939_v59  ;;  %v9629_v32 = vpop.f32.mrf.mxu0  ;;  %4496 = vmatprep.mubr.bf16.mxu1 %v10405_v53 }
 0x145   : >> { %v11595_v51 = vadd.f32 %v9629_v32, %v9628_v61  ;;  %v9717_v4 = vpop.f32.mrf.mxu1  ;;  %v3960_v61 = vadd.f32 %v11571_v0, %v11569_v13 }
 0x146   : >> { %v9718_v5 = vadd.f32 %v9717_v4, %v9716_v26  ;;  %v9631_v29 = vpop.f32.mrf.mxu0  ;;  %v10417_v4 = vld [vmem:[#allocation3 + $0x338] ss:$36 sps:$4 sm:$0xff]  }
 0x147   : >> { %v9719_v37 = vpop.f32.mrf.mxu1 }
 0x148   : >> { %v11599_v10 = vadd.f32 %v9718_v5, %v3944_v41  ;;  %v9632_v14 = vpop.f32.mrf.mxu0  ;;  %v10413_v41 = vld [vmem:[#allocation3 + $0x3c0] ss:$36 sps:$4 sm:$0xff]  }
 0x149   : >> { %v11601_v16 = vadd.f32 %v9632_v14, %v9631_v29  ;;  %v9720_v18 = vpop.f32.mrf.mxu1  ;;  %v10421_v5 = vld [vmem:[#allocation3 + $0x380] ss:$36 sps:$4 sm:$0xff]   ;;  %v3963_v14 = vadd.f32 %v11577_v30, %v11569_v13 }
 0x14a   : >> { %v9721_v21 = vadd.f32 %v9720_v18, %v9719_v37  ;;  %v9634_v22 = vpop.f32.mrf.mxu0  ;;  %10095 = vmatmul.mubr.bf16.gmra.mxu0 %v10407_v56  ;;  %v10420_v37 = vld [vmem:[#allocation3 + $0x40c] ss:$36 sps:$4 sm:$0xff]  }
 0x14b   : >> { %v9722_v44 = vpop.f32.mrf.mxu1  ;;  %4497 = vmatmul.mubr.bf16.gmra.mxu1 %v10403_v8  ;;  %10098 = vmatprep.mubr.bf16.mxu0 %v10411_v9 }
 0x14c   : >> { %v11605_v23 = vadd.f32 %v9721_v21, %v3947_v17  ;;  %v9635_v25 = vpop.f32.mrf.mxu0  ;;  %4504 = vmatprep.mubr.bf16.mxu1 %v10410_v15 }
 0x14d   : >> { %v11607_v28 = vadd.f32 %v9635_v25, %v9634_v22  ;;  %v9723_v31 = vpop.f32.mrf.mxu1  ;;  %v3968_v25 = vadd.f32 %v11583_v40, %v11569_v13 }
 0x14e   : >> { %v9724_v34 = vadd.f32 %v9723_v31, %v9722_v44  ;;  %v9637_v35 = vpop.f32.mrf.mxu0 }
 0x14f   : >> { %v9725_v54 = vpop.f32.mrf.mxu1 }
 0x150   : >> { %v11611_v43 = vadd.f32 %v9724_v34, %v3952_v33  ;;  %v9638_v11 = vpop.f32.mrf.mxu0  ;;  %v10422_v34 = vld [vmem:[#allocation3 + $0x3c8] ss:$36 sps:$4 sm:$0xff]  }
 0x151   : >> { %v11613_v47 = vadd.f32 %v9638_v11, %v9637_v35  ;;  %v9726_v19 = vpop.f32.mrf.mxu1  ;;  %v10418_v35 = vld [vmem:[#allocation3 + $0x408] ss:$36 sps:$4 sm:$0xff]  }
 0x152   : >> { %v9727_v49 = vadd.f32 %v9726_v19, %v9725_v54  ;;  %v9640_v52 = vpop.f32.mrf.mxu0  ;;  %10099 = vmatmul.mubr.bf16.gmra.mxu0 %v10412_v12  ;;  %v10426_v12 = vld [vmem:[#allocation3 + $0x410] ss:$36 sps:$4 sm:$0xff]   ;;  %v3971_v19 = vadd.f32 %v11589_v57, %v11569_v13 }
 0x153   : >> { %v9728_v62 = vpop.f32.mrf.mxu1  ;;  %4505 = vmatmul.mubr.bf16.gmra.mxu1 %v10408_v39  ;;  %10102 = vmatprep.mubr.bf16.mxu0 %v10416_v42  ;;  %v10425_v42 = vld [vmem:[#allocation3 + $0x454] ss:$36 sps:$4 sm:$0xff]  }
 0x154   : >> { %v11617_v53 = vadd.f32 %v9727_v49, %v3955_v48  ;;  %v9641_v58 = vpop.f32.mrf.mxu0  ;;  %4512 = vmatprep.mubr.bf16.mxu1 %v10415_v46 }
 0x155   : >> { %v11619_v59 = vadd.f32 %v9641_v58, %v9640_v52  ;;  %v9729_v60 = vpop.f32.mrf.mxu1 }
 0x156   : >> { %v9730_v26 = vadd.f32 %v9729_v60, %v9728_v62  ;;  %v9643_v32 = vpop.f32.mrf.mxu0 }
 0x157   : >> { %v9731_v6 = vpop.f32.mrf.mxu1 }
 0x158   : >> { %v11623_v29 = vadd.f32 %v9730_v26, %v3960_v61  ;;  %v9644_v56 = vpop.f32.mrf.mxu0  ;;  %v3976_v61 = vadd.f32 %v11595_v51, %v11569_v13 }
 0x159   : >> { %v11625_v8 = vadd.f32 %v9644_v56, %v9643_v32  ;;  %v9732_v9 = vpop.f32.mrf.mxu1 }
 0x15a   : >> { %v9733_v15 = vadd.f32 %v9732_v9, %v9731_v6  ;;  %v9646_v18 = vpop.f32.mrf.mxu0  ;;  %10103 = vmatmul.mubr.bf16.gmra.mxu0 %v10417_v4  ;;  %v10427_v4 = vld [vmem:[#allocation3 + $0x458] ss:$36 sps:$4 sm:$0xff]   ;;  %v10423_v6 = vld [vmem:[#allocation3 + $0x450] ss:$36 sps:$4 sm:$0xff]   ;;  %v3979_v9 = vadd.f32 %v11601_v16, %v11569_v13 }
 0x15b   : >> { %v9734_v0 = vpop.f32.mrf.mxu1  ;;  %4513 = vmatmul.mubr.bf16.gmra.mxu1 %v10413_v41  ;;  %10106 = vmatprep.mubr.bf16.mxu0 %v10421_v5 }
 0x15c   : >> { %v11629_v17 = vadd.f32 %v9733_v15, %v3963_v14  ;;  %v9647_v21 = vpop.f32.mrf.mxu0  ;;  %4520 = vmatprep.mubr.bf16.mxu1 %v10420_v37 }
 0x15d   : >> { %v11631_v22 = vadd.f32 %v9647_v21, %v9646_v18  ;;  %v9735_v44 = vpop.f32.mrf.mxu1 }
 0x15e   : >> { %v9736_v31 = vadd.f32 %v9735_v44, %v9734_v0  ;;  %v9649_v33 = vpop.f32.mrf.mxu0 }
 0x15f   : >> { %v9737_v30 = vpop.f32.mrf.mxu1 }
 0x160   : >> { %v11635_v54 = vadd.f32 %v9736_v31, %v3968_v25  ;;  %v9650_v39 = vpop.f32.mrf.mxu0  ;;  %v3984_v25 = vadd.f32 %v11607_v28, %v11569_v13 }
 0x161   : >> { %v11637_v11 = vadd.f32 %v9650_v39, %v9649_v33  ;;  %v9738_v46 = vpop.f32.mrf.mxu1  ;;  %v3987_v39 = vadd.f32 %v11613_v47, %v11569_v13 }
 0x162   : >> { %v9739_v48 = vadd.f32 %v9738_v46, %v9737_v30  ;;  %v9652_v49 = vpop.f32.mrf.mxu0  ;;  %10107 = vmatmul.mubr.bf16.gmra.mxu0 %v10422_v34 }
 0x163   : >> { %v9740_v40 = vpop.f32.mrf.mxu1  ;;  %4521 = vmatmul.mubr.bf16.gmra.mxu1 %v10418_v35  ;;  %10110 = vmatprep.mubr.bf16.mxu0 %v10426_v12 }
 0x164   : >> { %v11641_v52 = vadd.f32 %v9739_v48, %v3971_v19  ;;  %v9653_v62 = vpop.f32.mrf.mxu0  ;;  %4528 = vmatprep.mubr.bf16.mxu1 %v10425_v42 }
 0x165   : >> { %v11643_v58 = vadd.f32 %v9653_v62, %v9652_v49  ;;  %v9741_v60 = vpop.f32.mrf.mxu1  ;;  %v3992_v62 = vadd.f32 %v11619_v59, %v11569_v13 }
 0x166   : >> { %v9742_v26 = vadd.f32 %v9741_v60, %v9740_v40  ;;  %v9655_v32 = vpop.f32.mrf.mxu0 }
 0x167   : >> { %v9743_v57 = vpop.f32.mrf.mxu1 }
 0x168   : >> { %v11647_v41 = vadd.f32 %v9742_v26, %v3976_v61  ;;  %v9656_v5 = vpop.f32.mrf.mxu0 }
 0x169   : >> { %v11649_v56 = vadd.f32 %v9656_v5, %v9655_v32  ;;  %v9744_v37 = vpop.f32.mrf.mxu1  ;;  %v3995_v5 = vadd.f32 %v11625_v8, %v11569_v13 }
 0x16a   : >> { %v9745_v14 = vadd.f32 %v9744_v37, %v9743_v57  ;;  %v9658_v15 = vpop.f32.mrf.mxu0  ;;  %10111 = vmatmul.mubr.bf16.gmra.mxu0 %v10427_v4 }
 0x16b   : >> { %v9746_v18 = vpop.f32.mrf.mxu1  ;;  %4529 = vmatmul.mubr.bf16.gmra.mxu1 %v10423_v6 }
 0x16c   : >> { %v11653_v51 = vadd.f32 %v9745_v14, %v3979_v9  ;;  %v9659_v0 = vpop.f32.mrf.mxu0 }
 0x16d   : >> { %v11655_v21 = vadd.f32 %v9659_v0, %v9658_v15  ;;  %v9747_v44 = vpop.f32.mrf.mxu1 }
 0x16e   : >> { %v9748_v31 = vadd.f32 %v9747_v44, %v9746_v18  ;;  %v9661_v33 = vpop.f32.mrf.mxu0  ;;  %v4000_v44 = vadd.f32 %v11631_v22, %v11569_v13 }
 0x16f   : >> { %v9749_v34 = vpop.f32.mrf.mxu1 }
 0x170   : >> { %v11659_v30 = vadd.f32 %v9748_v31, %v3984_v25  ;;  %v9662_v16 = vpop.f32.mrf.mxu0 }
 0x171   : >> { %v11661_v35 = vadd.f32 %v9662_v16, %v9661_v33  ;;  %v9750_v12 = vpop.f32.mrf.mxu1 }
 0x172   : >> { %v9751_v42 = vadd.f32 %v9750_v12, %v9749_v34  ;;  %v9816_v46 = vpop.f32.mrf.mxu0 }
 0x173   : >> { %v9752_v19 = vpop.f32.mrf.mxu1 }
 0x174   : >> { %v11665_v48 = vadd.f32 %v9751_v42, %v3987_v39  ;;  %v9817_v49 = vpop.f32.mrf.mxu0  ;;  %v4003_v39 = vadd.f32 %v11637_v11, %v11569_v13 }
 0x175   : >> { %v9753_v40 = vpop.f32.mrf.mxu1  ;;  %v9818_v28 = vadd.f32 %v9817_v49, %v9816_v46 }
 0x176   : >> { %v9754_v60 = vadd.f32 %v9753_v40, %v9752_v19  ;;  %v9819_v61 = vpop.f32.mrf.mxu0 }
 0x177   : >> { %v11670_v26 = vadd.f32 %v9818_v28, %v11575_v24  ;;  %v9755_v32 = vpop.f32.mrf.mxu1 }
 0x178   : >> { %v11672_v4 = vadd.f32 %v9754_v60, %v3992_v62  ;;  %v9820_v47 = vpop.f32.mrf.mxu0  ;;  %v4008_v62 = vadd.f32 %v11643_v58, %v11569_v13 }
 0x179   : >> { %v9756_v57 = vpop.f32.mrf.mxu1  ;;  %v9821_v6 = vadd.f32 %v9820_v47, %v9819_v61 }
 0x17a   : >> { %v9757_v37 = vadd.f32 %v9756_v57, %v9755_v32  ;;  %v9822_v9 = vpop.f32.mrf.mxu0 }
 0x17b   : >> { %v11677_v14 = vadd.f32 %v9821_v6, %v11581_v36  ;;  %v9758_v59 = vpop.f32.mrf.mxu1 }
 0x17c   : >> { %v11679_v15 = vadd.f32 %v9757_v37, %v3995_v5  ;;  %v9823_v18 = vpop.f32.mrf.mxu0  ;;  %v4011_v5 = vadd.f32 %v11649_v56, %v11569_v13 }
 0x17d   : >> { %v9759_v24 = vpop.f32.mrf.mxu1  ;;  %v9824_v0 = vadd.f32 %v9823_v18, %v9822_v9 }
 0x17e   : >> { %v9760_v25 = vadd.f32 %v9759_v24, %v9758_v59  ;;  %v9825_v31 = vpop.f32.mrf.mxu0 }
 0x17f   : >> { %v11684_v33 = vadd.f32 %v9824_v0, %v11587_v50  ;;  %v9761_v8 = vpop.f32.mrf.mxu1 }
 0x180   : >> { %v11686_v34 = vadd.f32 %v9760_v25, %v4000_v44  ;;  %v9826_v16 = vpop.f32.mrf.mxu0  ;;  %v4016_v44 = vadd.f32 %v11655_v21, %v11569_v13 }
 0x181   : >> { %v9762_v36 = vpop.f32.mrf.mxu1  ;;  %v9827_v12 = vadd.f32 %v9826_v16, %v9825_v31 }
 0x182   : >> { %v9763_v42 = vadd.f32 %v9762_v36, %v9761_v8  ;;  %v9828_v46 = vpop.f32.mrf.mxu0 }
 0x183   : >> { %v11691_v19 = vadd.f32 %v9827_v12, %v11593_v3  ;;  %v9764_v22 = vpop.f32.mrf.mxu1 }
 0x184   : >> { %v11693_v49 = vadd.f32 %v9763_v42, %v4003_v39  ;;  %v9829_v40 = vpop.f32.mrf.mxu0  ;;  %v4019_v39 = vadd.f32 %v11661_v35, %v11569_v13 }
 0x185   : >> { %v9765_v50 = vpop.f32.mrf.mxu1  ;;  %v9830_v28 = vadd.f32 %v9829_v40, %v9828_v46 }
 0x186   : >> { %v9766_v60 = vadd.f32 %v9765_v50, %v9764_v22  ;;  %v9831_v61 = vpop.f32.mrf.mxu0 }
 0x187   : >> { %v11698_v32 = vadd.f32 %v9830_v28, %v11599_v10  ;;  %v9767_v11 = vpop.f32.mrf.mxu1 }
 0x188   : >> { %v11700_v47 = vadd.f32 %v9766_v60, %v4008_v62  ;;  %v9832_v57 = vpop.f32.mrf.mxu0  ;;  %v4024_v62 = vadd.f32 %v11535_v63, %v11569_v13 }
 0x189   : >> { %v9768_v3 = vpop.f32.mrf.mxu1  ;;  %v9833_v6 = vadd.f32 %v9832_v57, %v9831_v61 }
 0x18a   : >> { %v9769_v37 = vadd.f32 %v9768_v3, %v9767_v11  ;;  %v9834_v9 = vpop.f32.mrf.mxu0 }
 0x18b   : >> { %v11705_v59 = vadd.f32 %v9833_v6, %v11605_v23  ;;  %v9770_v58 = vpop.f32.mrf.mxu1 }
 0x18c   : >> { %v11707_v18 = vadd.f32 %v9769_v37, %v4011_v5  ;;  %v9835_v24 = vpop.f32.mrf.mxu0  ;;  %v4027_v5 = vadd.f32 %v11539_v20, %v11569_v13 }
 0x18d   : >> { %v9771_v10 = vpop.f32.mrf.mxu1  ;;  %v9836_v0 = vadd.f32 %v9835_v24, %v9834_v9 }
 0x18e   : >> { %v9772_v25 = vadd.f32 %v9771_v10, %v9770_v58  ;;  %v9837_v31 = vpop.f32.mrf.mxu0 }
 0x18f   : >> { %v11712_v8 = vadd.f32 %v9836_v0, %v11611_v43  ;;  %v9773_v56 = vpop.f32.mrf.mxu1 }
 0x190   : >> { %v11714_v16 = vadd.f32 %v9772_v25, %v4016_v44  ;;  %v9838_v36 = vpop.f32.mrf.mxu0  ;;  %v4032_v44 = vadd.f32 %v11543_v27, %v11569_v13 }
 0x191   : >> { %v9774_v23 = vpop.f32.mrf.mxu1  ;;  %v9839_v12 = vadd.f32 %v9838_v36, %v9837_v31 }
 0x192   : >> { %v9775_v42 = vadd.f32 %v9774_v23, %v9773_v56  ;;  %v9840_v46 = vpop.f32.mrf.mxu0 }
 0x193   : >> { %v11719_v22 = vadd.f32 %v9839_v12, %v11617_v53  ;;  %v9776_v21 = vpop.f32.mrf.mxu1 }
 0x194   : >> { %v11721_v40 = vadd.f32 %v9775_v42, %v4019_v39  ;;  %v9841_v50 = vpop.f32.mrf.mxu0  ;;  %v4035_v39 = vadd.f32 %v11547_v38, %v11569_v13 }
 0x195   : >> { %v9777_v43 = vpop.f32.mrf.mxu1  ;;  %v9842_v28 = vadd.f32 %v9841_v50, %v9840_v46 }
 0x196   : >> { %v9778_v60 = vadd.f32 %v9777_v43, %v9776_v21  ;;  %v9843_v61 = vpop.f32.mrf.mxu0 }
 0x197   : >> { %v11726_v11 = vadd.f32 %v9842_v28, %v11623_v29  ;;  %v9779_v35 = vpop.f32.mrf.mxu1 }
 0x198   : >> { %v11728_v57 = vadd.f32 %v9778_v60, %v4024_v62  ;;  %v9844_v3 = vpop.f32.mrf.mxu0  ;;  %v4040_v62 = vadd.f32 %v11551_v45, %v11569_v13 }
 0x199   : >> { %v9780_v53 = vpop.f32.mrf.mxu1  ;;  %v9845_v6 = vadd.f32 %v9844_v3, %v9843_v61 }
 0x19a   : >> { %v9781_v37 = vadd.f32 %v9780_v53, %v9779_v35  ;;  %v9846_v9 = vpop.f32.mrf.mxu0 }
 0x19b   : >> { %v11733_v58 = vadd.f32 %v9845_v6, %v11629_v17  ;;  %v9782_v63 = vpop.f32.mrf.mxu1 }
 0x19c   : >> { %v11735_v24 = vadd.f32 %v9781_v37, %v4027_v5  ;;  %v9847_v10 = vpop.f32.mrf.mxu0  ;;  %v4043_v5 = vadd.f32 %v11555_v55, %v11569_v13 }
 0x19d   : >> { %v9783_v29 = vpop.f32.mrf.mxu1  ;;  %v9848_v0 = vadd.f32 %v9847_v10, %v9846_v9 }
 0x19e   : >> { %v9784_v25 = vadd.f32 %v9783_v29, %v9782_v63  ;;  %v9849_v31 = vpop.f32.mrf.mxu0 }
 0x19f   : >> { %v11740_v56 = vadd.f32 %v9848_v0, %v11635_v54  ;;  %v9785_v20 = vpop.f32.mrf.mxu1 }
 0x1a0   : >> { %v11742_v36 = vadd.f32 %v9784_v25, %v4032_v44  ;;  %v9850_v23 = vpop.f32.mrf.mxu0  ;;  %v4048_v44 = vadd.f32 %v11559_v2, %v11569_v13 }
 0x1a1   : >> { %v9786_v17 = vpop.f32.mrf.mxu1  ;;  %v9851_v12 = vadd.f32 %v9850_v23, %v9849_v31 }
 0x1a2   : >> { %v9787_v42 = vadd.f32 %v9786_v17, %v9785_v20  ;;  %v9852_v46 = vpop.f32.mrf.mxu0 }
 0x1a3   : >> { %v11747_v21 = vadd.f32 %v9851_v12, %v11641_v52  ;;  %v9788_v27 = vpop.f32.mrf.mxu1 }
 0x1a4   : >> { %v11749_v50 = vadd.f32 %v9787_v42, %v4035_v39  ;;  %v9853_v43 = vpop.f32.mrf.mxu0  ;;  %v4051_v39 = vadd.f32 %v11563_v7, %v11569_v13 }
 0x1a5   : >> { %v9789_v54 = vpop.f32.mrf.mxu1  ;;  %v9854_v28 = vadd.f32 %v9853_v43, %v9852_v46 }
 0x1a6   : >> { %v9790_v60 = vadd.f32 %v9789_v54, %v9788_v27  ;;  %v9855_v61 = vpop.f32.mrf.mxu0 }
 0x1a7   : >> { %v11754_v35 = vadd.f32 %v9854_v28, %v11647_v41  ;;  %v9791_v38 = vpop.f32.mrf.mxu1 }
 0x1a8   : >> { %v11756_v3 = vadd.f32 %v9790_v60, %v4040_v62  ;;  %v9856_v53 = vpop.f32.mrf.mxu0 }
 0x1a9   : >> { %v9792_v52 = vpop.f32.mrf.mxu1  ;;  %v9857_v6 = vadd.f32 %v9856_v53, %v9855_v61 }
 0x1aa   : >> { %v9793_v37 = vadd.f32 %v9792_v52, %v9791_v38  ;;  %v9858_v9 = vpop.f32.mrf.mxu0 }
 0x1ab   : >> { %v11761_v63 = vadd.f32 %v9857_v6, %v11653_v51  ;;  %v9794_v45 = vpop.f32.mrf.mxu1 }
 0x1ac   : >> { %v11763_v10 = vadd.f32 %v9793_v37, %v4043_v5  ;;  %v9859_v29 = vpop.f32.mrf.mxu0 }
 0x1ad   : >> { %v9795_v41 = vpop.f32.mrf.mxu1  ;;  %v9860_v0 = vadd.f32 %v9859_v29, %v9858_v9 }
 0x1ae   : >> { %v9796_v25 = vadd.f32 %v9795_v41, %v9794_v45  ;;  %v9861_v31 = vpop.f32.mrf.mxu0 }
 0x1af   : >> { %v11768_v20 = vadd.f32 %v9860_v0, %v11659_v30  ;;  %v9797_v55 = vpop.f32.mrf.mxu1 }
 0x1b0   : >> { %v11770_v23 = vadd.f32 %v9796_v25, %v4048_v44  ;;  %v9862_v17 = vpop.f32.mrf.mxu0 }
 0x1b1   : >> { %v9798_v51 = vpop.f32.mrf.mxu1  ;;  %v9863_v12 = vadd.f32 %v9862_v17, %v9861_v31 }
 0x1b2   : >> { %v9799_v42 = vadd.f32 %v9798_v51, %v9797_v55  ;;  %v9864_v46 = vpop.f32.mrf.mxu0 }
 0x1b3   : >> { %v11775_v27 = vadd.f32 %v9863_v12, %v11665_v48  ;;  %v11777_v2 = vpop.f32.mrf.mxu1 }
 0x1b4   : >> { %v11779_v43 = vadd.f32 %v9799_v42, %v4051_v39  ;;  %v9865_v30 = vpop.f32.mrf.mxu0 }
 0x1b5   : >> { %v9866_v54 = vadd.f32 %v9865_v30, %v9864_v46  ;;  %v11781_v28 = vpop.f32.mrf.mxu1 }
 0x1b6   : >> { %v9867_v62 = vpop.f32.mrf.mxu0 }
 0x1b7   : >> { %v11784_v60 = vadd.f32 %v9866_v54, %v11672_v4  ;;  %v11786_v61 = vpop.f32.mrf.mxu1 }
 0x1b8   : >> { %v9868_v7 = vpop.f32.mrf.mxu0 }
 0x1b9   : >> { %v9869_v13 = vadd.f32 %v9868_v7, %v9867_v62  ;;  %v11788_v38 = vpop.f32.mrf.mxu1 }
 0x1ba   : >> { %v9870_v48 = vpop.f32.mrf.mxu0 }
 0x1bb   : >> { %v11791_v53 = vadd.f32 %v9869_v13, %v11679_v15  ;;  %v11793_v52 = vpop.f32.mrf.mxu1 }
 0x1bc   : >> { %v9871_v6 = vpop.f32.mrf.mxu0 }
 0x1bd   : >> { %v9872_v5 = vadd.f32 %v9871_v6, %v9870_v48  ;;  %v11795_v37 = vpop.f32.mrf.mxu1 }
 0x1be   : >> { %v9873_v9 = vpop.f32.mrf.mxu0 }
 0x1bf   : >> { %v11798_v4 = vadd.f32 %v9872_v5, %v11686_v34  ;;  %v11800_v45 = vpop.f32.mrf.mxu1 }
 0x1c0   : >> { %v9874_v29 = vpop.f32.mrf.mxu0 }
 0x1c1   : >> { %v9875_v41 = vadd.f32 %v9874_v29, %v9873_v9  ;;  %v11802_v0 = vpop.f32.mrf.mxu1 }
 0x1c2   : >> { %v9876_v44 = vpop.f32.mrf.mxu0 }
 0x1c3   : >> { %v11805_v15 = vadd.f32 %v9875_v41, %v11693_v49  ;;  %v11807_v25 = vpop.f32.mrf.mxu1 }
 0x1c4   : >> { %v9877_v31 = vpop.f32.mrf.mxu0 }
 0x1c5   : >> { %v9878_v55 = vadd.f32 %v9877_v31, %v9876_v44  ;;  %v11809_v17 = vpop.f32.mrf.mxu1 }
 0x1c6   : >> { %v9879_v51 = vpop.f32.mrf.mxu0 }
 0x1c7   : >> { %v11812_v34 = vadd.f32 %v9878_v55, %v11700_v47  ;;  %v11814_v12 = vpop.f32.mrf.mxu1 }
 0x1c8   : >> { %v9880_v39 = vpop.f32.mrf.mxu0 }
 0x1c9   : >> { %12627 = vst [vmem:[#allocation5_spill] sm:$0xff] %v11812_v34  ;;  %v9881_v42 = vadd.f32 %v9880_v39, %v9879_v51  ;;  %v11816_v46 = vpop.f32.mrf.mxu1 }
 0x1ca   : >> { %v9882_v30 = vpop.f32.mrf.mxu0 }
 0x1cb   : >> { %v11819_v49 = vadd.f32 %v9881_v42, %v11707_v18  ;;  %v11821_v54 = vpop.f32.mrf.mxu1 }
 0x1cc   : >> { %v9883_v62 = vpop.f32.mrf.mxu0 }
 0x1cd   : >> { %12628 = vst [vmem:[#allocation6_spill] sm:$0xff] %v11819_v49  ;;  %v9884_v7 = vadd.f32 %v9883_v62, %v9882_v30  ;;  %v11823_v13 = vpop.f32.mrf.mxu1 }
 0x1ce   : >> { %v9885_v48 = vpop.f32.mrf.mxu0 }
 0x1cf   : >> { %v11826_v47 = vadd.f32 %v9884_v7, %v11714_v16  ;;  %v11828_v6 = vpop.f32.mrf.mxu1 }
 0x1d0   : >> { %v9886_v5 = vpop.f32.mrf.mxu0 }
 0x1d1   : >> { %12629 = vst [vmem:[#allocation7_spill] sm:$0xff] %v11826_v47  ;;  %v9887_v9 = vadd.f32 %v9886_v5, %v9885_v48  ;;  %v11830_v29 = vpop.f32.mrf.mxu1 }
 0x1d2   : >> { %v9888_v41 = vpop.f32.mrf.mxu0 }
 0x1d3   : >> { %v11833_v18 = vadd.f32 %v9887_v9, %v11721_v40  ;;  %v11835_v44 = vpop.f32.mrf.mxu1 }
 0x1d4   : >> { %v9889_v31 = vpop.f32.mrf.mxu0 }
 0x1d5   : >> { %12630 = vst [vmem:[#allocation8_spill] sm:$0xff] %v11833_v18  ;;  %v9890_v55 = vadd.f32 %v9889_v31, %v9888_v41  ;;  %v11837_v51 = vpop.f32.mrf.mxu1 }
 0x1d6   : >> { %v9891_v39 = vpop.f32.mrf.mxu0 }
 0x1d7   : >> { %v11840_v16 = vadd.f32 %v9890_v55, %v11728_v57  ;;  %v11842_v42 = vpop.f32.mrf.mxu1 }
 0x1d8   : >> { %v9892_v30 = vpop.f32.mrf.mxu0 }
 0x1d9   : >> { %12631 = vst [vmem:[#allocation9_spill] sm:$0xff] %v11840_v16  ;;  %v9893_v62 = vadd.f32 %v9892_v30, %v9891_v39  ;;  %v11844_v7 = vpop.f32.mrf.mxu1 }
 0x1da   : >> { %v9894_v48 = vpop.f32.mrf.mxu0 }
 0x1db   : >> { %v11847_v40 = vadd.f32 %v9893_v62, %v11735_v24  ;;  %v11849_v5 = vpop.f32.mrf.mxu1 }
 0x1dc   : >> { %v9895_v9 = vpop.f32.mrf.mxu0 }
 0x1dd   : >> { %12632 = vst [vmem:[#allocation10_spill] sm:$0xff] %v11847_v40  ;;  %v9896_v41 = vadd.f32 %v9895_v9, %v9894_v48  ;;  %v11851_v31 = vpop.f32.mrf.mxu1 }
 0x1de   : >> { %v9897_v1 = vpop.f32.mrf.mxu0 }
 0x1df   : >> { %v11854_v57 = vadd.f32 %v9896_v41, %v11742_v36  ;;  %v11856_v55 = vpop.f32.mrf.mxu1 }
 0x1e0   : >> { %v9898_v16 = vpop.f32.mrf.mxu0 }
 0x1e1   : >> { %12633 = vst [vmem:[#allocation11_spill] sm:$0xff] %v11854_v57  ;;  %v9899_v39 = vadd.f32 %v9898_v16, %v9897_v1  ;;  %v11858_v30 = vpop.f32.mrf.mxu1 }
 0x1e2   : >> { %v9900_v49 = vpop.f32.mrf.mxu0 }
 0x1e3   : >> { %v11861_v24 = vadd.f32 %v9899_v39, %v11749_v50  ;;  %v11863_v62 = vpop.f32.mrf.mxu1 }
 0x1e4   : >> { %v9901_v40 = vpop.f32.mrf.mxu0 }
 0x1e5   : >> { %12634 = vst [vmem:[#allocation12_spill] sm:$0xff] %v11861_v24  ;;  %v9902_v48 = vadd.f32 %v9901_v40, %v9900_v49  ;;  %v11865_v9 = vpop.f32.mrf.mxu1  ;;  %v9936_v49 = vadd.f32 %v11795_v37, %v11793_v52 }
 0x1e6   : >> { %v9903_v18 = vpop.f32.mrf.mxu0 }
 0x1e7   : >> { %v11868_v36 = vadd.f32 %v9902_v48, %v11756_v3  ;;  %v11870_v41 = vpop.f32.mrf.mxu1  ;;  %v9930_v48 = vadd.f32 %v11781_v28, %v11777_v2  ;;  %v4419_v52 = vadd.f32 %v9936_v49, %v11684_v33 }
 0x1e8   : >> { %v9904_v57 = vpop.f32.mrf.mxu0 }
 0x1e9   : >> { %12635 = vst [vmem:[#allocation13_spill] sm:$0xff] %v11868_v36  ;;  %v9905_v1 = vadd.f32 %v9904_v57, %v9903_v18  ;;  %v11872_v16 = vpop.f32.mrf.mxu1 }
 0x1ea   : >> { %v9906_v34 = vpop.f32.mrf.mxu0 }
 0x1eb   : >> { %v11875_v50 = vadd.f32 %v9905_v1, %v11763_v10  ;;  %v11877_v39 = vpop.f32.mrf.mxu1  ;;  %v9939_v1 = vadd.f32 %v11802_v0, %v11800_v45  ;;  %v9948_v45 = vadd.f32 %v11823_v13, %v11821_v54  ;;  %v9951_v54 = vadd.f32 %v11830_v29, %v11828_v6 }
 0x1ec   : >> { %v9907_v24 = vpop.f32.mrf.mxu0  ;;  %v9960_v6 = vadd.f32 %v11851_v31, %v11849_v5  ;;  %v9963_v5 = vadd.f32 %v11858_v30, %v11856_v55 }
 0x1ed   : >> { %12636 = vst [vmem:[#allocation14_spill] sm:$0xff] %v11875_v50  ;;  %v9908_v40 = vadd.f32 %v9907_v24, %v9906_v34  ;;  %v11881_v47 = vpop.f32.mrf.mxu1  ;;  %v9933_v34 = vadd.f32 %v11788_v38, %v11786_v61  ;;  %v4411_v24 = vadd.f32 %v9930_v48, %v11670_v26  ;;  %v4422_v49 = vadd.f32 %v9939_v1, %v11691_v19 }
 0x1ee   : >> { %v9909_v3 = vpop.f32.mrf.mxu0  ;;  %v4435_v1 = vadd.f32 %v9948_v45, %v11712_v8  ;;  %v4438_v8 = vadd.f32 %v9951_v54, %v11719_v22  ;;  %v4451_v22 = vadd.f32 %v9960_v6, %v11740_v56  ;;  %v9972_v55 = vadd.f32 %v11881_v47, %v11877_v39 }
 0x1ef   : >> { %v11886_v18 = vadd.f32 %v9908_v40, %v11770_v23  ;;  %v11888_v57 = vpop.f32.mrf.mxu1  ;;  %v4414_v26 = vadd.f32 %v9933_v34, %v11677_v14  ;;  %v4454_v56 = vadd.f32 %v9963_v5, %v11747_v21 }
 0x1f0   : >> { %v9910_v10 = vpop.f32.mrf.mxu0  ;;  %v4467_v21 = vadd.f32 %v9972_v55, %v11768_v20 }
 0x1f1   : >> { %v9911_v50 = vadd.f32 %v9910_v10, %v9909_v3  ;;  %v11892_v36 = vpop.f32.mrf.mxu1 }
 0x1f2   : >> { %v10084_v37 = vpop.f32.mrf.mxu0  ;;  %v9975_v47 = vadd.f32 %v11892_v36, %v11888_v57 }
 0x1f3   : >> { %v11898_v2 = vadd.f32 %v9911_v50, %v11779_v43  ;;  %v11900_v23 = vpop.f32.mrf.mxu1  ;;  %v4580_v28 = vadd.f32 %v10084_v37, %v4419_v52  ;;  %v9942_v43 = vadd.f32 %v11809_v17, %v11807_v25  ;;  %v9945_v25 = vadd.f32 %v11816_v46, %v11814_v12 }
 0x1f4   : >> { %v4571_v40 = vpop.f32.mrf.mxu0  ;;  %v9954_v12 = vadd.f32 %v11837_v51, %v11835_v44  ;;  %v9957_v44 = vadd.f32 %v11844_v7, %v11842_v42  ;;  %v9966_v42 = vadd.f32 %v11865_v9, %v11863_v62  ;;  %v9969_v62 = vadd.f32 %v11872_v16, %v11870_v41 }
 0x1f5   : >> { %v4700_v0 = vmax.f32 %v4580_v28, 0.0  ;;  %v11905_v3 = vpop.f32.mrf.mxu1  ;;  %v4572_v33 = vadd.f32 %v4571_v40, %v4411_v24  ;;  %v4427_v14 = vadd.f32 %v9942_v43, %v11698_v32  ;;  %v4430_v32 = vadd.f32 %v9945_v25, %v11705_v59 }
 0x1f6   : >> { %v10085_v10 = vpop.f32.mrf.mxu0  ;;  %v4443_v59 = vadd.f32 %v9954_v12, %v11726_v11  ;;  %v4446_v11 = vadd.f32 %v9957_v44, %v11733_v58  ;;  %v4459_v58 = vadd.f32 %v9966_v42, %v11754_v35  ;;  %v4470_v12 = vadd.f32 %v9975_v47, %v11775_v27  ;;  %v12637_v42 = vld [vmem:[#allocation7_spill] sm:$0xff] }
 0x1f7   : >> { %4732 = vst [vmem:[#allocation2 + $0x40] sm:$0xff] %v4700_v0  ;;  %v4698_v61 = vmax.f32 %v4572_v33, 0.0  ;;  %v11910_v38 = vpop.f32.mrf.mxu1  ;;  %v4583_v50 = vadd.f32 %v10085_v10, %v4422_v49  ;;  %v9978_v20 = vadd.f32 %v11905_v3, %v11900_v23 }
 0x1f8   : >> { %v4574_v48 = vpop.f32.mrf.mxu0 }
 0x1f9   : >> { %4730 = vst [vmem:[#allocation2 + $0x48] sm:$0xff] %v4698_v61  ;;  %v4701_v13 = vmax.f32 %v4583_v50, 0.0  ;;  %v11915_v52 = vpop.f32.mrf.mxu1  ;;  %v4575_v19 = vadd.f32 %v4574_v48, %v4414_v26 }
 0x1fa   : >> { %v10088_v37 = vpop.f32.mrf.mxu0  ;;  %v9981_v27 = vadd.f32 %v11915_v52, %v11910_v38 }
 0x1fb   : >> { %4733 = vst [vmem:[#allocation2 + $0x178] sm:$0xff] %v4701_v13  ;;  %v4699_v17 = vmax.f32 %v4575_v19, 0.0  ;;  %v9982_v28 = vpop.f32.mrf.mxu1  ;;  %v4596_v24 = vadd.f32 %v10088_v37, %v4435_v1 }
 0x1fc   : >> { %v4587_v34 = vpop.f32.mrf.mxu0  ;;  %v4478_v55 = vadd.f32 %v9981_v27, %v11791_v53 }
 0x1fd   : >> { %4731 = vst [vmem:[#allocation2 + $0x160] sm:$0xff] %v4699_v17  ;;  %v4704_v29 = vmax.f32 %v4596_v24, 0.0  ;;  %v9983_v40 = vpop.f32.mrf.mxu1  ;;  %v4588_v0 = vadd.f32 %v4587_v34, %v4427_v14 }
 0x1fe   : >> { %v10089_v45 = vpop.f32.mrf.mxu0 }
 0x1ff   : >> { %4736 = vst [vmem:[#allocation2 + $0x148] sm:$0xff] %v4704_v29  ;;  %v4702_v46 = vmax.f32 %v4588_v0, 0.0  ;;  %v9985_v33 = vpop.f32.mrf.mxu1  ;;  %v4599_v49 = vadd.f32 %v10089_v45, %v4438_v8  ;;  %v9984_v8 = vadd.f32 %v9983_v40, %v9982_v28 }
 0x200   : >> { %v4590_v10 = vpop.f32.mrf.mxu0 }
 0x201   : >> { %4734 = vst [vmem:[#allocation2 + $0x110] sm:$0xff] %v4702_v46  ;;  %v4705_v31 = vmax.f32 %v4599_v49, 0.0  ;;  %v9986_v43 = vpop.f32.mrf.mxu1  ;;  %v4591_v61 = vadd.f32 %v4590_v10, %v4430_v32  ;;  %v4462_v32 = vadd.f32 %v9969_v62, %v11761_v63 }
 0x202   : >> { %v10092_v50 = vpop.f32.mrf.mxu0  ;;  %v9987_v35 = vadd.f32 %v9986_v43, %v9985_v33 }
 0x203   : >> { %4737 = vst [vmem:[#allocation2 + $0x100] sm:$0xff] %v4705_v31  ;;  %v4703_v51 = vmax.f32 %v4591_v61, 0.0  ;;  %v11932_v26 = vpop.f32.mrf.mxu1  ;;  %v4612_v48 = vadd.f32 %v10092_v50, %v4451_v22  ;;  %v4483_v31 = vadd.f32 %v9984_v8, %v11798_v4  ;;  %v4475_v50 = vadd.f32 %v9978_v20, %v11784_v60 }
 0x204   : >> { %v4603_v54 = vpop.f32.mrf.mxu0 }
 0x205   : >> { %4735 = vst [vmem:[#allocation2 + $0x90] sm:$0xff] %v4703_v51  ;;  %v4708_v30 = vmax.f32 %v4612_v48, 0.0  ;;  %v9989_v13 = vpop.f32.mrf.mxu1  ;;  %v4604_v19 = vadd.f32 %v4603_v54, %v4443_v59  ;;  %v4486_v48 = vadd.f32 %v9987_v35, %v11805_v15 }
 0x206   : >> { %v10093_v1 = vpop.f32.mrf.mxu0  ;;  %v9990_v4 = vadd.f32 %v9989_v13, %v11932_v26 }
 0x207   : >> { %4740 = vst [vmem:[#allocation2 + $0x138] sm:$0xff] %v4708_v30  ;;  %v4706_v7 = vmax.f32 %v4604_v19, 0.0  ;;  %v11940_v37 = vpop.f32.mrf.mxu1  ;;  %v4615_v25 = vadd.f32 %v10093_v1, %v4454_v56 }
 0x208   : >> { %v4606_v17 = vpop.f32.mrf.mxu0 }
 0x209   : >> { %4738 = vst [vmem:[#allocation2 + $0xd8] sm:$0xff] %v4706_v7  ;;  %v4709_v39 = vmax.f32 %v4615_v25, 0.0  ;;  %v9992_v24 = vpop.f32.mrf.mxu1  ;;  %v4607_v14 = vadd.f32 %v4606_v17, %v4446_v11  ;;  %v12638_v17 = vld [vmem:[#allocation5_spill] sm:$0xff] }
 0x20a   : >> { %v10096_v34 = vpop.f32.mrf.mxu0  ;;  %v9993_v15 = vadd.f32 %v9992_v24, %v11940_v37  ;;  %v4491_v47 = vadd.f32 %v9990_v4, %v12638_v17  ;;  %v12640_v24 = vld [vmem:[#allocation6_spill] sm:$0xff] }
 0x20b   : >> { %4741 = vst [vmem:[#allocation2 + $0x78] sm:$0xff] %v4709_v39  ;;  %v4707_v9 = vmax.f32 %v4607_v14, 0.0  ;;  %v9994_v6 = vpop.f32.mrf.mxu1  ;;  %v4628_v29 = vadd.f32 %v10096_v34, %v4467_v21  ;;  %v12639_v34 = vld [vmem:[#allocation8_spill] sm:$0xff] }
 0x20c   : >> { %v4619_v0 = vpop.f32.mrf.mxu0  ;;  %v4494_v8 = vadd.f32 %v9993_v15, %v12640_v24 }
 0x20d   : >> { %4739 = vst [vmem:[#allocation2 + $0x180] sm:$0xff] %v4707_v9  ;;  %v4712_v36 = vmax.f32 %v4628_v29, 0.0  ;;  %v9995_v57 = vpop.f32.mrf.mxu1  ;;  %v4620_v45 = vadd.f32 %v4619_v0, %v4459_v58 }
 0x20e   : >> { %v10097_v46 = vpop.f32.mrf.mxu0  ;;  %v9996_v63 = vadd.f32 %v9995_v57, %v9994_v6 }
 0x20f   : >> { %4744 = vst [vmem:[#allocation2 + $0x80] sm:$0xff] %v4712_v36  ;;  %v4710_v41 = vmax.f32 %v4620_v45, 0.0  ;;  %v9997_v16 = vpop.f32.mrf.mxu1  ;;  %v4631_v49 = vadd.f32 %v10097_v46, %v4470_v12  ;;  %v12641_v46 = vld [vmem:[#allocation11_spill] sm:$0xff] }
 0x210   : >> { %v4622_v10 = vpop.f32.mrf.mxu0  ;;  %v4499_v7 = vadd.f32 %v9996_v63, %v12637_v42 }
 0x211   : >> { %4742 = vst [vmem:[#allocation2 + $0x158] sm:$0xff] %v4710_v41  ;;  %v4713_v28 = vmax.f32 %v4631_v49, 0.0  ;;  %v9998_v40 = vpop.f32.mrf.mxu1  ;;  %v4623_v5 = vadd.f32 %v4622_v10, %v4462_v32 }
 0x212   : >> { %v10100_v61 = vpop.f32.mrf.mxu0  ;;  %v9999_v19 = vadd.f32 %v9998_v40, %v9997_v16 }
 0x213   : >> { %4745 = vst [vmem:[#allocation2 + $0xa8] sm:$0xff] %v4713_v28  ;;  %v4711_v23 = vmax.f32 %v4623_v5, 0.0  ;;  %v10000_v3 = vpop.f32.mrf.mxu1  ;;  %v4644_v22 = vadd.f32 %v10100_v61, %v4483_v31  ;;  %v12642_v28 = vld [vmem:[#allocation9_spill] sm:$0xff] }
 0x214   : >> { %v4635_v44 = vpop.f32.mrf.mxu0  ;;  %v4502_v62 = vadd.f32 %v9999_v19, %v12639_v34  ;;  %v12645_v19 = vld [vmem:[#allocation13_spill] sm:$0xff] }
 0x215   : >> { %4743 = vst [vmem:[#allocation2 + $0x98] sm:$0xff] %v4711_v23  ;;  %v4716_v33 = vmax.f32 %v4644_v22, 0.0  ;;  %v10001_v43 = vpop.f32.mrf.mxu1  ;;  %v4636_v51 = vadd.f32 %v4635_v44, %v4475_v50  ;;  %v12643_v23 = vld [vmem:[#allocation12_spill] sm:$0xff] }
 0x216   : >> { %v10101_v59 = vpop.f32.mrf.mxu0  ;;  %v10002_v29 = vadd.f32 %v10001_v43, %v10000_v3  ;;  %v12644_v43 = vld [vmem:[#allocation10_spill] sm:$0xff] }
 0x217   : >> { %4748 = vst [vmem:[#allocation2 + $0x1a8] sm:$0xff] %v4716_v33  ;;  %v4714_v54 = vmax.f32 %v4636_v51, 0.0  ;;  %v10003_v38 = vpop.f32.mrf.mxu1  ;;  %v4647_v52 = vadd.f32 %v10101_v59, %v4486_v48 }
 0x218   : >> { %v4638_v30 = vpop.f32.mrf.mxu0  ;;  %v4507_v40 = vadd.f32 %v10002_v29, %v12642_v28 }
 0x219   : >> { %4746 = vst [vmem:[#allocation2] sm:$0xff] %v4714_v54  ;;  %v4717_v60 = vmax.f32 %v4647_v52, 0.0  ;;  %v10004_v56 = vpop.f32.mrf.mxu1  ;;  %v4639_v1 = vadd.f32 %v4638_v30, %v4478_v55 }
 0x21a   : >> { %v10104_v25 = vpop.f32.mrf.mxu0  ;;  %v10005_v49 = vadd.f32 %v10004_v56, %v10003_v38 }
 0x21b   : >> { %4749 = vst [vmem:[#allocation2 + $0x140] sm:$0xff] %v4717_v60  ;;  %v4715_v11 = vmax.f32 %v4639_v1, 0.0  ;;  %v10006_v26 = vpop.f32.mrf.mxu1  ;;  %v4660_v13 = vadd.f32 %v10104_v25, %v4499_v7 }
 0x21c   : >> { %v4651_v39 = vpop.f32.mrf.mxu0  ;;  %v4510_v51 = vadd.f32 %v10005_v49, %v12644_v43  ;;  %v4780_v49 = vld [vmem:[#allocation2 + $0x138] sm:$0xff] (%p336_p4) }
 0x21d   : >> { %4747 = vst [vmem:[#allocation2 + $0x168] sm:$0xff] %v4715_v11  ;;  %v4720_v53 = vmax.f32 %v4660_v13, 0.0  ;;  %v10007_v14 = vpop.f32.mrf.mxu1  ;;  %v4652_v21 = vadd.f32 %v4651_v39, %v4491_v47 }
 0x21e   : >> { %v10008_v9 = vadd.f32 %v10007_v14, %v10006_v26  ;;  %v10105_v6 = vpop.f32.mrf.mxu0  ;;  %v12646_v26 = vld [vmem:[#allocation14_spill] sm:$0xff] }
 0x21f   : >> { %4752 = vst [vmem:[#allocation2 + $0xc0] sm:$0xff] %v4720_v53  ;;  %v4718_v58 = vmax.f32 %v4652_v21, 0.0  ;;  %v10009_v0 = vpop.f32.mrf.mxu1  ;;  %v4663_v37 = vadd.f32 %v10105_v6, %v4502_v62 }
 0x220   : >> { %v4654_v36 = vpop.f32.mrf.mxu0  ;;  %v4515_v20 = vadd.f32 %v10008_v9, %v12641_v46 }
 0x221   : >> { %4750 = vst [vmem:[#allocation2 + $0xa0] sm:$0xff] %v4718_v58  ;;  %v4721_v57 = vmax.f32 %v4663_v37, 0.0  ;;  %v10010_v45 = vpop.f32.mrf.mxu1  ;;  %v4655_v12 = vadd.f32 %v4654_v36, %v4494_v8  ;;  %v4783_v58 = vld [vmem:[#allocation2 + $0x158] sm:$0xff] (%p336_p4)  ;;  %v11979_v36 = vld [vmem:[#allocation2 + $0xe8] sm:$0xff] (%p336_p4) }
 0x222   : >> { %v10011_v41 = vadd.f32 %v10010_v45, %v10009_v0  ;;  %v10108_v16 = vpop.f32.mrf.mxu0  ;;  %v4784_v0 = vld [vmem:[#allocation2 + $0x98] sm:$0xff] (%p336_p4)  ;;  %v4831_v24 = vrot.slane (%p336_p4), %v4783_v58, 7  ;;  %v5477_v45 = vld [vmem:[#allocation2 + $0xa8] sm:$0xff] (%p336_p4) }
 0x223   : >> { %4753 = vst [vmem:[#allocation2 + $0x190] sm:$0xff] %v4721_v57  ;;  %v4719_v32 = vmax.f32 %v4655_v12, 0.0  ;;  %v10012_v10 = vpop.f32.mrf.mxu1  ;;  %v4676_v35 = vadd.f32 %v10108_v16, %v4515_v20  ;;  %v4832_v8 = vrot.slane (%p336_p4), %v4784_v0, 7  ;;  %v5476_v57 = vld [vmem:[#allocation2 + $0x80] sm:$0xff] (%p336_p4)  ;;  %v9335_v12 = vpack.c.bf16 (%p336_p4), %v4784_v0, %v4784_v0  ;;  %v11983_v16 = vld [vmem:[#allocation2 + $0x130] sm:$0xff] (%p336_p4) }
 0x224   : >> { %v4667_v5 = vpop.f32.mrf.mxu0  ;;  %v4518_v3 = vadd.f32 %v10011_v41, %v12643_v23  ;;  %v4833_v20 = vrot.slane (%p336_p4), %v11979_v36, 7  ;;  %v5234_v41 = vrot.slane (%p336_p4), %v4783_v58, 1  ;;  %v5235_v28 = vrot.slane (%p336_p4), %v4784_v0, 1  ;;  %v4781_v23 = vld [vmem:[#allocation2 + $0x78] sm:$0xff] (%p336_p4) }
 0x225   : >> { %4751 = vst [vmem:[#allocation2 + $0x170] sm:$0xff] %v4719_v32  ;;  %v4724_v31 = vmax.f32 %v4676_v35, 0.0  ;;  %v10013_v61 = vpop.f32.mrf.mxu1  ;;  %v4668_v27 = vadd.f32 %v4667_v5, %v4507_v40  ;;  %v5236_v40 = vrot.slane (%p336_p4), %v11979_v36, 1  ;;  %5196 = vst [vmem:[#allocation3 + $0x220] sm:$0xf] (%p336_p4), %v9335_v12  ;;  %v12268_v36 = vld [vmem:[#allocation2 + $0x138] sm:$0xff] (%p336_p4) }
 0x226   : >> { %v10109_v22 = vpop.f32.mrf.mxu0  ;;  %v10014_v50 = vadd.f32 %v10013_v61, %v10012_v10  ;;  %v4877_v10 = vsel (%p336_p4), %vm438_vm0, %v4831_v24, %v4832_v8  ;;  %v5524_v61 = vrot.slane (%p336_p4), %v5476_v57, 7 }
 0x227   : >> { %4756 = vst [vmem:[#allocation2 + $0xf8] sm:$0xff] %v4724_v31  ;;  %v4722_v44 = vmax.f32 %v4668_v27, 0.0  ;;  %v10015_v63 = vpop.f32.mrf.mxu1  ;;  %v4679_v33 = vadd.f32 %v10109_v22, %v4518_v3  ;;  %v9303_v31 = vpack.c.bf16 (%p336_p4), %v4877_v10, %v4877_v10  ;;  %v5525_v27 = vrot.slane (%p336_p4), %v5477_v45, 7  ;;  %v12026_v10 = vld [vmem:[#allocation2 + $0x108] sm:$0xff] (%p336_p4) }
 0x228   : >> { %v4670_v48 = vpop.f32.mrf.mxu0  ;;  %v4523_v60 = vadd.f32 %v10014_v50, %v12645_v19  ;;  %v5278_v3 = vsel (%p336_p4), %vm839_vm1, %v5235_v28, %v5236_v40  ;;  %v5279_v22 = vsel (%p336_p4), %vm839_vm1, %v5234_v41, %v5235_v28  ;;  %v4827_v50 = vrot.slane (%p336_p4), %v11983_v16, 7  ;;  %v4772_v28 = vld [vmem:[#allocation2 + $0x90] sm:$0xff] (%p336_p4) }
 0x229   : >> { %4754 = vst [vmem:[#allocation2 + $0xf0] sm:$0xff] %v4722_v44  ;;  %v4725_v59 = vmax.f32 %v4679_v33, 0.0  ;;  %v10016_v4 = vpop.f32.mrf.mxu1  ;;  %v4671_v54 = vadd.f32 %v4670_v48, %v4510_v51  ;;  %v4828_v44 = vrot.slane (%p336_p4), %v4780_v49, 7  ;;  %5036 = vst [vmem:[#allocation3 + $0x21c] sm:$0xf] (%p336_p4), %v9303_v31  ;;  %v9367_v33 = vpack.c.bf16 (%p336_p4), %v5278_v3, %v5278_v3  ;;  %v12003_v48 = vld [vmem:[#allocation2 + $0x58] sm:$0xff] (%p336_p4) }
 0x22a   : >> { %v10112_v38 = vpop.f32.mrf.mxu0  ;;  %v10017_v52 = vadd.f32 %v10016_v4, %v10015_v63  ;;  %v9366_v63 = vpack.c.bf16 (%p336_p4), %v5279_v22, %v5279_v22  ;;  %v5567_v43 = vsel (%p336_p4), %vm438_vm0, %v5524_v61, %v5525_v27  ;;  %v5568_v51 = vsel (%p336_p4), %vm438_vm0, %v4833_v20, %v5524_v61  ;;  %5724 = vst [vmem:[#allocation3 + $0x1e0] sm:$0xf] (%p336_p4), %v9303_v31 }
 0x22b   : >> { %4757 = vst [vmem:[#allocation2 + $0x18] sm:$0xff] %v4725_v59  ;;  %v4723_v55 = vmax.f32 %v4671_v54, 0.0  ;;  %v10018_v30 = vpop.f32.mrf.mxu1  ;;  %v4777_v59 = vld [vmem:[#allocation2 + $0xd8] sm:$0xff] (%p336_p4)  ;;  %v9398_v4 = vpack.c.bf16 (%p336_p4), %v5568_v51, %v5568_v51  ;;  %v9399_v54 = vpack.c.bf16 (%p336_p4), %v5567_v43, %v5567_v43  ;;  %5437 = vst [vmem:[#allocation3 + $0x224] sm:$0xf] (%p336_p4), %v9367_v33  ;;  %v9332_v19 = vpack.c.bf16 (%p336_p4), %v4780_v49, %v4780_v49 }
 0x22c   : >> { %v4683_v56 = vpop.f32.mrf.mxu0  ;;  %v4526_v13 = vadd.f32 %v10017_v52, %v12646_v26  ;;  %v4880_v52 = vsel (%p336_p4), %vm438_vm0, %v4827_v50, %v4828_v44  ;;  %5436 = vst [vmem:[#allocation3 + $0x200] sm:$0xf] (%p336_p4), %v9366_v63  ;;  %v9330_v26 = vpack.c.bf16 (%p336_p4), %v4777_v59, %v4777_v59  ;;  %v4818_v43 = vrot.slane (%p336_p4), %v12026_v10, 7 }
 0x22d   : >> { %4755 = vst [vmem:[#allocation2 + $0x150] sm:$0xff] %v4723_v55  ;;  %v10019_v1 = vpop.f32.mrf.mxu1  ;;  %v4684_v42 = vadd.f32 %v4683_v56, %v4523_v60  ;;  %v4778_v55 = vld [vmem:[#allocation2 + $0x180] sm:$0xff] (%p336_p4)  ;;  %v9333_v60 = vpack.c.bf16 (%p336_p4), %v4781_v23, %v4781_v23  ;;  %v5231_v56 = vrot.slane (%p336_p4), %v4780_v49, 1  ;;  %5725 = vst [vmem:[#allocation3 + $0x204] sm:$0xf] (%p336_p4), %v9398_v4  ;;  %v12036_v4 = vld [vmem:[#allocation2 + $0x128] sm:$0xff] (%p336_p4) }
 0x22e   : >> { %v10020_v7 = vadd.f32 %v10019_v1, %v10018_v30  ;;  %v10113_v25 = vpop.f32.mrf.mxu0  ;;  %v9300_v30 = vpack.c.bf16 (%p336_p4), %v4880_v52, %v4880_v52  ;;  %5726 = vst [vmem:[#allocation3 + $0x228] sm:$0xf] (%p336_p4), %v9399_v54  ;;  %5193 = vst [vmem:[#allocation3 + $0x1b4] sm:$0xf] (%p336_p4), %v9332_v19  ;;  %v5229_v0 = vrot.slane (%p336_p4), %v4778_v55, 1  ;;  %v4768_v54 = vld [vmem:[#allocation2 + $0x40] sm:$0xff] (%p336_p4) }
 0x22f   : >> { %v4726_v15 = vmax.f32 %v4684_v42, 0.0  ;;  %v10021_v11 = vpop.f32.mrf.mxu1  ;;  %v5232_v42 = vrot.slane (%p336_p4), %v4781_v23, 1  ;;  %5194 = vst [vmem:[#allocation3 + $0x1d8] sm:$0xf] (%p336_p4), %v9333_v60  ;;  %5191 = vst [vmem:[#allocation3 + $0x16c] sm:$0xf] (%p336_p4), %v9330_v26 }
 0x230   : >> { %v4531_v17 = vadd.f32 %v10020_v7, %v11886_v18  ;;  %v4686_v47 = vpop.f32.mrf.mxu0  ;;  %v11976_v18 = vld [vmem:[#allocation2 + $0x1a0] sm:$0xff] (%p336_p4)  ;;  %v4824_v7 = vrot.slane (%p336_p4), %v12003_v48, 7  ;;  %5033 = vst [vmem:[#allocation3 + $0x1b0] sm:$0xf] (%p336_p4), %v9300_v30  ;;  %5721 = vst [vmem:[#allocation3 + $0x174] sm:$0xf] (%p336_p4), %v9300_v30 }
 0x231   : >> { %4758 = vst [vmem:[#allocation2 + $0x60] sm:$0xff] %v4726_v15  ;;  %v10022_v39 = vpop.f32.mrf.mxu1  ;;  %v4687_v53 = vadd.f32 %v4686_v47, %v4526_v13  ;;  %v4830_v37 = vrot.slane (%p336_p4), %v11976_v18, 7  ;;  %v5233_v46 = vrot.slane (%p336_p4), %v11976_v18, 1  ;;  %v9331_v13 = vpack.c.bf16 (%p336_p4), %v4778_v55, %v4778_v55  ;;  %v4769_v19 = vld [vmem:[#allocation2 + $0x178] sm:$0xff] (%p336_p4) }
 0x232   : >> { %v4692_v14 = vadd.f32 %v10112_v38, %v4531_v17  ;;  %v10023_v21 = vadd.f32 %v10022_v39, %v10021_v11  ;;  %v4829_v38 = vrot.slane (%p336_p4), %v4781_v23, 7  ;;  %v4826_v11 = vrot.slane (%p336_p4), %v4778_v55, 7 }
 0x233   : >> { %v4727_v34 = vmax.f32 %v4687_v53, 0.0  ;;  %v4878_v35 = vsel (%p336_p4), %vm438_vm0, %v4830_v37, %v4831_v24  ;;  %v5280_v17 = vsel (%p336_p4), %vm839_vm1, %v5232_v42, %v5233_v46  ;;  %v5281_v47 = vsel (%p336_p4), %vm839_vm1, %v5231_v56, %v5232_v42  ;;  %5192 = vst [vmem:[#allocation3 + $0x190] sm:$0xf] (%p336_p4), %v9331_v13  ;;  %v10436_v3 = vld [vmem:[#allocation3 + $0x200] ss:$36 sps:$4 sm:$0xff] (%p336_p4)  }
 0x234   : >> { %v4728_v62 = vmax.f32 %v4692_v14, 0.0  ;;  %v4534_v9 = vadd.f32 %v10023_v21, %v11898_v2  ;;  %v9334_v2 = vpack.c.bf16 (%p336_p4), %v4783_v58, %v4783_v58  ;;  %v9302_v5 = vpack.c.bf16 (%p336_p4), %v4878_v35, %v4878_v35  ;;  %v12016_v14 = vld [vmem:[#allocation2 + $0x118] sm:$0xff] (%p336_p4)  ;;  %v4774_v21 = vld [vmem:[#allocation2 + $0x148] sm:$0xff] (%p336_p4)  ;;  %v4771_v35 = vld [vmem:[#allocation2 + $0x110] sm:$0xff] (%p336_p4) }
 0x235   : >> { %4759 = vst [vmem:[#allocation2 + $0x70] sm:$0xff] %v4727_v34  ;;  %v4879_v1 = vsel (%p336_p4), %vm438_vm0, %v4828_v44, %v4829_v38  ;;  %v5228_v53 = vrot.slane (%p336_p4), %v4777_v59, 1  ;;  %v4775_v34 = vld [vmem:[#allocation2 + $0x100] sm:$0xff] (%p336_p4)  ;;  %v5230_v37 = vrot.slane (%p336_p4), %v11983_v16, 1  ;;  %v9328_v24 = vpack.c.bf16 (%p336_p4), %v4774_v21, %v4774_v21 }
 0x236   : >> { %4760 = vst [vmem:[#allocation2 + $0x38] sm:$0xff] %v4728_v62  ;;  %v4695_v6 = vadd.f32 %v10113_v25, %v4534_v9  ;;  %338 = sbr.rel (!%p336_p4) target bundleno = 45 (0x2d), region = 83  ;;  %5195 = vst [vmem:[#allocation3 + $0x1fc] sm:$0xf] (%p336_p4), %v9334_v2  ;;  %v4825_v25 = vrot.slane (%p336_p4), %v4777_v59, 7  ;;  %v9301_v15 = vpack.c.bf16 (%p336_p4), %v4879_v1, %v4879_v1  ;;  %v9364_v62 = vpack.c.bf16 (%p336_p4), %v5281_v47, %v5281_v47 }
 0x237   : > { %5035 = vst [vmem:[#allocation3 + $0x1f8] sm:$0xf] (%p336_p4), %v9302_v5  ;;  %5723 = vst [vmem:[#allocation3 + $0x1bc] sm:$0xf] (%p336_p4), %v9302_v5  ;;  %v9365_v9 = vpack.c.bf16 (%p336_p4), %v5280_v17, %v5280_v17  ;;  %v4821_v2 = vrot.slane (%p336_p4), %v12016_v14, 7  ;;  %v4822_v57 = vrot.slane (%p336_p4), %v4774_v21, 7  ;;  %v9329_v12 = vpack.c.bf16 (%p336_p4), %v4775_v34, %v4775_v34 }
 0x238   : >> { %v4729_v29 = vmax.f32 %v4695_v6, 0.0  ;;  %v4882_v39 = vsel (%p336_p4), %vm438_vm0, %v4824_v7, %v4825_v25  ;;  %5034 = vst [vmem:[#allocation3 + $0x1d4] sm:$0xf] (%p336_p4), %v9301_v15  ;;  %v4881_v6 = vsel (%p336_p4), %vm438_vm0, %v4825_v25, %v4826_v11  ;;  %5722 = vst [vmem:[#allocation3 + $0x198] sm:$0xf] (%p336_p4), %v9301_v15  ;;  %v4823_v45 = vrot.slane (%p336_p4), %v4775_v34, 7 }
 0x239   : > { %v9299_v58 = vpack.c.bf16 (%p336_p4), %v4881_v6, %v4881_v6  ;;  %5434 = vst [vmem:[#allocation3 + $0x1b8] sm:$0xf] (%p336_p4), %v9364_v62  ;;  %5435 = vst [vmem:[#allocation3 + $0x1dc] sm:$0xf] (%p336_p4), %v9365_v9  ;;  %v5282_v46 = vsel (%p336_p4), %vm839_vm1, %v5229_v0, %v5230_v37  ;;  %v5283_v41 = vsel (%p336_p4), %vm839_vm1, %v5228_v53, %v5229_v0  ;;  %v5225_v16 = vrot.slane (%p336_p4), %v4774_v21, 1  ;;  %v12044_v25 = vld [vmem:[#allocation2 + $0x10] sm:$0xff] (%p336_p4) }
 0x23a   : >> { %4761 = vst [vmem:[#allocation2 + $0x20] sm:$0xff] %v4729_v29  ;;  %v9298_v29 = vpack.c.bf16 (%p336_p4), %v4882_v39, %v4882_v39  ;;  %5189 = vst [vmem:[#allocation3 + $0x124] sm:$0xf] (%p336_p4), %v9328_v24  ;;  %v5226_v49 = vrot.slane (%p336_p4), %v4775_v34, 1  ;;  %v10434_v5 = vld [vmem:[#allocation3 + $0x204] ss:$36 sps:$4 sm:$0xff] (%p336_p4)   ;;  %v9362_v31 = vpack.c.bf16 (%p336_p4), %v5283_v41, %v5283_v41  ;;  %v9363_v61 = vpack.c.bf16 (%p336_p4), %v5282_v46, %v5282_v46 }
 0x23b   : > { %5032 = vst [vmem:[#allocation3 + $0x18c] sm:$0xf] %v9299_v58  ;;  %5720 = vst [vmem:[#allocation3 + $0x150] sm:$0xf] %v9299_v58  ;;  %v4883_v27 = vsel %vm438_vm0, %v4822_v57, %v4823_v45  ;;  %v4884_v23 = vsel %vm438_vm0, %v4821_v2, %v4822_v57  ;;  %v5227_v44 = vrot.slane %v12003_v48, 1  ;;  %7812 = vmatprep.subr.bf16.mxu1 %v10434_v5  ;;  %v4819_v51 = vrot.slane %v4771_v35, 7 }
 0x23c   : > { %5031 = vst [vmem:[#allocation3 + $0x168] sm:$0xf] %v9298_v29  ;;  %5719 = vst [vmem:[#allocation3 + $0x12c] sm:$0xf] %v9298_v29  ;;  %v9296_v22 = vpack.c.bf16 %v4884_v23, %v4884_v23  ;;  %v9297_v50 = vpack.c.bf16 %v4883_v27, %v4883_v27  ;;  %v5285_v63 = vsel %vm839_vm1, %v5225_v16, %v5226_v49  ;;  %v4820_v59 = vrot.slane %v4772_v28, 7  ;;  %v4765_v34 = vld [vmem:[#allocation2 + $0x48] sm:$0xff] }
 0x23d   : > { %v10431_v18 = vld [vmem:[#allocation3 + $0x1fc] ss:$36 sps:$4 sm:$0xff]   ;;  %5190 = vst [vmem:[#allocation3 + $0x148] sm:$0xf] %v9329_v12  ;;  %5432 = vst [vmem:[#allocation3 + $0x170] sm:$0xf] %v9362_v31  ;;  %v9360_v33 = vpack.c.bf16 %v5285_v63, %v5285_v63  ;;  %7813 = vmatpush1.bf16.xpose.msra.mxu1 %v10436_v3  ;;  %v5284_v48 = vsel %vm839_vm1, %v5226_v49, %v5227_v44  ;;  %v9326_v52 = vpack.c.bf16 %v4771_v35, %v4771_v35 }
 0x23e   : > { %v10433_v8 = vld [vmem:[#allocation3 + $0x1f8] ss:$36 sps:$4 sm:$0xff]   ;;  %7771 = vmatprep.subr.bf16.mxu0 %v10431_v18  ;;  %5433 = vst [vmem:[#allocation3 + $0x194] sm:$0xf] %v9363_v61  ;;  %5029 = vst [vmem:[#allocation3 + $0x120] sm:$0xf] %v9296_v22  ;;  %v9327_v55 = vpack.c.bf16 %v4772_v28, %v4772_v28  ;;  %v9361_v56 = vpack.c.bf16 %v5284_v48, %v5284_v48  ;;  %v4885_v1 = vsel %vm438_vm0, %v4819_v51, %v4820_v59 }
 0x23f   : > { %7772 = vmatpush1.bf16.xpose.msra.mxu0 %v10433_v8  ;;  %v10437_v38 = vld [vmem:[#allocation3 + $0x1b4] ss:$36 sps:$4 sm:$0xff]   ;;  %5030 = vst [vmem:[#allocation3 + $0x144] sm:$0xf] %v9297_v50  ;;  %v5222_v30 = vrot.slane %v4771_v35, 1  ;;  %v4886_v42 = vsel %vm438_vm0, %v4818_v43, %v4819_v51  ;;  %v5223_v7 = vrot.slane %v4772_v28, 1  ;;  %v9295_v26 = vpack.c.bf16 %v4885_v1, %v4885_v1 }
 0x240   : > { %5717 = vst [vmem:[#allocation3 + $0xe4] sm:$0xf] %v9296_v22  ;;  %5718 = vst [vmem:[#allocation3 + $0x108] sm:$0xf] %v9297_v50  ;;  %v10439_v60 = vld [vmem:[#allocation3 + $0x1b0] ss:$36 sps:$4 sm:$0xff]   ;;  %7773 = vmatprep.subr.bf16.mxu0 %v10437_v38  ;;  %v9294_v11 = vpack.c.bf16 %v4886_v42, %v4886_v42  ;;  %v9324_v21 = vpack.c.bf16 %v4768_v54, %v4768_v54  ;;  %v9322_v35 = vpack.c.bf16 %v4765_v34, %v4765_v34 }
 0x241   : > { %5430 = vst [vmem:[#allocation3 + $0x128] sm:$0xf] %v9360_v33  ;;  %v10440_v15 = vld [vmem:[#allocation3 + $0x1bc] ss:$36 sps:$4 sm:$0xff]   ;;  %5187 = vst [vmem:[#allocation3 + $0xdc] sm:$0xf] %v9326_v52  ;;  %v5287_v47 = vsel %vm839_vm1, %v5222_v30, %v5223_v7 }
 0x242   : > { %5188 = vst [vmem:[#allocation3 + $0x100] sm:$0xf] %v9327_v55  ;;  %v5224_v13 = vrot.slane %v12016_v14, 1  ;;  %v4815_v17 = vrot.slane %v12036_v4, 7  ;;  %5431 = vst [vmem:[#allocation3 + $0x14c] sm:$0xf] %v9361_v56  ;;  %7814 = vmatprep.subr.bf16.mxu1 %v10440_v15  ;;  %v9358_v29 = vpack.c.bf16 %v5287_v47, %v5287_v47  ;;  %v9325_v14 = vpack.c.bf16 %v4769_v19, %v4769_v19 }
 0x243   : > { %v4816_v39 = vrot.slane %v4768_v54, 7  ;;  %v4817_v53 = vrot.slane %v4769_v19, 7  ;;  %v10442_v62 = vld [vmem:[#allocation3 + $0x1b8] ss:$36 sps:$4 sm:$0xff]   ;;  %v10443_v9 = vld [vmem:[#allocation3 + $0x16c] ss:$36 sps:$4 sm:$0xff]  }
 0x244   : > { %5027 = vst [vmem:[#allocation3 + $0xd8] sm:$0xf] %v9294_v11  ;;  %5028 = vst [vmem:[#allocation3 + $0xfc] sm:$0xf] %v9295_v26  ;;  %v5286_v6 = vsel %vm839_vm1, %v5223_v7, %v5224_v13  ;;  %v5219_v18 = vrot.slane %v4768_v54, 1  ;;  %v4766_v58 = vld [vmem:[#allocation2 + $0x160] sm:$0xff] }
 0x245   : > { %5715 = vst [vmem:[#allocation3 + $0x9c] sm:$0xf] %v9294_v11  ;;  %5716 = vst [vmem:[#allocation3 + $0xc0] sm:$0xf] %v9295_v26  ;;  %v9359_v0 = vpack.c.bf16 %v5286_v6, %v5286_v6  ;;  %v4887_v37 = vsel %vm438_vm0, %v4816_v39, %v4817_v53  ;;  %v4888_v24 = vsel %vm438_vm0, %v4815_v17, %v4816_v39  ;;  %v5220_v8 = vrot.slane %v4769_v19, 1  ;;  %v4763_v27 = vld [vmem:[#allocation2 + $0xd0] sm:$0xff] }
 0x246   : > { %5185 = vst [vmem:[#allocation3 + $0x94] sm:$0xf] %v9324_v21  ;;  %v10446_v2 = vld [vmem:[#allocation3 + $0x174] ss:$36 sps:$4 sm:$0xff]   ;;  %5428 = vst [vmem:[#allocation3 + $0xe0] sm:$0xf] %v9358_v29  ;;  %v9292_v57 = vpack.c.bf16 %v4888_v24, %v4888_v24  ;;  %v9293_v45 = vpack.c.bf16 %v4887_v37, %v4887_v37  ;;  %7815 = vmatpush1.bf16.xpose.msra.mxu1 %v10442_v62  ;;  %v9323_v31 = vpack.c.bf16 %v4766_v58, %v4766_v58 }
 0x247   : > { %7774 = vmatpush1.bf16.xpose.msra.mxu0 %v10439_v60  ;;  %5186 = vst [vmem:[#allocation3 + $0xb8] sm:$0xf] %v9325_v14  ;;  %v5221_v12 = vrot.slane %v12026_v10, 1  ;;  %v4812_v46 = vrot.slane %v12044_v25, 7  ;;  %5429 = vst [vmem:[#allocation3 + $0x104] sm:$0xf] %v9359_v0  ;;  %v5289_v41 = vsel %vm839_vm1, %v5219_v18, %v5220_v8  ;;  %7816 = vmatprep.subr.bf16.mxu1 %v10446_v2 }
 0x248   : > { %7775 = vmatprep.subr.bf16.mxu0 %v10443_v9  ;;  %v12060_v16 = vrot.slane %v4765_v34, 7  ;;  %v4814_v49 = vrot.slane %v4766_v58, 7  ;;  %5025 = vst [vmem:[#allocation3 + $0x90] sm:$0xf] %v9292_v57  ;;  %5026 = vst [vmem:[#allocation3 + $0xb4] sm:$0xf] %v9293_v45  ;;  %v9356_v5 = vpack.c.bf16 %v5289_v41, %v5289_v41  ;;  %v9321_v55 = vpack.c.bf16 %v4763_v27, %v4763_v27 }
 0x249   : > { %v5288_v28 = vsel %vm839_vm1, %v5220_v8, %v5221_v12  ;;  %v5216_v61 = vrot.slane %v4765_v34, 1  ;;  %5713 = vst [vmem:[#allocation3 + $0x54] sm:$0xf] %v9292_v57  ;;  %5714 = vst [vmem:[#allocation3 + $0x78] sm:$0xf] %v9293_v45  ;;  %v4762_v10 = vld [vmem:[#allocation2 + $0xb0] sm:$0xff] }
 0x24a   : > { %v10445_v23 = vld [vmem:[#allocation3 + $0x168] ss:$36 sps:$4 sm:$0xff]   ;;  %v9357_v3 = vpack.c.bf16 %v5288_v28, %v5288_v28  ;;  %v4889_v22 = vsel %vm438_vm0, %v12060_v16, %v4814_v49  ;;  %v4890_v50 = vsel %vm438_vm0, %v4812_v46, %v12060_v16  ;;  %5183 = vst [vmem:[#allocation3 + $0x4c] sm:$0xf] %v9322_v35  ;;  %v5217_v44 = vrot.slane %v4766_v58, 1  ;;  %v12070_v63 = vld [vmem:[#allocation2 + $0x68] sm:$0xff] }
 0x24b   : > { %v10449_v33 = vld [vmem:[#allocation3 + $0x124] ss:$36 sps:$4 sm:$0xff]   ;;  %5426 = vst [vmem:[#allocation3 + $0x98] sm:$0xf] %v9356_v5  ;;  %v9290_v43 = vpack.c.bf16 %v4890_v50, %v4890_v50  ;;  %v9291_v51 = vpack.c.bf16 %v4889_v22, %v4889_v22  ;;  %5184 = vst [vmem:[#allocation3 + $0x70] sm:$0xf] %v9323_v31  ;;  %v9320_v54 = vpack.c.bf16 %v4762_v10, %v4762_v10 }
 0x24c   : > { %v5218_v59 = vrot.slane %v12036_v4, 1  ;;  %5427 = vst [vmem:[#allocation3 + $0xbc] sm:$0xf] %v9357_v3  ;;  %v5291_v38 = vsel %vm839_vm1, %v5216_v61, %v5217_v44  ;;  %v4810_v48 = vrot.slane %v4762_v10, 7  ;;  %v4811_v52 = vrot.slane %v4763_v27, 7  ;;  %v5502_v30 = vld [vmem:[#allocation2 + $0x88] sm:$0xff] }
 0x24d   : > { %v10448_v19 = vld [vmem:[#allocation3 + $0x170] ss:$36 sps:$4 sm:$0xff]   ;;  %5023 = vst [vmem:[#allocation3 + $0x48] sm:$0xf] %v9290_v43  ;;  %5024 = vst [vmem:[#allocation3 + $0x6c] sm:$0xf] %v9291_v51  ;;  %v9354_v56 = vpack.c.bf16 %v5291_v38, %v5291_v38 }
 0x24e   : > { %v5290_v60 = vsel %vm839_vm1, %v5217_v44, %v5218_v59  ;;  %v4857_v1 = vrot.slane %v12070_v63, 7  ;;  %5181 = vst [vmem:[#allocation3 + $0x4] sm:$0xf] %v9320_v54  ;;  %v5213_v4 = vrot.slane %v4762_v10, 1  ;;  %5712 = vst [vmem:[#allocation3 + $0x30] sm:$0xf] %v9291_v51  ;;  %v4891_v11 = vsel %vm438_vm0, %v4810_v48, %v4811_v52  ;;  %7817 = vmatpush1.bf16.xpose.msra.mxu1 %v10448_v19 }
 0x24f   : > { %v12078_v42 = vld [vmem:[#allocation2 + $0x8] sm:$0xff]  ;;  %7776 = vmatpush1.bf16.xpose.msra.mxu0 %v10445_v23  ;;  %v10452_v7 = vld [vmem:[#allocation3 + $0x12c] ss:$36 sps:$4 sm:$0xff]   ;;  %v9355_v15 = vpack.c.bf16 %v5290_v60, %v5290_v60  ;;  %5182 = vst [vmem:[#allocation3 + $0x28] sm:$0xf] %v9321_v55  ;;  %v5214_v26 = vrot.slane %v4763_v27, 1  ;;  %v9289_v39 = vpack.c.bf16 %v4891_v11, %v4891_v11 }
 0x250   : > { %v5215_v13 = vrot.slane %v12044_v25, 1  ;;  %v4807_v17 = vld [vmem:[#allocation2 + $0x60] sm:$0xff]  ;;  %7777 = vmatprep.subr.bf16.mxu0 %v10449_v33  ;;  %5424 = vst [vmem:[#allocation3 + $0x50] sm:$0xf] %v9354_v56  ;;  %v4892_v47 = vsel %vm438_vm0, %v4857_v1, %v4810_v48  ;;  %v5550_v53 = vrot.slane %v5502_v30, 7  ;;  %v4808_v21 = vld [vmem:[#allocation2 + $0x70] sm:$0xff]  ;;  %7818 = vmatprep.subr.bf16.mxu1 %v10452_v7 }
 0x251   : > { %v9350_v34 = vpack.c.bf16 %v4807_v17, %v4807_v17  ;;  %5425 = vst [vmem:[#allocation3 + $0x74] sm:$0xf] %v9355_v15  ;;  %v9288_v62 = vpack.c.bf16 %v4892_v47, %v4892_v47  ;;  %v5293_v25 = vsel %vm839_vm1, %v5213_v4, %v5214_v26  ;;  %v4854_v6 = vrot.slane %v12078_v42, 7  ;;  %v5500_v29 = vld [vmem:[#allocation2 + $0x38] sm:$0xff]  ;;  %5022 = vst [vmem:[#allocation3 + $0x24] sm:$0xf] %v9289_v39 }
 0x252   : > { %v5292_v9 = vsel %vm839_vm1, %v5214_v26, %v5215_v13  ;;  %v9352_v14 = vpack.c.bf16 %v5293_v25, %v5293_v25  ;;  %v5582_v58 = vsel %vm438_vm0, %v5550_v53, %v12060_v16  ;;  %v4855_v0 = vrot.slane %v4807_v17, 7  ;;  %v5501_v37 = vld [vmem:[#allocation2 + $0x20] sm:$0xff]  ;;  %v12095_v24 = vld [vmem:[#allocation2 + $0x30] sm:$0xff]  ;;  %v12097_v8 = vld [vmem:[#allocation2 + $0xf8] sm:$0xff] }
 0x253   : > { %v9353_v18 = vpack.c.bf16 %v5292_v9, %v5292_v9  ;;  %5211 = vst [vmem:[#allocation3 + $0x43c] sm:$0xf] %v9350_v34  ;;  %v10451_v2 = vld [vmem:[#allocation3 + $0x120] ss:$36 sps:$4 sm:$0xff]   ;;  %5021 = vst [vmem:[#allocation3] sm:$0xf] %v9288_v62  ;;  %v9384_v57 = vpack.c.bf16 %v5582_v58, %v5582_v58  ;;  %v9351_v12 = vpack.c.bf16 %v4808_v21, %v4808_v21 }
 0x254   : > { %v4856_v45 = vrot.slane %v4808_v21, 7  ;;  %v5258_v46 = vrot.slane %v4807_v17, 1  ;;  %v12099_v41 = vld [vmem:[#allocation2 + $0x18] sm:$0xff]  ;;  %v10455_v49 = vld [vmem:[#allocation3 + $0xdc] ss:$36 sps:$4 sm:$0xff]   ;;  %v4862_v16 = vsel %vm438_vm0, %v4854_v6, %v4855_v0  ;;  %v5259_v35 = vrot.slane %v4808_v21, 1 }
 0x255   : > { %5422 = vst [vmem:[#allocation3 + $0x8] sm:$0xf] %v9352_v14  ;;  %5423 = vst [vmem:[#allocation3 + $0x2c] sm:$0xf] %v9353_v18  ;;  %v9348_v28 = vpack.c.bf16 %v12097_v8, %v12097_v8  ;;  %v9349_v5 = vpack.c.bf16 %v12099_v41, %v12099_v41  ;;  %v9318_v61 = vpack.c.bf16 %v4862_v16, %v4862_v16  ;;  %v5260_v10 = vrot.slane %v12070_v63, 1  ;;  %v12123_v30 = vld [vmem:[#allocation2 + $0xc8] sm:$0xff] }
 0x256   : > { %5711 = vst [vmem:[#allocation3 + $0xc] sm:$0xf] %v9384_v57  ;;  %v4861_v31 = vsel %vm438_vm0, %v4855_v0, %v4856_v45  ;;  %5212 = vst [vmem:[#allocation3 + $0x460] sm:$0xf] %v9351_v12  ;;  %v5548_v27 = vrot.slane %v5500_v29, 7  ;;  %v5263_v22 = vsel %vm839_vm1, %v5258_v46, %v5259_v35  ;;  %v5549_v50 = vrot.slane %v5501_v37, 7 }
 0x257   : > { %v10454_v23 = vld [vmem:[#allocation3 + $0x128] ss:$36 sps:$4 sm:$0xff]   ;;  %v9319_v3 = vpack.c.bf16 %v4861_v31, %v4861_v31  ;;  %v4851_v44 = vrot.slane %v12095_v24, 7  ;;  %5209 = vst [vmem:[#allocation3 + $0x3f4] sm:$0xf] %v9348_v28  ;;  %7778 = vmatpush1.bf16.xpose.msra.mxu0 %v10451_v2  ;;  %v5262_v43 = vsel %vm839_vm1, %v5259_v35, %v5260_v10  ;;  %v9382_v51 = vpack.c.bf16 %v5263_v22, %v5263_v22  ;;  %v4801_v19 = vld [vmem:[#allocation2 + $0xf0] sm:$0xff] }
 0x258   : > { %5210 = vst [vmem:[#allocation3 + $0x418] sm:$0xf] %v9349_v5  ;;  %v10458_v33 = vld [vmem:[#allocation3 + $0xe4] ss:$36 sps:$4 sm:$0xff]   ;;  %5051 = vst [vmem:[#allocation3 + $0x438] sm:$0xf] %v9318_v61  ;;  %v5552_v59 = vsel %vm438_vm0, %v4857_v1, %v5548_v27  ;;  %7779 = vmatprep.subr.bf16.mxu0 %v10455_v49  ;;  %v9383_v38 = vpack.c.bf16 %v5262_v43, %v5262_v43  ;;  %v5551_v48 = vsel %vm438_vm0, %v5548_v27, %v5549_v50 }
 0x259   : > { %v4852_v54 = vrot.slane %v12097_v8, 7  ;;  %5739 = vst [vmem:[#allocation3 + $0x3fc] sm:$0xf] %v9318_v61  ;;  %5052 = vst [vmem:[#allocation3 + $0x45c] sm:$0xf] %v9319_v3  ;;  %v9414_v52 = vpack.c.bf16 %v5552_v59, %v5552_v59  ;;  %v4853_v55 = vrot.slane %v12099_v41, 7  ;;  %v9415_v63 = vpack.c.bf16 %v5551_v48, %v5551_v48  ;;  %7819 = vmatpush1.bf16.xpose.msra.mxu1 %v10454_v23 }
 0x25a   : > { %5740 = vst [vmem:[#allocation3 + $0x420] sm:$0xf] %v9319_v3  ;;  %5452 = vst [vmem:[#allocation3 + $0x440] sm:$0xf] %v9382_v51  ;;  %v5255_v56 = vrot.slane %v12097_v8, 1  ;;  %v5256_v1 = vrot.slane %v12099_v41, 1  ;;  %v9346_v26 = vpack.c.bf16 %v4801_v19, %v4801_v19  ;;  %7820 = vmatprep.subr.bf16.mxu1 %v10458_v33 }
 0x25b   : > { %v4864_v60 = vsel %vm438_vm0, %v4851_v44, %v4852_v54  ;;  %v4802_v4 = vld [vmem:[#allocation2 + $0x150] sm:$0xff]  ;;  %5453 = vst [vmem:[#allocation3 + $0x464] sm:$0xf] %v9383_v38  ;;  %5741 = vst [vmem:[#allocation3 + $0x444] sm:$0xf] %v9414_v52  ;;  %v4863_v7 = vsel %vm438_vm0, %v4852_v54, %v4853_v55  ;;  %v5257_v11 = vrot.slane %v12078_v42, 1 }
 0x25c   : > { %v9316_v15 = vpack.c.bf16 %v4864_v60, %v4864_v60  ;;  %v10457_v13 = vld [vmem:[#allocation3 + $0xd8] ss:$36 sps:$4 sm:$0xff]   ;;  %5742 = vst [vmem:[#allocation3 + $0x468] sm:$0xf] %v9415_v63  ;;  %v9317_v17 = vpack.c.bf16 %v4863_v7, %v4863_v7  ;;  %v5265_v47 = vsel %vm839_vm1, %v5255_v56, %v5256_v1  ;;  %v4848_v39 = vrot.slane %v12123_v30, 7  ;;  %v12135_v21 = vld [vmem:[#allocation2 + $0x198] sm:$0xff] }
 0x25d   : > { %v4849_v53 = vrot.slane %v4801_v19, 7  ;;  %v10461_v34 = vld [vmem:[#allocation3 + $0x94] ss:$36 sps:$4 sm:$0xff]   ;;  %v5264_v62 = vsel %vm839_vm1, %v5256_v1, %v5257_v11  ;;  %v9380_v9 = vpack.c.bf16 %v5265_v47, %v5265_v47  ;;  %v4850_v42 = vrot.slane %v4802_v4, 7  ;;  %5207 = vst [vmem:[#allocation3 + $0x3ac] sm:$0xf] %v9346_v26 }
 0x25e   : > { %5049 = vst [vmem:[#allocation3 + $0x3f0] sm:$0xf] %v9316_v15  ;;  %v9347_v25 = vpack.c.bf16 %v4802_v4, %v4802_v4  ;;  %5737 = vst [vmem:[#allocation3 + $0x3b4] sm:$0xf] %v9316_v15  ;;  %v4798_v6 = vld [vmem:[#allocation2 + $0xc0] sm:$0xff]  ;;  %v9381_v29 = vpack.c.bf16 %v5264_v62, %v5264_v62  ;;  %v5252_v18 = vrot.slane %v4801_v19, 1 }
 0x25f   : > { %5050 = vst [vmem:[#allocation3 + $0x414] sm:$0xf] %v9317_v17  ;;  %v4866_v14 = vsel %vm438_vm0, %v4848_v39, %v4849_v53  ;;  %v5253_v58 = vrot.slane %v4802_v4, 1  ;;  %5738 = vst [vmem:[#allocation3 + $0x3d8] sm:$0xf] %v9317_v17  ;;  %v4799_v0 = vld [vmem:[#allocation2 + $0x190] sm:$0xff]  ;;  %v4865_v8 = vsel %vm438_vm0, %v4849_v53, %v4850_v42  ;;  %7780 = vmatpush1.bf16.xpose.msra.mxu0 %v10457_v13 }
 0x260   : > { %v10460_v37 = vld [vmem:[#allocation3 + $0xe0] ss:$36 sps:$4 sm:$0xff]   ;;  %5450 = vst [vmem:[#allocation3 + $0x3f8] sm:$0xf] %v9380_v9  ;;  %v9314_v2 = vpack.c.bf16 %v4866_v14, %v4866_v14  ;;  %5208 = vst [vmem:[#allocation3 + $0x3d0] sm:$0xf] %v9347_v25  ;;  %v9315_v46 = vpack.c.bf16 %v4865_v8, %v4865_v8  ;;  %v9344_v16 = vpack.c.bf16 %v4798_v6, %v4798_v6  ;;  %7781 = vmatprep.subr.bf16.mxu0 %v10461_v34 }
 0x261   : > { %v5254_v57 = vrot.slane %v12095_v24, 1  ;;  %v4845_v45 = vrot.slane %v12135_v21, 7  ;;  %v10464_v12 = vld [vmem:[#allocation3 + $0x9c] ss:$36 sps:$4 sm:$0xff]   ;;  %5451 = vst [vmem:[#allocation3 + $0x41c] sm:$0xf] %v9381_v29  ;;  %v5267_v41 = vsel %vm839_vm1, %v5252_v18, %v5253_v58  ;;  %v9345_v31 = vpack.c.bf16 %v4799_v0, %v4799_v0  ;;  %7821 = vmatpush1.bf16.xpose.msra.mxu1 %v10460_v37 }
 0x262   : > { %v4846_v49 = vrot.slane %v4798_v6, 7  ;;  %5047 = vst [vmem:[#allocation3 + $0x3a8] sm:$0xf] %v9314_v2  ;;  %v9378_v28 = vpack.c.bf16 %v5267_v41, %v5267_v41  ;;  %v4847_v5 = vrot.slane %v4799_v0, 7  ;;  %5735 = vst [vmem:[#allocation3 + $0x36c] sm:$0xf] %v9314_v2  ;;  %7822 = vmatprep.subr.bf16.mxu1 %v10464_v12 }
 0x263   : > { %v5266_v35 = vsel %vm839_vm1, %v5253_v58, %v5254_v57  ;;  %v12149_v24 = vld [vmem:[#allocation2 + $0x50] sm:$0xff]  ;;  %v4795_v61 = vld [vmem:[#allocation2 + $0xa0] sm:$0xff]  ;;  %5048 = vst [vmem:[#allocation3 + $0x3cc] sm:$0xf] %v9315_v46  ;;  %5205 = vst [vmem:[#allocation3 + $0x364] sm:$0xf] %v9344_v16 }
 0x264   : > { %v9379_v10 = vpack.c.bf16 %v5266_v35, %v5266_v35  ;;  %v4868_v27 = vsel %vm438_vm0, %v4845_v45, %v4846_v49  ;;  %v5249_v23 = vrot.slane %v4798_v6, 1  ;;  %v5250_v3 = vrot.slane %v4799_v0, 1  ;;  %5736 = vst [vmem:[#allocation3 + $0x390] sm:$0xf] %v9315_v46  ;;  %v4796_v22 = vld [vmem:[#allocation2 + $0x170] sm:$0xff]  ;;  %v12159_v52 = vld [vmem:[#allocation2 + $0xb8] sm:$0xff] }
 0x265   : > { %5448 = vst [vmem:[#allocation3 + $0x3b0] sm:$0xf] %v9378_v28  ;;  %v4867_v50 = vsel %vm438_vm0, %v4846_v49, %v4847_v5  ;;  %v9312_v44 = vpack.c.bf16 %v4868_v27, %v4868_v27  ;;  %5206 = vst [vmem:[#allocation3 + $0x388] sm:$0xf] %v9345_v31  ;;  %v5251_v33 = vrot.slane %v12123_v30, 1  ;;  %v9342_v43 = vpack.c.bf16 %v4795_v61, %v4795_v61  ;;  %v4792_v56 = vld [vmem:[#allocation2 + $0x1a8] sm:$0xff] }
 0x266   : > { %v10463_v51 = vld [vmem:[#allocation3 + $0x90] ss:$36 sps:$4 sm:$0xff]   ;;  %5449 = vst [vmem:[#allocation3 + $0x3d4] sm:$0xf] %v9379_v10  ;;  %v9313_v59 = vpack.c.bf16 %v4867_v50, %v4867_v50  ;;  %v5269_v54 = vsel %vm839_vm1, %v5249_v23, %v5250_v3  ;;  %v4842_v38 = vrot.slane %v12149_v24, 7  ;;  %v4843_v48 = vrot.slane %v4795_v61, 7 }
 0x267   : > { %v10467_v55 = vld [vmem:[#allocation3 + $0x4c] ss:$36 sps:$4 sm:$0xff]   ;;  %5045 = vst [vmem:[#allocation3 + $0x360] sm:$0xf] %v9312_v44  ;;  %v5268_v19 = vsel %vm839_vm1, %v5250_v3, %v5251_v33  ;;  %v9376_v63 = vpack.c.bf16 %v5269_v54, %v5269_v54  ;;  %v4844_v30 = vrot.slane %v4796_v22, 7  ;;  %v9343_v60 = vpack.c.bf16 %v4796_v22, %v4796_v22  ;;  %7782 = vmatpush1.bf16.xpose.msra.mxu0 %v10463_v51  ;;  %v4790_v2 = vld [vmem:[#allocation2 + $0x168] sm:$0xff] }
 0x268   : > { %5203 = vst [vmem:[#allocation3 + $0x31c] sm:$0xf] %v9342_v43  ;;  %5733 = vst [vmem:[#allocation3 + $0x324] sm:$0xf] %v9312_v44  ;;  %v9377_v1 = vpack.c.bf16 %v5268_v19, %v5268_v19  ;;  %v4870_v4 = vsel %vm438_vm0, %v4842_v38, %v4843_v48  ;;  %v5246_v7 = vrot.slane %v4795_v61, 1  ;;  %v5247_v15 = vrot.slane %v4796_v22, 1  ;;  %7783 = vmatprep.subr.bf16.mxu0 %v10467_v55 }
 0x269   : > { %5046 = vst [vmem:[#allocation3 + $0x384] sm:$0xf] %v9313_v59  ;;  %5734 = vst [vmem:[#allocation3 + $0x348] sm:$0xf] %v9313_v59  ;;  %v4793_v11 = vld [vmem:[#allocation2 + $0x140] sm:$0xff]  ;;  %v4869_v13 = vsel %vm438_vm0, %v4843_v48, %v4844_v30  ;;  %v9310_v17 = vpack.c.bf16 %v4870_v4, %v4870_v4  ;;  %v5248_v47 = vrot.slane %v12135_v21, 1  ;;  %v9340_v39 = vpack.c.bf16 %v4792_v56, %v4792_v56 }
 0x26a   : > { %v10466_v26 = vld [vmem:[#allocation3 + $0x98] ss:$36 sps:$4 sm:$0xff]   ;;  %5446 = vst [vmem:[#allocation3 + $0x368] sm:$0xf] %v9376_v63  ;;  %5204 = vst [vmem:[#allocation3 + $0x340] sm:$0xf] %v9343_v60  ;;  %v9311_v34 = vpack.c.bf16 %v4869_v13, %v4869_v13  ;;  %v5271_v62 = vsel %vm839_vm1, %v5246_v7, %v5247_v15  ;;  %v9341_v14 = vpack.c.bf16 %v4793_v11, %v4793_v11 }
 0x26b   : > { %v10470_v53 = vld [vmem:[#allocation3 + $0x54] ss:$36 sps:$4 sm:$0xff]   ;;  %5447 = vst [vmem:[#allocation3 + $0x38c] sm:$0xf] %v9377_v1  ;;  %v4839_v9 = vrot.slane %v12159_v52, 7  ;;  %v4840_v42 = vrot.slane %v4792_v56, 7  ;;  %v5270_v25 = vsel %vm839_vm1, %v5247_v15, %v5248_v47  ;;  %v9374_v6 = vpack.c.bf16 %v5271_v62, %v5271_v62  ;;  %7823 = vmatpush1.bf16.xpose.msra.mxu1 %v10466_v26 }
 0x26c   : > { %5043 = vst [vmem:[#allocation3 + $0x318] sm:$0xf] %v9310_v17  ;;  %v4841_v29 = vrot.slane %v4793_v11, 7  ;;  %5201 = vst [vmem:[#allocation3 + $0x2d4] sm:$0xf] %v9340_v39  ;;  %v12173_v21 = vld [vmem:[#allocation2 + $0x28] sm:$0xff]  ;;  %v9375_v58 = vpack.c.bf16 %v5270_v25, %v5270_v25  ;;  %7824 = vmatprep.subr.bf16.mxu1 %v10470_v53  ;;  %v9339_v27 = vpack.c.bf16 %v4790_v2, %v4790_v2 }
 0x26d   : > { %5731 = vst [vmem:[#allocation3 + $0x2dc] sm:$0xf] %v9310_v17  ;;  %v4789_v18 = vld [vmem:[#allocation2] sm:$0xff]  ;;  %5044 = vst [vmem:[#allocation3 + $0x33c] sm:$0xf] %v9311_v34  ;;  %v4872_v0 = vsel %vm438_vm0, %v4839_v9, %v4840_v42  ;;  %v5243_v37 = vrot.slane %v4792_v56, 1 }
 0x26e   : > { %v5244_v8 = vrot.slane %v4793_v11, 1  ;;  %5732 = vst [vmem:[#allocation3 + $0x300] sm:$0xf] %v9311_v34  ;;  %5444 = vst [vmem:[#allocation3 + $0x320] sm:$0xf] %v9374_v6  ;;  %v4871_v57 = vsel %vm438_vm0, %v4840_v42, %v4841_v29  ;;  %v9308_v45 = vpack.c.bf16 %v4872_v0, %v4872_v0  ;;  %v5245_v12 = vrot.slane %v12149_v24, 1 }
 0x26f   : > { %5202 = vst [vmem:[#allocation3 + $0x2f8] sm:$0xf] %v9341_v14  ;;  %v9338_v46 = vpack.c.bf16 %v4789_v18, %v4789_v18  ;;  %v10469_v41 = vld [vmem:[#allocation3 + $0x48] ss:$36 sps:$4 sm:$0xff]   ;;  %5445 = vst [vmem:[#allocation3 + $0x344] sm:$0xf] %v9375_v58  ;;  %v9309_v49 = vpack.c.bf16 %v4871_v57, %v4871_v57 }
 0x270   : > { %v5273_v16 = vsel %vm839_vm1, %v5243_v37, %v5244_v8  ;;  %v4836_v35 = vrot.slane %v12173_v21, 7  ;;  %v4837_v28 = vrot.slane %v4789_v18, 7  ;;  %v12183_v5 = vld [vmem:[#allocation2 + $0x80] sm:$0xff]  ;;  %v10473_v31 = vld [vmem:[#allocation3 + $0x4] ss:$36 sps:$4 sm:$0xff]   ;;  %v5272_v61 = vsel %vm839_vm1, %v5244_v8, %v5245_v12  ;;  %v12187_v23 = vld [vmem:[#allocation2 + $0xa8] sm:$0xff]  ;;  %7784 = vmatpush1.bf16.xpose.msra.mxu0 %v10469_v41 }
 0x271   : > { %5041 = vst [vmem:[#allocation3 + $0x2d0] sm:$0xf] %v9308_v45  ;;  %v9372_v10 = vpack.c.bf16 %v5273_v16, %v5273_v16  ;;  %v4838_v24 = vrot.slane %v4790_v2, 7  ;;  %5199 = vst [vmem:[#allocation3 + $0x28c] sm:$0xf] %v9338_v46  ;;  %v9373_v3 = vpack.c.bf16 %v5272_v61, %v5272_v61  ;;  %v5240_v50 = vrot.slane %v4789_v18, 1  ;;  %7785 = vmatprep.subr.bf16.mxu0 %v10473_v31 }
 0x272   : > { %5729 = vst [vmem:[#allocation3 + $0x294] sm:$0xf] %v9308_v45  ;;  %6574 = vst [vmem:[#allocation3 + $0x214] sm:$0xf] %v9338_v46  ;;  %v4874_v22 = vsel %vm438_vm0, %v4836_v35, %v4837_v28  ;;  %v12191_v44 = vrot.slane %v4790_v2, 1  ;;  %v5242_v59 = vrot.slane %v12159_v52, 1  ;;  %v9336_v54 = vpack.c.bf16 %v12183_v5, %v12183_v5 }
 0x273   : > { %5042 = vst [vmem:[#allocation3 + $0x2f4] sm:$0xf] %v9309_v49  ;;  %5730 = vst [vmem:[#allocation3 + $0x2b8] sm:$0xf] %v9309_v49  ;;  %v10472_v33 = vld [vmem:[#allocation3 + $0x50] ss:$36 sps:$4 sm:$0xff]   ;;  %v4873_v43 = vsel %vm438_vm0, %v4837_v28, %v4838_v24  ;;  %v9306_v51 = vpack.c.bf16 %v4874_v22, %v4874_v22  ;;  %v9337_v60 = vpack.c.bf16 %v12187_v23, %v12187_v23 }
 0x274   : > { %5442 = vst [vmem:[#allocation3 + $0x2d8] sm:$0xf] %v9372_v10  ;;  %5200 = vst [vmem:[#allocation3 + $0x2b0] sm:$0xf] %v9339_v27  ;;  %v10476_v38 = vld [vmem:[#allocation3 + $0xc] ss:$36 sps:$4 sm:$0xff]   ;;  %v9307_v48 = vpack.c.bf16 %v4873_v43, %v4873_v43  ;;  %v5275_v55 = vsel %vm839_vm1, %v5240_v50, %v12191_v44  ;;  %v5274_v52 = vsel %vm839_vm1, %v12191_v44, %v5242_v59  ;;  %7825 = vmatpush1.bf16.xpose.msra.mxu1 %v10472_v33 }
 0x275   : > { %6575 = vst [vmem:[#allocation3 + $0x238] sm:$0xf] %v9339_v27  ;;  %5443 = vst [vmem:[#allocation3 + $0x2fc] sm:$0xf] %v9373_v3  ;;  %v12202_v19 = vrot.slane %v12183_v5, 7  ;;  %v4835_v63 = vrot.slane %v12187_v23, 7  ;;  %v12208_v30 = vpack.c.bf16 %v5275_v55, %v5275_v55  ;;  %v9371_v4 = vpack.c.bf16 %v5274_v52, %v5274_v52  ;;  %7826 = vmatprep.subr.bf16.mxu1 %v10476_v38 }
 0x276   : > { %5039 = vst [vmem:[#allocation3 + $0x288] sm:$0xf] %v9306_v51  ;;  %5197 = vst [vmem:[#allocation3 + $0x244] sm:$0xf] %v9336_v54  ;;  %v5237_v56 = vrot.slane %v12183_v5, 1  ;;  %v12216_v1 = vld [vmem:[%s12621_s3] sm:$0xff] }
 0x277   : > { %5727 = vst [vmem:[#allocation3 + $0x24c] sm:$0xf] %v9306_v51  ;;  %6414 = vst [vmem:[#allocation3 + $0x210] sm:$0xf] %v9306_v51  ;;  %v4875_v7 = vsel %vm438_vm0, %v12202_v19, %v4835_v63  ;;  %v4876_v15 = vsel %vm438_vm0, %v4833_v20, %v12202_v19  ;;  %v5238_v11 = vrot.slane %v12187_v23, 1  ;;  %v5239_v17 = vrot.slane %v12173_v21, 1 }
 0x278   : > { %6572 = vst [vmem:[#allocation3 + $0x1cc] sm:$0xf] %v9336_v54  ;;  %5040 = vst [vmem:[#allocation3 + $0x2ac] sm:$0xf] %v9307_v48  ;;  %v9304_v26 = vpack.c.bf16 %v4876_v15, %v4876_v15  ;;  %v9305_v13 = vpack.c.bf16 %v4875_v7, %v4875_v7  ;;  %v12232_v47 = vld [vmem:[%s12621_s3 + $0x8] sm:$0xff]  ;;  %v8844_v53 = vcombine.high %v12216_v1, %v12216_v1  ;;  %v10648_v34 = vld [vmem:[#allocation2 + $0x80] sm:$0xff] }
 0x279   : > { %5728 = vst [vmem:[#allocation3 + $0x270] sm:$0xf] %v9307_v48  ;;  %6415 = vst [vmem:[#allocation3 + $0x234] sm:$0xf] %v9307_v48  ;;  %v10475_v39 = vld [vmem:[#allocation3] ss:$36 sps:$4 sm:$0xff]   ;;  %v5277_v20 = vsel %vm839_vm1, %v5237_v56, %v5238_v11  ;;  %v9430_v62 = vpack.c.bf16 %v10648_v34, %v10648_v34  ;;  %v5276_v6 = vsel %vm839_vm1, %v5238_v11, %v5239_v17 }
 0x27a   : > { %5440 = vst [vmem:[#allocation3 + $0x290] sm:$0xf] %v12208_v30  ;;  %5198 = vst [vmem:[#allocation3 + $0x268] sm:$0xf] %v9337_v60  ;;  %v10649_v9 = vld [vmem:[#allocation2 + $0xa8] sm:$0xff]  ;;  %v12240_v29 = vpack.c.bf16 %v5277_v20, %v5277_v20  ;;  %v5924_v14 = vrot.slane %v10648_v34, 1  ;;  %v12244_v18 = vpack.c.bf16 %v5276_v6, %v5276_v6  ;;  %7803 = vmatprep.mubr.bf16.mxu0 %v8844_v53  ;;  %7786 = vmatpush1.bf16.xpose.msra.mxu0 %v10475_v39 }
 0x27b   : > { %6573 = vst [vmem:[#allocation3 + $0x1f0] sm:$0xf] %v9337_v60  ;;  %5441 = vst [vmem:[#allocation3 + $0x2b4] sm:$0xf] %v9371_v4  ;;  %v9431_v42 = vpack.c.bf16 %v10649_v9, %v10649_v9  ;;  %v10479_v25 = vld [vmem:[#allocation3 + $0x43c] ss:$36 sps:$4 sm:$0xff]   ;;  %v8846_v0 = vcombine.high %v12232_v47, %v12232_v47 }
 0x27c   : > { %5037 = vst [vmem:[#allocation3 + $0x240] sm:$0xf] %v9304_v26  ;;  %5038 = vst [vmem:[#allocation3 + $0x264] sm:$0xf] %v9305_v13  ;;  %v12242_v21 = vld [vmem:[#allocation2 + $0xe8] sm:$0xff]  ;;  %v5925_v58 = vrot.slane %v10649_v9, 1  ;;  %7787 = vmatprep.subr.bf16.mxu0 %v10479_v25 }
 0x27d   : > { %6413 = vst [vmem:[#allocation3 + $0x1ec] sm:$0xf] %v9305_v13  ;;  %5885 = vst [vmem:[#allocation3 + $0x208] sm:$0xf] %v9430_v62  ;;  %v10650_v37 = vld [vmem:[#allocation2 + $0x158] sm:$0xff]  ;;  %7844 = vmatprep.mubr.bf16.mxu1 %v8846_v0  ;;  %v6209_v10 = vrot.slane %v12242_v21, 7  ;;  %v9520_v13 = vpack.c.bf16 %v12268_v36, %v12268_v36 }
 0x27e   : > { %5886 = vst [vmem:[#allocation3 + $0x22c] sm:$0xf] %v9431_v42  ;;  %v9428_v8 = vpack.c.bf16 %v10650_v37, %v10650_v37  ;;  %v10478_v2 = vld [vmem:[#allocation3 + $0x8] ss:$36 sps:$4 sm:$0xff]   ;;  %5438 = vst [vmem:[#allocation3 + $0x248] sm:$0xf] %v12240_v29  ;;  %v5967_v5 = vsel %vm839_vm1, %v5925_v58, %v5239_v17  ;;  %v5968_v31 = vsel %vm839_vm1, %v5924_v14, %v5925_v58 }
 0x27f   : > { %v10651_v57 = vld [vmem:[#allocation2 + $0x98] sm:$0xff]  ;;  %v5921_v12 = vrot.slane %v10650_v37, 1  ;;  %5439 = vst [vmem:[#allocation3 + $0x26c] sm:$0xf] %v12244_v18  ;;  %v9462_v24 = vpack.c.bf16 %v5968_v31, %v5968_v31  ;;  %v9463_v27 = vpack.c.bf16 %v5967_v5, %v5967_v5  ;;  %v6158_v23 = vld [vmem:[#allocation2 + $0x1a0] sm:$0xff]  ;;  %v6259_v33 = vsel %vm438_vm0, %v6209_v10, %v12202_v19  ;;  %7827 = vmatpush1.bf16.xpose.msra.mxu1 %v10478_v2  ;;  %v6155_v53 = vld [vmem:[#allocation2 + $0x130] sm:$0xff] }
 0x280   : > { %v9429_v45 = vpack.c.bf16 %v10651_v57, %v10651_v57  ;;  %v10652_v46 = vld [vmem:[#allocation2 + $0x138] sm:$0xff]  ;;  %5883 = vst [vmem:[#allocation3 + $0x1c0] sm:$0xf] %v9428_v8  ;;  %v5922_v61 = vrot.slane %v10651_v57, 1  ;;  %v9492_v54 = vpack.c.bf16 %v6259_v33, %v6259_v33  ;;  %v10654_v55 = vld [vmem:[#allocation2 + $0x1a0] sm:$0xff]  ;;  %v6206_v52 = vrot.slane %v6158_v23, 7 }
 0x281   : > { %v9426_v41 = vpack.c.bf16 %v10652_v46, %v10652_v46  ;;  %v10653_v49 = vld [vmem:[#allocation2 + $0x78] sm:$0xff]  ;;  %v5918_v43 = vrot.slane %v10652_v46, 1  ;;  %6125 = vst [vmem:[#allocation3 + $0x20c] sm:$0xf] %v9462_v24  ;;  %6126 = vst [vmem:[#allocation3 + $0x230] sm:$0xf] %v9463_v27 }
 0x282   : > { %v9427_v16 = vpack.c.bf16 %v10653_v49, %v10653_v49  ;;  %v12249_v35 = vld [vmem:[#allocation2 + $0x158] sm:$0xff]  ;;  %5884 = vst [vmem:[#allocation3 + $0x1e4] sm:$0xf] %v9429_v45  ;;  %v5969_v22 = vsel %vm839_vm1, %v5922_v61, %v5236_v40  ;;  %v5970_v50 = vsel %vm839_vm1, %v5921_v12, %v5922_v61  ;;  %v5919_v38 = vrot.slane %v10653_v49, 1  ;;  %v10481_v40 = vld [vmem:[#allocation3 + $0x438] ss:$36 sps:$4 sm:$0xff]  }
 0x283   : > { %v10482_v28 = vld [vmem:[#allocation3 + $0x444] ss:$36 sps:$4 sm:$0xff]   ;;  %5881 = vst [vmem:[#allocation3 + $0x178] sm:$0xf] %v9426_v41  ;;  %v9522_v3 = vpack.c.bf16 %v12249_v35, %v12249_v35  ;;  %v9460_v51 = vpack.c.bf16 %v5970_v50, %v5970_v50  ;;  %v9461_v59 = vpack.c.bf16 %v5969_v22, %v5969_v22  ;;  %v5920_v63 = vrot.slane %v10654_v55, 1  ;;  %v10656_v11 = vld [vmem:[#allocation2 + $0x180] sm:$0xff]  ;;  %7788 = vmatpush2.bf16.xpose.msra.mxu0 %v10481_v40 }
 0x284   : > { %5882 = vst [vmem:[#allocation3 + $0x19c] sm:$0xf] %v9427_v16  ;;  %v6160_v48 = vld [vmem:[#allocation2 + $0x98] sm:$0xff]  ;;  %7828 = vmatprep.subr.bf16.mxu1 %v10482_v28  ;;  %v10485_v4 = vld [vmem:[#allocation3 + $0x3f4] ss:$36 sps:$4 sm:$0xff]   ;;  %v5972_v7 = vsel %vm839_vm1, %v5918_v43, %v5919_v38  ;;  %v6207_v15 = vrot.slane %v12249_v35, 7  ;;  %v9425_v26 = vpack.c.bf16 %v10656_v11, %v10656_v11 }
 0x285   : > { %6570 = vst [vmem:[#allocation3 + $0x184] sm:$0xf] %v9522_v3  ;;  %v9523_v60 = vpack.c.bf16 %v6160_v48, %v6160_v48  ;;  %v10655_v56 = vld [vmem:[#allocation2 + $0xd8] sm:$0xff]  ;;  %6123 = vst [vmem:[#allocation3 + $0x1c4] sm:$0xf] %v9460_v51  ;;  %v5971_v17 = vsel %vm839_vm1, %v5919_v38, %v5920_v63  ;;  %v9458_v39 = vpack.c.bf16 %v5972_v7, %v5972_v7  ;;  %v6208_v20 = vrot.slane %v6160_v48, 7 }
 0x286   : > { %v9424_v19 = vpack.c.bf16 %v10655_v56, %v10655_v56  ;;  %6124 = vst [vmem:[#allocation3 + $0x1e8] sm:$0xf] %v9461_v59  ;;  %6412 = vst [vmem:[#allocation3 + $0x1c8] sm:$0xf] %v9492_v54  ;;  %v6157_v34 = vld [vmem:[#allocation2 + $0x78] sm:$0xff]  ;;  %v9459_v9 = vpack.c.bf16 %v5971_v17, %v5971_v17  ;;  %v6261_v42 = vsel %vm438_vm0, %v6206_v52, %v6207_v15  ;;  %v5915_v0 = vrot.slane %v10655_v56, 1 }
 0x287   : > { %6571 = vst [vmem:[#allocation3 + $0x1a8] sm:$0xf] %v9523_v60  ;;  %v10484_v62 = vld [vmem:[#allocation3 + $0x440] ss:$36 sps:$4 sm:$0xff]   ;;  %5880 = vst [vmem:[#allocation3 + $0x154] sm:$0xf] %v9425_v26  ;;  %v9521_v25 = vpack.c.bf16 %v6157_v34, %v6157_v34  ;;  %v6260_v14 = vsel %vm438_vm0, %v6207_v15, %v6208_v20  ;;  %v9490_v58 = vpack.c.bf16 %v6261_v42, %v6261_v42  ;;  %7789 = vmatprep.subr.bf16.mxu0 %v10485_v4 }
 0x288   : > { %5879 = vst [vmem:[#allocation3 + $0x130] sm:$0xf] %v9424_v19  ;;  %6568 = vst [vmem:[#allocation3 + $0x13c] sm:$0xf] %v9520_v13  ;;  %v10488_v6 = vld [vmem:[#allocation3 + $0x3fc] ss:$36 sps:$4 sm:$0xff]   ;;  %v9491_v37 = vpack.c.bf16 %v6260_v14, %v6260_v14  ;;  %7829 = vmatpush2.bf16.xpose.msra.mxu1 %v10484_v62 }
 0x289   : > { %6121 = vst [vmem:[#allocation3 + $0x17c] sm:$0xf] %v9458_v39  ;;  %6122 = vst [vmem:[#allocation3 + $0x1a0] sm:$0xf] %v9459_v9  ;;  %v5916_v8 = vrot.slane %v10656_v11, 1  ;;  %v10657_v2 = vld [vmem:[#allocation2 + $0x130] sm:$0xff]  ;;  %7830 = vmatprep.subr.bf16.mxu1 %v10488_v6 }
 0x28a   : > { %v5917_v57 = vrot.slane %v10657_v2, 1  ;;  %v6203_v45 = vrot.slane %v6155_v53, 7  ;;  %6569 = vst [vmem:[#allocation3 + $0x160] sm:$0xf] %v9521_v25  ;;  %6410 = vst [vmem:[#allocation3 + $0x180] sm:$0xf] %v9490_v58 }
 0x28b   : > { %v6204_v12 = vrot.slane %v12268_v36, 7  ;;  %v6205_v46 = vrot.slane %v6157_v34, 7  ;;  %v10658_v41 = vld [vmem:[#allocation2 + $0x148] sm:$0xff]  ;;  %v10659_v16 = vld [vmem:[#allocation2 + $0x100] sm:$0xff]  ;;  %6411 = vst [vmem:[#allocation3 + $0x1a4] sm:$0xf] %v9491_v37  ;;  %v5974_v5 = vsel %vm839_vm1, %v5915_v0, %v5916_v8 }
 0x28c   : > { %v9422_v49 = vpack.c.bf16 %v10658_v41, %v10658_v41  ;;  %v9423_v35 = vpack.c.bf16 %v10659_v16, %v10659_v16  ;;  %v5973_v28 = vsel %vm839_vm1, %v5916_v8, %v5917_v57  ;;  %v6152_v31 = vld [vmem:[#allocation2 + $0x58] sm:$0xff]  ;;  %v6154_v10 = vld [vmem:[#allocation2 + $0x180] sm:$0xff]  ;;  %v9456_v27 = vpack.c.bf16 %v5974_v5, %v5974_v5  ;;  %v10490_v40 = vld [vmem:[#allocation3 + $0x3f8] ss:$36 sps:$4 sm:$0xff]   ;;  %6814 = vst [vmem:[#allocation3 + $0x218] sm:$0xf] %v12208_v30 }
 0x28d   : > { %v6153_v61 = vld [vmem:[#allocation2 + $0xd8] sm:$0xff]  ;;  %v10487_v24 = vld [vmem:[#allocation3 + $0x3f0] ss:$36 sps:$4 sm:$0xff]   ;;  %v9457_v23 = vpack.c.bf16 %v5973_v28, %v5973_v28  ;;  %v6262_v3 = vsel %vm438_vm0, %v6204_v12, %v6205_v46  ;;  %v6263_v22 = vsel %vm438_vm0, %v6203_v45, %v6204_v12  ;;  %v5912_v59 = vrot.slane %v10658_v41, 1  ;;  %v10661_v4 = vld [vmem:[#allocation2 + $0x110] sm:$0xff] }
 0x28e   : > { %5877 = vst [vmem:[#allocation3 + $0xe8] sm:$0xf] %v9422_v49  ;;  %5878 = vst [vmem:[#allocation3 + $0x10c] sm:$0xf] %v9423_v35  ;;  %v10491_v50 = vld [vmem:[#allocation3 + $0x3ac] ss:$36 sps:$4 sm:$0xff]   ;;  %v9488_v33 = vpack.c.bf16 %v6263_v22, %v6263_v22  ;;  %v9489_v43 = vpack.c.bf16 %v6262_v3, %v6262_v3  ;;  %v9518_v51 = vpack.c.bf16 %v6153_v61, %v6153_v61  ;;  %7790 = vmatpush2.bf16.xpose.msra.mxu0 %v10487_v24 }
 0x28f   : > { %6119 = vst [vmem:[#allocation3 + $0x134] sm:$0xf] %v9456_v27  ;;  %6120 = vst [vmem:[#allocation3 + $0x158] sm:$0xf] %v9457_v23  ;;  %v5913_v54 = vrot.slane %v10659_v16, 1  ;;  %v10660_v38 = vld [vmem:[#allocation2 + $0x58] sm:$0xff]  ;;  %v9519_v52 = vpack.c.bf16 %v6154_v10, %v6154_v10  ;;  %v9420_v7 = vpack.c.bf16 %v10661_v4, %v10661_v4  ;;  %7791 = vmatprep.subr.bf16.mxu0 %v10491_v50 }
 0x290   : > { %v5914_v48 = vrot.slane %v10660_v38, 1  ;;  %v6200_v36 = vrot.slane %v6152_v31, 7  ;;  %6408 = vst [vmem:[#allocation3 + $0x138] sm:$0xf] %v9488_v33  ;;  %6409 = vst [vmem:[#allocation3 + $0x15c] sm:$0xf] %v9489_v43  ;;  %7831 = vmatpush2.bf16.xpose.msra.mxu1 %v10490_v40 }
 0x291   : > { %v6201_v55 = vrot.slane %v6153_v61, 7  ;;  %v6202_v63 = vrot.slane %v6154_v10, 7  ;;  %6566 = vst [vmem:[#allocation3 + $0xf4] sm:$0xf] %v9518_v51  ;;  %v10494_v60 = vld [vmem:[#allocation3 + $0x3b4] ss:$36 sps:$4 sm:$0xff]   ;;  %v5976_v19 = vsel %vm839_vm1, %v5912_v59, %v5913_v54 }
 0x292   : > { %v5975_v56 = vsel %vm839_vm1, %v5913_v54, %v5914_v48  ;;  %v6149_v15 = vld [vmem:[#allocation2 + $0x118] sm:$0xff]  ;;  %v9454_v11 = vpack.c.bf16 %v5976_v19, %v5976_v19  ;;  %6567 = vst [vmem:[#allocation3 + $0x118] sm:$0xf] %v9519_v52  ;;  %v6150_v39 = vld [vmem:[#allocation2 + $0x148] sm:$0xff]  ;;  %v6151_v20 = vld [vmem:[#allocation2 + $0x100] sm:$0xff]  ;;  %v5909_v42 = vrot.slane %v10661_v4, 1  ;;  %7832 = vmatprep.subr.bf16.mxu1 %v10494_v60 }
 0x293   : > { %v9455_v26 = vpack.c.bf16 %v5975_v56, %v5975_v56  ;;  %v6264_v13 = vsel %vm438_vm0, %v6201_v55, %v6202_v63  ;;  %v6265_v17 = vsel %vm438_vm0, %v6200_v36, %v6201_v55  ;;  %v10662_v62 = vld [vmem:[#allocation2 + $0x90] sm:$0xff]  ;;  %5875 = vst [vmem:[#allocation3 + $0xa0] sm:$0xf] %v9420_v7  ;;  %v10663_v6 = vld [vmem:[#allocation2 + $0x118] sm:$0xff]  ;;  %v6197_v58 = vrot.slane %v6149_v15, 7  ;;  %v6146_v45 = vld [vmem:[#allocation2 + $0x108] sm:$0xff] }
 0x294   : > { %v9486_v53 = vpack.c.bf16 %v6265_v17, %v6265_v17  ;;  %v9487_v34 = vpack.c.bf16 %v6264_v13, %v6264_v13  ;;  %v9421_v9 = vpack.c.bf16 %v10662_v62, %v10662_v62  ;;  %6117 = vst [vmem:[#allocation3 + $0xec] sm:$0xf] %v9454_v11  ;;  %v5910_v25 = vrot.slane %v10662_v62, 1  ;;  %v10493_v0 = vld [vmem:[#allocation3 + $0x3a8] ss:$36 sps:$4 sm:$0xff]   ;;  %v6147_v12 = vld [vmem:[#allocation2 + $0x110] sm:$0xff] }
 0x295   : > { %6118 = vst [vmem:[#allocation3 + $0x110] sm:$0xf] %v9455_v26  ;;  %v5911_v14 = vrot.slane %v10663_v6, 1  ;;  %v6198_v37 = vrot.slane %v6150_v39, 7  ;;  %v6199_v8 = vrot.slane %v6151_v20, 7  ;;  %v9516_v2 = vpack.c.bf16 %v6150_v39, %v6150_v39  ;;  %v6148_v31 = vld [vmem:[#allocation2 + $0x90] sm:$0xff] }
 0x296   : > { %6406 = vst [vmem:[#allocation3 + $0xf0] sm:$0xf] %v9486_v53  ;;  %6407 = vst [vmem:[#allocation3 + $0x114] sm:$0xf] %v9487_v34  ;;  %v9517_v57 = vpack.c.bf16 %v6151_v20, %v6151_v20  ;;  %v10497_v46 = vld [vmem:[#allocation3 + $0x364] ss:$36 sps:$4 sm:$0xff]   ;;  %v5978_v49 = vsel %vm839_vm1, %v5909_v42, %v5910_v25  ;;  %7792 = vmatpush2.bf16.xpose.msra.mxu0 %v10493_v0  ;;  %v9514_v36 = vpack.c.bf16 %v6147_v12, %v6147_v12 }
 0x297   : > { %5876 = vst [vmem:[#allocation3 + $0xc4] sm:$0xf] %v9421_v9  ;;  %v5977_v41 = vsel %vm839_vm1, %v5910_v25, %v5911_v14  ;;  %v9452_v16 = vpack.c.bf16 %v5978_v49, %v5978_v49  ;;  %v6266_v28 = vsel %vm438_vm0, %v6198_v37, %v6199_v8  ;;  %v6267_v5 = vsel %vm438_vm0, %v6197_v58, %v6198_v37  ;;  %v10496_v61 = vld [vmem:[#allocation3 + $0x3b0] ss:$36 sps:$4 sm:$0xff]   ;;  %v10665_v22 = vld [vmem:[#allocation2 + $0x178] sm:$0xff]  ;;  %v10666_v51 = vld [vmem:[#allocation2 + $0x108] sm:$0xff] }
 0x298   : > { %v9453_v35 = vpack.c.bf16 %v5977_v41, %v5977_v41  ;;  %6564 = vst [vmem:[#allocation3 + $0xac] sm:$0xf] %v9516_v2  ;;  %6565 = vst [vmem:[#allocation3 + $0xd0] sm:$0xf] %v9517_v57  ;;  %v9484_v10 = vpack.c.bf16 %v6267_v5, %v6267_v5  ;;  %v9485_v24 = vpack.c.bf16 %v6266_v28, %v6266_v28  ;;  %v10664_v27 = vld [vmem:[#allocation2 + $0x40] sm:$0xff]  ;;  %v5907_v43 = vrot.slane %v10665_v22, 1 }
 0x299   : > { %v9418_v23 = vpack.c.bf16 %v10664_v27, %v10664_v27  ;;  %v10500_v3 = vld [vmem:[#allocation3 + $0x36c] ss:$36 sps:$4 sm:$0xff]   ;;  %6115 = vst [vmem:[#allocation3 + $0xa4] sm:$0xf] %v9452_v16  ;;  %v9419_v50 = vpack.c.bf16 %v10665_v22, %v10665_v22  ;;  %v5906_v33 = vrot.slane %v10664_v27, 1  ;;  %v5908_v59 = vrot.slane %v10666_v51, 1  ;;  %7793 = vmatprep.subr.bf16.mxu0 %v10497_v46  ;;  %7833 = vmatpush2.bf16.xpose.msra.mxu1 %v10496_v61 }
 0x29a   : > { %6116 = vst [vmem:[#allocation3 + $0xc8] sm:$0xf] %v9453_v35  ;;  %6404 = vst [vmem:[#allocation3 + $0xa8] sm:$0xf] %v9484_v10  ;;  %v6194_v54 = vrot.slane %v6146_v45, 7  ;;  %v6195_v38 = vrot.slane %v6147_v12, 7  ;;  %v9515_v52 = vpack.c.bf16 %v6148_v31, %v6148_v31  ;;  %7834 = vmatprep.subr.bf16.mxu1 %v10500_v3  ;;  %v8843_v26 = vcombine.low %v12216_v1, %v12216_v1 }
 0x29b   : > { %6405 = vst [vmem:[#allocation3 + $0xcc] sm:$0xf] %v9485_v24  ;;  %5873 = vst [vmem:[#allocation3 + $0x58] sm:$0xf] %v9418_v23  ;;  %v6196_v48 = vrot.slane %v6148_v31, 7  ;;  %v6144_v40 = vld [vmem:[#allocation2 + $0x40] sm:$0xff]  ;;  %v5979_v55 = vsel %vm839_vm1, %v5907_v43, %v5908_v59  ;;  %v5980_v63 = vsel %vm839_vm1, %v5906_v33, %v5907_v43  ;;  %v8845_v57 = vcombine.low %v12232_v47, %v12232_v47 }
 0x29c   : > { %5874 = vst [vmem:[#allocation3 + $0x7c] sm:$0xf] %v9419_v50  ;;  %v6145_v60 = vld [vmem:[#allocation2 + $0x178] sm:$0xff]  ;;  %v9450_v56 = vpack.c.bf16 %v5980_v63, %v5980_v63  ;;  %v9451_v19 = vpack.c.bf16 %v5979_v55, %v5979_v55  ;;  %v6269_v7 = vsel %vm438_vm0, %v6194_v54, %v6195_v38  ;;  %6562 = vst [vmem:[#allocation3 + $0x64] sm:$0xf] %v9514_v36  ;;  %v12314_v15 = vld [vmem:[#allocation2 + $0x188] sm:$0xff] }
 0x29d   : > { %v6268_v4 = vsel %vm438_vm0, %v6195_v38, %v6196_v48  ;;  %v10499_v11 = vld [vmem:[#allocation3 + $0x360] ss:$36 sps:$4 sm:$0xff]   ;;  %v9482_v13 = vpack.c.bf16 %v6269_v7, %v6269_v7  ;;  %6563 = vst [vmem:[#allocation3 + $0x88] sm:$0xf] %v9515_v52  ;;  %v10502_v39 = vld [vmem:[#allocation3 + $0x368] ss:$36 sps:$4 sm:$0xff]   ;;  %v9512_v12 = vpack.c.bf16 %v6144_v40, %v6144_v40  ;;  %v9513_v46 = vpack.c.bf16 %v6145_v60, %v6145_v60 }
 0x29e   : > { %v9483_v17 = vpack.c.bf16 %v6268_v4, %v6268_v4  ;;  %v10503_v20 = vld [vmem:[#allocation3 + $0x31c] ss:$36 sps:$4 sm:$0xff]   ;;  %6113 = vst [vmem:[#allocation3 + $0x5c] sm:$0xf] %v9450_v56  ;;  %6114 = vst [vmem:[#allocation3 + $0x80] sm:$0xf] %v9451_v19  ;;  %7794 = vmatpush2.bf16.xpose.msra.mxu0 %v10499_v11 }
 0x29f   : > { %v10667_v53 = vld [vmem:[#allocation2 + $0x48] sm:$0xff]  ;;  %v10668_v62 = vld [vmem:[#allocation2 + $0x160] sm:$0xff]  ;;  %v10506_v6 = vld [vmem:[#allocation3 + $0x324] ss:$36 sps:$4 sm:$0xff]   ;;  %6402 = vst [vmem:[#allocation3 + $0x60] sm:$0xf] %v9482_v13  ;;  %7795 = vmatprep.subr.bf16.mxu0 %v10503_v20 }
 0x2a0   : > { %v9416_v34 = vpack.c.bf16 %v10667_v53, %v10667_v53  ;;  %v9417_v9 = vpack.c.bf16 %v10668_v62, %v10668_v62  ;;  %v5903_v42 = vrot.slane %v10667_v53, 1  ;;  %v5904_v25 = vrot.slane %v10668_v62, 1  ;;  %6403 = vst [vmem:[#allocation3 + $0x84] sm:$0xf] %v9483_v17  ;;  %v10669_v14 = vld [vmem:[#allocation2 + $0x128] sm:$0xff]  ;;  %v12325_v41 = vld [vmem:[#allocation2 + $0xe0] sm:$0xff] }
 0x2a1   : > { %v5905_v58 = vrot.slane %v10669_v14, 1  ;;  %v6192_v0 = vrot.slane %v6144_v40, 7  ;;  %v6193_v37 = vrot.slane %v6145_v60, 7  ;;  %v6239_v8 = vrot.slane %v12314_v15, 7  ;;  %v12319_v2 = vld [vmem:[#allocation2 + $0x88] sm:$0xff]  ;;  %v12333_v5 = vld [vmem:[#allocation2 + $0x120] sm:$0xff]  ;;  %7835 = vmatpush2.bf16.xpose.msra.mxu1 %v10502_v39 }
 0x2a2   : > { %5871 = vst [vmem:[#allocation3 + $0x10] sm:$0xf] %v9416_v34  ;;  %5872 = vst [vmem:[#allocation3 + $0x34] sm:$0xf] %v9417_v9  ;;  %v5982_v45 = vsel %vm839_vm1, %v5903_v42, %v5904_v25  ;;  %v6609_v31 = vrot.slane %v12242_v21, 1  ;;  %v10670_v23 = vld [vmem:[#allocation2 + $0x38] sm:$0xff]  ;;  %7836 = vmatprep.subr.bf16.mxu1 %v10506_v6  ;;  %v9542_v52 = vpack.c.bf16 %v12325_v41, %v12325_v41 }
 0x2a3   : > { %v5981_v49 = vsel %vm839_vm1, %v5904_v25, %v5905_v58  ;;  %v9448_v16 = vpack.c.bf16 %v5982_v45, %v5982_v45  ;;  %v6270_v35 = vsel %vm438_vm0, %v6192_v0, %v6193_v37  ;;  %v6271_v28 = vsel %vm438_vm0, %v6239_v8, %v6192_v0  ;;  %6560 = vst [vmem:[#allocation3 + $0x1c] sm:$0xf] %v9512_v12  ;;  %v10505_v27 = vld [vmem:[#allocation3 + $0x318] ss:$36 sps:$4 sm:$0xff]   ;;  %v10671_v22 = vld [vmem:[#allocation2 + $0x20] sm:$0xff]  ;;  %v12350_v56 = vld [vmem:[#allocation2 + $0x38] sm:$0xff] }
 0x2a4   : > { %v9449_v61 = vpack.c.bf16 %v5981_v49, %v5981_v49  ;;  %v9480_v10 = vpack.c.bf16 %v6271_v28, %v6271_v28  ;;  %v9481_v24 = vpack.c.bf16 %v6270_v35, %v6270_v35  ;;  %6561 = vst [vmem:[#allocation3 + $0x40] sm:$0xf] %v9513_v46  ;;  %v9446_v3 = vpack.c.bf16 %v10670_v23, %v10670_v23  ;;  %v10509_v51 = vld [vmem:[#allocation3 + $0x2d4] ss:$36 sps:$4 sm:$0xff]   ;;  %v10508_v9 = vld [vmem:[#allocation3 + $0x320] ss:$36 sps:$4 sm:$0xff]  }
 0x2a5   : > { %6111 = vst [vmem:[#allocation3 + $0x14] sm:$0xf] %v9448_v16  ;;  %v9447_v50 = vpack.c.bf16 %v10671_v22, %v10671_v22  ;;  %v5948_v33 = vrot.slane %v10670_v23, 1  ;;  %v5949_v43 = vrot.slane %v10671_v22, 1  ;;  %v10672_v59 = vld [vmem:[#allocation2 + $0x88] sm:$0xff]  ;;  %v6236_v38 = vrot.slane %v12319_v2, 7 }
 0x2a6   : > { %6112 = vst [vmem:[#allocation3 + $0x38] sm:$0xf] %v9449_v61  ;;  %6400 = vst [vmem:[#allocation3 + $0x18] sm:$0xf] %v9480_v10  ;;  %v5950_v54 = vrot.slane %v10672_v59, 1  ;;  %v6237_v48 = vrot.slane %v12325_v41, 7  ;;  %v9543_v60 = vpack.c.bf16 %v12333_v5, %v12333_v5  ;;  %7796 = vmatpush2.bf16.xpose.msra.mxu0 %v10505_v27  ;;  %v9540_v46 = vpack.c.bf16 %v12350_v56, %v12350_v56 }
 0x2a7   : > { %6401 = vst [vmem:[#allocation3 + $0x3c] sm:$0xf] %v9481_v24  ;;  %v6238_v36 = vrot.slane %v12333_v5, 7  ;;  %v6997_v40 = vld [vmem:[%s12622_s4] sm:$0xff]  ;;  %v12342_v55 = vld [vmem:[#allocation2 + $0x68] sm:$0xff]  ;;  %v5952_v63 = vsel %vm839_vm1, %v5948_v33, %v5949_v43  ;;  %v10727_v13 = vmov 0   ;;  %7797 = vmatprep.subr.bf16.mxu0 %v10509_v51 }
 0x2a8   : > { %5901 = vst [vmem:[#allocation3 + $0x448] sm:$0xf] %v9446_v3  ;;  %5902 = vst [vmem:[#allocation3 + $0x46c] sm:$0xf] %v9447_v50  ;;  %v5951_v19 = vsel %vm839_vm1, %v5949_v43, %v5950_v54  ;;  %v9478_v4 = vpack.c.bf16 %v5952_v63, %v5952_v63  ;;  %v6241_v11 = vsel %vm438_vm0, %v6236_v38, %v6237_v48  ;;  %10430 = vset.pattern.permute.xlu0 %v10727_v13  ;;  %v12358_v17 = vld [vmem:[#allocation2 + $0x20] sm:$0xff]  ;;  %v10674_v42 = vld [vmem:[#allocation2 + $0x70] sm:$0xff] }
 0x2a9   : > { %v6240_v7 = vsel %vm438_vm0, %v6237_v48, %v6238_v36  ;;  %v9479_v39 = vpack.c.bf16 %v5951_v19, %v5951_v19  ;;  %v9510_v20 = vpack.c.bf16 %v6241_v11, %v6241_v11  ;;  %6590 = vst [vmem:[#allocation3 + $0x454] sm:$0xf] %v9542_v52  ;;  %6591 = vst [vmem:[#allocation3 + $0x478] sm:$0xf] %v9543_v60  ;;  %7000 = vperm.xlu0 %10430, %v6997_v40   ;;  %v10673_v34 = vld [vmem:[#allocation2 + $0x60] sm:$0xff]  ;;  %v10675_v58 = vld [vmem:[#allocation2 + $0x68] sm:$0xff] }
 0x2aa   : > { %v9511_v53 = vpack.c.bf16 %v6240_v7, %v6240_v7  ;;  %v9444_v62 = vpack.c.bf16 %v10673_v34, %v10673_v34  ;;  %6141 = vst [vmem:[#allocation3 + $0x44c] sm:$0xf] %v9478_v4  ;;  %v9445_v25 = vpack.c.bf16 %v10674_v42, %v10674_v42  ;;  %v5945_v6 = vrot.slane %v10673_v34, 1  ;;  %v10512_v37 = vld [vmem:[#allocation3 + $0x2dc] ss:$36 sps:$4 sm:$0xff]   ;;  %v10676_v28 = vld [vmem:[#allocation2 + $0xf8] sm:$0xff]  ;;  %7837 = vmatpush2.bf16.xpose.msra.mxu1 %v10508_v9 }
 0x2ab   : > { %v5946_v14 = vrot.slane %v10674_v42, 1  ;;  %v5947_v0 = vrot.slane %v10675_v58, 1  ;;  %6142 = vst [vmem:[#allocation3 + $0x470] sm:$0xf] %v9479_v39  ;;  %6430 = vst [vmem:[#allocation3 + $0x450] sm:$0xf] %v9510_v20  ;;  %v9541_v35 = vpack.c.bf16 %v12358_v17, %v12358_v17  ;;  %v9442_v61 = vpack.c.bf16 %v10676_v28, %v10676_v28  ;;  %7838 = vmatprep.subr.bf16.mxu1 %v10512_v37 }
 0x2ac   : > { %6431 = vst [vmem:[#allocation3 + $0x474] sm:$0xf] %v9511_v53  ;;  %5899 = vst [vmem:[#allocation3 + $0x400] sm:$0xf] %v9444_v62  ;;  %v6233_v8 = vrot.slane %v12342_v55, 7  ;;  %v6234_v45 = vrot.slane %v12350_v56, 7 }
 0x2ad   : > { %v6235_v12 = vrot.slane %v12358_v17, 7  ;;  %5900 = vst [vmem:[#allocation3 + $0x424] sm:$0xf] %v9445_v25  ;;  %v5953_v49 = vsel %vm839_vm1, %v5946_v14, %v5947_v0  ;;  %v5954_v16 = vsel %vm839_vm1, %v5945_v6, %v5946_v14  ;;  %v12371_v10 = vld [vmem:[#allocation2 + $0x8] sm:$0xff]  ;;  %v12373_v24 = vld [vmem:[#allocation2 + $0x60] sm:$0xff]  ;;  %v12379_v50 = vld [vmem:[#allocation2 + $0x70] sm:$0xff] }
 0x2ae   : > { %v9476_v27 = vpack.c.bf16 %v5954_v16, %v5954_v16  ;;  %v9477_v23 = vpack.c.bf16 %v5953_v49, %v5953_v49  ;;  %v6243_v22 = vsel %vm438_vm0, %v6233_v8, %v6234_v45  ;;  %6588 = vst [vmem:[#allocation3 + $0x40c] sm:$0xf] %v9540_v46  ;;  %6589 = vst [vmem:[#allocation3 + $0x430] sm:$0xf] %v9541_v35  ;;  %v10677_v51 = vld [vmem:[#allocation2 + $0x18] sm:$0xff]  ;;  %v5942_v54 = vrot.slane %v10676_v28, 1 }
 0x2af   : > { %v6242_v3 = vsel %vm438_vm0, %v6234_v45, %v6235_v12  ;;  %v9508_v33 = vpack.c.bf16 %v6243_v22, %v6243_v22  ;;  %v9443_v59 = vpack.c.bf16 %v10677_v51, %v10677_v51  ;;  %5897 = vst [vmem:[#allocation3 + $0x3b8] sm:$0xf] %v9442_v61  ;;  %v10511_v38 = vld [vmem:[#allocation3 + $0x2d0] ss:$36 sps:$4 sm:$0xff]   ;;  %v5943_v48 = vrot.slane %v10677_v51, 1  ;;  %v10678_v36 = vld [vmem:[#allocation2 + $0x8] sm:$0xff] }
 0x2b0   : > { %v9509_v43 = vpack.c.bf16 %v6242_v3, %v6242_v3  ;;  %6139 = vst [vmem:[#allocation3 + $0x404] sm:$0xf] %v9476_v27  ;;  %6140 = vst [vmem:[#allocation3 + $0x428] sm:$0xf] %v9477_v23  ;;  %v5944_v40 = vrot.slane %v10678_v36, 1  ;;  %v6230_v63 = vrot.slane %v12371_v10, 7  ;;  %v9538_v4 = vpack.c.bf16 %v12373_v24, %v12373_v24  ;;  %7798 = vmatpush2.bf16.xpose.msra.mxu0 %v10511_v38 }
 0x2b1   : > { %v6231_v52 = vrot.slane %v12373_v24, 7  ;;  %v10515_v60 = vld [vmem:[#allocation3 + $0x28c] ss:$36 sps:$4 sm:$0xff]   ;;  %6428 = vst [vmem:[#allocation3 + $0x408] sm:$0xf] %v9508_v33  ;;  %v6232_v19 = vrot.slane %v12379_v50, 7  ;;  %v9539_v7 = vpack.c.bf16 %v12379_v50, %v12379_v50  ;;  %v5956_v53 = vsel %vm839_vm1, %v5942_v54, %v5943_v48 }
 0x2b2   : > { %6429 = vst [vmem:[#allocation3 + $0x42c] sm:$0xf] %v9509_v43  ;;  %5898 = vst [vmem:[#allocation3 + $0x3dc] sm:$0xf] %v9443_v59  ;;  %v10679_v11 = vld [vmem:[#allocation2 + $0xf0] sm:$0xff]  ;;  %v5955_v20 = vsel %vm839_vm1, %v5943_v48, %v5944_v40  ;;  %v12396_v42 = vld [vmem:[#allocation2 + $0xf8] sm:$0xff]  ;;  %v9474_v14 = vpack.c.bf16 %v5956_v53, %v5956_v53  ;;  %7799 = vmatprep.subr.bf16.mxu0 %v10515_v60 }
 0x2b3   : > { %v9440_v13 = vpack.c.bf16 %v10679_v11, %v10679_v11  ;;  %v12388_v39 = vld [vmem:[#allocation2 + $0x30] sm:$0xff]  ;;  %v6245_v34 = vsel %vm438_vm0, %v6230_v63, %v6231_v52  ;;  %v12398_v25 = vld [vmem:[#allocation2 + $0x18] sm:$0xff]  ;;  %v10514_v6 = vld [vmem:[#allocation3 + $0x2d8] ss:$36 sps:$4 sm:$0xff]   ;;  %v9475_v58 = vpack.c.bf16 %v5955_v20, %v5955_v20  ;;  %v6244_v0 = vsel %vm438_vm0, %v6231_v52, %v6232_v19  ;;  %6586 = vst [vmem:[#allocation3 + $0x3c4] sm:$0xf] %v9538_v4 }
 0x2b4   : > { %v10680_v62 = vld [vmem:[#allocation2 + $0x150] sm:$0xff]  ;;  %v9506_v37 = vpack.c.bf16 %v6245_v34, %v6245_v34  ;;  %6587 = vst [vmem:[#allocation3 + $0x3e8] sm:$0xf] %v9539_v7  ;;  %v10518_v8 = vld [vmem:[#allocation3 + $0x294] ss:$36 sps:$4 sm:$0xff]   ;;  %v9507_v45 = vpack.c.bf16 %v6244_v0, %v6244_v0  ;;  %v5939_v12 = vrot.slane %v10679_v11, 1  ;;  %v9536_v49 = vpack.c.bf16 %v12396_v42, %v12396_v42  ;;  %7839 = vmatpush2.bf16.xpose.msra.mxu1 %v10514_v6 }
 0x2b5   : > { %v9441_v9 = vpack.c.bf16 %v10680_v62, %v10680_v62  ;;  %5895 = vst [vmem:[#allocation3 + $0x370] sm:$0xf] %v9440_v13  ;;  %v5940_v46 = vrot.slane %v10680_v62, 1  ;;  %6137 = vst [vmem:[#allocation3 + $0x3bc] sm:$0xf] %v9474_v14  ;;  %v10681_v16 = vld [vmem:[#allocation2 + $0x30] sm:$0xff]  ;;  %v9537_v3 = vpack.c.bf16 %v12398_v25, %v12398_v25  ;;  %7840 = vmatprep.subr.bf16.mxu1 %v10518_v8 }
 0x2b6   : > { %6138 = vst [vmem:[#allocation3 + $0x3e0] sm:$0xf] %v9475_v58  ;;  %6426 = vst [vmem:[#allocation3 + $0x3c0] sm:$0xf] %v9506_v37  ;;  %v5941_v35 = vrot.slane %v10681_v16, 1  ;;  %v6227_v28 = vrot.slane %v12388_v39, 7 }
 0x2b7   : > { %5896 = vst [vmem:[#allocation3 + $0x394] sm:$0xf] %v9441_v9  ;;  %v6228_v61 = vrot.slane %v12396_v42, 7  ;;  %v6229_v27 = vrot.slane %v12398_v25, 7  ;;  %6427 = vst [vmem:[#allocation3 + $0x3e4] sm:$0xf] %v9507_v45  ;;  %v5958_v23 = vsel %vm839_vm1, %v5939_v12, %v5940_v46 }
 0x2b8   : > { %6584 = vst [vmem:[#allocation3 + $0x37c] sm:$0xf] %v9536_v49  ;;  %v10682_v22 = vld [vmem:[#allocation2 + $0xc0] sm:$0xff]  ;;  %v10683_v43 = vld [vmem:[#allocation2 + $0x190] sm:$0xff]  ;;  %v12411_v59 = vld [vmem:[#allocation2 + $0xc8] sm:$0xff]  ;;  %v5957_v38 = vsel %vm839_vm1, %v5940_v46, %v5941_v35  ;;  %v9472_v48 = vpack.c.bf16 %v5958_v23, %v5958_v23  ;;  %v6633_v30 = vrot.slane %v12342_v55, 1 }
 0x2b9   : > { %v9438_v33 = vpack.c.bf16 %v10682_v22, %v10682_v22  ;;  %v9439_v51 = vpack.c.bf16 %v10683_v43, %v10683_v43  ;;  %v12413_v54 = vld [vmem:[#allocation2 + $0xf0] sm:$0xff]  ;;  %v6246_v36 = vsel %vm438_vm0, %v6228_v61, %v6229_v27  ;;  %v6247_v40 = vsel %vm438_vm0, %v6227_v28, %v6228_v61  ;;  %v10517_v52 = vld [vmem:[#allocation3 + $0x288] ss:$36 sps:$4 sm:$0xff]   ;;  %6585 = vst [vmem:[#allocation3 + $0x3a0] sm:$0xf] %v9537_v3  ;;  %v10684_v20 = vld [vmem:[#allocation2 + $0xc8] sm:$0xff] }
 0x2ba   : > { %v12421_v63 = vld [vmem:[#allocation2 + $0x150] sm:$0xff]  ;;  %v9473_v60 = vpack.c.bf16 %v5957_v38, %v5957_v38  ;;  %v9504_v19 = vpack.c.bf16 %v6247_v40, %v6247_v40  ;;  %v9505_v4 = vpack.c.bf16 %v6246_v36, %v6246_v36  ;;  %v5936_v7 = vrot.slane %v10682_v22, 1  ;;  %6135 = vst [vmem:[#allocation3 + $0x374] sm:$0xf] %v9472_v48  ;;  %v10520_v9 = vld [vmem:[#allocation3 + $0x290] ss:$36 sps:$4 sm:$0xff]   ;;  %7800 = vmatpush2.bf16.xpose.msra.mxu0 %v10517_v52 }
 0x2bb   : > { %5893 = vst [vmem:[#allocation3 + $0x328] sm:$0xf] %v9438_v33  ;;  %5894 = vst [vmem:[#allocation3 + $0x34c] sm:$0xf] %v9439_v51  ;;  %v10521_v11 = vld [vmem:[#allocation3 + $0x244] ss:$36 sps:$4 sm:$0xff]   ;;  %v9534_v34 = vpack.c.bf16 %v12413_v54, %v12413_v54  ;;  %v9535_v62 = vpack.c.bf16 %v12421_v63, %v12421_v63 }
 0x2bc   : > { %v5937_v13 = vrot.slane %v10683_v43, 1  ;;  %v5938_v53 = vrot.slane %v10684_v20, 1  ;;  %6136 = vst [vmem:[#allocation3 + $0x398] sm:$0xf] %v9473_v60  ;;  %6424 = vst [vmem:[#allocation3 + $0x378] sm:$0xf] %v9504_v19  ;;  %7801 = vmatprep.subr.bf16.mxu0 %v10521_v11  ;;  %7841 = vmatpush2.bf16.xpose.msra.mxu1 %v10520_v9 }
 0x2bd   : > { %6425 = vst [vmem:[#allocation3 + $0x39c] sm:$0xf] %v9505_v4  ;;  %v6224_v6 = vrot.slane %v12411_v59, 7  ;;  %v6225_v14 = vrot.slane %v12413_v54, 7  ;;  %v6226_v58 = vrot.slane %v12421_v63, 7  ;;  %v10685_v0 = vld [vmem:[#allocation2 + $0xa0] sm:$0xff] }
 0x2be   : > { %v9436_v37 = vpack.c.bf16 %v10685_v0, %v10685_v0  ;;  %v10524_v8 = vld [vmem:[#allocation3 + $0x24c] ss:$36 sps:$4 sm:$0xff]   ;;  %v5959_v45 = vsel %vm839_vm1, %v5937_v13, %v5938_v53  ;;  %v5960_v12 = vsel %vm839_vm1, %v5936_v7, %v5937_v13  ;;  %6582 = vst [vmem:[#allocation3 + $0x334] sm:$0xf] %v9534_v34  ;;  %6583 = vst [vmem:[#allocation3 + $0x358] sm:$0xf] %v9535_v62 }
 0x2bf   : > { %v10686_v46 = vld [vmem:[#allocation2 + $0x170] sm:$0xff]  ;;  %v5933_v16 = vrot.slane %v10685_v0, 1  ;;  %v12434_v35 = vld [vmem:[#allocation2 + $0x198] sm:$0xff]  ;;  %v12436_v28 = vld [vmem:[#allocation2 + $0xc0] sm:$0xff]  ;;  %v9470_v61 = vpack.c.bf16 %v5960_v12, %v5960_v12  ;;  %v9471_v27 = vpack.c.bf16 %v5959_v45, %v5959_v45  ;;  %v6248_v23 = vsel %vm438_vm0, %v6225_v14, %v6226_v58  ;;  %7842 = vmatprep.subr.bf16.mxu1 %v10524_v8  ;;  %6812 = vst [vmem:[#allocation3 + $0x1d0] sm:$0xf] %v12240_v29 }
 0x2c0   : > { %v9437_v49 = vpack.c.bf16 %v10686_v46, %v10686_v46  ;;  %v6249_v3 = vsel %vm438_vm0, %v6224_v6, %v6225_v14  ;;  %5891 = vst [vmem:[#allocation3 + $0x2e0] sm:$0xf] %v9436_v37  ;;  %v12442_v22 = vld [vmem:[#allocation2 + $0x190] sm:$0xff]  ;;  %v9503_v43 = vpack.c.bf16 %v6248_v23, %v6248_v23  ;;  %v5934_v51 = vrot.slane %v10686_v46, 1  ;;  %v10687_v38 = vld [vmem:[#allocation2 + $0x198] sm:$0xff]  ;;  %v10688_v13 = vld [vmem:[#allocation2 + $0x1a8] sm:$0xff] }
 0x2c1   : > { %v9502_v33 = vpack.c.bf16 %v6249_v3, %v6249_v3  ;;  %v5935_v48 = vrot.slane %v10687_v38, 1  ;;  %6133 = vst [vmem:[#allocation3 + $0x32c] sm:$0xf] %v9470_v61  ;;  %6134 = vst [vmem:[#allocation3 + $0x350] sm:$0xf] %v9471_v27  ;;  %v6221_v36 = vrot.slane %v12434_v35, 7  ;;  %v9532_v52 = vpack.c.bf16 %v12436_v28, %v12436_v28 }
 0x2c2   : > { %5892 = vst [vmem:[#allocation3 + $0x304] sm:$0xf] %v9437_v49  ;;  %v6222_v40 = vrot.slane %v12436_v28, 7  ;;  %v9533_v60 = vpack.c.bf16 %v12442_v22, %v12442_v22  ;;  %v10523_v19 = vld [vmem:[#allocation3 + $0x240] ss:$36 sps:$4 sm:$0xff]   ;;  %v5962_v7 = vsel %vm839_vm1, %v5933_v16, %v5934_v51  ;;  %v6223_v11 = vrot.slane %v12442_v22, 7 }
 0x2c3   : > { %6422 = vst [vmem:[#allocation3 + $0x330] sm:$0xf] %v9502_v33  ;;  %6423 = vst [vmem:[#allocation3 + $0x354] sm:$0xf] %v9503_v43  ;;  %v5961_v4 = vsel %vm839_vm1, %v5934_v51, %v5935_v48  ;;  %v9434_v20 = vpack.c.bf16 %v10688_v13, %v10688_v13  ;;  %v12455_v53 = vld [vmem:[#allocation2 + $0x50] sm:$0xff]  ;;  %v9468_v34 = vpack.c.bf16 %v5962_v7, %v5962_v7  ;;  %v10689_v6 = vld [vmem:[#allocation2 + $0x140] sm:$0xff]  ;;  %7802 = vmatpush2.bf16.xpose.msra.mxu0 %v10523_v19 }
 0x2c4   : > { %v9469_v62 = vpack.c.bf16 %v5961_v4, %v5961_v4  ;;  %v6251_v9 = vsel %vm438_vm0, %v6221_v36, %v6222_v40  ;;  %6580 = vst [vmem:[#allocation3 + $0x2ec] sm:$0xf] %v9532_v52  ;;  %6581 = vst [vmem:[#allocation3 + $0x310] sm:$0xf] %v9533_v60  ;;  %v9435_v14 = vpack.c.bf16 %v10689_v6, %v10689_v6  ;;  %v12459_v58 = vld [vmem:[#allocation2 + $0xa0] sm:$0xff]  ;;  %v12461_v0 = vld [vmem:[#allocation2 + $0x170] sm:$0xff] }
 0x2c5   : > { %v10531_v37 = vld [vmem:[#allocation3 + $0x20c] ss:$36 sps:$4 sm:$0xff]   ;;  %v6250_v45 = vsel %vm438_vm0, %v6222_v40, %v6223_v11  ;;  %v9500_v12 = vpack.c.bf16 %v6251_v9, %v6251_v9  ;;  %5889 = vst [vmem:[#allocation3 + $0x298] sm:$0xf] %v9434_v20  ;;  %v5930_v8 = vrot.slane %v10688_v13, 1  ;;  %v9530_v46 = vpack.c.bf16 %v12459_v58, %v12459_v58  ;;  %v10690_v61 = vld [vmem:[#allocation2 + $0x50] sm:$0xff] }
 0x2c6   : > { %6131 = vst [vmem:[#allocation3 + $0x2e4] sm:$0xf] %v9468_v34  ;;  %6132 = vst [vmem:[#allocation3 + $0x308] sm:$0xf] %v9469_v62  ;;  %v9501_v49 = vpack.c.bf16 %v6250_v45, %v6250_v45  ;;  %v5931_v16 = vrot.slane %v10689_v6, 1  ;;  %v5932_v27 = vrot.slane %v10690_v61, 1  ;;  %v9531_v23 = vpack.c.bf16 %v12461_v0, %v12461_v0  ;;  %7853 = vmatprep.subr.bf16.mxu0 %v10531_v37 }
 0x2c7   : > { %5890 = vst [vmem:[#allocation3 + $0x2bc] sm:$0xf] %v9435_v14  ;;  %v10526_v3 = vld [vmem:[#allocation3 + $0x248] ss:$36 sps:$4 sm:$0xff]   ;;  %6420 = vst [vmem:[#allocation3 + $0x2e8] sm:$0xf] %v9500_v12 }
 0x2c8   : > { %v6218_v33 = vrot.slane %v12455_v53, 7  ;;  %v6219_v43 = vrot.slane %v12459_v58, 7  ;;  %v6220_v51 = vrot.slane %v12461_v0, 7  ;;  %6578 = vst [vmem:[#allocation3 + $0x2a4] sm:$0xf] %v9530_v46  ;;  %v10691_v38 = vld [vmem:[#allocation2] sm:$0xff]  ;;  %v5963_v40 = vsel %vm839_vm1, %v5931_v16, %v5932_v27  ;;  %7843 = vmatpush2.bf16.xpose.msra.mxu1 %v10526_v3 }
 0x2c9   : > { %v9432_v48 = vpack.c.bf16 %v10691_v38, %v10691_v38  ;;  %v10536_v36 = vld [vmem:[#allocation3 + $0x214] ss:$36 sps:$4 sm:$0xff]   ;;  %6421 = vst [vmem:[#allocation3 + $0x30c] sm:$0xf] %v9501_v49  ;;  %v5964_v52 = vsel %vm839_vm1, %v5930_v8, %v5931_v16  ;;  %6579 = vst [vmem:[#allocation3 + $0x2c8] sm:$0xf] %v9531_v23  ;;  %v9467_v34 = vpack.c.bf16 %v5963_v40, %v5963_v40 }
 0x2ca   : > { %v10692_v60 = vld [vmem:[#allocation2 + $0x168] sm:$0xff]  ;;  %v5927_v7 = vrot.slane %v10691_v38, 1  ;;  %v6167_v11 = vld [vmem:[#allocation2 + $0xb8] sm:$0xff]  ;;  %v9466_v20 = vpack.c.bf16 %v5964_v52, %v5964_v52  ;;  %v6252_v19 = vsel %vm438_vm0, %v6219_v43, %v6220_v51  ;;  %v6253_v62 = vsel %vm438_vm0, %v6218_v33, %v6219_v43  ;;  %v12482_v9 = vld [vmem:[#allocation2 + $0x140] sm:$0xff]  ;;  %7894 = vmatprep.subr.bf16.mxu1 %v10536_v36  ;;  %7804 = vmatmul.mubr.bf16.vlgmr.msra.gmra.mxu0 %v8843_v26 }
 0x2cb   : > { %v9433_v4 = vpack.c.bf16 %v10692_v60, %v10692_v60  ;;  %v12476_v13 = vld [vmem:[#allocation2 + $0x1a8] sm:$0xff]  ;;  %5887 = vst [vmem:[#allocation3 + $0x250] sm:$0xf] %v9432_v48  ;;  %v9498_v6 = vpack.c.bf16 %v6253_v62, %v6253_v62  ;;  %v9499_v14 = vpack.c.bf16 %v6252_v19, %v6252_v19  ;;  %v5928_v45 = vrot.slane %v10692_v60, 1  ;;  %v10693_v12 = vld [vmem:[#allocation2 + $0xb8] sm:$0xff]  ;;  %v12497_v43 = vld [vmem:[%s12621_s3 + $0x10] sm:$0xff] }
 0x2cc   : > { %v5929_v8 = vrot.slane %v10693_v12, 1  ;;  %6129 = vst [vmem:[#allocation3 + $0x29c] sm:$0xf] %v9466_v20  ;;  %6130 = vst [vmem:[#allocation3 + $0x2c0] sm:$0xf] %v9467_v34  ;;  %v6215_v37 = vrot.slane %v6167_v11, 7  ;;  %v9528_v49 = vpack.c.bf16 %v12476_v13, %v12476_v13  ;;  %v9529_v16 = vpack.c.bf16 %v12482_v9, %v12482_v9 }
 0x2cd   : > { %5888 = vst [vmem:[#allocation3 + $0x274] sm:$0xf] %v9433_v4  ;;  %v6216_v46 = vrot.slane %v12476_v13, 7  ;;  %v10529_v61 = vld [vmem:[#allocation3 + $0x208] ss:$36 sps:$4 sm:$0xff]   ;;  %v5966_v23 = vsel %vm839_vm1, %v5927_v7, %v5928_v45  ;;  %v6217_v3 = vrot.slane %v12482_v9, 7  ;;  %v8848_v7 = vcombine.high %v12497_v43, %v12497_v43 }
 0x2ce   : > { %6418 = vst [vmem:[#allocation3 + $0x2a0] sm:$0xf] %v9498_v6  ;;  %6419 = vst [vmem:[#allocation3 + $0x2c4] sm:$0xf] %v9499_v14  ;;  %v5965_v27 = vsel %vm839_vm1, %v5928_v45, %v5929_v8  ;;  %v6615_v33 = vrot.slane %v6167_v11, 1  ;;  %v10694_v38 = vld [vmem:[#allocation2 + $0x158] sm:$0xff]  ;;  %v9464_v36 = vpack.c.bf16 %v5966_v23, %v5966_v23  ;;  %7854 = vmatpush1.bf16.xpose.msra.mxu0 %v10529_v61 }
 0x2cf   : > { %v10539_v51 = vld [vmem:[#allocation3 + $0x1c4] ss:$36 sps:$4 sm:$0xff]   ;;  %v6607_v48 = vrot.slane %v10694_v38, 1  ;;  %v9465_v40 = vpack.c.bf16 %v5965_v27, %v5965_v27  ;;  %v6255_v52 = vsel %vm438_vm0, %v6215_v37, %v6216_v46  ;;  %6576 = vst [vmem:[#allocation3 + $0x25c] sm:$0xf] %v9528_v49  ;;  %v6254_v60 = vsel %vm438_vm0, %v6216_v46, %v6217_v3  ;;  %7885 = vmatprep.mubr.bf16.mxu0 %v8848_v7  ;;  %v10696_v29 = vld [vmem:[#allocation2 + $0x1a0] sm:$0xff] }
 0x2d0   : > { %6577 = vst [vmem:[#allocation3 + $0x280] sm:$0xf] %v9529_v16  ;;  %v9496_v4 = vpack.c.bf16 %v6255_v52, %v6255_v52  ;;  %v6637_v11 = vrot.slane %v12325_v41, 1  ;;  %v12509_v20 = vld [vmem:[%s12621_s3 + $0x18] sm:$0xff]  ;;  %v10534_v34 = vld [vmem:[#allocation3 + $0x210] ss:$36 sps:$4 sm:$0xff]   ;;  %v9497_v6 = vpack.c.bf16 %v6254_v60, %v6254_v60  ;;  %v6656_v1 = vsel %vm839_vm1, %v12191_v44, %v6615_v33  ;;  %7855 = vmatprep.subr.bf16.mxu0 %v10539_v51 }
 0x2d1   : > { %v10695_v19 = vld [vmem:[#allocation2 + $0x98] sm:$0xff]  ;;  %6127 = vst [vmem:[#allocation3 + $0x254] sm:$0xf] %v9464_v36  ;;  %6128 = vst [vmem:[#allocation3 + $0x278] sm:$0xf] %v9465_v40  ;;  %v6638_v14 = vrot.slane %v12333_v5, 1  ;;  %v8850_v41 = vcombine.high %v12509_v20, %v12509_v20  ;;  %v9559_v8 = vpack.c.bf16 %v6656_v1, %v6656_v1  ;;  %7845 = vmatmul.mubr.bf16.vlgmr.msra.gmra.mxu1 %v8845_v57 }
 0x2d2   : > { %v6608_v62 = vrot.slane %v10695_v19, 1  ;;  %v10542_v45 = vld [vmem:[#allocation3 + $0x1cc] ss:$36 sps:$4 sm:$0xff]   ;;  %6416 = vst [vmem:[#allocation3 + $0x258] sm:$0xf] %v9496_v4  ;;  %v6639_v12 = vrot.slane %v12314_v15, 1  ;;  %7895 = vmatpush1.bf16.xpose.msra.mxu1 %v10534_v34 }
 0x2d3   : > { %v6634_v26 = vrot.slane %v12350_v56, 1  ;;  %6417 = vst [vmem:[#allocation3 + $0x27c] sm:$0xf] %v9497_v6  ;;  %v6641_v5 = vsel %vm839_vm1, %v6637_v11, %v6638_v14  ;;  %v6635_v37 = vrot.slane %v12358_v17, 1  ;;  %v6636_v44 = vrot.slane %v12319_v2, 1  ;;  %7926 = vmatprep.mubr.bf16.mxu1 %v8850_v41  ;;  %7896 = vmatprep.subr.bf16.mxu1 %v10542_v45  ;;  %v10697_v36 = vld [vmem:[#allocation2 + $0x138] sm:$0xff] }
 0x2d4   : > { %v6640_v15 = vsel %vm839_vm1, %v6638_v14, %v6639_v12  ;;  %v9574_v46 = vpack.c.bf16 %v6641_v5, %v6641_v5  ;;  %6815 = vst [vmem:[#allocation3 + $0x23c] sm:$0xf] %v9559_v8  ;;  %v6631_v17 = vrot.slane %v12373_v24, 1  ;;  %v10537_v16 = vld [vmem:[#allocation3 + $0x1c0] ss:$36 sps:$4 sm:$0xff]   ;;  %v6632_v27 = vrot.slane %v12379_v50, 1 }
 0x2d5   : > { %v9575_v56 = vpack.c.bf16 %v6640_v15, %v6640_v15  ;;  %v6643_v49 = vsel %vm839_vm1, %v6634_v26, %v6635_v37  ;;  %v6642_v47 = vsel %vm839_vm1, %v6635_v37, %v6636_v44  ;;  %v10545_v61 = vld [vmem:[#allocation3 + $0x17c] ss:$36 sps:$4 sm:$0xff]   ;;  %v6660_v23 = vsel %vm839_vm1, %v6608_v62, %v6609_v31  ;;  %6813 = vst [vmem:[#allocation3 + $0x1f4] sm:$0xf] %v12244_v18  ;;  %v10540_v33 = vld [vmem:[#allocation3 + $0x1c8] ss:$36 sps:$4 sm:$0xff]  }
 0x2d6   : > { %6830 = vst [vmem:[#allocation3 + $0x458] sm:$0xf] %v9574_v46  ;;  %v9572_v57 = vpack.c.bf16 %v6643_v49, %v6643_v49  ;;  %v9573_v2 = vpack.c.bf16 %v6642_v47, %v6642_v47  ;;  %v6661_v24 = vsel %vm839_vm1, %v6607_v48, %v6608_v62  ;;  %v9555_v3 = vpack.c.bf16 %v6660_v23, %v6660_v23  ;;  %v10548_v31 = vld [vmem:[#allocation3 + $0x184] ss:$36 sps:$4 sm:$0xff]   ;;  %v10543_v11 = vld [vmem:[#allocation3 + $0x178] ss:$36 sps:$4 sm:$0xff]  }
 0x2d7   : > { %6831 = vst [vmem:[#allocation3 + $0x47c] sm:$0xf] %v9575_v56  ;;  %v6644_v50 = vsel %vm839_vm1, %v6632_v27, %v6633_v30  ;;  %v6645_v21 = vsel %vm839_vm1, %v6631_v17, %v6632_v27  ;;  %v9554_v55 = vpack.c.bf16 %v6661_v24, %v6661_v24  ;;  %7856 = vmatpush1.bf16.xpose.msra.mxu0 %v10537_v16  ;;  %v6606_v18 = vrot.slane %v10696_v29, 1  ;;  %v10698_v40 = vld [vmem:[#allocation2 + $0x78] sm:$0xff]  ;;  %v10551_v34 = vld [vmem:[#allocation3 + $0x134] ss:$36 sps:$4 sm:$0xff]  }
 0x2d8   : > { %6828 = vst [vmem:[#allocation3 + $0x410] sm:$0xf] %v9572_v57  ;;  %6829 = vst [vmem:[#allocation3 + $0x434] sm:$0xf] %v9573_v2  ;;  %v9570_v51 = vpack.c.bf16 %v6645_v21, %v6645_v21  ;;  %v9571_v38 = vpack.c.bf16 %v6644_v50, %v6644_v50  ;;  %7857 = vmatprep.subr.bf16.mxu0 %v10545_v61  ;;  %v6604_v48 = vrot.slane %v10697_v36, 1  ;;  %v6605_v52 = vrot.slane %v10698_v40, 1 }
 0x2d9   : > { %6811 = vst [vmem:[#allocation3 + $0x1ac] sm:$0xf] %v9555_v3  ;;  %6810 = vst [vmem:[#allocation3 + $0x188] sm:$0xf] %v9554_v55  ;;  %v6628_v60 = vrot.slane %v12396_v42, 1  ;;  %v6629_v4 = vrot.slane %v12398_v25, 1 }
 0x2da   : > { %6826 = vst [vmem:[#allocation3 + $0x3c8] sm:$0xf] %v9570_v51  ;;  %6827 = vst [vmem:[#allocation3 + $0x3ec] sm:$0xf] %v9571_v38  ;;  %7897 = vmatpush1.bf16.xpose.msra.mxu1 %v10540_v33  ;;  %v6630_v7 = vrot.slane %v12371_v10, 1  ;;  %v6662_v6 = vsel %vm839_vm1, %v6605_v52, %v6606_v18  ;;  %v6663_v14 = vsel %vm839_vm1, %v6604_v48, %v6605_v52  ;;  %v10699_v12 = vld [vmem:[#allocation2 + $0x130] sm:$0xff] }
 0x2db   : > { %7898 = vmatprep.subr.bf16.mxu1 %v10548_v31  ;;  %v6647_v62 = vsel %vm839_vm1, %v6628_v60, %v6629_v4  ;;  %v9552_v25 = vpack.c.bf16 %v6663_v14, %v6663_v14  ;;  %v9553_v45 = vpack.c.bf16 %v6662_v6, %v6662_v6  ;;  %v10546_v10 = vld [vmem:[#allocation3 + $0x180] ss:$36 sps:$4 sm:$0xff]   ;;  %v6603_v1 = vrot.slane %v10699_v12, 1  ;;  %v10700_v5 = vld [vmem:[#allocation2 + $0xd8] sm:$0xff]  ;;  %v10701_v37 = vld [vmem:[#allocation2 + $0x180] sm:$0xff] }
 0x2dc   : > { %v6646_v19 = vsel %vm839_vm1, %v6629_v4, %v6630_v7  ;;  %v9568_v42 = vpack.c.bf16 %v6647_v62, %v6647_v62  ;;  %v10554_v26 = vld [vmem:[#allocation3 + $0x13c] ss:$36 sps:$4 sm:$0xff]   ;;  %v6601_v8 = vrot.slane %v10700_v5, 1  ;;  %v6602_v15 = vrot.slane %v10701_v37, 1  ;;  %v10549_v49 = vld [vmem:[#allocation3 + $0x130] ss:$36 sps:$4 sm:$0xff]  }
 0x2dd   : > { %v9569_v41 = vpack.c.bf16 %v6646_v19, %v6646_v19  ;;  %6808 = vst [vmem:[#allocation3 + $0x140] sm:$0xf] %v9552_v25  ;;  %6809 = vst [vmem:[#allocation3 + $0x164] sm:$0xf] %v9553_v45  ;;  %v6625_v46 = vrot.slane %v12413_v54, 1  ;;  %v6626_v44 = vrot.slane %v12421_v63, 1 }
 0x2de   : > { %6824 = vst [vmem:[#allocation3 + $0x380] sm:$0xf] %v9568_v42  ;;  %v6627_v56 = vrot.slane %v12388_v39, 1  ;;  %v10557_v47 = vld [vmem:[#allocation3 + $0xec] ss:$36 sps:$4 sm:$0xff]   ;;  %v6664_v2 = vsel %vm839_vm1, %v6602_v15, %v6603_v1  ;;  %v6665_v54 = vsel %vm839_vm1, %v6601_v8, %v6602_v15  ;;  %v10703_v3 = vld [vmem:[#allocation2 + $0x148] sm:$0xff] }
 0x2df   : > { %7858 = vmatpush1.bf16.xpose.msra.mxu0 %v10543_v11  ;;  %6825 = vst [vmem:[#allocation3 + $0x3a4] sm:$0xf] %v9569_v41  ;;  %v6649_v16 = vsel %vm839_vm1, %v6625_v46, %v6626_v44  ;;  %v9550_v63 = vpack.c.bf16 %v6665_v54, %v6665_v54  ;;  %v9551_v39 = vpack.c.bf16 %v6664_v2, %v6664_v2  ;;  %v10552_v27 = vld [vmem:[#allocation3 + $0x138] ss:$36 sps:$4 sm:$0xff]   ;;  %v10702_v23 = vld [vmem:[#allocation2 + $0x58] sm:$0xff]  ;;  %v6598_v33 = vrot.slane %v10703_v3, 1 }
 0x2e0   : > { %7859 = vmatprep.subr.bf16.mxu0 %v10551_v34  ;;  %v6648_v17 = vsel %vm839_vm1, %v6626_v44, %v6627_v56  ;;  %v9566_v57 = vpack.c.bf16 %v6649_v16, %v6649_v16  ;;  %v10560_v30 = vld [vmem:[#allocation3 + $0xf4] ss:$36 sps:$4 sm:$0xff]   ;;  %v6600_v24 = vrot.slane %v10702_v23, 1  ;;  %v6622_v55 = vrot.slane %v12436_v28, 1  ;;  %v10555_v38 = vld [vmem:[#allocation3 + $0xe8] ss:$36 sps:$4 sm:$0xff]  }
 0x2e1   : > { %v9567_v61 = vpack.c.bf16 %v6648_v17, %v6648_v17  ;;  %6806 = vst [vmem:[#allocation3 + $0xf8] sm:$0xf] %v9550_v63  ;;  %6807 = vst [vmem:[#allocation3 + $0x11c] sm:$0xf] %v9551_v39  ;;  %v10704_v50 = vld [vmem:[#allocation2 + $0x100] sm:$0xff]  ;;  %v6623_v31 = vrot.slane %v12442_v22, 1 }
 0x2e2   : > { %7899 = vmatpush1.bf16.xpose.msra.mxu1 %v10546_v10  ;;  %6822 = vst [vmem:[#allocation3 + $0x338] sm:$0xf] %v9566_v57  ;;  %v6599_v21 = vrot.slane %v10704_v50, 1  ;;  %v6624_v51 = vrot.slane %v12411_v59, 1  ;;  %v10563_v36 = vld [vmem:[#allocation3 + $0xa4] ss:$36 sps:$4 sm:$0xff]  }
 0x2e3   : > { %7900 = vmatprep.subr.bf16.mxu1 %v10554_v26  ;;  %6823 = vst [vmem:[#allocation3 + $0x35c] sm:$0xf] %v9567_v61  ;;  %v6651_v18 = vsel %vm839_vm1, %v6622_v55, %v6623_v31  ;;  %v10558_v60 = vld [vmem:[#allocation3 + $0xf0] ss:$36 sps:$4 sm:$0xff]   ;;  %v10705_v7 = vld [vmem:[#allocation2 + $0x118] sm:$0xff]  ;;  %v10706_v34 = vld [vmem:[#allocation2 + $0x110] sm:$0xff] }
 0x2e4   : > { %v6650_v29 = vsel %vm839_vm1, %v6623_v31, %v6624_v51  ;;  %v9564_v48 = vpack.c.bf16 %v6651_v18, %v6651_v18  ;;  %v6666_v52 = vsel %vm839_vm1, %v6599_v21, %v6600_v24  ;;  %v6667_v28 = vsel %vm839_vm1, %v6598_v33, %v6599_v21  ;;  %v10566_v4 = vld [vmem:[#allocation3 + $0xac] ss:$36 sps:$4 sm:$0xff]   ;;  %v10707_v62 = vld [vmem:[#allocation2 + $0x90] sm:$0xff]  ;;  %v10708_v15 = vld [vmem:[#allocation2 + $0x108] sm:$0xff] }
 0x2e5   : > { %v9565_v40 = vpack.c.bf16 %v6650_v29, %v6650_v29  ;;  %v9548_v22 = vpack.c.bf16 %v6667_v28, %v6667_v28  ;;  %v9549_v59 = vpack.c.bf16 %v6666_v52, %v6666_v52  ;;  %v6597_v11 = vrot.slane %v10705_v7, 1  ;;  %v10561_v25 = vld [vmem:[#allocation3 + $0xa0] ss:$36 sps:$4 sm:$0xff]   ;;  %v10564_v8 = vld [vmem:[#allocation3 + $0xa8] ss:$36 sps:$4 sm:$0xff]   ;;  %v10709_v44 = vld [vmem:[#allocation2 + $0x40] sm:$0xff] }
 0x2e6   : > { %6820 = vst [vmem:[#allocation3 + $0x2f0] sm:$0xf] %v9564_v48  ;;  %v6595_v19 = vrot.slane %v10706_v34, 1  ;;  %v6596_v6 = vrot.slane %v10707_v62, 1  ;;  %v6619_v14 = vrot.slane %v12459_v58, 1  ;;  %v6620_v42 = vrot.slane %v12461_v0, 1 }
 0x2e7   : > { %7860 = vmatpush1.bf16.xpose.msra.mxu0 %v10549_v49  ;;  %6821 = vst [vmem:[#allocation3 + $0x314] sm:$0xf] %v9565_v40  ;;  %6804 = vst [vmem:[#allocation3 + $0xb0] sm:$0xf] %v9548_v22  ;;  %v6621_v41 = vrot.slane %v12434_v35, 1  ;;  %v6594_v46 = vrot.slane %v10708_v15, 1 }
 0x2e8   : > { %7861 = vmatprep.subr.bf16.mxu0 %v10557_v47  ;;  %6805 = vst [vmem:[#allocation3 + $0xd4] sm:$0xf] %v9549_v59  ;;  %v6653_v10 = vsel %vm839_vm1, %v6619_v14, %v6620_v42  ;;  %v10569_v12 = vld [vmem:[#allocation3 + $0x5c] ss:$36 sps:$4 sm:$0xff]   ;;  %v6668_v5 = vsel %vm839_vm1, %v6596_v6, %v6597_v11  ;;  %v6669_v58 = vsel %vm839_vm1, %v6595_v19, %v6596_v6  ;;  %v10572_v37 = vld [vmem:[#allocation3 + $0x64] ss:$36 sps:$4 sm:$0xff]  }
 0x2e9   : > { %v6652_v45 = vsel %vm839_vm1, %v6620_v42, %v6621_v41  ;;  %v9562_v1 = vpack.c.bf16 %v6653_v10, %v6653_v10  ;;  %v9546_v0 = vpack.c.bf16 %v6669_v58, %v6669_v58  ;;  %v9547_v35 = vpack.c.bf16 %v6668_v5, %v6668_v5  ;;  %v10710_v49 = vld [vmem:[#allocation2 + $0x178] sm:$0xff]  ;;  %v10567_v61 = vld [vmem:[#allocation3 + $0x58] ss:$36 sps:$4 sm:$0xff]   ;;  %v10570_v23 = vld [vmem:[#allocation3 + $0x60] ss:$36 sps:$4 sm:$0xff]  }
 0x2ea   : > { %7901 = vmatpush1.bf16.xpose.msra.mxu1 %v10552_v27  ;;  %v9563_v26 = vpack.c.bf16 %v6652_v45, %v6652_v45  ;;  %v6592_v56 = vrot.slane %v10709_v44, 1  ;;  %v6593_v17 = vrot.slane %v10710_v49, 1  ;;  %v6616_v16 = vrot.slane %v12476_v13, 1  ;;  %v10575_v63 = vld [vmem:[#allocation3 + $0x14] ss:$36 sps:$4 sm:$0xff]  }
 0x2eb   : > { %7902 = vmatprep.subr.bf16.mxu1 %v10560_v30  ;;  %6818 = vst [vmem:[#allocation3 + $0x2a8] sm:$0xf] %v9562_v1  ;;  %6802 = vst [vmem:[#allocation3 + $0x68] sm:$0xf] %v9546_v0  ;;  %v6617_v47 = vrot.slane %v12482_v9, 1  ;;  %v6618_v57 = vrot.slane %v12455_v53, 1  ;;  %v8847_v5 = vcombine.low %v12497_v43, %v12497_v43 }
 0x2ec   : > { %6819 = vst [vmem:[#allocation3 + $0x2cc] sm:$0xf] %v9563_v26  ;;  %6803 = vst [vmem:[#allocation3 + $0x8c] sm:$0xf] %v9547_v35  ;;  %v6670_v30 = vsel %vm839_vm1, %v6593_v17, %v6594_v46  ;;  %v6671_v13 = vsel %vm839_vm1, %v6592_v56, %v6593_v17  ;;  %v10578_v24 = vld [vmem:[#allocation3 + $0x1c] ss:$36 sps:$4 sm:$0xff]  }
 0x2ed   : > { %v6654_v2 = vsel %vm839_vm1, %v6617_v47, %v6618_v57  ;;  %v6655_v54 = vsel %vm839_vm1, %v6616_v16, %v6617_v47  ;;  %v9544_v9 = vpack.c.bf16 %v6671_v13, %v6671_v13  ;;  %v9545_v53 = vpack.c.bf16 %v6670_v30, %v6670_v30  ;;  %v10573_v3 = vld [vmem:[#allocation3 + $0x10] ss:$36 sps:$4 sm:$0xff]   ;;  %v10576_v50 = vld [vmem:[#allocation3 + $0x18] ss:$36 sps:$4 sm:$0xff]   ;;  %v10579_v32 = vld [vmem:[#allocation3 + $0x448] ss:$36 sps:$4 sm:$0xff]  }
 0x2ee   : > { %v9560_v39 = vpack.c.bf16 %v6655_v54, %v6655_v54  ;;  %v9561_v27 = vpack.c.bf16 %v6654_v2, %v6654_v2  ;;  %v10581_v33 = vld [vmem:[#allocation3 + $0x44c] ss:$36 sps:$4 sm:$0xff]   ;;  %v10584_v21 = vld [vmem:[#allocation3 + $0x454] ss:$36 sps:$4 sm:$0xff]   ;;  %v10587_v55 = vld [vmem:[#allocation3 + $0x404] ss:$36 sps:$4 sm:$0xff]  }
 0x2ef   : > { %7862 = vmatpush1.bf16.xpose.msra.mxu0 %v10555_v38  ;;  %6800 = vst [vmem:[#allocation3 + $0x20] sm:$0xf] %v9544_v9  ;;  %6801 = vst [vmem:[#allocation3 + $0x44] sm:$0xf] %v9545_v53  ;;  %v10582_v31 = vld [vmem:[#allocation3 + $0x450] ss:$36 sps:$4 sm:$0xff]  }
 0x2f0   : > { %7863 = vmatprep.subr.bf16.mxu0 %v10563_v36  ;;  %6816 = vst [vmem:[#allocation3 + $0x260] sm:$0xf] %v9560_v39  ;;  %6817 = vst [vmem:[#allocation3 + $0x284] sm:$0xf] %v9561_v27  ;;  %v10590_v51 = vld [vmem:[#allocation3 + $0x40c] ss:$36 sps:$4 sm:$0xff]  }
 0x2f1   : > { %v10585_v38 = vld [vmem:[#allocation3 + $0x400] ss:$36 sps:$4 sm:$0xff]   ;;  %v10588_v18 = vld [vmem:[#allocation3 + $0x408] ss:$36 sps:$4 sm:$0xff]   ;;  %v10591_v48 = vld [vmem:[#allocation3 + $0x3b8] ss:$36 sps:$4 sm:$0xff]  }
 0x2f2   : > { %7903 = vmatpush1.bf16.xpose.msra.mxu1 %v10558_v60  ;;  %v10593_v29 = vld [vmem:[#allocation3 + $0x3bc] ss:$36 sps:$4 sm:$0xff]   ;;  %v10596_v36 = vld [vmem:[#allocation3 + $0x3c4] ss:$36 sps:$4 sm:$0xff]   ;;  %v10599_v40 = vld [vmem:[#allocation3 + $0x374] ss:$36 sps:$4 sm:$0xff]  }
 0x2f3   : > { %7904 = vmatprep.subr.bf16.mxu1 %v10566_v4  ;;  %v10594_v52 = vld [vmem:[#allocation3 + $0x3c0] ss:$36 sps:$4 sm:$0xff]   ;;  %v10597_v22 = vld [vmem:[#allocation3 + $0x370] ss:$36 sps:$4 sm:$0xff]   ;;  %v10600_v60 = vld [vmem:[#allocation3 + $0x378] ss:$36 sps:$4 sm:$0xff]  }
 0x2f4   : > { %v10602_v28 = vld [vmem:[#allocation3 + $0x37c] ss:$36 sps:$4 sm:$0xff]   ;;  %v10605_v59 = vld [vmem:[#allocation3 + $0x32c] ss:$36 sps:$4 sm:$0xff]   ;;  %v10608_v4 = vld [vmem:[#allocation3 + $0x334] ss:$36 sps:$4 sm:$0xff]  }
 0x2f5   : > { %v10603_v7 = vld [vmem:[#allocation3 + $0x328] ss:$36 sps:$4 sm:$0xff]   ;;  %v10606_v34 = vld [vmem:[#allocation3 + $0x330] ss:$36 sps:$4 sm:$0xff]   ;;  %v10609_v62 = vld [vmem:[#allocation3 + $0x2e0] ss:$36 sps:$4 sm:$0xff]  }
 0x2f6   : > { %v10611_v11 = vld [vmem:[#allocation3 + $0x2e4] ss:$36 sps:$4 sm:$0xff]   ;;  %v10614_v19 = vld [vmem:[#allocation3 + $0x2ec] ss:$36 sps:$4 sm:$0xff]   ;;  %v10617_v6 = vld [vmem:[#allocation3 + $0x29c] ss:$36 sps:$4 sm:$0xff]  }
 0x2f7   : > { %7864 = vmatpush1.bf16.xpose.msra.mxu0 %v10561_v25  ;;  %v10612_v14 = vld [vmem:[#allocation3 + $0x2e8] ss:$36 sps:$4 sm:$0xff]   ;;  %v10615_v41 = vld [vmem:[#allocation3 + $0x298] ss:$36 sps:$4 sm:$0xff]   ;;  %v10618_v45 = vld [vmem:[#allocation3 + $0x2a0] ss:$36 sps:$4 sm:$0xff]  }
 0x2f8   : > { %7865 = vmatprep.subr.bf16.mxu0 %v10569_v12  ;;  %v10620_v42 = vld [vmem:[#allocation3 + $0x2a4] ss:$36 sps:$4 sm:$0xff]   ;;  %v10623_v25 = vld [vmem:[#allocation3 + $0x254] ss:$36 sps:$4 sm:$0xff]   ;;  %v10626_v10 = vld [vmem:[#allocation3 + $0x25c] ss:$36 sps:$4 sm:$0xff]  }
 0x2f9   : > { %v10621_v12 = vld [vmem:[#allocation3 + $0x250] ss:$36 sps:$4 sm:$0xff]   ;;  %v10629_v1 = vld [vmem:[#allocation3 + $0x458] ss:$36 sps:$4 sm:$0xff]   ;;  %v10635_v15 = vld [vmem:[#allocation3 + $0x3c8] ss:$36 sps:$4 sm:$0xff]  }
 0x2fa   : > { %7905 = vmatpush1.bf16.xpose.msra.mxu1 %v10564_v8  ;;  %v10624_v26 = vld [vmem:[#allocation3 + $0x258] ss:$36 sps:$4 sm:$0xff]   ;;  %v10647_v0 = vld [vmem:[%s12621_s3 + $0x20] ss:$0 sps:$4 sm:$0xff]   ;;  %v8849_v8 = vcombine.low %v12509_v20, %v12509_v20  ;;  %v10636_v46 = vld [vmem:[#allocation3 + $0x188] ss:$36 sps:$4 sm:$0xff]  }
 0x2fb   : > { %7906 = vmatprep.subr.bf16.mxu1 %v10572_v37  ;;  %v10632_v58 = vld [vmem:[#allocation3 + $0x218] ss:$36 sps:$4 sm:$0xff]   ;;  %v10633_v35 = vld [vmem:[#allocation3 + $0x410] ss:$36 sps:$4 sm:$0xff]   ;;  %v10637_v43 = vld [vmem:[#allocation3 + $0x380] ss:$36 sps:$4 sm:$0xff]  }
 0x2fc   : > { %v10634_v37 = vld [vmem:[#allocation3 + $0x1d0] ss:$36 sps:$4 sm:$0xff]   ;;  %v10638_v44 = vld [vmem:[#allocation3 + $0x140] ss:$36 sps:$4 sm:$0xff]   ;;  %v10639_v56 = vld [vmem:[#allocation3 + $0x338] ss:$36 sps:$4 sm:$0xff]  }
 0x2fd   : > { %v10640_v49 = vld [vmem:[#allocation3 + $0xf8] ss:$36 sps:$4 sm:$0xff]   ;;  %v10641_v17 = vld [vmem:[#allocation3 + $0x2f0] ss:$36 sps:$4 sm:$0xff]   ;;  %v10643_v16 = vld [vmem:[#allocation3 + $0x2a8] ss:$36 sps:$4 sm:$0xff]  }
 0x2fe   : > { %v10642_v20 = vld [vmem:[#allocation3 + $0xb0] ss:$36 sps:$4 sm:$0xff]   ;;  %v10644_v47 = vld [vmem:[#allocation3 + $0x68] ss:$36 sps:$4 sm:$0xff]   ;;  %v10645_v57 = vld [vmem:[#allocation3 + $0x260] ss:$36 sps:$4 sm:$0xff]  }
 0x2ff   : > { %7866 = vmatpush1.bf16.xpose.msra.mxu0 %v10567_v61  ;;  %v10646_v61 = vld [vmem:[#allocation3 + $0x20] ss:$36 sps:$4 sm:$0xff]  }
 0x300   : > { %7867 = vmatprep.subr.bf16.mxu0 %v10575_v63 }
 0x302   : > { %7907 = vmatpush1.bf16.xpose.msra.mxu1 %v10570_v23 }
 0x303   : > { %7908 = vmatprep.subr.bf16.mxu1 %v10578_v24 }
 0x307   : > { %7868 = vmatpush1.bf16.xpose.msra.mxu0 %v10573_v3 }
 0x308   : > { %7869 = vmatprep.subr.bf16.mxu0 %v10581_v33 }
 0x30a   : > { %7909 = vmatpush1.bf16.xpose.msra.mxu1 %v10576_v50 }
 0x30b   : > { %7910 = vmatprep.subr.bf16.mxu1 %v10584_v21 }
 0x30f   : > { %7870 = vmatpush2.bf16.xpose.msra.mxu0 %v10579_v32 }
 0x310   : > { %7871 = vmatprep.subr.bf16.mxu0 %v10587_v55 }
 0x312   : > { %7911 = vmatpush2.bf16.xpose.msra.mxu1 %v10582_v31 }
 0x313   : > { %7912 = vmatprep.subr.bf16.mxu1 %v10590_v51 }
 0x317   : > { %7872 = vmatpush2.bf16.xpose.msra.mxu0 %v10585_v38 }
 0x318   : > { %7873 = vmatprep.subr.bf16.mxu0 %v10593_v29 }
 0x31a   : > { %7913 = vmatpush2.bf16.xpose.msra.mxu1 %v10588_v18 }
 0x31b   : > { %7914 = vmatprep.subr.bf16.mxu1 %v10596_v36 }
 0x31f   : > { %7874 = vmatpush2.bf16.xpose.msra.mxu0 %v10591_v48 }
 0x320   : > { %7875 = vmatprep.subr.bf16.mxu0 %v10599_v40 }
 0x322   : > { %7915 = vmatpush2.bf16.xpose.msra.mxu1 %v10594_v52 }
 0x323   : > { %7916 = vmatprep.subr.bf16.mxu1 %v10602_v28 }
 0x324   : > { %v7001_v2 = vpop.permute.xlu0 %7000 }
 0x327   : > { %7876 = vmatpush2.bf16.xpose.msra.mxu0 %v10597_v22 }
 0x328   : > { %7877 = vmatprep.subr.bf16.mxu0 %v10605_v59 }
 0x32a   : > { %7917 = vmatpush2.bf16.xpose.msra.mxu1 %v10600_v60 }
 0x32b   : > { %7918 = vmatprep.subr.bf16.mxu1 %v10608_v4 }
 0x32f   : > { %7878 = vmatpush2.bf16.xpose.msra.mxu0 %v10603_v7 }
 0x330   : > { %7879 = vmatprep.subr.bf16.mxu0 %v10611_v11 }
 0x332   : > { %7919 = vmatpush2.bf16.xpose.msra.mxu1 %v10606_v34 }
 0x333   : > { %7920 = vmatprep.subr.bf16.mxu1 %v10614_v19 }
 0x337   : > { %7880 = vmatpush2.bf16.xpose.msra.mxu0 %v10609_v62 }
 0x338   : > { %7881 = vmatprep.subr.bf16.mxu0 %v10617_v6 }
 0x33a   : > { %7921 = vmatpush2.bf16.xpose.msra.mxu1 %v10612_v14 }
 0x33b   : > { %7922 = vmatprep.subr.bf16.mxu1 %v10620_v42 }
 0x33f   : > { %7882 = vmatpush2.bf16.xpose.msra.mxu0 %v10615_v41 }
 0x340   : > { %7883 = vmatprep.subr.bf16.mxu0 %v10623_v25 }
 0x342   : > { %7923 = vmatpush2.bf16.xpose.msra.mxu1 %v10618_v45 }
 0x343   : > { %7924 = vmatprep.subr.bf16.mxu1 %v10626_v10 }
 0x347   : > { %7884 = vmatpush2.bf16.xpose.msra.mxu0 %v10621_v12 }
 0x348   : > { %10048 = vmatprep.subr.bf16.mxu0 %v10629_v1 }
 0x34a   : > { %7925 = vmatpush2.bf16.xpose.msra.mxu1 %v10624_v26 }
 0x34e   : > { %7886 = vmatmul.mubr.bf16.vlgmr.msra.gmra.mxu0 %v8847_v5 }
 0x34f   : > { %10049 = vmatpush3.bf16.xpose.msra.mxu0 %v10632_v58  ;;  %10064 = vmatprep.mubr.bf16.mxu0 %v10647_v0 }
 0x350   : > { %10050 = vmatprep.subr.bf16.mxu0 %v10633_v35 }
 0x351   : > { %7927 = vmatmul.mubr.bf16.vlgmr.msra.gmra.mxu1 %v8849_v8 }
 0x357   : > { %10051 = vmatpush3.bf16.xpose.msra.mxu0 %v10634_v37 }
 0x358   : > { %10052 = vmatprep.subr.bf16.mxu0 %v10635_v15 }
 0x35f   : > { %10053 = vmatpush3.bf16.xpose.msra.mxu0 %v10636_v46 }
 0x360   : > { %10054 = vmatprep.subr.bf16.mxu0 %v10637_v43 }
 0x367   : > { %10055 = vmatpush3.bf16.xpose.msra.mxu0 %v10638_v44 }
 0x368   : > { %10056 = vmatprep.subr.bf16.mxu0 %v10639_v56 }
 0x36f   : > { %10057 = vmatpush3.bf16.xpose.msra.mxu0 %v10640_v49 }
 0x370   : > { %10058 = vmatprep.subr.bf16.mxu0 %v10641_v17 }
 0x377   : > { %10059 = vmatpush3.bf16.xpose.msra.mxu0 %v10642_v20 }
 0x378   : > { %10060 = vmatprep.subr.bf16.mxu0 %v10643_v16 }
 0x37f   : > { %10061 = vmatpush3.bf16.xpose.msra.mxu0 %v10644_v47 }
 0x380   : > { %10062 = vmatprep.subr.bf16.mxu0 %v10645_v57 }
 0x387   : > { %10063 = vmatpush3.bf16.xpose.msra.mxu0 %v10646_v61 }
 0x38a   : > { %v7805_v54 = vpop.f32.mrf.mxu0 }
 0x38b   : > { %v7806_v63 = vadd.f32 %v7805_v54, %v7001_v2 }
 0x38c   : > { %v7807_v39 = vpop.f32.mrf.mxu0 }
 0x38d   : > { %v7808_v27 = vadd.f32 %v7807_v39, %v7001_v2 }
 0x38e   : > { %10065 = vmatmul.mubr.bf16.vlgmr.msra.gmra.mxu0 %v10647_v0  ;;  %v7809_v9 = vpop.f32.mrf.mxu0 }
 0x390   : > { %v7810_v24 = vpop.f32.mrf.mxu0 }
 0x391   : > { %v7846_v30 = vpop.f32.mrf.mxu1 }
 0x392   : > { %v7847_v13 = vadd.f32 %v7846_v30, %v7806_v63 }
 0x393   : > { %v7848_v53 = vpop.f32.mrf.mxu1 }
 0x394   : > { %v7849_v23 = vadd.f32 %v7848_v53, %v7808_v27 }
 0x395   : > { %v7850_v3 = vpop.f32.mrf.mxu1 }
 0x397   : > { %v7851_v33 = vpop.f32.mrf.mxu1 }
 0x40e   : > { %v7887_v50 = vpop.f32.mrf.mxu0 }
 0x40f   : > { %v7888_v18 = vadd.f32 %v7887_v50, %v7847_v13 }
 0x410   : > { %v7889_v21 = vpop.f32.mrf.mxu0 }
 0x411   : > { %v7928_v32 = vpop.f32.mrf.mxu1  ;;  %v7890_v36 = vadd.f32 %v7889_v21, %v7849_v23 }
 0x412   : > { %v7891_v55 = vpop.f32.mrf.mxu0  ;;  %v7929_v48 = vadd.f32 %v7928_v32, %v7888_v18 }
 0x413   : > { %v7930_v31 = vpop.f32.mrf.mxu1 }
 0x414   : > { %v7892_v51 = vpop.f32.mrf.mxu0  ;;  %v7931_v52 = vadd.f32 %v7930_v31, %v7890_v36 }
 0x415   : > { %v7932_v38 = vpop.f32.mrf.mxu1 }
 0x417   : > { %v7933_v29 = vpop.f32.mrf.mxu1 }
 0x44e   : > { %v7969_v40 = vpop.f32.mrf.mxu0 }
 0x44f   : > { %v7970_v28 = vadd.f32 %v7969_v40, %v7929_v48 }
 0x450   : > { %v7971_v22 = vpop.f32.mrf.mxu0 }
 0x451   : > { %7976 = vst [vmem:[%s10769_s24] sm:$0xff] %v7970_v28  ;;  %v7972_v59 = vadd.f32 %v7971_v22, %v7931_v52 }
 0x452   : > { %v7973_v60 = vpop.f32.mrf.mxu0 }
 0x453   : > { %7977 = vst [vmem:[%s10769_s24 + $0x8] sm:$0xff] %v7972_v59 }
 0x454   : > { %v7974_v4 = vpop.f32.mrf.mxu0 }
 0x455 PF: > { %s15_s18 = sadd.s32 1, %s10721_s18  }
 0x456   : > { %p12_p5 = scmp.ge.s32.totalorder %s15_s18, 4  }
 0x458   :  { %14 = sbr.rel (!%p12_p5) target bundleno = 1 (0x1), region = 94 }

</bundles_post_ra>
